<compile_context>
chip_gen: v7x
topology: tpu7x:2x2x1
jax: 0.10.0
libtpu: 0.0.40
codegen_flags: <defaults>
</compile_context>

<pallas_src>
import jax
import jax.numpy as jnp
from jax import lax
from jax.experimental import pallas as pl
from jax.experimental.pallas import tpu as pltpu

EPS = 1e-5


def block_kernel(x_ref, w1_ref, g1_ref, be1_ref, w2_ref, g2_ref, be2_ref,
                 out_ref, p1_ref, p2_ref):
    # x_ref   : (N, H, W, Cin)      f32   unpadded input, NHWC
    # w1_ref  : (9*Cin, F)          bf16  tap-major / channel-minor im2col weights
    # w2_ref  : (9*F,   F)          bf16
    # g*/be*  : (1, F)              f32   BN gamma / beta
    # out_ref : (N, H, W, F)        f32
    # p1_ref  : (N, H, W, 9*Cin)    f32 scratch (im2col patches, conv1)
    # p2_ref  : (N, H, W, 9*F)      f32 scratch (im2col patches, conv2)
    N, H, W, Cin = x_ref.shape
    F = out_ref.shape[-1]
    M = N * H * W
    inv_m = 1.0 / M

    def im2col(src, patch_ref, C):
        # src: (N, H, W, C) f32 value.  Tap t = dh*3 + dw occupies channel
        # slab [t*C, (t+1)*C) of patch_ref.  Only the boundary strips of each
        # slab are zero-filled; the shift-valid interior rectangle is written
        # directly from `src` (no padded copy of the activation is ever
        # materialized).  All slices are static.
        for dh in range(3):
            for dw in range(3):
                t = dh * 3 + dw
                c0, c1 = t * C, (t + 1) * C
                if dh == 0:
                    patch_ref[:, 0:1, :, c0:c1] = jnp.zeros((N, 1, W, C), jnp.float32)
                elif dh == 2:
                    patch_ref[:, H - 1:H, :, c0:c1] = jnp.zeros((N, 1, W, C), jnp.float32)
                if dw == 0:
                    patch_ref[:, :, 0:1, c0:c1] = jnp.zeros((N, H, 1, C), jnp.float32)
                elif dw == 2:
                    patch_ref[:, :, W - 1:W, c0:c1] = jnp.zeros((N, H, 1, C), jnp.float32)
                hd0, hd1 = max(0, 1 - dh), min(H, H + 1 - dh)
                wd0, wd1 = max(0, 1 - dw), min(W, W + 1 - dw)
                patch_ref[:, hd0:hd1, wd0:wd1, c0:c1] = \
                    src[:, hd0 + dh - 1:hd1 + dh - 1, wd0 + dw - 1:wd1 + dw - 1, :]

    def conv_bn_relu(patch_ref, w_ref, g, be, C):
        # One im2col MXU matmul (K = 9*C), bf16 operands / f32 accumulation,
        # then single-pass BN stats fused with normalize+scale+ReLU.
        patch = patch_ref[...].reshape(M, 9 * C).astype(jnp.bfloat16)
        acc = jnp.dot(patch, w_ref[...], preferred_element_type=jnp.float32)  # (M, F)
        mean = jnp.sum(acc, axis=0, keepdims=True) * inv_m
        ex2 = jnp.sum(acc * acc, axis=0, keepdims=True) * inv_m
        var = jnp.maximum(ex2 - mean * mean, 0.0)
        scale = g * lax.rsqrt(var + EPS)           # EUP
        shift = be - mean * scale
        return jnp.maximum(acc * scale + shift, 0.0)   # (M, F) f32

    # ---------------- conv1 -> bn1 (training stats) -> relu ------------------
    # Conv bias omitted: it is cancelled exactly by the BN mean subtraction.
    im2col(x_ref[...], p1_ref, Cin)
    h = conv_bn_relu(p1_ref, w1_ref, g1_ref[...], be1_ref[...], Cin)

    # ---------------- conv2 -> bn2 -> relu -----------------------------------
    im2col(h.reshape(N, H, W, F), p2_ref, F)
    out = conv_bn_relu(p2_ref, w2_ref, g2_ref[...], be2_ref[...], F)
    out_ref[...] = out.reshape(N, H, W, F)


def unet_block_forward(x_nchw, params):
    """x_nchw: (N, Cin, H, W) float32. Returns (N, F, H, W)."""
    x = jnp.transpose(x_nchw, (0, 2, 3, 1)).astype(jnp.float32)   # -> NHWC
    N, H, W, Cin = x.shape
    F = params["w1"].shape[0]
    M = N * H * W

    # torch conv weight (F, Cin, kh, kw) -> (kh, kw, Cin, F) -> (9*Cin, F),
    # matching the tap-major / channel-minor im2col K layout in the kernel.
    w1 = jnp.transpose(params["w1"], (2, 3, 1, 0)).reshape(9 * Cin, F)
    w2 = jnp.transpose(params["w2"], (2, 3, 1, 0)).reshape(9 * F, F)
    w1 = w1.astype(jnp.bfloat16)
    w2 = w2.astype(jnp.bfloat16)
    vec = lambda p: p.reshape(1, F).astype(jnp.float32)

    cost = pl.CostEstimate(
        flops=2 * M * (9 * Cin) * F + 2 * M * (9 * F) * F,
        transcendentals=2 * F,
        bytes_accessed=4 * (x.size + M * F) + 2 * (w1.size + w2.size) + 16 * F,
    )

    out_nhwc = pl.pallas_call(
        block_kernel,
        out_shape=jax.ShapeDtypeStruct((N, H, W, F), jnp.float32),
        in_specs=[pl.BlockSpec(memory_space=pltpu.MemorySpace.VMEM)] * 7,
        out_specs=pl.BlockSpec(memory_space=pltpu.MemorySpace.VMEM),
        scratch_shapes=[
            pltpu.VMEM((N, H, W, 9 * Cin), jnp.float32),   # im2col patch conv1
            pltpu.VMEM((N, H, W, 9 * F), jnp.float32),     # im2col patch conv2
        ],
        compiler_params=pltpu.CompilerParams(
            vmem_limit_bytes=32 * 1024 * 1024),
        cost_estimate=cost,
    )(x, w1, vec(params["g1"]), vec(params["beta1"]),
      w2, vec(params["g2"]), vec(params["beta2"]))

    return jnp.transpose(out_nhwc, (0, 3, 1, 2))                  # -> NCHW


def reference_forward(x_nchw, params):
    """Pure-JAX f32 reference mirroring the PyTorch forward (training BN)."""
    def conv(x, w, b):
        y = lax.conv_general_dilated(
            x, w, window_strides=(1, 1), padding="SAME",
            dimension_numbers=("NCHW", "OIHW", "NCHW"),
            precision=lax.Precision.HIGHEST)
        return y + b[None, :, None, None]

    def bn_relu(x, g, beta):
        mean = jnp.mean(x, axis=(0, 2, 3), keepdims=True)
        var = jnp.mean((x - mean) ** 2, axis=(0, 2, 3), keepdims=True)
        y = (x - mean) * lax.rsqrt(var + EPS)
        y = y * g[None, :, None, None] + beta[None, :, None, None]
        return jnp.maximum(y, 0.0)

    h = bn_relu(conv(x_nchw, params["w1"], params["b1"]),
                params["g1"], params["beta1"])
    return bn_relu(conv(h, params["w2"], params["b2"]),
                   params["g2"], params["beta2"])


if __name__ == "__main__":
    N, Cin, H, W = 2, 4, 16, 16
    F = 8

    key = jax.random.PRNGKey(0)
    ks = jax.random.split(key, 9)
    params = {
        "w1": 0.2 * jax.random.normal(ks[0], (F, Cin, 3, 3), jnp.float32),
        "b1": 0.1 * jax.random.normal(ks[1], (F,), jnp.float32),
        "g1": 1.0 + 0.1 * jax.random.normal(ks[2], (F,), jnp.float32),
        "beta1": 0.1 * jax.random.normal(ks[3], (F,), jnp.float32),
        "w2": 0.2 * jax.random.normal(ks[4], (F, F, 3, 3), jnp.float32),
        "b2": 0.1 * jax.random.normal(ks[5], (F,), jnp.float32),
        "g2": 1.0 + 0.1 * jax.random.normal(ks[6], (F,), jnp.float32),
        "beta2": 0.1 * jax.random.normal(ks[7], (F,), jnp.float32),
    }
    x = jax.random.normal(ks[8], (N, Cin, H, W), jnp.float32)

    out = jax.block_until_ready(unet_block_forward(x, params))
    ref = jax.block_until_ready(reference_forward(x, params))

    assert out.shape == (N, F, H, W)
    # Kernel uses bf16 MXU operands with f32 accumulation (standard TPU conv
    # path); tolerance reflects bf16 input rounding vs. the exact-f32 reference.
    assert jnp.allclose(out, ref, rtol=2e-2, atol=2e-2), (
        f"max abs err {jnp.max(jnp.abs(out - ref))}")
    print("KERNEL_OK")
</pallas_src>

<mosaic_0001>
module attributes {stable_mosaic.version = 11 : i64} {
  func.func @block_kernel(%arg0: memref<2x16x16x4xf32, #tpu.memory_space<vmem>>, %arg1: memref<36x8xbf16, #tpu.memory_space<vmem>>, %arg2: memref<1x8xf32, #tpu.memory_space<vmem>>, %arg3: memref<1x8xf32, #tpu.memory_space<vmem>>, %arg4: memref<72x8xbf16, #tpu.memory_space<vmem>>, %arg5: memref<1x8xf32, #tpu.memory_space<vmem>>, %arg6: memref<1x8xf32, #tpu.memory_space<vmem>>, %arg7: memref<2x16x16x8xf32, #tpu.memory_space<vmem>>, %arg8: memref<2x16x16x36xf32, #tpu.memory_space<vmem>>, %arg9: memref<2x16x16x72xf32, #tpu.memory_space<vmem>>) attributes {dimension_semantics = [], scalar_prefetch = 0 : i64, scratch_operands = 2 : i64, tpu.core_type = #tpu.core_type<tc>} {
    %c0 = arith.constant 0 : index
    %c0_0 = arith.constant 0 : index
    %c0_1 = arith.constant 0 : index
    %c0_2 = arith.constant 0 : index
    %0 = vector.load %arg0[%c0, %c0_0, %c0_1, %c0_2] : memref<2x16x16x4xf32, #tpu.memory_space<vmem>>, vector<2x16x16x4xf32>
    %cst = arith.constant 0.000000e+00 : f32
    %1 = vector.broadcast %cst : f32 to vector<2x1x16x4xf32>
    %c0_3 = arith.constant 0 : index
    %c0_4 = arith.constant 0 : index
    %c0_5 = arith.constant 0 : index
    %c0_6 = arith.constant 0 : index
    %2 = vector.load %arg8[%c0_3, %c0_4, %c0_5, %c0_6] : memref<2x16x16x36xf32, #tpu.memory_space<vmem>>, vector<2x1x16x4xf32>
    tpu.vector_store %arg8[%c0_3, %c0_4, %c0_5, %c0_6], %1 {strides = array<i32>} : memref<2x16x16x36xf32, #tpu.memory_space<vmem>>, vector<2x1x16x4xf32>,
    %cst_7 = arith.constant 0.000000e+00 : f32
    %3 = vector.broadcast %cst_7 : f32 to vector<2x16x1x4xf32>
    %c0_8 = arith.constant 0 : index
    %c0_9 = arith.constant 0 : index
    %c0_10 = arith.constant 0 : index
    %c0_11 = arith.constant 0 : index
    %4 = vector.load %arg8[%c0_8, %c0_9, %c0_10, %c0_11] : memref<2x16x16x36xf32, #tpu.memory_space<vmem>>, vector<2x16x1x4xf32>
    tpu.vector_store %arg8[%c0_8, %c0_9, %c0_10, %c0_11], %3 {strides = array<i32>} : memref<2x16x16x36xf32, #tpu.memory_space<vmem>>, vector<2x16x1x4xf32>,
    %5 = vector.extract_strided_slice %0 {offsets = [0, 0, 0, 0], sizes = [2, 15, 15, 4], strides = [1, 1, 1, 1]} : vector<2x16x16x4xf32> to vector<2x15x15x4xf32>
    %c0_12 = arith.constant 0 : index
    %c1 = arith.constant 1 : index
    %c1_13 = arith.constant 1 : index
    %c0_14 = arith.constant 0 : index
    %6 = vector.load %arg8[%c0_12, %c1, %c1_13, %c0_14] : memref<2x16x16x36xf32, #tpu.memory_space<vmem>>, vector<2x15x15x4xf32>
    tpu.vector_store %arg8[%c0_12, %c1, %c1_13, %c0_14], %5 {strides = array<i32>} : memref<2x16x16x36xf32, #tpu.memory_space<vmem>>, vector<2x15x15x4xf32>,
    %cst_15 = arith.constant 0.000000e+00 : f32
    %7 = vector.broadcast %cst_15 : f32 to vector<2x1x16x4xf32>
    %c0_16 = arith.constant 0 : index
    %c0_17 = arith.constant 0 : index
    %c0_18 = arith.constant 0 : index
    %c4 = arith.constant 4 : index
    %8 = vector.load %arg8[%c0_16, %c0_17, %c0_18, %c4] : memref<2x16x16x36xf32, #tpu.memory_space<vmem>>, vector<2x1x16x4xf32>
    tpu.vector_store %arg8[%c0_16, %c0_17, %c0_18, %c4], %7 {strides = array<i32>} : memref<2x16x16x36xf32, #tpu.memory_space<vmem>>, vector<2x1x16x4xf32>,
    %9 = vector.extract_strided_slice %0 {offsets = [0, 0, 0, 0], sizes = [2, 15, 16, 4], strides = [1, 1, 1, 1]} : vector<2x16x16x4xf32> to vector<2x15x16x4xf32>
    %c0_19 = arith.constant 0 : index
    %c1_20 = arith.constant 1 : index
    %c0_21 = arith.constant 0 : index
    %c4_22 = arith.constant 4 : index
    %10 = vector.load %arg8[%c0_19, %c1_20, %c0_21, %c4_22] : memref<2x16x16x36xf32, #tpu.memory_space<vmem>>, vector<2x15x16x4xf32>
    tpu.vector_store %arg8[%c0_19, %c1_20, %c0_21, %c4_22], %9 {strides = array<i32>} : memref<2x16x16x36xf32, #tpu.memory_space<vmem>>, vector<2x15x16x4xf32>,
    %cst_23 = arith.constant 0.000000e+00 : f32
    %11 = vector.broadcast %cst_23 : f32 to vector<2x1x16x4xf32>
    %c0_24 = arith.constant 0 : index
    %c0_25 = arith.constant 0 : index
    %c0_26 = arith.constant 0 : index
    %c8 = arith.constant 8 : index
    %12 = vector.load %arg8[%c0_24, %c0_25, %c0_26, %c8] : memref<2x16x16x36xf32, #tpu.memory_space<vmem>>, vector<2x1x16x4xf32>
    tpu.vector_store %arg8[%c0_24, %c0_25, %c0_26, %c8], %11 {strides = array<i32>} : memref<2x16x16x36xf32, #tpu.memory_space<vmem>>, vector<2x1x16x4xf32>,
    %cst_27 = arith.constant 0.000000e+00 : f32
    %13 = vector.broadcast %cst_27 : f32 to vector<2x16x1x4xf32>
    %c0_28 = arith.constant 0 : index
    %c0_29 = arith.constant 0 : index
    %c15 = arith.constant 15 : index
    %c8_30 = arith.constant 8 : index
    %14 = vector.load %arg8[%c0_28, %c0_29, %c15, %c8_30] : memref<2x16x16x36xf32, #tpu.memory_space<vmem>>, vector<2x16x1x4xf32>
    tpu.vector_store %arg8[%c0_28, %c0_29, %c15, %c8_30], %13 {strides = array<i32>} : memref<2x16x16x36xf32, #tpu.memory_space<vmem>>, vector<2x16x1x4xf32>,
    %15 = vector.extract_strided_slice %0 {offsets = [0, 0, 1, 0], sizes = [2, 15, 15, 4], strides = [1, 1, 1, 1]} : vector<2x16x16x4xf32> to vector<2x15x15x4xf32>
    %c0_31 = arith.constant 0 : index
    %c1_32 = arith.constant 1 : index
    %c0_33 = arith.constant 0 : index
    %c8_34 = arith.constant 8 : index
    %16 = vector.load %arg8[%c0_31, %c1_32, %c0_33, %c8_34] : memref<2x16x16x36xf32, #tpu.memory_space<vmem>>, vector<2x15x15x4xf32>
    tpu.vector_store %arg8[%c0_31, %c1_32, %c0_33, %c8_34], %15 {strides = array<i32>} : memref<2x16x16x36xf32, #tpu.memory_space<vmem>>, vector<2x15x15x4xf32>,
    %cst_35 = arith.constant 0.000000e+00 : f32
    %17 = vector.broadcast %cst_35 : f32 to vector<2x16x1x4xf32>
    %c0_36 = arith.constant 0 : index
    %c0_37 = arith.constant 0 : index
    %c0_38 = arith.constant 0 : index
    %c12 = arith.constant 12 : index
    %18 = vector.load %arg8[%c0_36, %c0_37, %c0_38, %c12] : memref<2x16x16x36xf32, #tpu.memory_space<vmem>>, vector<2x16x1x4xf32>
    tpu.vector_store %arg8[%c0_36, %c0_37, %c0_38, %c12], %17 {strides = array<i32>} : memref<2x16x16x36xf32, #tpu.memory_space<vmem>>, vector<2x16x1x4xf32>,
    %19 = vector.extract_strided_slice %0 {offsets = [0, 0, 0, 0], sizes = [2, 16, 15, 4], strides = [1, 1, 1, 1]} : vector<2x16x16x4xf32> to vector<2x16x15x4xf32>
    %c0_39 = arith.constant 0 : index
    %c0_40 = arith.constant 0 : index
    %c1_41 = arith.constant 1 : index
    %c12_42 = arith.constant 12 : index
    %20 = vector.load %arg8[%c0_39, %c0_40, %c1_41, %c12_42] : memref<2x16x16x36xf32, #tpu.memory_space<vmem>>, vector<2x16x15x4xf32>
    tpu.vector_store %arg8[%c0_39, %c0_40, %c1_41, %c12_42], %19 {strides = array<i32>} : memref<2x16x16x36xf32, #tpu.memory_space<vmem>>, vector<2x16x15x4xf32>,
    %c0_43 = arith.constant 0 : index
    %c0_44 = arith.constant 0 : index
    %c0_45 = arith.constant 0 : index
    %c16 = arith.constant 16 : index
    %21 = vector.load %arg8[%c0_43, %c0_44, %c0_45, %c16] : memref<2x16x16x36xf32, #tpu.memory_space<vmem>>, vector<2x16x16x4xf32>
    tpu.vector_store %arg8[%c0_43, %c0_44, %c0_45, %c16], %0 {strides = array<i32>} : memref<2x16x16x36xf32, #tpu.memory_space<vmem>>, vector<2x16x16x4xf32>,
    %cst_46 = arith.constant 0.000000e+00 : f32
    %22 = vector.broadcast %cst_46 : f32 to vector<2x16x1x4xf32>
    %c0_47 = arith.constant 0 : index
    %c0_48 = arith.constant 0 : index
    %c15_49 = arith.constant 15 : index
    %c20 = arith.constant 20 : index
    %23 = vector.load %arg8[%c0_47, %c0_48, %c15_49, %c20] : memref<2x16x16x36xf32, #tpu.memory_space<vmem>>, vector<2x16x1x4xf32>
    tpu.vector_store %arg8[%c0_47, %c0_48, %c15_49, %c20], %22 {strides = array<i32>} : memref<2x16x16x36xf32, #tpu.memory_space<vmem>>, vector<2x16x1x4xf32>,
    %24 = vector.extract_strided_slice %0 {offsets = [0, 0, 1, 0], sizes = [2, 16, 15, 4], strides = [1, 1, 1, 1]} : vector<2x16x16x4xf32> to vector<2x16x15x4xf32>
    %c0_50 = arith.constant 0 : index
    %c0_51 = arith.constant 0 : index
    %c0_52 = arith.constant 0 : index
    %c20_53 = arith.constant 20 : index
    %25 = vector.load %arg8[%c0_50, %c0_51, %c0_52, %c20_53] : memref<2x16x16x36xf32, #tpu.memory_space<vmem>>, vector<2x16x15x4xf32>
    tpu.vector_store %arg8[%c0_50, %c0_51, %c0_52, %c20_53], %24 {strides = array<i32>} : memref<2x16x16x36xf32, #tpu.memory_space<vmem>>, vector<2x16x15x4xf32>,
    %cst_54 = arith.constant 0.000000e+00 : f32
    %26 = vector.broadcast %cst_54 : f32 to vector<2x1x16x4xf32>
    %c0_55 = arith.constant 0 : index
    %c15_56 = arith.constant 15 : index
    %c0_57 = arith.constant 0 : index
    %c24 = arith.constant 24 : index
    %27 = vector.load %arg8[%c0_55, %c15_56, %c0_57, %c24] : memref<2x16x16x36xf32, #tpu.memory_space<vmem>>, vector<2x1x16x4xf32>
    tpu.vector_store %arg8[%c0_55, %c15_56, %c0_57, %c24], %26 {strides = array<i32>} : memref<2x16x16x36xf32, #tpu.memory_space<vmem>>, vector<2x1x16x4xf32>,
    %cst_58 = arith.constant 0.000000e+00 : f32
    %28 = vector.broadcast %cst_58 : f32 to vector<2x16x1x4xf32>
    %c0_59 = arith.constant 0 : index
    %c0_60 = arith.constant 0 : index
    %c0_61 = arith.constant 0 : index
    %c24_62 = arith.constant 24 : index
    %29 = vector.load %arg8[%c0_59, %c0_60, %c0_61, %c24_62] : memref<2x16x16x36xf32, #tpu.memory_space<vmem>>, vector<2x16x1x4xf32>
    tpu.vector_store %arg8[%c0_59, %c0_60, %c0_61, %c24_62], %28 {strides = array<i32>} : memref<2x16x16x36xf32, #tpu.memory_space<vmem>>, vector<2x16x1x4xf32>,
    %30 = vector.extract_strided_slice %0 {offsets = [0, 1, 0, 0], sizes = [2, 15, 15, 4], strides = [1, 1, 1, 1]} : vector<2x16x16x4xf32> to vector<2x15x15x4xf32>
    %c0_63 = arith.constant 0 : index
    %c0_64 = arith.constant 0 : index
    %c1_65 = arith.constant 1 : index
    %c24_66 = arith.constant 24 : index
    %31 = vector.load %arg8[%c0_63, %c0_64, %c1_65, %c24_66] : memref<2x16x16x36xf32, #tpu.memory_space<vmem>>, vector<2x15x15x4xf32>
    tpu.vector_store %arg8[%c0_63, %c0_64, %c1_65, %c24_66], %30 {strides = array<i32>} : memref<2x16x16x36xf32, #tpu.memory_space<vmem>>, vector<2x15x15x4xf32>,
    %cst_67 = arith.constant 0.000000e+00 : f32
    %32 = vector.broadcast %cst_67 : f32 to vector<2x1x16x4xf32>
    %c0_68 = arith.constant 0 : index
    %c15_69 = arith.constant 15 : index
    %c0_70 = arith.constant 0 : index
    %c28 = arith.constant 28 : index
    %33 = vector.load %arg8[%c0_68, %c15_69, %c0_70, %c28] : memref<2x16x16x36xf32, #tpu.memory_space<vmem>>, vector<2x1x16x4xf32>
    tpu.vector_store %arg8[%c0_68, %c15_69, %c0_70, %c28], %32 {strides = array<i32>} : memref<2x16x16x36xf32, #tpu.memory_space<vmem>>, vector<2x1x16x4xf32>,
    %34 = vector.extract_strided_slice %0 {offsets = [0, 1, 0, 0], sizes = [2, 15, 16, 4], strides = [1, 1, 1, 1]} : vector<2x16x16x4xf32> to vector<2x15x16x4xf32>
    %c0_71 = arith.constant 0 : index
    %c0_72 = arith.constant 0 : index
    %c0_73 = arith.constant 0 : index
    %c28_74 = arith.constant 28 : index
    %35 = vector.load %arg8[%c0_71, %c0_72, %c0_73, %c28_74] : memref<2x16x16x36xf32, #tpu.memory_space<vmem>>, vector<2x15x16x4xf32>
    tpu.vector_store %arg8[%c0_71, %c0_72, %c0_73, %c28_74], %34 {strides = array<i32>} : memref<2x16x16x36xf32, #tpu.memory_space<vmem>>, vector<2x15x16x4xf32>,
    %cst_75 = arith.constant 0.000000e+00 : f32
    %36 = vector.broadcast %cst_75 : f32 to vector<2x1x16x4xf32>
    %c0_76 = arith.constant 0 : index
    %c15_77 = arith.constant 15 : index
    %c0_78 = arith.constant 0 : index
    %c32 = arith.constant 32 : index
    %37 = vector.load %arg8[%c0_76, %c15_77, %c0_78, %c32] : memref<2x16x16x36xf32, #tpu.memory_space<vmem>>, vector<2x1x16x4xf32>
    tpu.vector_store %arg8[%c0_76, %c15_77, %c0_78, %c32], %36 {strides = array<i32>} : memref<2x16x16x36xf32, #tpu.memory_space<vmem>>, vector<2x1x16x4xf32>,
    %cst_79 = arith.constant 0.000000e+00 : f32
    %38 = vector.broadcast %cst_79 : f32 to vector<2x16x1x4xf32>
    %c0_80 = arith.constant 0 : index
    %c0_81 = arith.constant 0 : index
    %c15_82 = arith.constant 15 : index
    %c32_83 = arith.constant 32 : index
    %39 = vector.load %arg8[%c0_80, %c0_81, %c15_82, %c32_83] : memref<2x16x16x36xf32, #tpu.memory_space<vmem>>, vector<2x16x1x4xf32>
    tpu.vector_store %arg8[%c0_80, %c0_81, %c15_82, %c32_83], %38 {strides = array<i32>} : memref<2x16x16x36xf32, #tpu.memory_space<vmem>>, vector<2x16x1x4xf32>,
    %40 = vector.extract_strided_slice %0 {offsets = [0, 1, 1, 0], sizes = [2, 15, 15, 4], strides = [1, 1, 1, 1]} : vector<2x16x16x4xf32> to vector<2x15x15x4xf32>
    %c0_84 = arith.constant 0 : index
    %c0_85 = arith.constant 0 : index
    %c0_86 = arith.constant 0 : index
    %c32_87 = arith.constant 32 : index
    %41 = vector.load %arg8[%c0_84, %c0_85, %c0_86, %c32_87] : memref<2x16x16x36xf32, #tpu.memory_space<vmem>>, vector<2x15x15x4xf32>
    tpu.vector_store %arg8[%c0_84, %c0_85, %c0_86, %c32_87], %40 {strides = array<i32>} : memref<2x16x16x36xf32, #tpu.memory_space<vmem>>, vector<2x15x15x4xf32>,
    %c0_88 = arith.constant 0 : index
    %c0_89 = arith.constant 0 : index
    %42 = vector.load %arg2[%c0_88, %c0_89] : memref<1x8xf32, #tpu.memory_space<vmem>>, vector<1x8xf32>
    %c0_90 = arith.constant 0 : index
    %c0_91 = arith.constant 0 : index
    %43 = vector.load %arg3[%c0_90, %c0_91] : memref<1x8xf32, #tpu.memory_space<vmem>>, vector<1x8xf32>
    %c0_92 = arith.constant 0 : index
    %c0_93 = arith.constant 0 : index
    %c0_94 = arith.constant 0 : index
    %c0_95 = arith.constant 0 : index
    %44 = vector.load %arg8[%c0_92, %c0_93, %c0_94, %c0_95] : memref<2x16x16x36xf32, #tpu.memory_space<vmem>>, vector<2x16x16x36xf32>
    %45 = vector.shape_cast %44 : vector<2x16x16x36xf32> to vector<512x36xf32>
    %46 = arith.truncf %45 : vector<512x36xf32> to vector<512x36xbf16>
    %c0_96 = arith.constant 0 : index
    %c0_97 = arith.constant 0 : index
    %47 = vector.load %arg1[%c0_96, %c0_97] : memref<36x8xbf16, #tpu.memory_space<vmem>>, vector<36x8xbf16>
    %cst_98 = arith.constant dense<0.000000e+00> : vector<512x8xf32>
    %48 = tpu.matmul %46, %47, %cst_98 {dimension_numbers = #tpu.dot_dimension_numbers<[1], [0], [0], [1], [0, 0, 1, 1], [], []>} : vector<512x36xbf16>, vector<36x8xbf16>, vector<512x8xf32> -> vector<512x8xf32>
    %cst_99 = arith.constant dense<0.000000e+00> : vector<8xf32>
    %49 = vector.multi_reduction <add>, %48, %cst_99 [0] : vector<512x8xf32> to vector<8xf32>
    %50 = vector.shape_cast %49 : vector<8xf32> to vector<1x8xf32>
    %cst_100 = arith.constant 0.001953125 : f32
    %51 = vector.broadcast %cst_100 : f32 to vector<1x8xf32>
    %52 = arith.mulf %50, %51 : vector<1x8xf32>
    %53 = arith.mulf %48, %48 : vector<512x8xf32>
    %cst_101 = arith.constant dense<0.000000e+00> : vector<8xf32>
    %54 = vector.multi_reduction <add>, %53, %cst_101 [0] : vector<512x8xf32> to vector<8xf32>
    %55 = vector.shape_cast %54 : vector<8xf32> to vector<1x8xf32>
    %cst_102 = arith.constant 0.001953125 : f32
    %56 = vector.broadcast %cst_102 : f32 to vector<1x8xf32>
    %57 = arith.mulf %55, %56 : vector<1x8xf32>
    %58 = arith.mulf %52, %52 : vector<1x8xf32>
    %59 = arith.subf %57, %58 : vector<1x8xf32>
    %cst_103 = arith.constant 0.000000e+00 : f32
    %60 = vector.broadcast %cst_103 : f32 to vector<1x8xf32>
    %61 = arith.maximumf %59, %60 : vector<1x8xf32>
    %cst_104 = arith.constant 9.99999974E-6 : f32
    %62 = vector.broadcast %cst_104 : f32 to vector<1x8xf32>
    %63 = arith.addf %61, %62 : vector<1x8xf32>
    %64 = math.rsqrt %63 : vector<1x8xf32>
    %65 = arith.mulf %42, %64 : vector<1x8xf32>
    %66 = arith.mulf %52, %65 : vector<1x8xf32>
    %67 = arith.subf %43, %66 : vector<1x8xf32>
    %68 = vector.broadcast %65 : vector<1x8xf32> to vector<512x8xf32>
    %69 = arith.mulf %48, %68 : vector<512x8xf32>
    %70 = vector.broadcast %67 : vector<1x8xf32> to vector<512x8xf32>
    %71 = arith.addf %69, %70 : vector<512x8xf32>
    %cst_105 = arith.constant 0.000000e+00 : f32
    %72 = vector.broadcast %cst_105 : f32 to vector<512x8xf32>
    %73 = arith.maximumf %71, %72 : vector<512x8xf32>
    %74 = vector.shape_cast %73 : vector<512x8xf32> to vector<2x16x16x8xf32>
    %cst_106 = arith.constant 0.000000e+00 : f32
    %75 = vector.broadcast %cst_106 : f32 to vector<2x1x16x8xf32>
    %c0_107 = arith.constant 0 : index
    %c0_108 = arith.constant 0 : index
    %c0_109 = arith.constant 0 : index
    %c0_110 = arith.constant 0 : index
    %76 = vector.load %arg9[%c0_107, %c0_108, %c0_109, %c0_110] : memref<2x16x16x72xf32, #tpu.memory_space<vmem>>, vector<2x1x16x8xf32>
    tpu.vector_store %arg9[%c0_107, %c0_108, %c0_109, %c0_110], %75 {strides = array<i32>} : memref<2x16x16x72xf32, #tpu.memory_space<vmem>>, vector<2x1x16x8xf32>,
    %cst_111 = arith.constant 0.000000e+00 : f32
    %77 = vector.broadcast %cst_111 : f32 to vector<2x16x1x8xf32>
    %c0_112 = arith.constant 0 : index
    %c0_113 = arith.constant 0 : index
    %c0_114 = arith.constant 0 : index
    %c0_115 = arith.constant 0 : index
    %78 = vector.load %arg9[%c0_112, %c0_113, %c0_114, %c0_115] : memref<2x16x16x72xf32, #tpu.memory_space<vmem>>, vector<2x16x1x8xf32>
    tpu.vector_store %arg9[%c0_112, %c0_113, %c0_114, %c0_115], %77 {strides = array<i32>} : memref<2x16x16x72xf32, #tpu.memory_space<vmem>>, vector<2x16x1x8xf32>,
    %79 = vector.extract_strided_slice %74 {offsets = [0, 0, 0, 0], sizes = [2, 15, 15, 8], strides = [1, 1, 1, 1]} : vector<2x16x16x8xf32> to vector<2x15x15x8xf32>
    %c0_116 = arith.constant 0 : index
    %c1_117 = arith.constant 1 : index
    %c1_118 = arith.constant 1 : index
    %c0_119 = arith.constant 0 : index
    %80 = vector.load %arg9[%c0_116, %c1_117, %c1_118, %c0_119] : memref<2x16x16x72xf32, #tpu.memory_space<vmem>>, vector<2x15x15x8xf32>
    tpu.vector_store %arg9[%c0_116, %c1_117, %c1_118, %c0_119], %79 {strides = array<i32>} : memref<2x16x16x72xf32, #tpu.memory_space<vmem>>, vector<2x15x15x8xf32>,
    %cst_120 = arith.constant 0.000000e+00 : f32
    %81 = vector.broadcast %cst_120 : f32 to vector<2x1x16x8xf32>
    %c0_121 = arith.constant 0 : index
    %c0_122 = arith.constant 0 : index
    %c0_123 = arith.constant 0 : index
    %c8_124 = arith.constant 8 : index
    %82 = vector.load %arg9[%c0_121, %c0_122, %c0_123, %c8_124] : memref<2x16x16x72xf32, #tpu.memory_space<vmem>>, vector<2x1x16x8xf32>
    tpu.vector_store %arg9[%c0_121, %c0_122, %c0_123, %c8_124], %81 {strides = array<i32>} : memref<2x16x16x72xf32, #tpu.memory_space<vmem>>, vector<2x1x16x8xf32>,
    %83 = vector.extract_strided_slice %74 {offsets = [0, 0, 0, 0], sizes = [2, 15, 16, 8], strides = [1, 1, 1, 1]} : vector<2x16x16x8xf32> to vector<2x15x16x8xf32>
    %c0_125 = arith.constant 0 : index
    %c1_126 = arith.constant 1 : index
    %c0_127 = arith.constant 0 : index
    %c8_128 = arith.constant 8 : index
    %84 = vector.load %arg9[%c0_125, %c1_126, %c0_127, %c8_128] : memref<2x16x16x72xf32, #tpu.memory_space<vmem>>, vector<2x15x16x8xf32>
    tpu.vector_store %arg9[%c0_125, %c1_126, %c0_127, %c8_128], %83 {strides = array<i32>} : memref<2x16x16x72xf32, #tpu.memory_space<vmem>>, vector<2x15x16x8xf32>,
    %cst_129 = arith.constant 0.000000e+00 : f32
    %85 = vector.broadcast %cst_129 : f32 to vector<2x1x16x8xf32>
    %c0_130 = arith.constant 0 : index
    %c0_131 = arith.constant 0 : index
    %c0_132 = arith.constant 0 : index
    %c16_133 = arith.constant 16 : index
    %86 = vector.load %arg9[%c0_130, %c0_131, %c0_132, %c16_133] : memref<2x16x16x72xf32, #tpu.memory_space<vmem>>, vector<2x1x16x8xf32>
    tpu.vector_store %arg9[%c0_130, %c0_131, %c0_132, %c16_133], %85 {strides = array<i32>} : memref<2x16x16x72xf32, #tpu.memory_space<vmem>>, vector<2x1x16x8xf32>,
    %cst_134 = arith.constant 0.000000e+00 : f32
    %87 = vector.broadcast %cst_134 : f32 to vector<2x16x1x8xf32>
    %c0_135 = arith.constant 0 : index
    %c0_136 = arith.constant 0 : index
    %c15_137 = arith.constant 15 : index
    %c16_138 = arith.constant 16 : index
    %88 = vector.load %arg9[%c0_135, %c0_136, %c15_137, %c16_138] : memref<2x16x16x72xf32, #tpu.memory_space<vmem>>, vector<2x16x1x8xf32>
    tpu.vector_store %arg9[%c0_135, %c0_136, %c15_137, %c16_138], %87 {strides = array<i32>} : memref<2x16x16x72xf32, #tpu.memory_space<vmem>>, vector<2x16x1x8xf32>,
    %89 = vector.extract_strided_slice %74 {offsets = [0, 0, 1, 0], sizes = [2, 15, 15, 8], strides = [1, 1, 1, 1]} : vector<2x16x16x8xf32> to vector<2x15x15x8xf32>
    %c0_139 = arith.constant 0 : index
    %c1_140 = arith.constant 1 : index
    %c0_141 = arith.constant 0 : index
    %c16_142 = arith.constant 16 : index
    %90 = vector.load %arg9[%c0_139, %c1_140, %c0_141, %c16_142] : memref<2x16x16x72xf32, #tpu.memory_space<vmem>>, vector<2x15x15x8xf32>
    tpu.vector_store %arg9[%c0_139, %c1_140, %c0_141, %c16_142], %89 {strides = array<i32>} : memref<2x16x16x72xf32, #tpu.memory_space<vmem>>, vector<2x15x15x8xf32>,
    %cst_143 = arith.constant 0.000000e+00 : f32
    %91 = vector.broadcast %cst_143 : f32 to vector<2x16x1x8xf32>
    %c0_144 = arith.constant 0 : index
    %c0_145 = arith.constant 0 : index
    %c0_146 = arith.constant 0 : index
    %c24_147 = arith.constant 24 : index
    %92 = vector.load %arg9[%c0_144, %c0_145, %c0_146, %c24_147] : memref<2x16x16x72xf32, #tpu.memory_space<vmem>>, vector<2x16x1x8xf32>
    tpu.vector_store %arg9[%c0_144, %c0_145, %c0_146, %c24_147], %91 {strides = array<i32>} : memref<2x16x16x72xf32, #tpu.memory_space<vmem>>, vector<2x16x1x8xf32>,
    %93 = vector.extract_strided_slice %74 {offsets = [0, 0, 0, 0], sizes = [2, 16, 15, 8], strides = [1, 1, 1, 1]} : vector<2x16x16x8xf32> to vector<2x16x15x8xf32>
    %c0_148 = arith.constant 0 : index
    %c0_149 = arith.constant 0 : index
    %c1_150 = arith.constant 1 : index
    %c24_151 = arith.constant 24 : index
    %94 = vector.load %arg9[%c0_148, %c0_149, %c1_150, %c24_151] : memref<2x16x16x72xf32, #tpu.memory_space<vmem>>, vector<2x16x15x8xf32>
    tpu.vector_store %arg9[%c0_148, %c0_149, %c1_150, %c24_151], %93 {strides = array<i32>} : memref<2x16x16x72xf32, #tpu.memory_space<vmem>>, vector<2x16x15x8xf32>,
    %c0_152 = arith.constant 0 : index
    %c0_153 = arith.constant 0 : index
    %c0_154 = arith.constant 0 : index
    %c32_155 = arith.constant 32 : index
    %95 = vector.load %arg9[%c0_152, %c0_153, %c0_154, %c32_155] : memref<2x16x16x72xf32, #tpu.memory_space<vmem>>, vector<2x16x16x8xf32>
    tpu.vector_store %arg9[%c0_152, %c0_153, %c0_154, %c32_155], %74 {strides = array<i32>} : memref<2x16x16x72xf32, #tpu.memory_space<vmem>>, vector<2x16x16x8xf32>,
    %cst_156 = arith.constant 0.000000e+00 : f32
    %96 = vector.broadcast %cst_156 : f32 to vector<2x16x1x8xf32>
    %c0_157 = arith.constant 0 : index
    %c0_158 = arith.constant 0 : index
    %c15_159 = arith.constant 15 : index
    %c40 = arith.constant 40 : index
    %97 = vector.load %arg9[%c0_157, %c0_158, %c15_159, %c40] : memref<2x16x16x72xf32, #tpu.memory_space<vmem>>, vector<2x16x1x8xf32>
    tpu.vector_store %arg9[%c0_157, %c0_158, %c15_159, %c40], %96 {strides = array<i32>} : memref<2x16x16x72xf32, #tpu.memory_space<vmem>>, vector<2x16x1x8xf32>,
    %98 = vector.extract_strided_slice %74 {offsets = [0, 0, 1, 0], sizes = [2, 16, 15, 8], strides = [1, 1, 1, 1]} : vector<2x16x16x8xf32> to vector<2x16x15x8xf32>
    %c0_160 = arith.constant 0 : index
    %c0_161 = arith.constant 0 : index
    %c0_162 = arith.constant 0 : index
    %c40_163 = arith.constant 40 : index
    %99 = vector.load %arg9[%c0_160, %c0_161, %c0_162, %c40_163] : memref<2x16x16x72xf32, #tpu.memory_space<vmem>>, vector<2x16x15x8xf32>
    tpu.vector_store %arg9[%c0_160, %c0_161, %c0_162, %c40_163], %98 {strides = array<i32>} : memref<2x16x16x72xf32, #tpu.memory_space<vmem>>, vector<2x16x15x8xf32>,
    %cst_164 = arith.constant 0.000000e+00 : f32
    %100 = vector.broadcast %cst_164 : f32 to vector<2x1x16x8xf32>
    %c0_165 = arith.constant 0 : index
    %c15_166 = arith.constant 15 : index
    %c0_167 = arith.constant 0 : index
    %c48 = arith.constant 48 : index
    %101 = vector.load %arg9[%c0_165, %c15_166, %c0_167, %c48] : memref<2x16x16x72xf32, #tpu.memory_space<vmem>>, vector<2x1x16x8xf32>
    tpu.vector_store %arg9[%c0_165, %c15_166, %c0_167, %c48], %100 {strides = array<i32>} : memref<2x16x16x72xf32, #tpu.memory_space<vmem>>, vector<2x1x16x8xf32>,
    %cst_168 = arith.constant 0.000000e+00 : f32
    %102 = vector.broadcast %cst_168 : f32 to vector<2x16x1x8xf32>
    %c0_169 = arith.constant 0 : index
    %c0_170 = arith.constant 0 : index
    %c0_171 = arith.constant 0 : index
    %c48_172 = arith.constant 48 : index
    %103 = vector.load %arg9[%c0_169, %c0_170, %c0_171, %c48_172] : memref<2x16x16x72xf32, #tpu.memory_space<vmem>>, vector<2x16x1x8xf32>
    tpu.vector_store %arg9[%c0_169, %c0_170, %c0_171, %c48_172], %102 {strides = array<i32>} : memref<2x16x16x72xf32, #tpu.memory_space<vmem>>, vector<2x16x1x8xf32>,
    %104 = vector.extract_strided_slice %74 {offsets = [0, 1, 0, 0], sizes = [2, 15, 15, 8], strides = [1, 1, 1, 1]} : vector<2x16x16x8xf32> to vector<2x15x15x8xf32>
    %c0_173 = arith.constant 0 : index
    %c0_174 = arith.constant 0 : index
    %c1_175 = arith.constant 1 : index
    %c48_176 = arith.constant 48 : index
    %105 = vector.load %arg9[%c0_173, %c0_174, %c1_175, %c48_176] : memref<2x16x16x72xf32, #tpu.memory_space<vmem>>, vector<2x15x15x8xf32>
    tpu.vector_store %arg9[%c0_173, %c0_174, %c1_175, %c48_176], %104 {strides = array<i32>} : memref<2x16x16x72xf32, #tpu.memory_space<vmem>>, vector<2x15x15x8xf32>,
    %cst_177 = arith.constant 0.000000e+00 : f32
    %106 = vector.broadcast %cst_177 : f32 to vector<2x1x16x8xf32>
    %c0_178 = arith.constant 0 : index
    %c15_179 = arith.constant 15 : index
    %c0_180 = arith.constant 0 : index
    %c56 = arith.constant 56 : index
    %107 = vector.load %arg9[%c0_178, %c15_179, %c0_180, %c56] : memref<2x16x16x72xf32, #tpu.memory_space<vmem>>, vector<2x1x16x8xf32>
    tpu.vector_store %arg9[%c0_178, %c15_179, %c0_180, %c56], %106 {strides = array<i32>} : memref<2x16x16x72xf32, #tpu.memory_space<vmem>>, vector<2x1x16x8xf32>,
    %108 = vector.extract_strided_slice %74 {offsets = [0, 1, 0, 0], sizes = [2, 15, 16, 8], strides = [1, 1, 1, 1]} : vector<2x16x16x8xf32> to vector<2x15x16x8xf32>
    %c0_181 = arith.constant 0 : index
    %c0_182 = arith.constant 0 : index
    %c0_183 = arith.constant 0 : index
    %c56_184 = arith.constant 56 : index
    %109 = vector.load %arg9[%c0_181, %c0_182, %c0_183, %c56_184] : memref<2x16x16x72xf32, #tpu.memory_space<vmem>>, vector<2x15x16x8xf32>
    tpu.vector_store %arg9[%c0_181, %c0_182, %c0_183, %c56_184], %108 {strides = array<i32>} : memref<2x16x16x72xf32, #tpu.memory_space<vmem>>, vector<2x15x16x8xf32>,
    %cst_185 = arith.constant 0.000000e+00 : f32
    %110 = vector.broadcast %cst_185 : f32 to vector<2x1x16x8xf32>
    %c0_186 = arith.constant 0 : index
    %c15_187 = arith.constant 15 : index
    %c0_188 = arith.constant 0 : index
    %c64 = arith.constant 64 : index
    %111 = vector.load %arg9[%c0_186, %c15_187, %c0_188, %c64] : memref<2x16x16x72xf32, #tpu.memory_space<vmem>>, vector<2x1x16x8xf32>
    tpu.vector_store %arg9[%c0_186, %c15_187, %c0_188, %c64], %110 {strides = array<i32>} : memref<2x16x16x72xf32, #tpu.memory_space<vmem>>, vector<2x1x16x8xf32>,
    %cst_189 = arith.constant 0.000000e+00 : f32
    %112 = vector.broadcast %cst_189 : f32 to vector<2x16x1x8xf32>
    %c0_190 = arith.constant 0 : index
    %c0_191 = arith.constant 0 : index
    %c15_192 = arith.constant 15 : index
    %c64_193 = arith.constant 64 : index
    %113 = vector.load %arg9[%c0_190, %c0_191, %c15_192, %c64_193] : memref<2x16x16x72xf32, #tpu.memory_space<vmem>>, vector<2x16x1x8xf32>
    tpu.vector_store %arg9[%c0_190, %c0_191, %c15_192, %c64_193], %112 {strides = array<i32>} : memref<2x16x16x72xf32, #tpu.memory_space<vmem>>, vector<2x16x1x8xf32>,
    %114 = vector.extract_strided_slice %74 {offsets = [0, 1, 1, 0], sizes = [2, 15, 15, 8], strides = [1, 1, 1, 1]} : vector<2x16x16x8xf32> to vector<2x15x15x8xf32>
    %c0_194 = arith.constant 0 : index
    %c0_195 = arith.constant 0 : index
    %c0_196 = arith.constant 0 : index
    %c64_197 = arith.constant 64 : index
    %115 = vector.load %arg9[%c0_194, %c0_195, %c0_196, %c64_197] : memref<2x16x16x72xf32, #tpu.memory_space<vmem>>, vector<2x15x15x8xf32>
    tpu.vector_store %arg9[%c0_194, %c0_195, %c0_196, %c64_197], %114 {strides = array<i32>} : memref<2x16x16x72xf32, #tpu.memory_space<vmem>>, vector<2x15x15x8xf32>,
    %c0_198 = arith.constant 0 : index
    %c0_199 = arith.constant 0 : index
    %116 = vector.load %arg5[%c0_198, %c0_199] : memref<1x8xf32, #tpu.memory_space<vmem>>, vector<1x8xf32>
    %c0_200 = arith.constant 0 : index
    %c0_201 = arith.constant 0 : index
    %117 = vector.load %arg6[%c0_200, %c0_201] : memref<1x8xf32, #tpu.memory_space<vmem>>, vector<1x8xf32>
    %c0_202 = arith.constant 0 : index
    %c0_203 = arith.constant 0 : index
    %c0_204 = arith.constant 0 : index
    %c0_205 = arith.constant 0 : index
    %118 = vector.load %arg9[%c0_202, %c0_203, %c0_204, %c0_205] : memref<2x16x16x72xf32, #tpu.memory_space<vmem>>, vector<2x16x16x72xf32>
    %119 = vector.shape_cast %118 : vector<2x16x16x72xf32> to vector<512x72xf32>
    %120 = arith.truncf %119 : vector<512x72xf32> to vector<512x72xbf16>
    %c0_206 = arith.constant 0 : index
    %c0_207 = arith.constant 0 : index
    %121 = vector.load %arg4[%c0_206, %c0_207] : memref<72x8xbf16, #tpu.memory_space<vmem>>, vector<72x8xbf16>
    %cst_208 = arith.constant dense<0.000000e+00> : vector<512x8xf32>
    %122 = tpu.matmul %120, %121, %cst_208 {dimension_numbers = #tpu.dot_dimension_numbers<[1], [0], [0], [1], [0, 0, 1, 1], [], []>} : vector<512x72xbf16>, vector<72x8xbf16>, vector<512x8xf32> -> vector<512x8xf32>
    %cst_209 = arith.constant dense<0.000000e+00> : vector<8xf32>
    %123 = vector.multi_reduction <add>, %122, %cst_209 [0] : vector<512x8xf32> to vector<8xf32>
    %124 = vector.shape_cast %123 : vector<8xf32> to vector<1x8xf32>
    %cst_210 = arith.constant 0.001953125 : f32
    %125 = vector.broadcast %cst_210 : f32 to vector<1x8xf32>
    %126 = arith.mulf %124, %125 : vector<1x8xf32>
    %127 = arith.mulf %122, %122 : vector<512x8xf32>
    %cst_211 = arith.constant dense<0.000000e+00> : vector<8xf32>
    %128 = vector.multi_reduction <add>, %127, %cst_211 [0] : vector<512x8xf32> to vector<8xf32>
    %129 = vector.shape_cast %128 : vector<8xf32> to vector<1x8xf32>
    %cst_212 = arith.constant 0.001953125 : f32
    %130 = vector.broadcast %cst_212 : f32 to vector<1x8xf32>
    %131 = arith.mulf %129, %130 : vector<1x8xf32>
    %132 = arith.mulf %126, %126 : vector<1x8xf32>
    %133 = arith.subf %131, %132 : vector<1x8xf32>
    %cst_213 = arith.constant 0.000000e+00 : f32
    %134 = vector.broadcast %cst_213 : f32 to vector<1x8xf32>
    %135 = arith.maximumf %133, %134 : vector<1x8xf32>
    %cst_214 = arith.constant 9.99999974E-6 : f32
    %136 = vector.broadcast %cst_214 : f32 to vector<1x8xf32>
    %137 = arith.addf %135, %136 : vector<1x8xf32>
    %138 = math.rsqrt %137 : vector<1x8xf32>
    %139 = arith.mulf %116, %138 : vector<1x8xf32>
    %140 = arith.mulf %126, %139 : vector<1x8xf32>
    %141 = arith.subf %117, %140 : vector<1x8xf32>
    %142 = vector.broadcast %139 : vector<1x8xf32> to vector<512x8xf32>
    %143 = arith.mulf %122, %142 : vector<512x8xf32>
    %144 = vector.broadcast %141 : vector<1x8xf32> to vector<512x8xf32>
    %145 = arith.addf %143, %144 : vector<512x8xf32>
    %cst_215 = arith.constant 0.000000e+00 : f32
    %146 = vector.broadcast %cst_215 : f32 to vector<512x8xf32>
    %147 = arith.maximumf %145, %146 : vector<512x8xf32>
    %148 = vector.shape_cast %147 : vector<512x8xf32> to vector<2x16x16x8xf32>
    %c0_216 = arith.constant 0 : index
    %c0_217 = arith.constant 0 : index
    %c0_218 = arith.constant 0 : index
    %c0_219 = arith.constant 0 : index
    %149 = vector.load %arg7[%c0_216, %c0_217, %c0_218, %c0_219] : memref<2x16x16x8xf32, #tpu.memory_space<vmem>>, vector<2x16x16x8xf32>
    tpu.vector_store %arg7[%c0_216, %c0_217, %c0_218, %c0_219], %148 {strides = array<i32>} : memref<2x16x16x8xf32, #tpu.memory_space<vmem>>, vector<2x16x16x8xf32>,
    return
  }
}

</mosaic_0001>

<bundles_post_ra>
// kernel: tpu_custom_call.1
= control target key start
LH: loop header
LB: loop body
LE: loop exit
PB: predicated region body
PF: predicated region fallthrough
CT: control target
= control target key end

     0   :  { %vm91_vm0 = vcmask 31744   ;;  %vm96_vm1 = vcmask 24576   ;;  %v14257_v3 = vmov 0.0   ;;  %vm191_vm2 = vcmask 64544   ;;  %s7261_s30 = smov 4   ;;  %s7262_s12 = smov 8   ;;  %s14249_s0 = inlined_call_operand.vmem [shape: f32[2,16,16,4], index: 0, kind: input, shape index: {}]   ;;  %s14250_s1 = inlined_call_operand.vmem [shape: bf16[36,8], index: 1, kind: input, shape index: {}]   ;;  %s14251_s2 = inlined_call_operand.vmem [shape: f32[1,8], index: 2, kind: input, shape index: {}]   ;;  %s14252_s3 = inlined_call_operand.vmem [shape: f32[1,8], index: 3, kind: input, shape index: {}]   ;;  %s14253_s4 = inlined_call_operand.vmem [shape: bf16[72,8], index: 4, kind: input, shape index: {}]   ;;  %s14254_s5 = inlined_call_operand.vmem [shape: f32[1,8], index: 5, kind: input, shape index: {}]   ;;  %s14255_s6 = inlined_call_operand.vmem [shape: f32[1,8], index: 6, kind: input, shape index: {}]   ;;  %s14256_s7 = inlined_call_operand.vmem [shape: f32[2,16,16,8], index: 7, kind: output, shape index: {}]  }
   0x1   :  { %v7316_v0 = vld [vmem:[%s14249_s0 + $0x10] sm:$0xff]  ;;  %v7321_v1 = vld [vmem:[%s14249_s0] sm:$0xff]  ;;  %v7326_v2 = vld [vmem:[%s14249_s0 + $0x18] sm:$0xff]  ;;  %99 = vst.msk [vmem:[#allocation2 + $0x20] sm:$0x1] %vm96_vm1, %v14257_v3  ;;  %vm131_vm3 = vcmask 30720  }
   0x2   :  { %92 = vst.msk [vmem:[#allocation2] sm:$0xff] %vm91_vm0, %v14257_v3  ;;  %93 = vst.msk [vmem:[#allocation2 + $0x8] sm:$0xff] %vm91_vm0, %v14257_v3  ;;  %260 = vrot.lane.b32.xlu1 %v7316_v0, %s7261_s30  ;;  %256 = vrot.lane.b32.xlu0 %v7321_v1, %s7261_s30  ;;  %v7403_v4 = vld [vmem:[%s14249_s0 + $0x8] sm:$0xff]  ;;  %v7427_v6 = vld [vmem:[%s14249_s0 + $0x20] sm:$0xff]  ;;  %vm501_vm4 = vcmask 90176   ;;  %vm496_vm5 = vcmask 97344  }
   0x3   :  { %94 = vst.msk [vmem:[#allocation2 + $0x100] sm:$0xff] %vm91_vm0, %v14257_v3  ;;  %95 = vst.msk [vmem:[#allocation2 + $0x108] sm:$0xff] %vm91_vm0, %v14257_v3  ;;  %v7408_v5 = vld [vmem:[%s14249_s0 + $0x28] sm:$0xff]  ;;  %v7432_v7 = vld [vmem:[%s14249_s0 + $0x38] sm:$0xff]  ;;  %vm775_vm6 = vcmask 122976   ;;  %vm714_vm7 = vcmask 97345  }
   0x4   :  { %98 = vst.msk [vmem:[#allocation2 + $0x10] sm:$0x1] %vm96_vm1, %v14257_v3  ;;  %100 = vst.msk [vmem:[#allocation2 + $0x30] sm:$0x1] %vm96_vm1, %v14257_v3  ;;  %v7437_v8 = vld [vmem:[%s14249_s0 + $0x30] sm:$0xff]  ;;  %v7450_v9 = vld [vmem:[%s14249_s0 + $0x48] sm:$0xff] }
   0x5   :  { %101 = vst.msk [vmem:[#allocation2 + $0x40] sm:$0x1] %vm96_vm1, %v14257_v3  ;;  %102 = vst.msk [vmem:[#allocation2 + $0x50] sm:$0x1] %vm96_vm1, %v14257_v3  ;;  %v7455_v10 = vld [vmem:[%s14249_s0 + $0x40] sm:$0xff]  ;;  %v7460_v11 = vld [vmem:[%s14249_s0 + $0x58] sm:$0xff] }
   0x6   :  { %103 = vst.msk [vmem:[#allocation2 + $0x60] sm:$0x1] %vm96_vm1, %v14257_v3  ;;  %104 = vst.msk [vmem:[#allocation2 + $0x70] sm:$0x1] %vm96_vm1, %v14257_v3  ;;  %v7471_v12 = vld [vmem:[%s14249_s0 + $0x50] sm:$0xff]  ;;  %v7476_v13 = vld [vmem:[%s14249_s0 + $0x68] sm:$0xff]  ;;  %262 = vrot.lane.b32.xlu1 %v7326_v2, %s7261_s30  ;;  %258 = vrot.lane.b32.xlu0 %v7403_v4, %s7261_s30 }
   0x7   :  { %105 = vst.msk [vmem:[#allocation2 + $0x80] sm:$0x1] %vm96_vm1, %v14257_v3  ;;  %106 = vst.msk [vmem:[#allocation2 + $0x90] sm:$0x1] %vm96_vm1, %v14257_v3  ;;  %v7481_v14 = vld [vmem:[%s14249_s0 + $0x60] sm:$0xff]  ;;  %v7496_v15 = vld [vmem:[%s14249_s0 + $0x78] sm:$0xff] }
   0x8   :  { %107 = vst.msk [vmem:[#allocation2 + $0xa0] sm:$0x1] %vm96_vm1, %v14257_v3  ;;  %108 = vst.msk [vmem:[#allocation2 + $0xb0] sm:$0x1] %vm96_vm1, %v14257_v3  ;;  %v7501_v16 = vld [vmem:[%s14249_s0 + $0x70] sm:$0xff]  ;;  %v7512_v17 = vld [vmem:[%s14249_s0 + $0x88] sm:$0xff] }
   0x9   :  { %109 = vst.msk [vmem:[#allocation2 + $0xc0] sm:$0x1] %vm96_vm1, %v14257_v3  ;;  %110 = vst.msk [vmem:[#allocation2 + $0xd0] sm:$0x1] %vm96_vm1, %v14257_v3  ;;  %v7517_v18 = vld [vmem:[%s14249_s0 + $0x80] sm:$0xff]  ;;  %v7522_v19 = vld [vmem:[%s14249_s0 + $0x98] sm:$0xff] }
   0xa   :  { %111 = vst.msk [vmem:[#allocation2 + $0xe0] sm:$0x1] %vm96_vm1, %v14257_v3  ;;  %112 = vst.msk [vmem:[#allocation2 + $0xf0] sm:$0x1] %vm96_vm1, %v14257_v3  ;;  %v7531_v20 = vld [vmem:[%s14249_s0 + $0x90] sm:$0xff]  ;;  %v7536_v21 = vld [vmem:[%s14249_s0 + $0xa8] sm:$0xff]  ;;  %266 = vrot.lane.b32.xlu1 %v7408_v5, %s7261_s30  ;;  %264 = vrot.lane.b32.xlu0 %v7427_v6, %s7261_s30 }
   0xb   :  { %114 = vst.msk [vmem:[#allocation2 + $0x110] sm:$0x1] %vm96_vm1, %v14257_v3  ;;  %115 = vst.msk [vmem:[#allocation2 + $0x120] sm:$0x1] %vm96_vm1, %v14257_v3  ;;  %v7541_v22 = vld [vmem:[%s14249_s0 + $0xa0] sm:$0xff]  ;;  %v7552_v23 = vld [vmem:[%s14249_s0 + $0xb8] sm:$0xff] }
   0xc   :  { %116 = vst.msk [vmem:[#allocation2 + $0x130] sm:$0x1] %vm96_vm1, %v14257_v3  ;;  %117 = vst.msk [vmem:[#allocation2 + $0x140] sm:$0x1] %vm96_vm1, %v14257_v3  ;;  %v7557_v24 = vld [vmem:[%s14249_s0 + $0xb0] sm:$0xff]  ;;  %v7562_v25 = vld [vmem:[%s14249_s0 + $0xc8] sm:$0xff] }
   0xd   :  { %118 = vst.msk [vmem:[#allocation2 + $0x150] sm:$0x1] %vm96_vm1, %v14257_v3  ;;  %119 = vst.msk [vmem:[#allocation2 + $0x160] sm:$0x1] %vm96_vm1, %v14257_v3  ;;  %v7577_v26 = vld [vmem:[%s14249_s0 + $0xc0] sm:$0xff]  ;;  %v7582_v27 = vld [vmem:[%s14249_s0 + $0xd8] sm:$0xff] }
   0xe   :  { %120 = vst.msk [vmem:[#allocation2 + $0x170] sm:$0x1] %vm96_vm1, %v14257_v3  ;;  %121 = vst.msk [vmem:[#allocation2 + $0x180] sm:$0x1] %vm96_vm1, %v14257_v3  ;;  %v7593_v28 = vld [vmem:[%s14249_s0 + $0xd0] sm:$0xff]  ;;  %v7598_v29 = vld [vmem:[%s14249_s0 + $0xe8] sm:$0xff]  ;;  %270 = vrot.lane.b32.xlu1 %v7432_v7, %s7261_s30  ;;  %268 = vrot.lane.b32.xlu0 %v7437_v8, %s7261_s30 }
   0xf   :  { %122 = vst.msk [vmem:[#allocation2 + $0x190] sm:$0x1] %vm96_vm1, %v14257_v3  ;;  %123 = vst.msk [vmem:[#allocation2 + $0x1a0] sm:$0x1] %vm96_vm1, %v14257_v3  ;;  %v7603_v30 = vld [vmem:[%s14249_s0 + $0xe0] sm:$0xff]  ;;  %v7612_v31 = vld [vmem:[%s14249_s0 + $0x108] sm:$0xff] }
  0x10   :  { %124 = vst.msk [vmem:[#allocation2 + $0x1b0] sm:$0x1] %vm96_vm1, %v14257_v3  ;;  %125 = vst.msk [vmem:[#allocation2 + $0x1c0] sm:$0x1] %vm96_vm1, %v14257_v3  ;;  %v7617_v32 = vld [vmem:[%s14249_s0 + $0x100] sm:$0xff]  ;;  %v7622_v33 = vld [vmem:[%s14249_s0 + $0x118] sm:$0xff] }
  0x11   :  { %126 = vst.msk [vmem:[#allocation2 + $0x1d0] sm:$0x1] %vm96_vm1, %v14257_v3  ;;  %127 = vst.msk [vmem:[#allocation2 + $0x1e0] sm:$0x1] %vm96_vm1, %v14257_v3  ;;  %v7633_v34 = vld [vmem:[%s14249_s0 + $0x110] sm:$0xff]  ;;  %v7638_v35 = vld [vmem:[%s14249_s0 + $0x128] sm:$0xff] }
  0x12   :  { %128 = vst.msk [vmem:[#allocation2 + $0x1f0] sm:$0x1] %vm96_vm1, %v14257_v3  ;;  %97 = vst.msk [vmem:[#allocation2] sm:$0x1] %vm96_vm1, %v14257_v3  ;;  %v7643_v36 = vld [vmem:[%s14249_s0 + $0x120] sm:$0xff]  ;;  %v7658_v37 = vld [vmem:[%s14249_s0 + $0x138] sm:$0xff]  ;;  %274 = vrot.lane.b32.xlu1 %v7450_v9, %s7261_s30  ;;  %272 = vrot.lane.b32.xlu0 %v7455_v10, %s7261_s30 }
  0x13   :  { %133 = vst.msk [vmem:[#allocation2 + $0x21] sm:$0xff] %vm91_vm0, %v7316_v0  ;;  %130 = vst.msk [vmem:[#allocation2 + $0x11] sm:$0xff] %vm91_vm0, %v7321_v1  ;;  %v7663_v38 = vld [vmem:[%s14249_s0 + $0x130] sm:$0xff]  ;;  %v7674_v39 = vld [vmem:[%s14249_s0 + $0x148] sm:$0xff]  ;;  %vm1006_vm8 = vcmask 129120   ;;  %vm1004_vm9 = vcmask 130144  }
  0x14   :  { %113 = vst.msk [vmem:[#allocation2 + $0x100] sm:$0x1] %vm96_vm1, %v14257_v3  ;;  %14363 = vst [vmem:[#allocation4_spill] sm:$0xff] %v7562_v25  ;;  %v7679_v40 = vld [vmem:[%s14249_s0 + $0x140] sm:$0xff]  ;;  %v7684_v41 = vld [vmem:[%s14249_s0 + $0x158] sm:$0xff]  ;;  %s7264_s21 = smov 16  }
  0x15   :  { %193 = vst.msk [vmem:[#allocation2 + $0x8] sm:$0xff] %vm191_vm2, %v14257_v3  ;;  %195 = vst.msk [vmem:[#allocation2 + $0x108] sm:$0xff] %vm191_vm2, %v14257_v3  ;;  %v7693_v42 = vld [vmem:[%s14249_s0 + $0x150] sm:$0xff]  ;;  %v7698_v43 = vld [vmem:[%s14249_s0 + $0x168] sm:$0xff]  ;;  %vm1262_vm10 = vcmask 162944   ;;  %vm1327_vm11 = vcmask 188576  }
  0x16   :  { %134 = vst.msk [vmem:[#allocation2 + $0x29] sm:$0x7f] %vm131_vm3, %v7326_v2  ;;  %132 = vst.msk [vmem:[#allocation2 + $0x19] sm:$0x7f] %vm131_vm3, %v7403_v4  ;;  %v7703_v44 = vld [vmem:[%s14249_s0 + $0x160] sm:$0xff]  ;;  %v7714_v45 = vld [vmem:[%s14249_s0 + $0x178] sm:$0xff]  ;;  %278 = vrot.lane.b32.xlu1 %v7460_v11, %s7261_s30  ;;  %276 = vrot.lane.b32.xlu0 %v7471_v12, %s7261_s30 }
  0x17   :  { %192 = vst.msk [vmem:[#allocation2] sm:$0xff] %vm191_vm2, %v14257_v3  ;;  %194 = vst.msk [vmem:[#allocation2 + $0x100] sm:$0xff] %vm191_vm2, %v14257_v3  ;;  %v7719_v46 = vld [vmem:[%s14249_s0 + $0x170] sm:$0xff]  ;;  %v7724_v47 = vld [vmem:[%s14249_s0 + $0x188] sm:$0xff]  ;;  %s7265_s22 = smov 20   ;;  %vm1554_vm12 = vcmask 195744  }
  0x18   :  { %136 = vst.msk [vmem:[#allocation2 + $0x39] sm:$0x7f] %vm131_vm3, %v7408_v5  ;;  %138 = vst.msk [vmem:[#allocation2 + $0x49] sm:$0x7f] %vm131_vm3, %v7432_v7  ;;  %v7739_v48 = vld [vmem:[%s14249_s0 + $0x180] sm:$0xff]  ;;  %v7744_v49 = vld [vmem:[%s14249_s0 + $0x198] sm:$0xff] }
  0x19   :  { %135 = vst.msk [vmem:[#allocation2 + $0x31] sm:$0xff] %vm91_vm0, %v7427_v6  ;;  %137 = vst.msk [vmem:[#allocation2 + $0x41] sm:$0xff] %vm91_vm0, %v7437_v8  ;;  %v7755_v50 = vld [vmem:[%s14249_s0 + $0x190] sm:$0xff]  ;;  %v7760_v51 = vld [vmem:[%s14249_s0 + $0x1a8] sm:$0xff]  ;;  %vm1552_vm13 = vcmask 195745   ;;  %vm1624_vm14 = vcmask 221376  }
  0x1a   :  { %139 = vst.msk [vmem:[#allocation2 + $0x51] sm:$0xff] %vm91_vm0, %v7455_v10  ;;  %141 = vst.msk [vmem:[#allocation2 + $0x61] sm:$0xff] %vm91_vm0, %v7471_v12  ;;  %v7765_v52 = vld [vmem:[%s14249_s0 + $0x1a0] sm:$0xff]  ;;  %v7774_v53 = vld [vmem:[%s14249_s0 + $0x1b8] sm:$0xff]  ;;  %282 = vrot.lane.b32.xlu1 %v7476_v13, %s7261_s30  ;;  %280 = vrot.lane.b32.xlu0 %v7481_v14, %s7261_s30  ;;  %s7266_s23 = smov 24   ;;  %vm1619_vm15 = vcmask 228544  }
  0x1b   :  { %140 = vst.msk [vmem:[#allocation2 + $0x59] sm:$0x7f] %vm131_vm3, %v7450_v9  ;;  %142 = vst.msk [vmem:[#allocation2 + $0x69] sm:$0x7f] %vm131_vm3, %v7460_v11  ;;  %v7779_v54 = vld [vmem:[%s14249_s0 + $0x1b0] sm:$0xff]  ;;  %v7784_v55 = vld [vmem:[%s14249_s0 + $0x1c8] sm:$0xff] }
  0x1c   :  { %143 = vst.msk [vmem:[#allocation2 + $0x71] sm:$0xff] %vm91_vm0, %v7481_v14  ;;  %145 = vst.msk [vmem:[#allocation2 + $0x81] sm:$0xff] %vm91_vm0, %v7501_v16  ;;  %v7795_v56 = vld [vmem:[%s14249_s0 + $0x1c0] sm:$0xff]  ;;  %v7800_v57 = vld [vmem:[%s14249_s0 + $0x1d8] sm:$0xff]  ;;  %vm2143_vm1 = vcmask 294144   ;;  %s7267_s10 = smov 28  }
  0x1d   :  { %144 = vst.msk [vmem:[#allocation2 + $0x79] sm:$0x7f] %vm131_vm3, %v7476_v13  ;;  %146 = vst.msk [vmem:[#allocation2 + $0x89] sm:$0x7f] %vm131_vm3, %v7496_v15  ;;  %v7805_v58 = vld [vmem:[%s14249_s0 + $0x1d0] sm:$0xff]  ;;  %v7824_v59 = vld [vmem:[%s14249_s0 + $0x1e8] sm:$0xff] }
  0x1e   :  { %147 = vst.msk [vmem:[#allocation2 + $0x91] sm:$0xff] %vm91_vm0, %v7517_v18  ;;  %149 = vst.msk [vmem:[#allocation2 + $0xa1] sm:$0xff] %vm91_vm0, %v7531_v20  ;;  %v7829_v60 = vld [vmem:[%s14249_s0 + $0x1e0] sm:$0xff]  ;;  %286 = vrot.lane.b32.xlu1 %v7496_v15, %s7261_s30  ;;  %284 = vrot.lane.b32.xlu0 %v7501_v16, %s7261_s30  ;;  %s7272_s26 = smov 64  }
  0x1f   :  { %148 = vst.msk [vmem:[#allocation2 + $0x99] sm:$0x7f] %vm131_vm3, %v7512_v17  ;;  %150 = vst.msk [vmem:[#allocation2 + $0xa9] sm:$0x7f] %vm131_vm3, %v7522_v19 }
  0x20   :  { %151 = vst.msk [vmem:[#allocation2 + $0xb1] sm:$0xff] %vm91_vm0, %v7541_v22  ;;  %14364 = vst [vmem:[#allocation5_spill] sm:$0xff] %v7577_v26 }
  0x21   :  { %152 = vst.msk [vmem:[#allocation2 + $0xb9] sm:$0x7f] %vm131_vm3, %v7536_v21  ;;  %154 = vst.msk [vmem:[#allocation2 + $0xc9] sm:$0x7f] %vm131_vm3, %v7552_v23 }
  0x22   :  { %153 = vst.msk [vmem:[#allocation2 + $0xc1] sm:$0xff] %vm91_vm0, %v7557_v24  ;;  %14365 = vst [vmem:[#allocation6_spill] sm:$0xff] %v7598_v29  ;;  %290 = vrot.lane.b32.xlu1 %v7512_v17, %s7261_s30  ;;  %288 = vrot.lane.b32.xlu0 %v7517_v18, %s7261_s30 }
  0x23   :  { %156 = vst.msk [vmem:[#allocation2 + $0xd9] sm:$0x7f] %vm131_vm3, %v7562_v25  ;;  %14366 = vst [vmem:[#allocation7_spill] sm:$0xff] %v7603_v30 }
  0x24   :  { %155 = vst.msk [vmem:[#allocation2 + $0xd1] sm:$0xff] %vm91_vm0, %v7577_v26  ;;  %157 = vst.msk [vmem:[#allocation2 + $0xe1] sm:$0xff] %vm91_vm0, %v7593_v28 }
  0x25   :  { %158 = vst.msk [vmem:[#allocation2 + $0xe9] sm:$0x7f] %vm131_vm3, %v7582_v27  ;;  %160 = vst.msk [vmem:[#allocation2 + $0xf9] sm:$0x7f] %vm131_vm3, %v7598_v29 }
  0x26   :  { %159 = vst.msk [vmem:[#allocation2 + $0xf1] sm:$0xff] %vm91_vm0, %v7603_v30  ;;  %161 = vst.msk [vmem:[#allocation2 + $0x111] sm:$0xff] %vm91_vm0, %v7617_v32  ;;  %294 = vrot.lane.b32.xlu1 %v7522_v19, %s7261_s30  ;;  %292 = vrot.lane.b32.xlu0 %v7531_v20, %s7261_s30 }
  0x27   :  { %162 = vst.msk [vmem:[#allocation2 + $0x119] sm:$0x7f] %vm131_vm3, %v7612_v31  ;;  %164 = vst.msk [vmem:[#allocation2 + $0x129] sm:$0x7f] %vm131_vm3, %v7622_v33 }
  0x28   :  { %163 = vst.msk [vmem:[#allocation2 + $0x121] sm:$0xff] %vm91_vm0, %v7633_v34  ;;  %165 = vst.msk [vmem:[#allocation2 + $0x131] sm:$0xff] %vm91_vm0, %v7643_v36 }
  0x29   :  { %166 = vst.msk [vmem:[#allocation2 + $0x139] sm:$0x7f] %vm131_vm3, %v7638_v35  ;;  %168 = vst.msk [vmem:[#allocation2 + $0x149] sm:$0x7f] %vm131_vm3, %v7658_v37 }
  0x2a   :  { %167 = vst.msk [vmem:[#allocation2 + $0x141] sm:$0xff] %vm91_vm0, %v7663_v38  ;;  %169 = vst.msk [vmem:[#allocation2 + $0x151] sm:$0xff] %vm91_vm0, %v7679_v40  ;;  %298 = vrot.lane.b32.xlu1 %v7536_v21, %s7261_s30  ;;  %296 = vrot.lane.b32.xlu0 %v7541_v22, %s7261_s30 }
  0x2b   :  { %170 = vst.msk [vmem:[#allocation2 + $0x159] sm:$0x7f] %vm131_vm3, %v7674_v39  ;;  %172 = vst.msk [vmem:[#allocation2 + $0x169] sm:$0x7f] %vm131_vm3, %v7684_v41 }
  0x2c   :  { %171 = vst.msk [vmem:[#allocation2 + $0x161] sm:$0xff] %vm91_vm0, %v7693_v42  ;;  %173 = vst.msk [vmem:[#allocation2 + $0x171] sm:$0xff] %vm91_vm0, %v7703_v44 }
  0x2d   :  { %174 = vst.msk [vmem:[#allocation2 + $0x179] sm:$0x7f] %vm131_vm3, %v7698_v43  ;;  %176 = vst.msk [vmem:[#allocation2 + $0x189] sm:$0x7f] %vm131_vm3, %v7714_v45 }
  0x2e   :  { %175 = vst.msk [vmem:[#allocation2 + $0x181] sm:$0xff] %vm91_vm0, %v7719_v46  ;;  %14367 = vst [vmem:[#allocation8_spill] sm:$0xff] %v7755_v50  ;;  %302 = vrot.lane.b32.xlu1 %v7552_v23, %s7261_s30  ;;  %300 = vrot.lane.b32.xlu0 %v7557_v24, %s7261_s30 }
  0x2f   :  { %178 = vst.msk [vmem:[#allocation2 + $0x199] sm:$0x7f] %vm131_vm3, %v7724_v47  ;;  %180 = vst.msk [vmem:[#allocation2 + $0x1a9] sm:$0x7f] %vm131_vm3, %v7744_v49 }
  0x30   :  { %177 = vst.msk [vmem:[#allocation2 + $0x191] sm:$0xff] %vm91_vm0, %v7739_v48  ;;  %14368 = vst [vmem:[#allocation9_spill] sm:$0xff] %v7774_v53 }
  0x31   :  { %14369 = vst [vmem:[#allocation10_spill] sm:$0xff] %v7779_v54  ;;  %14370 = vst [vmem:[#allocation11_spill] sm:$0xff] %v7784_v55 }
  0x32   :  { %179 = vst.msk [vmem:[#allocation2 + $0x1a1] sm:$0xff] %vm91_vm0, %v7755_v50  ;;  %181 = vst.msk [vmem:[#allocation2 + $0x1b1] sm:$0xff] %vm91_vm0, %v7765_v52  ;;  %306 = vrot.lane.b32.xlu1 %v7562_v25, %s7261_s30  ;;  %304 = vrot.lane.b32.xlu0 %v7577_v26, %s7261_s30 }
  0x33   :  { %182 = vst.msk [vmem:[#allocation2 + $0x1b9] sm:$0x7f] %vm131_vm3, %v7760_v51  ;;  %14371 = vst [vmem:[#allocation12_spill] sm:$0xff] %v7800_v57 }
  0x34   :  { %14372 = vst [vmem:[#allocation13_spill] sm:$0xff] %v7805_v58  ;;  %183 = vst.msk [vmem:[#allocation2 + $0x1c1] sm:$0xff] %vm91_vm0, %v7779_v54 }
  0x35   :  { %184 = vst.msk [vmem:[#allocation2 + $0x1c9] sm:$0x7f] %vm131_vm3, %v7774_v53  ;;  %186 = vst.msk [vmem:[#allocation2 + $0x1d9] sm:$0x7f] %vm131_vm3, %v7784_v55 }
  0x36   :  { %185 = vst.msk [vmem:[#allocation2 + $0x1d1] sm:$0xff] %vm91_vm0, %v7795_v56  ;;  %187 = vst.msk [vmem:[#allocation2 + $0x1e1] sm:$0xff] %vm91_vm0, %v7805_v58  ;;  %310 = vrot.lane.b32.xlu1 %v7582_v27, %s7261_s30  ;;  %308 = vrot.lane.b32.xlu0 %v7593_v28, %s7261_s30 }
  0x37   :  { %14373 = vst [vmem:[#allocation14_spill] sm:$0xff] %v7829_v60  ;;  %188 = vst.msk [vmem:[#allocation2 + $0x1e9] sm:$0x7f] %vm131_vm3, %v7800_v57 }
  0x38   :  { %189 = vst.msk [vmem:[#allocation2 + $0x1f1] sm:$0xff] %vm91_vm0, %v7829_v60  ;;  %vm1898_vm0 = vcmask 261344  }
  0x39   :  { %190 = vst.msk [vmem:[#allocation2 + $0x1f9] sm:$0x7f] %vm131_vm3, %v7824_v59  ;;  %vm1838_vm3 = vcmask 227520  }
  0x3a   :  { %314 = vrot.lane.b32.xlu1 %v7598_v29, %s7261_s30  ;;  %312 = vrot.lane.b32.xlu0 %v7603_v30, %s7261_s30  ;;  %497 = vst.msk [vmem:[#allocation2] sm:$0xff] %vm496_vm5, %v14257_v3  ;;  %498 = vst.msk [vmem:[#allocation2 + $0x8] sm:$0xff] %vm496_vm5, %v14257_v3 }
  0x3b   :  { %499 = vst.msk [vmem:[#allocation2 + $0x100] sm:$0xff] %vm496_vm5, %v14257_v3  ;;  %500 = vst.msk [vmem:[#allocation2 + $0x108] sm:$0xff] %vm496_vm5, %v14257_v3 }
  0x3c   :  { %502 = vst.msk [vmem:[#allocation2 + $0xf] sm:$0x1] %vm501_vm4, %v14257_v3  ;;  %518 = vst.msk [vmem:[#allocation2 + $0x10f] sm:$0x1] %vm501_vm4, %v14257_v3 }
  0x3d   :  { %776 = vst.msk [vmem:[#allocation2] sm:$0x1] %vm775_vm6, %v14257_v3  ;;  %792 = vst.msk [vmem:[#allocation2 + $0x100] sm:$0x1] %vm775_vm6, %v14257_v3 }
  0x3e   :  { %318 = vrot.lane.b32.xlu1 %v7612_v31, %s7261_s30  ;;  %316 = vrot.lane.b32.xlu0 %v7617_v32, %s7261_s30 }
  0x42   :  { %322 = vrot.lane.b32.xlu1 %v7622_v33, %s7261_s30  ;;  %320 = vrot.lane.b32.xlu0 %v7633_v34, %s7261_s30 }
  0x46   :  { %326 = vrot.lane.b32.xlu1 %v7638_v35, %s7261_s30  ;;  %324 = vrot.lane.b32.xlu0 %v7643_v36, %s7261_s30 }
  0x4a   :  { %330 = vrot.lane.b32.xlu1 %v7658_v37, %s7261_s30  ;;  %328 = vrot.lane.b32.xlu0 %v7663_v38, %s7261_s30 }
  0x4e   :  { %334 = vrot.lane.b32.xlu1 %v7674_v39, %s7261_s30  ;;  %332 = vrot.lane.b32.xlu0 %v7679_v40, %s7261_s30 }
  0x52   :  { %338 = vrot.lane.b32.xlu1 %v7684_v41, %s7261_s30  ;;  %336 = vrot.lane.b32.xlu0 %v7693_v42, %s7261_s30 }
  0x56   :  { %342 = vrot.lane.b32.xlu1 %v7698_v43, %s7261_s30  ;;  %340 = vrot.lane.b32.xlu0 %v7703_v44, %s7261_s30 }
  0x5a   :  { %346 = vrot.lane.b32.xlu1 %v7714_v45, %s7261_s30  ;;  %344 = vrot.lane.b32.xlu0 %v7719_v46, %s7261_s30 }
  0x5e   :  { %350 = vrot.lane.b32.xlu1 %v7724_v47, %s7261_s30  ;;  %348 = vrot.lane.b32.xlu0 %v7739_v48, %s7261_s30 }
  0x62   :  { %354 = vrot.lane.b32.xlu1 %v7744_v49, %s7261_s30  ;;  %352 = vrot.lane.b32.xlu0 %v7755_v50, %s7261_s30 }
  0x66   :  { %358 = vrot.lane.b32.xlu1 %v7760_v51, %s7261_s30  ;;  %356 = vrot.lane.b32.xlu0 %v7765_v52, %s7261_s30 }
  0x6a   :  { %362 = vrot.lane.b32.xlu1 %v7774_v53, %s7261_s30  ;;  %360 = vrot.lane.b32.xlu0 %v7779_v54, %s7261_s30 }
  0x6e   :  { %366 = vrot.lane.b32.xlu1 %v7784_v55, %s7261_s30  ;;  %364 = vrot.lane.b32.xlu0 %v7795_v56, %s7261_s30 }
  0x72   :  { %370 = vrot.lane.b32.xlu1 %v7800_v57, %s7261_s30  ;;  %368 = vrot.lane.b32.xlu0 %v7805_v58, %s7261_s30  ;;  %v14374_v57 = vmov 0.0  }
  0x74   :  { %v261_v61 = vpop.permute.xlu1 %260  ;;  %v257_v62 = vpop.permute.xlu0 %256 }
  0x75   :  { %438 = vst.msk [vmem:[#allocation2 + $0x20] sm:$0xff] %vm191_vm2, %v261_v61  ;;  %436 = vst.msk [vmem:[#allocation2 + $0x10] sm:$0xff] %vm191_vm2, %v257_v62 }
  0x76   :  { %374 = vrot.lane.b32.xlu1 %v7824_v59, %s7261_s30  ;;  %372 = vrot.lane.b32.xlu0 %v7829_v60, %s7261_s30  ;;  %s7263_s30 = smov 12  }
  0x78   :  { %v263_v63 = vpop.permute.xlu1 %262  ;;  %v259_v3 = vpop.permute.xlu0 %258 }
  0x79   :  { %439 = vst.msk [vmem:[#allocation2 + $0x28] sm:$0xff] %vm191_vm2, %v263_v63  ;;  %437 = vst.msk [vmem:[#allocation2 + $0x18] sm:$0xff] %vm191_vm2, %v259_v3 }
  0x7a   :  { %504 = vst.msk [vmem:[#allocation2 + $0x2f] sm:$0x1] %vm501_vm4, %v14374_v57  ;;  %503 = vst.msk [vmem:[#allocation2 + $0x1f] sm:$0x1] %vm501_vm4, %v14374_v57  ;;  %536 = vrot.lane.b32.xlu1 %v7403_v4, %s7262_s12  ;;  %534 = vrot.lane.b32.xlu0 %v7321_v1, %s7262_s12 }
  0x7c   :  { %v267_v61 = vpop.permute.xlu1 %266  ;;  %v265_v62 = vpop.permute.xlu0 %264 }
  0x7d   :  { %441 = vst.msk [vmem:[#allocation2 + $0x38] sm:$0xff] %vm191_vm2, %v267_v61  ;;  %440 = vst.msk [vmem:[#allocation2 + $0x30] sm:$0xff] %vm191_vm2, %v265_v62 }
  0x7e   :  { %505 = vst.msk [vmem:[#allocation2 + $0x3f] sm:$0x1] %vm501_vm4, %v14374_v57  ;;  %540 = vrot.lane.b32.xlu1 %v7326_v2, %s7262_s12  ;;  %538 = vrot.lane.b32.xlu0 %v7316_v0, %s7262_s12 }
  0x80   :  { %v271_v3 = vpop.permute.xlu1 %270  ;;  %v269_v63 = vpop.permute.xlu0 %268 }
  0x81   :  { %443 = vst.msk [vmem:[#allocation2 + $0x48] sm:$0xff] %vm191_vm2, %v271_v3  ;;  %442 = vst.msk [vmem:[#allocation2 + $0x40] sm:$0xff] %vm191_vm2, %v269_v63 }
  0x82   :  { %506 = vst.msk [vmem:[#allocation2 + $0x4f] sm:$0x1] %vm501_vm4, %v14374_v57  ;;  %544 = vrot.lane.b32.xlu1 %v7408_v5, %s7262_s12  ;;  %542 = vrot.lane.b32.xlu0 %v7427_v6, %s7262_s12 }
  0x84   :  { %v275_v61 = vpop.permute.xlu1 %274  ;;  %v273_v62 = vpop.permute.xlu0 %272 }
  0x85   :  { %445 = vst.msk [vmem:[#allocation2 + $0x58] sm:$0xff] %vm191_vm2, %v275_v61  ;;  %444 = vst.msk [vmem:[#allocation2 + $0x50] sm:$0xff] %vm191_vm2, %v273_v62 }
  0x86   :  { %507 = vst.msk [vmem:[#allocation2 + $0x5f] sm:$0x1] %vm501_vm4, %v14374_v57  ;;  %548 = vrot.lane.b32.xlu1 %v7432_v7, %s7262_s12  ;;  %546 = vrot.lane.b32.xlu0 %v7437_v8, %s7262_s12 }
  0x88   :  { %v279_v3 = vpop.permute.xlu1 %278  ;;  %v277_v63 = vpop.permute.xlu0 %276 }
  0x89   :  { %447 = vst.msk [vmem:[#allocation2 + $0x68] sm:$0xff] %vm191_vm2, %v279_v3  ;;  %446 = vst.msk [vmem:[#allocation2 + $0x60] sm:$0xff] %vm191_vm2, %v277_v63 }
  0x8a   :  { %508 = vst.msk [vmem:[#allocation2 + $0x6f] sm:$0x1] %vm501_vm4, %v14374_v57  ;;  %552 = vrot.lane.b32.xlu1 %v7450_v9, %s7262_s12  ;;  %550 = vrot.lane.b32.xlu0 %v7455_v10, %s7262_s12 }
  0x8c   :  { %v283_v61 = vpop.permute.xlu1 %282  ;;  %v281_v62 = vpop.permute.xlu0 %280 }
  0x8d   :  { %449 = vst.msk [vmem:[#allocation2 + $0x78] sm:$0xff] %vm191_vm2, %v283_v61  ;;  %448 = vst.msk [vmem:[#allocation2 + $0x70] sm:$0xff] %vm191_vm2, %v281_v62 }
  0x8e   :  { %509 = vst.msk [vmem:[#allocation2 + $0x7f] sm:$0x1] %vm501_vm4, %v14374_v57  ;;  %556 = vrot.lane.b32.xlu1 %v7460_v11, %s7262_s12  ;;  %554 = vrot.lane.b32.xlu0 %v7471_v12, %s7262_s12 }
  0x90   :  { %v287_v3 = vpop.permute.xlu1 %286  ;;  %v285_v63 = vpop.permute.xlu0 %284 }
  0x91   :  { %451 = vst.msk [vmem:[#allocation2 + $0x88] sm:$0xff] %vm191_vm2, %v287_v3  ;;  %450 = vst.msk [vmem:[#allocation2 + $0x80] sm:$0xff] %vm191_vm2, %v285_v63 }
  0x92   :  { %510 = vst.msk [vmem:[#allocation2 + $0x8f] sm:$0x1] %vm501_vm4, %v14374_v57  ;;  %560 = vrot.lane.b32.xlu1 %v7476_v13, %s7262_s12  ;;  %558 = vrot.lane.b32.xlu0 %v7481_v14, %s7262_s12 }
  0x94   :  { %v291_v61 = vpop.permute.xlu1 %290  ;;  %v289_v62 = vpop.permute.xlu0 %288 }
  0x95   :  { %453 = vst.msk [vmem:[#allocation2 + $0x98] sm:$0xff] %vm191_vm2, %v291_v61  ;;  %452 = vst.msk [vmem:[#allocation2 + $0x90] sm:$0xff] %vm191_vm2, %v289_v62 }
  0x96   :  { %511 = vst.msk [vmem:[#allocation2 + $0x9f] sm:$0x1] %vm501_vm4, %v14374_v57  ;;  %564 = vrot.lane.b32.xlu1 %v7496_v15, %s7262_s12  ;;  %562 = vrot.lane.b32.xlu0 %v7501_v16, %s7262_s12 }
  0x98   :  { %v295_v3 = vpop.permute.xlu1 %294  ;;  %v293_v63 = vpop.permute.xlu0 %292 }
  0x99   :  { %455 = vst.msk [vmem:[#allocation2 + $0xa8] sm:$0xff] %vm191_vm2, %v295_v3  ;;  %454 = vst.msk [vmem:[#allocation2 + $0xa0] sm:$0xff] %vm191_vm2, %v293_v63 }
  0x9a   :  { %512 = vst.msk [vmem:[#allocation2 + $0xaf] sm:$0x1] %vm501_vm4, %v14374_v57  ;;  %568 = vrot.lane.b32.xlu1 %v7512_v17, %s7262_s12  ;;  %566 = vrot.lane.b32.xlu0 %v7517_v18, %s7262_s12 }
  0x9c   :  { %v299_v61 = vpop.permute.xlu1 %298  ;;  %v297_v62 = vpop.permute.xlu0 %296 }
  0x9d   :  { %457 = vst.msk [vmem:[#allocation2 + $0xb8] sm:$0xff] %vm191_vm2, %v299_v61  ;;  %456 = vst.msk [vmem:[#allocation2 + $0xb0] sm:$0xff] %vm191_vm2, %v297_v62 }
  0x9e   :  { %513 = vst.msk [vmem:[#allocation2 + $0xbf] sm:$0x1] %vm501_vm4, %v14374_v57  ;;  %572 = vrot.lane.b32.xlu1 %v7522_v19, %s7262_s12  ;;  %570 = vrot.lane.b32.xlu0 %v7531_v20, %s7262_s12 }
  0xa0   :  { %v303_v3 = vpop.permute.xlu1 %302  ;;  %v301_v63 = vpop.permute.xlu0 %300 }
  0xa1   :  { %459 = vst.msk [vmem:[#allocation2 + $0xc8] sm:$0xff] %vm191_vm2, %v303_v3  ;;  %458 = vst.msk [vmem:[#allocation2 + $0xc0] sm:$0xff] %vm191_vm2, %v301_v63 }
  0xa2   :  { %514 = vst.msk [vmem:[#allocation2 + $0xcf] sm:$0x1] %vm501_vm4, %v14374_v57  ;;  %576 = vrot.lane.b32.xlu1 %v7536_v21, %s7262_s12  ;;  %574 = vrot.lane.b32.xlu0 %v7541_v22, %s7262_s12 }
  0xa4   :  { %v307_v61 = vpop.permute.xlu1 %306  ;;  %v305_v62 = vpop.permute.xlu0 %304 }
  0xa5   :  { %461 = vst.msk [vmem:[#allocation2 + $0xd8] sm:$0xff] %vm191_vm2, %v307_v61  ;;  %460 = vst.msk [vmem:[#allocation2 + $0xd0] sm:$0xff] %vm191_vm2, %v305_v62 }
  0xa6   :  { %515 = vst.msk [vmem:[#allocation2 + $0xdf] sm:$0x1] %vm501_vm4, %v14374_v57  ;;  %580 = vrot.lane.b32.xlu1 %v7552_v23, %s7262_s12  ;;  %578 = vrot.lane.b32.xlu0 %v7557_v24, %s7262_s12 }
  0xa8   :  { %v311_v3 = vpop.permute.xlu1 %310  ;;  %v309_v63 = vpop.permute.xlu0 %308 }
  0xa9   :  { %463 = vst.msk [vmem:[#allocation2 + $0xe8] sm:$0xff] %vm191_vm2, %v311_v3  ;;  %462 = vst.msk [vmem:[#allocation2 + $0xe0] sm:$0xff] %vm191_vm2, %v309_v63 }
  0xaa   :  { %516 = vst.msk [vmem:[#allocation2 + $0xef] sm:$0x1] %vm501_vm4, %v14374_v57  ;;  %584 = vrot.lane.b32.xlu1 %v7562_v25, %s7262_s12  ;;  %582 = vrot.lane.b32.xlu0 %v7577_v26, %s7262_s12 }
  0xac   :  { %v315_v61 = vpop.permute.xlu1 %314  ;;  %v313_v62 = vpop.permute.xlu0 %312 }
  0xad   :  { %465 = vst.msk [vmem:[#allocation2 + $0xf8] sm:$0xff] %vm191_vm2, %v315_v61  ;;  %464 = vst.msk [vmem:[#allocation2 + $0xf0] sm:$0xff] %vm191_vm2, %v313_v62 }
  0xae   :  { %517 = vst.msk [vmem:[#allocation2 + $0xff] sm:$0x1] %vm501_vm4, %v14374_v57  ;;  %588 = vrot.lane.b32.xlu1 %v7582_v27, %s7262_s12  ;;  %586 = vrot.lane.b32.xlu0 %v7593_v28, %s7262_s12 }
  0xb0   :  { %v319_v3 = vpop.permute.xlu1 %318  ;;  %v317_v63 = vpop.permute.xlu0 %316 }
  0xb1   :  { %467 = vst.msk [vmem:[#allocation2 + $0x118] sm:$0xff] %vm191_vm2, %v319_v3  ;;  %466 = vst.msk [vmem:[#allocation2 + $0x110] sm:$0xff] %vm191_vm2, %v317_v63 }
  0xb2   :  { %519 = vst.msk [vmem:[#allocation2 + $0x11f] sm:$0x1] %vm501_vm4, %v14374_v57  ;;  %592 = vrot.lane.b32.xlu1 %v7598_v29, %s7262_s12  ;;  %590 = vrot.lane.b32.xlu0 %v7603_v30, %s7262_s12 }
  0xb4   :  { %v323_v61 = vpop.permute.xlu1 %322  ;;  %v321_v62 = vpop.permute.xlu0 %320 }
  0xb5   :  { %469 = vst.msk [vmem:[#allocation2 + $0x128] sm:$0xff] %vm191_vm2, %v323_v61  ;;  %468 = vst.msk [vmem:[#allocation2 + $0x120] sm:$0xff] %vm191_vm2, %v321_v62 }
  0xb6   :  { %520 = vst.msk [vmem:[#allocation2 + $0x12f] sm:$0x1] %vm501_vm4, %v14374_v57  ;;  %596 = vrot.lane.b32.xlu1 %v7612_v31, %s7262_s12  ;;  %594 = vrot.lane.b32.xlu0 %v7617_v32, %s7262_s12 }
  0xb8   :  { %v327_v3 = vpop.permute.xlu1 %326  ;;  %v325_v63 = vpop.permute.xlu0 %324 }
  0xb9   :  { %471 = vst.msk [vmem:[#allocation2 + $0x138] sm:$0xff] %vm191_vm2, %v327_v3  ;;  %470 = vst.msk [vmem:[#allocation2 + $0x130] sm:$0xff] %vm191_vm2, %v325_v63 }
  0xba   :  { %521 = vst.msk [vmem:[#allocation2 + $0x13f] sm:$0x1] %vm501_vm4, %v14374_v57  ;;  %600 = vrot.lane.b32.xlu1 %v7622_v33, %s7262_s12  ;;  %598 = vrot.lane.b32.xlu0 %v7633_v34, %s7262_s12 }
  0xbc   :  { %v331_v61 = vpop.permute.xlu1 %330  ;;  %v329_v62 = vpop.permute.xlu0 %328 }
  0xbd   :  { %473 = vst.msk [vmem:[#allocation2 + $0x148] sm:$0xff] %vm191_vm2, %v331_v61  ;;  %472 = vst.msk [vmem:[#allocation2 + $0x140] sm:$0xff] %vm191_vm2, %v329_v62 }
  0xbe   :  { %522 = vst.msk [vmem:[#allocation2 + $0x14f] sm:$0x1] %vm501_vm4, %v14374_v57  ;;  %604 = vrot.lane.b32.xlu1 %v7638_v35, %s7262_s12  ;;  %602 = vrot.lane.b32.xlu0 %v7643_v36, %s7262_s12 }
  0xc0   :  { %v335_v3 = vpop.permute.xlu1 %334  ;;  %v333_v63 = vpop.permute.xlu0 %332 }
  0xc1   :  { %475 = vst.msk [vmem:[#allocation2 + $0x158] sm:$0xff] %vm191_vm2, %v335_v3  ;;  %474 = vst.msk [vmem:[#allocation2 + $0x150] sm:$0xff] %vm191_vm2, %v333_v63 }
  0xc2   :  { %523 = vst.msk [vmem:[#allocation2 + $0x15f] sm:$0x1] %vm501_vm4, %v14374_v57  ;;  %608 = vrot.lane.b32.xlu1 %v7658_v37, %s7262_s12  ;;  %606 = vrot.lane.b32.xlu0 %v7663_v38, %s7262_s12 }
  0xc4   :  { %v339_v61 = vpop.permute.xlu1 %338  ;;  %v337_v62 = vpop.permute.xlu0 %336 }
  0xc5   :  { %477 = vst.msk [vmem:[#allocation2 + $0x168] sm:$0xff] %vm191_vm2, %v339_v61  ;;  %476 = vst.msk [vmem:[#allocation2 + $0x160] sm:$0xff] %vm191_vm2, %v337_v62 }
  0xc6   :  { %524 = vst.msk [vmem:[#allocation2 + $0x16f] sm:$0x1] %vm501_vm4, %v14374_v57  ;;  %612 = vrot.lane.b32.xlu1 %v7674_v39, %s7262_s12  ;;  %610 = vrot.lane.b32.xlu0 %v7679_v40, %s7262_s12 }
  0xc8   :  { %v343_v3 = vpop.permute.xlu1 %342  ;;  %v341_v63 = vpop.permute.xlu0 %340 }
  0xc9   :  { %479 = vst.msk [vmem:[#allocation2 + $0x178] sm:$0xff] %vm191_vm2, %v343_v3  ;;  %478 = vst.msk [vmem:[#allocation2 + $0x170] sm:$0xff] %vm191_vm2, %v341_v63 }
  0xca   :  { %525 = vst.msk [vmem:[#allocation2 + $0x17f] sm:$0x1] %vm501_vm4, %v14374_v57  ;;  %616 = vrot.lane.b32.xlu1 %v7684_v41, %s7262_s12  ;;  %614 = vrot.lane.b32.xlu0 %v7693_v42, %s7262_s12 }
  0xcc   :  { %v347_v61 = vpop.permute.xlu1 %346  ;;  %v345_v62 = vpop.permute.xlu0 %344 }
  0xcd   :  { %481 = vst.msk [vmem:[#allocation2 + $0x188] sm:$0xff] %vm191_vm2, %v347_v61  ;;  %480 = vst.msk [vmem:[#allocation2 + $0x180] sm:$0xff] %vm191_vm2, %v345_v62 }
  0xce   :  { %526 = vst.msk [vmem:[#allocation2 + $0x18f] sm:$0x1] %vm501_vm4, %v14374_v57  ;;  %620 = vrot.lane.b32.xlu1 %v7698_v43, %s7262_s12  ;;  %618 = vrot.lane.b32.xlu0 %v7703_v44, %s7262_s12 }
  0xd0   :  { %v351_v3 = vpop.permute.xlu1 %350  ;;  %v349_v63 = vpop.permute.xlu0 %348 }
  0xd1   :  { %483 = vst.msk [vmem:[#allocation2 + $0x198] sm:$0xff] %vm191_vm2, %v351_v3  ;;  %482 = vst.msk [vmem:[#allocation2 + $0x190] sm:$0xff] %vm191_vm2, %v349_v63 }
  0xd2   :  { %527 = vst.msk [vmem:[#allocation2 + $0x19f] sm:$0x1] %vm501_vm4, %v14374_v57  ;;  %624 = vrot.lane.b32.xlu1 %v7714_v45, %s7262_s12  ;;  %622 = vrot.lane.b32.xlu0 %v7719_v46, %s7262_s12 }
  0xd4   :  { %v355_v61 = vpop.permute.xlu1 %354  ;;  %v353_v62 = vpop.permute.xlu0 %352 }
  0xd5   :  { %485 = vst.msk [vmem:[#allocation2 + $0x1a8] sm:$0xff] %vm191_vm2, %v355_v61  ;;  %484 = vst.msk [vmem:[#allocation2 + $0x1a0] sm:$0xff] %vm191_vm2, %v353_v62 }
  0xd6   :  { %528 = vst.msk [vmem:[#allocation2 + $0x1af] sm:$0x1] %vm501_vm4, %v14374_v57  ;;  %628 = vrot.lane.b32.xlu1 %v7724_v47, %s7262_s12  ;;  %626 = vrot.lane.b32.xlu0 %v7739_v48, %s7262_s12 }
  0xd8   :  { %v359_v3 = vpop.permute.xlu1 %358  ;;  %v357_v63 = vpop.permute.xlu0 %356 }
  0xd9   :  { %487 = vst.msk [vmem:[#allocation2 + $0x1b8] sm:$0xff] %vm191_vm2, %v359_v3  ;;  %486 = vst.msk [vmem:[#allocation2 + $0x1b0] sm:$0xff] %vm191_vm2, %v357_v63 }
  0xda   :  { %529 = vst.msk [vmem:[#allocation2 + $0x1bf] sm:$0x1] %vm501_vm4, %v14374_v57  ;;  %632 = vrot.lane.b32.xlu1 %v7744_v49, %s7262_s12  ;;  %630 = vrot.lane.b32.xlu0 %v7755_v50, %s7262_s12 }
  0xdc   :  { %v363_v61 = vpop.permute.xlu1 %362  ;;  %v361_v62 = vpop.permute.xlu0 %360 }
  0xdd   :  { %489 = vst.msk [vmem:[#allocation2 + $0x1c8] sm:$0xff] %vm191_vm2, %v363_v61  ;;  %488 = vst.msk [vmem:[#allocation2 + $0x1c0] sm:$0xff] %vm191_vm2, %v361_v62 }
  0xde   :  { %530 = vst.msk [vmem:[#allocation2 + $0x1cf] sm:$0x1] %vm501_vm4, %v14374_v57  ;;  %636 = vrot.lane.b32.xlu1 %v7760_v51, %s7262_s12  ;;  %634 = vrot.lane.b32.xlu0 %v7765_v52, %s7262_s12 }
  0xe0   :  { %v367_v3 = vpop.permute.xlu1 %366  ;;  %v365_v63 = vpop.permute.xlu0 %364 }
  0xe1   :  { %491 = vst.msk [vmem:[#allocation2 + $0x1d8] sm:$0xff] %vm191_vm2, %v367_v3  ;;  %490 = vst.msk [vmem:[#allocation2 + $0x1d0] sm:$0xff] %vm191_vm2, %v365_v63 }
  0xe2   :  { %531 = vst.msk [vmem:[#allocation2 + $0x1df] sm:$0x1] %vm501_vm4, %v14374_v57  ;;  %640 = vrot.lane.b32.xlu1 %v7774_v53, %s7262_s12  ;;  %638 = vrot.lane.b32.xlu0 %v7779_v54, %s7262_s12 }
  0xe4   :  { %v371_v61 = vpop.permute.xlu1 %370  ;;  %v369_v62 = vpop.permute.xlu0 %368 }
  0xe5   :  { %493 = vst.msk [vmem:[#allocation2 + $0x1e8] sm:$0xff] %vm191_vm2, %v371_v61  ;;  %492 = vst.msk [vmem:[#allocation2 + $0x1e0] sm:$0xff] %vm191_vm2, %v369_v62  ;;  %v14375_v61 = vld [vmem:[#allocation12_spill] sm:$0xff] }
  0xe6   :  { %532 = vst.msk [vmem:[#allocation2 + $0x1ef] sm:$0x1] %vm501_vm4, %v14374_v57  ;;  %644 = vrot.lane.b32.xlu1 %v7784_v55, %s7262_s12  ;;  %642 = vrot.lane.b32.xlu0 %v7795_v56, %s7262_s12 }
  0xe8   :  { %v375_v3 = vpop.permute.xlu1 %374  ;;  %v373_v63 = vpop.permute.xlu0 %372 }
  0xe9   :  { %495 = vst.msk [vmem:[#allocation2 + $0x1f8] sm:$0xff] %vm191_vm2, %v375_v3  ;;  %494 = vst.msk [vmem:[#allocation2 + $0x1f0] sm:$0xff] %vm191_vm2, %v373_v63  ;;  %vm2148_vm2 = vcmask 286976  }
  0xea   :  { %533 = vst.msk [vmem:[#allocation2 + $0x1ff] sm:$0x1] %vm501_vm4, %v14374_v57  ;;  %648 = vrot.lane.b32.xlu1 %v14375_v61, %s7262_s12  ;;  %646 = vrot.lane.b32.xlu0 %v7805_v58, %s7262_s12  ;;  %vm2637_vm4 = vcmask 1041408  }
  0xec   :  { %v537_v62 = vpop.permute.xlu1 %536  ;;  %v535_v55 = vpop.permute.xlu0 %534 }
  0xed   :  { %716 = vst.msk [vmem:[#allocation2 + $0x17] sm:$0xff] %vm496_vm5, %v537_v62 }
  0xee   :  { %715 = vst.msk [vmem:[#allocation2 + $0xf] sm:$0xfe] %vm714_vm7, %v535_v55  ;;  %652 = vrot.lane.b32.xlu1 %v7824_v59, %s7262_s12  ;;  %650 = vrot.lane.b32.xlu0 %v7829_v60, %s7262_s12 }
  0xef   :  { %777 = vst.msk [vmem:[#allocation2 + $0x10] sm:$0x1] %vm775_vm6, %v14374_v57 }
  0xf0   :  { %v541_v3 = vpop.permute.xlu1 %540  ;;  %v539_v63 = vpop.permute.xlu0 %538 }
  0xf1   :  { %718 = vst.msk [vmem:[#allocation2 + $0x27] sm:$0xff] %vm496_vm5, %v541_v3 }
  0xf2   :  { %717 = vst.msk [vmem:[#allocation2 + $0x1f] sm:$0xfe] %vm714_vm7, %v539_v63  ;;  %814 = vrot.lane.b32.xlu1 %v7403_v4, %s7263_s30  ;;  %812 = vrot.lane.b32.xlu0 %v7321_v1, %s7263_s30 }
  0xf3   :  { %778 = vst.msk [vmem:[#allocation2 + $0x20] sm:$0x1] %vm775_vm6, %v14374_v57 }
  0xf4   :  { %v545_v55 = vpop.permute.xlu1 %544  ;;  %v543_v62 = vpop.permute.xlu0 %542 }
  0xf5   :  { %720 = vst.msk [vmem:[#allocation2 + $0x37] sm:$0xff] %vm496_vm5, %v545_v55 }
  0xf6   :  { %719 = vst.msk [vmem:[#allocation2 + $0x2f] sm:$0xfe] %vm714_vm7, %v543_v62  ;;  %818 = vrot.lane.b32.xlu1 %v7326_v2, %s7263_s30  ;;  %816 = vrot.lane.b32.xlu0 %v7316_v0, %s7263_s30 }
  0xf7   :  { %779 = vst.msk [vmem:[#allocation2 + $0x30] sm:$0x1] %vm775_vm6, %v14374_v57 }
  0xf8   :  { %v549_v3 = vpop.permute.xlu1 %548  ;;  %v547_v63 = vpop.permute.xlu0 %546 }
  0xf9   :  { %722 = vst.msk [vmem:[#allocation2 + $0x47] sm:$0xff] %vm496_vm5, %v549_v3 }
  0xfa   :  { %721 = vst.msk [vmem:[#allocation2 + $0x3f] sm:$0xfe] %vm714_vm7, %v547_v63  ;;  %822 = vrot.lane.b32.xlu1 %v7408_v5, %s7263_s30  ;;  %820 = vrot.lane.b32.xlu0 %v7427_v6, %s7263_s30 }
  0xfb   :  { %780 = vst.msk [vmem:[#allocation2 + $0x40] sm:$0x1] %vm775_vm6, %v14374_v57 }
  0xfc   :  { %v553_v55 = vpop.permute.xlu1 %552  ;;  %v551_v62 = vpop.permute.xlu0 %550 }
  0xfd   :  { %724 = vst.msk [vmem:[#allocation2 + $0x57] sm:$0xff] %vm496_vm5, %v553_v55 }
  0xfe   :  { %723 = vst.msk [vmem:[#allocation2 + $0x4f] sm:$0xfe] %vm714_vm7, %v551_v62  ;;  %826 = vrot.lane.b32.xlu1 %v7432_v7, %s7263_s30  ;;  %824 = vrot.lane.b32.xlu0 %v7437_v8, %s7263_s30 }
  0xff   :  { %781 = vst.msk [vmem:[#allocation2 + $0x50] sm:$0x1] %vm775_vm6, %v14374_v57 }
 0x100   :  { %v557_v3 = vpop.permute.xlu1 %556  ;;  %v555_v63 = vpop.permute.xlu0 %554 }
 0x101   :  { %726 = vst.msk [vmem:[#allocation2 + $0x67] sm:$0xff] %vm496_vm5, %v557_v3 }
 0x102   :  { %725 = vst.msk [vmem:[#allocation2 + $0x5f] sm:$0xfe] %vm714_vm7, %v555_v63  ;;  %830 = vrot.lane.b32.xlu1 %v7450_v9, %s7263_s30  ;;  %828 = vrot.lane.b32.xlu0 %v7455_v10, %s7263_s30 }
 0x103   :  { %782 = vst.msk [vmem:[#allocation2 + $0x60] sm:$0x1] %vm775_vm6, %v14374_v57 }
 0x104   :  { %v561_v55 = vpop.permute.xlu1 %560  ;;  %v559_v62 = vpop.permute.xlu0 %558 }
 0x105   :  { %728 = vst.msk [vmem:[#allocation2 + $0x77] sm:$0xff] %vm496_vm5, %v561_v55 }
 0x106   :  { %727 = vst.msk [vmem:[#allocation2 + $0x6f] sm:$0xfe] %vm714_vm7, %v559_v62  ;;  %834 = vrot.lane.b32.xlu1 %v7460_v11, %s7263_s30  ;;  %832 = vrot.lane.b32.xlu0 %v7471_v12, %s7263_s30 }
 0x107   :  { %783 = vst.msk [vmem:[#allocation2 + $0x70] sm:$0x1] %vm775_vm6, %v14374_v57 }
 0x108   :  { %v565_v3 = vpop.permute.xlu1 %564  ;;  %v563_v63 = vpop.permute.xlu0 %562 }
 0x109   :  { %730 = vst.msk [vmem:[#allocation2 + $0x87] sm:$0xff] %vm496_vm5, %v565_v3 }
 0x10a   :  { %729 = vst.msk [vmem:[#allocation2 + $0x7f] sm:$0xfe] %vm714_vm7, %v563_v63  ;;  %838 = vrot.lane.b32.xlu1 %v7476_v13, %s7263_s30  ;;  %836 = vrot.lane.b32.xlu0 %v7481_v14, %s7263_s30 }
 0x10b   :  { %784 = vst.msk [vmem:[#allocation2 + $0x80] sm:$0x1] %vm775_vm6, %v14374_v57 }
 0x10c   :  { %v569_v55 = vpop.permute.xlu1 %568  ;;  %v567_v62 = vpop.permute.xlu0 %566 }
 0x10d   :  { %732 = vst.msk [vmem:[#allocation2 + $0x97] sm:$0xff] %vm496_vm5, %v569_v55 }
 0x10e   :  { %731 = vst.msk [vmem:[#allocation2 + $0x8f] sm:$0xfe] %vm714_vm7, %v567_v62  ;;  %842 = vrot.lane.b32.xlu1 %v7496_v15, %s7263_s30  ;;  %840 = vrot.lane.b32.xlu0 %v7501_v16, %s7263_s30 }
 0x10f   :  { %785 = vst.msk [vmem:[#allocation2 + $0x90] sm:$0x1] %vm775_vm6, %v14374_v57 }
 0x110   :  { %v573_v3 = vpop.permute.xlu1 %572  ;;  %v571_v63 = vpop.permute.xlu0 %570 }
 0x111   :  { %734 = vst.msk [vmem:[#allocation2 + $0xa7] sm:$0xff] %vm496_vm5, %v573_v3 }
 0x112   :  { %733 = vst.msk [vmem:[#allocation2 + $0x9f] sm:$0xfe] %vm714_vm7, %v571_v63  ;;  %846 = vrot.lane.b32.xlu1 %v7512_v17, %s7263_s30  ;;  %844 = vrot.lane.b32.xlu0 %v7517_v18, %s7263_s30 }
 0x113   :  { %786 = vst.msk [vmem:[#allocation2 + $0xa0] sm:$0x1] %vm775_vm6, %v14374_v57 }
 0x114   :  { %v577_v55 = vpop.permute.xlu1 %576  ;;  %v575_v62 = vpop.permute.xlu0 %574 }
 0x115   :  { %736 = vst.msk [vmem:[#allocation2 + $0xb7] sm:$0xff] %vm496_vm5, %v577_v55 }
 0x116   :  { %735 = vst.msk [vmem:[#allocation2 + $0xaf] sm:$0xfe] %vm714_vm7, %v575_v62  ;;  %850 = vrot.lane.b32.xlu1 %v7522_v19, %s7263_s30  ;;  %848 = vrot.lane.b32.xlu0 %v7531_v20, %s7263_s30 }
 0x117   :  { %787 = vst.msk [vmem:[#allocation2 + $0xb0] sm:$0x1] %vm775_vm6, %v14374_v57 }
 0x118   :  { %v581_v3 = vpop.permute.xlu1 %580  ;;  %v579_v63 = vpop.permute.xlu0 %578 }
 0x119   :  { %738 = vst.msk [vmem:[#allocation2 + $0xc7] sm:$0xff] %vm496_vm5, %v581_v3 }
 0x11a   :  { %737 = vst.msk [vmem:[#allocation2 + $0xbf] sm:$0xfe] %vm714_vm7, %v579_v63  ;;  %854 = vrot.lane.b32.xlu1 %v7536_v21, %s7263_s30  ;;  %852 = vrot.lane.b32.xlu0 %v7541_v22, %s7263_s30 }
 0x11b   :  { %788 = vst.msk [vmem:[#allocation2 + $0xc0] sm:$0x1] %vm775_vm6, %v14374_v57 }
 0x11c   :  { %v585_v55 = vpop.permute.xlu1 %584  ;;  %v583_v62 = vpop.permute.xlu0 %582 }
 0x11d   :  { %740 = vst.msk [vmem:[#allocation2 + $0xd7] sm:$0xff] %vm496_vm5, %v585_v55 }
 0x11e   :  { %739 = vst.msk [vmem:[#allocation2 + $0xcf] sm:$0xfe] %vm714_vm7, %v583_v62  ;;  %858 = vrot.lane.b32.xlu1 %v7552_v23, %s7263_s30  ;;  %856 = vrot.lane.b32.xlu0 %v7557_v24, %s7263_s30 }
 0x11f   :  { %789 = vst.msk [vmem:[#allocation2 + $0xd0] sm:$0x1] %vm775_vm6, %v14374_v57 }
 0x120   :  { %v589_v3 = vpop.permute.xlu1 %588  ;;  %v587_v63 = vpop.permute.xlu0 %586 }
 0x121   :  { %742 = vst.msk [vmem:[#allocation2 + $0xe7] sm:$0xff] %vm496_vm5, %v589_v3 }
 0x122   :  { %741 = vst.msk [vmem:[#allocation2 + $0xdf] sm:$0xfe] %vm714_vm7, %v587_v63  ;;  %862 = vrot.lane.b32.xlu1 %v7562_v25, %s7263_s30  ;;  %860 = vrot.lane.b32.xlu0 %v7577_v26, %s7263_s30 }
 0x123   :  { %790 = vst.msk [vmem:[#allocation2 + $0xe0] sm:$0x1] %vm775_vm6, %v14374_v57 }
 0x124   :  { %v593_v55 = vpop.permute.xlu1 %592  ;;  %v591_v62 = vpop.permute.xlu0 %590 }
 0x125   :  { %744 = vst.msk [vmem:[#allocation2 + $0xf7] sm:$0xff] %vm496_vm5, %v593_v55  ;;  %v8316_v55 = vld [vmem:[%s14249_s0 + $0xf8] sm:$0xff] }
 0x126   :  { %743 = vst.msk [vmem:[#allocation2 + $0xef] sm:$0xfe] %vm714_vm7, %v591_v62  ;;  %866 = vrot.lane.b32.xlu1 %v7582_v27, %s7263_s30  ;;  %864 = vrot.lane.b32.xlu0 %v7593_v28, %s7263_s30  ;;  %v8321_v62 = vld [vmem:[%s14249_s0 + $0xf0] sm:$0xff] }
 0x127   :  { %791 = vst.msk [vmem:[#allocation2 + $0xf0] sm:$0x1] %vm775_vm6, %v14374_v57 }
 0x128   :  { %v597_v3 = vpop.permute.xlu1 %596  ;;  %v595_v63 = vpop.permute.xlu0 %594 }
 0x129   :  { %746 = vst.msk [vmem:[#allocation2 + $0x117] sm:$0xff] %vm496_vm5, %v597_v3 }
 0x12a   :  { %745 = vst.msk [vmem:[#allocation2 + $0x10f] sm:$0xfe] %vm714_vm7, %v595_v63  ;;  %870 = vrot.lane.b32.xlu1 %v7598_v29, %s7263_s30  ;;  %868 = vrot.lane.b32.xlu0 %v7603_v30, %s7263_s30 }
 0x12b   :  { %793 = vst.msk [vmem:[#allocation2 + $0x110] sm:$0x1] %vm775_vm6, %v14374_v57 }
 0x12c   :  { %v601_v3 = vpop.permute.xlu1 %600  ;;  %v599_v63 = vpop.permute.xlu0 %598 }
 0x12d   :  { %748 = vst.msk [vmem:[#allocation2 + $0x127] sm:$0xff] %vm496_vm5, %v601_v3 }
 0x12e   :  { %747 = vst.msk [vmem:[#allocation2 + $0x11f] sm:$0xfe] %vm714_vm7, %v599_v63  ;;  %874 = vrot.lane.b32.xlu1 %v8316_v55, %s7263_s30  ;;  %872 = vrot.lane.b32.xlu0 %v8321_v62, %s7263_s30 }
 0x12f   :  { %794 = vst.msk [vmem:[#allocation2 + $0x120] sm:$0x1] %vm775_vm6, %v14374_v57 }
 0x130   :  { %v605_v30 = vpop.permute.xlu1 %604  ;;  %v603_v29 = vpop.permute.xlu0 %602 }
 0x131   :  { %750 = vst.msk [vmem:[#allocation2 + $0x137] sm:$0xff] %vm496_vm5, %v605_v30 }
 0x132   :  { %749 = vst.msk [vmem:[#allocation2 + $0x12f] sm:$0xfe] %vm714_vm7, %v603_v29  ;;  %878 = vrot.lane.b32.xlu1 %v7612_v31, %s7263_s30  ;;  %876 = vrot.lane.b32.xlu0 %v7617_v32, %s7263_s30 }
 0x133   :  { %795 = vst.msk [vmem:[#allocation2 + $0x130] sm:$0x1] %vm775_vm6, %v14374_v57 }
 0x134   :  { %v609_v3 = vpop.permute.xlu1 %608  ;;  %v607_v63 = vpop.permute.xlu0 %606 }
 0x135   :  { %752 = vst.msk [vmem:[#allocation2 + $0x147] sm:$0xff] %vm496_vm5, %v609_v3 }
 0x136   :  { %751 = vst.msk [vmem:[#allocation2 + $0x13f] sm:$0xfe] %vm714_vm7, %v607_v63  ;;  %882 = vrot.lane.b32.xlu1 %v7622_v33, %s7263_s30  ;;  %880 = vrot.lane.b32.xlu0 %v7633_v34, %s7263_s30 }
 0x137   :  { %796 = vst.msk [vmem:[#allocation2 + $0x140] sm:$0x1] %vm775_vm6, %v14374_v57 }
 0x138   :  { %v613_v29 = vpop.permute.xlu1 %612  ;;  %v611_v30 = vpop.permute.xlu0 %610 }
 0x139   :  { %754 = vst.msk [vmem:[#allocation2 + $0x157] sm:$0xff] %vm496_vm5, %v613_v29 }
 0x13a   :  { %753 = vst.msk [vmem:[#allocation2 + $0x14f] sm:$0xfe] %vm714_vm7, %v611_v30  ;;  %886 = vrot.lane.b32.xlu1 %v7638_v35, %s7263_s30  ;;  %884 = vrot.lane.b32.xlu0 %v7643_v36, %s7263_s30 }
 0x13b   :  { %797 = vst.msk [vmem:[#allocation2 + $0x150] sm:$0x1] %vm775_vm6, %v14374_v57 }
 0x13c   :  { %v617_v3 = vpop.permute.xlu1 %616  ;;  %v615_v63 = vpop.permute.xlu0 %614 }
 0x13d   :  { %756 = vst.msk [vmem:[#allocation2 + $0x167] sm:$0xff] %vm496_vm5, %v617_v3 }
 0x13e   :  { %755 = vst.msk [vmem:[#allocation2 + $0x15f] sm:$0xfe] %vm714_vm7, %v615_v63  ;;  %890 = vrot.lane.b32.xlu1 %v7658_v37, %s7263_s30  ;;  %888 = vrot.lane.b32.xlu0 %v7663_v38, %s7263_s30 }
 0x13f   :  { %798 = vst.msk [vmem:[#allocation2 + $0x160] sm:$0x1] %vm775_vm6, %v14374_v57 }
 0x140   :  { %v621_v29 = vpop.permute.xlu1 %620  ;;  %v619_v30 = vpop.permute.xlu0 %618 }
 0x141   :  { %758 = vst.msk [vmem:[#allocation2 + $0x177] sm:$0xff] %vm496_vm5, %v621_v29 }
 0x142   :  { %757 = vst.msk [vmem:[#allocation2 + $0x16f] sm:$0xfe] %vm714_vm7, %v619_v30  ;;  %894 = vrot.lane.b32.xlu1 %v7674_v39, %s7263_s30  ;;  %892 = vrot.lane.b32.xlu0 %v7679_v40, %s7263_s30 }
 0x143   :  { %799 = vst.msk [vmem:[#allocation2 + $0x170] sm:$0x1] %vm775_vm6, %v14374_v57 }
 0x144   :  { %v625_v3 = vpop.permute.xlu1 %624  ;;  %v623_v63 = vpop.permute.xlu0 %622 }
 0x145   :  { %760 = vst.msk [vmem:[#allocation2 + $0x187] sm:$0xff] %vm496_vm5, %v625_v3 }
 0x146   :  { %759 = vst.msk [vmem:[#allocation2 + $0x17f] sm:$0xfe] %vm714_vm7, %v623_v63  ;;  %898 = vrot.lane.b32.xlu1 %v7684_v41, %s7263_s30  ;;  %896 = vrot.lane.b32.xlu0 %v7693_v42, %s7263_s30 }
 0x147   :  { %800 = vst.msk [vmem:[#allocation2 + $0x180] sm:$0x1] %vm775_vm6, %v14374_v57 }
 0x148   :  { %v629_v29 = vpop.permute.xlu1 %628  ;;  %v627_v30 = vpop.permute.xlu0 %626 }
 0x149   :  { %762 = vst.msk [vmem:[#allocation2 + $0x197] sm:$0xff] %vm496_vm5, %v629_v29 }
 0x14a   :  { %761 = vst.msk [vmem:[#allocation2 + $0x18f] sm:$0xfe] %vm714_vm7, %v627_v30  ;;  %902 = vrot.lane.b32.xlu1 %v7698_v43, %s7263_s30  ;;  %900 = vrot.lane.b32.xlu0 %v7703_v44, %s7263_s30 }
 0x14b   :  { %801 = vst.msk [vmem:[#allocation2 + $0x190] sm:$0x1] %vm775_vm6, %v14374_v57 }
 0x14c   :  { %v633_v3 = vpop.permute.xlu1 %632  ;;  %v631_v63 = vpop.permute.xlu0 %630 }
 0x14d   :  { %764 = vst.msk [vmem:[#allocation2 + $0x1a7] sm:$0xff] %vm496_vm5, %v633_v3 }
 0x14e   :  { %763 = vst.msk [vmem:[#allocation2 + $0x19f] sm:$0xfe] %vm714_vm7, %v631_v63  ;;  %906 = vrot.lane.b32.xlu1 %v7714_v45, %s7263_s30  ;;  %904 = vrot.lane.b32.xlu0 %v7719_v46, %s7263_s30 }
 0x14f   :  { %802 = vst.msk [vmem:[#allocation2 + $0x1a0] sm:$0x1] %vm775_vm6, %v14374_v57 }
 0x150   :  { %v637_v29 = vpop.permute.xlu1 %636  ;;  %v635_v30 = vpop.permute.xlu0 %634 }
 0x151   :  { %766 = vst.msk [vmem:[#allocation2 + $0x1b7] sm:$0xff] %vm496_vm5, %v637_v29 }
 0x152   :  { %765 = vst.msk [vmem:[#allocation2 + $0x1af] sm:$0xfe] %vm714_vm7, %v635_v30  ;;  %910 = vrot.lane.b32.xlu1 %v7724_v47, %s7263_s30  ;;  %908 = vrot.lane.b32.xlu0 %v7739_v48, %s7263_s30 }
 0x153   :  { %803 = vst.msk [vmem:[#allocation2 + $0x1b0] sm:$0x1] %vm775_vm6, %v14374_v57 }
 0x154   :  { %v641_v3 = vpop.permute.xlu1 %640  ;;  %v639_v63 = vpop.permute.xlu0 %638 }
 0x155   :  { %768 = vst.msk [vmem:[#allocation2 + $0x1c7] sm:$0xff] %vm496_vm5, %v641_v3 }
 0x156   :  { %767 = vst.msk [vmem:[#allocation2 + $0x1bf] sm:$0xfe] %vm714_vm7, %v639_v63  ;;  %914 = vrot.lane.b32.xlu1 %v7744_v49, %s7263_s30  ;;  %912 = vrot.lane.b32.xlu0 %v7755_v50, %s7263_s30 }
 0x157   :  { %804 = vst.msk [vmem:[#allocation2 + $0x1c0] sm:$0x1] %vm775_vm6, %v14374_v57 }
 0x158   :  { %v645_v29 = vpop.permute.xlu1 %644  ;;  %v643_v30 = vpop.permute.xlu0 %642 }
 0x159   :  { %770 = vst.msk [vmem:[#allocation2 + $0x1d7] sm:$0xff] %vm496_vm5, %v645_v29 }
 0x15a   :  { %769 = vst.msk [vmem:[#allocation2 + $0x1cf] sm:$0xfe] %vm714_vm7, %v643_v30  ;;  %918 = vrot.lane.b32.xlu1 %v7760_v51, %s7263_s30  ;;  %916 = vrot.lane.b32.xlu0 %v7765_v52, %s7263_s30 }
 0x15b   :  { %805 = vst.msk [vmem:[#allocation2 + $0x1d0] sm:$0x1] %vm775_vm6, %v14374_v57 }
 0x15c   :  { %v649_v3 = vpop.permute.xlu1 %648  ;;  %v647_v63 = vpop.permute.xlu0 %646 }
 0x15d   :  { %772 = vst.msk [vmem:[#allocation2 + $0x1e7] sm:$0xff] %vm496_vm5, %v649_v3  ;;  %v14376_v3 = vld [vmem:[#allocation11_spill] sm:$0xff] }
 0x15e   :  { %771 = vst.msk [vmem:[#allocation2 + $0x1df] sm:$0xfe] %vm714_vm7, %v647_v63  ;;  %922 = vrot.lane.b32.xlu1 %v7774_v53, %s7263_s30  ;;  %920 = vrot.lane.b32.xlu0 %v7779_v54, %s7263_s30 }
 0x15f   :  { %806 = vst.msk [vmem:[#allocation2 + $0x1e0] sm:$0x1] %vm775_vm6, %v14374_v57 }
 0x160   :  { %v653_v29 = vpop.permute.xlu1 %652  ;;  %v651_v30 = vpop.permute.xlu0 %650 }
 0x161   :  { %774 = vst.msk [vmem:[#allocation2 + $0x1f7] sm:$0xff] %vm496_vm5, %v653_v29  ;;  %vm2361_vm5 = vcmask 294145  }
 0x162   :  { %773 = vst.msk [vmem:[#allocation2 + $0x1ef] sm:$0xfe] %vm714_vm7, %v651_v30  ;;  %926 = vrot.lane.b32.xlu1 %v14376_v3, %s7263_s30  ;;  %924 = vrot.lane.b32.xlu0 %v7795_v56, %s7263_s30  ;;  %vm2930_vm7 = vcmask 64512  }
 0x163   :  { %807 = vst.msk [vmem:[#allocation2 + $0x1f0] sm:$0x1] %vm775_vm6, %v14374_v57  ;;  %vm2540_vm6 = vcmask 293888  }
 0x164   :  { %v815_v63 = vpop.permute.xlu1 %814  ;;  %v813_v53 = vpop.permute.xlu0 %812  ;;  %3475 = vst.msk [vmem:[#allocation3] sm:$0xff] %vm2930_vm7, %v14374_v57  ;;  %3476 = vst.msk [vmem:[#allocation3 + $0x8] sm:$0xff] %vm2930_vm7, %v14374_v57 }
 0x165   :  { %1007 = vst.msk [vmem:[#allocation2 + $0x9] sm:$0x7f] %vm1006_vm8, %v815_v63  ;;  %v8455_v63 = vld [vmem:[%s14249_s0 + $0x1f0] sm:$0xff] }
 0x166   :  { %1005 = vst.msk [vmem:[#allocation2 + $0x1] sm:$0xff] %vm1004_vm9, %v813_v53  ;;  %930 = vrot.lane.b32.xlu1 %v14375_v61, %s7263_s30  ;;  %928 = vrot.lane.b32.xlu0 %v7805_v58, %s7263_s30  ;;  %v8450_v53 = vld [vmem:[%s14249_s0 + $0x1f8] sm:$0xff] }
 0x167   :  { %3477 = vst.msk [vmem:[#allocation3 + $0x100] sm:$0xff] %vm2930_vm7, %v14374_v57  ;;  %3478 = vst.msk [vmem:[#allocation3 + $0x108] sm:$0xff] %vm2930_vm7, %v14374_v57 }
 0x168   :  { %v819_v29 = vpop.permute.xlu1 %818  ;;  %v817_v30 = vpop.permute.xlu0 %816 }
 0x169   :  { %1009 = vst.msk [vmem:[#allocation2 + $0x19] sm:$0x7f] %vm1006_vm8, %v819_v29 }
 0x16a   :  { %1008 = vst.msk [vmem:[#allocation2 + $0x11] sm:$0xff] %vm1004_vm9, %v817_v30  ;;  %934 = vrot.lane.b32.xlu1 %v7824_v59, %s7263_s30  ;;  %932 = vrot.lane.b32.xlu0 %v7829_v60, %s7263_s30 }
 0x16c   :  { %v823_v58 = vpop.permute.xlu1 %822  ;;  %v821_v29 = vpop.permute.xlu0 %820 }
 0x16d   :  { %1011 = vst.msk [vmem:[#allocation2 + $0x29] sm:$0x7f] %vm1006_vm8, %v823_v58 }
 0x16e   :  { %1010 = vst.msk [vmem:[#allocation2 + $0x21] sm:$0xff] %vm1004_vm9, %v821_v29  ;;  %938 = vrot.lane.b32.xlu1 %v8450_v53, %s7263_s30  ;;  %936 = vrot.lane.b32.xlu0 %v8455_v63, %s7263_s30 }
 0x170   :  { %v827_v30 = vpop.permute.xlu1 %826  ;;  %v825_v60 = vpop.permute.xlu0 %824 }
 0x171   :  { %1013 = vst.msk [vmem:[#allocation2 + $0x39] sm:$0x7f] %vm1006_vm8, %v827_v30 }
 0x172   :  { %1012 = vst.msk [vmem:[#allocation2 + $0x31] sm:$0xff] %vm1004_vm9, %v825_v60  ;;  %1072 = vrot.lane.b32.xlu1 %v7403_v4, %s7264_s21  ;;  %1070 = vrot.lane.b32.xlu0 %v7321_v1, %s7264_s21 }
 0x174   :  { %v831_v58 = vpop.permute.xlu1 %830  ;;  %v829_v29 = vpop.permute.xlu0 %828 }
 0x175   :  { %1015 = vst.msk [vmem:[#allocation2 + $0x49] sm:$0x7f] %vm1006_vm8, %v831_v58 }
 0x176   :  { %1014 = vst.msk [vmem:[#allocation2 + $0x41] sm:$0xff] %vm1004_vm9, %v829_v29  ;;  %1076 = vrot.lane.b32.xlu1 %v7326_v2, %s7264_s21  ;;  %1074 = vrot.lane.b32.xlu0 %v7316_v0, %s7264_s21 }
 0x178   :  { %v835_v60 = vpop.permute.xlu1 %834  ;;  %v833_v30 = vpop.permute.xlu0 %832 }
 0x179   :  { %1017 = vst.msk [vmem:[#allocation2 + $0x59] sm:$0x7f] %vm1006_vm8, %v835_v60 }
 0x17a   :  { %1016 = vst.msk [vmem:[#allocation2 + $0x51] sm:$0xff] %vm1004_vm9, %v833_v30  ;;  %1080 = vrot.lane.b32.xlu1 %v7408_v5, %s7264_s21  ;;  %1078 = vrot.lane.b32.xlu0 %v7427_v6, %s7264_s21 }
 0x17c   :  { %v839_v58 = vpop.permute.xlu1 %838  ;;  %v837_v29 = vpop.permute.xlu0 %836 }
 0x17d   :  { %1019 = vst.msk [vmem:[#allocation2 + $0x69] sm:$0x7f] %vm1006_vm8, %v839_v58 }
 0x17e   :  { %1018 = vst.msk [vmem:[#allocation2 + $0x61] sm:$0xff] %vm1004_vm9, %v837_v29  ;;  %1084 = vrot.lane.b32.xlu1 %v7432_v7, %s7264_s21  ;;  %1082 = vrot.lane.b32.xlu0 %v7437_v8, %s7264_s21 }
 0x180   :  { %v843_v60 = vpop.permute.xlu1 %842  ;;  %v841_v30 = vpop.permute.xlu0 %840 }
 0x181   :  { %1021 = vst.msk [vmem:[#allocation2 + $0x79] sm:$0x7f] %vm1006_vm8, %v843_v60 }
 0x182   :  { %1020 = vst.msk [vmem:[#allocation2 + $0x71] sm:$0xff] %vm1004_vm9, %v841_v30  ;;  %1088 = vrot.lane.b32.xlu1 %v7450_v9, %s7264_s21  ;;  %1086 = vrot.lane.b32.xlu0 %v7455_v10, %s7264_s21 }
 0x184   :  { %v847_v58 = vpop.permute.xlu1 %846  ;;  %v845_v29 = vpop.permute.xlu0 %844 }
 0x185   :  { %1023 = vst.msk [vmem:[#allocation2 + $0x89] sm:$0x7f] %vm1006_vm8, %v847_v58 }
 0x186   :  { %1022 = vst.msk [vmem:[#allocation2 + $0x81] sm:$0xff] %vm1004_vm9, %v845_v29  ;;  %1092 = vrot.lane.b32.xlu1 %v7460_v11, %s7264_s21  ;;  %1090 = vrot.lane.b32.xlu0 %v7471_v12, %s7264_s21 }
 0x188   :  { %v851_v60 = vpop.permute.xlu1 %850  ;;  %v849_v30 = vpop.permute.xlu0 %848 }
 0x189   :  { %1025 = vst.msk [vmem:[#allocation2 + $0x99] sm:$0x7f] %vm1006_vm8, %v851_v60 }
 0x18a   :  { %1024 = vst.msk [vmem:[#allocation2 + $0x91] sm:$0xff] %vm1004_vm9, %v849_v30  ;;  %1096 = vrot.lane.b32.xlu1 %v7476_v13, %s7264_s21  ;;  %1094 = vrot.lane.b32.xlu0 %v7481_v14, %s7264_s21 }
 0x18c   :  { %v855_v58 = vpop.permute.xlu1 %854  ;;  %v853_v29 = vpop.permute.xlu0 %852 }
 0x18d   :  { %1027 = vst.msk [vmem:[#allocation2 + $0xa9] sm:$0x7f] %vm1006_vm8, %v855_v58 }
 0x18e   :  { %1026 = vst.msk [vmem:[#allocation2 + $0xa1] sm:$0xff] %vm1004_vm9, %v853_v29  ;;  %1100 = vrot.lane.b32.xlu1 %v7496_v15, %s7264_s21  ;;  %1098 = vrot.lane.b32.xlu0 %v7501_v16, %s7264_s21 }
 0x190   :  { %v859_v60 = vpop.permute.xlu1 %858  ;;  %v857_v30 = vpop.permute.xlu0 %856 }
 0x191   :  { %1029 = vst.msk [vmem:[#allocation2 + $0xb9] sm:$0x7f] %vm1006_vm8, %v859_v60 }
 0x192   :  { %1028 = vst.msk [vmem:[#allocation2 + $0xb1] sm:$0xff] %vm1004_vm9, %v857_v30  ;;  %1104 = vrot.lane.b32.xlu1 %v7512_v17, %s7264_s21  ;;  %1102 = vrot.lane.b32.xlu0 %v7517_v18, %s7264_s21 }
 0x194   :  { %v863_v58 = vpop.permute.xlu1 %862  ;;  %v861_v29 = vpop.permute.xlu0 %860 }
 0x195   :  { %1031 = vst.msk [vmem:[#allocation2 + $0xc9] sm:$0x7f] %vm1006_vm8, %v863_v58 }
 0x196   :  { %1030 = vst.msk [vmem:[#allocation2 + $0xc1] sm:$0xff] %vm1004_vm9, %v861_v29  ;;  %1108 = vrot.lane.b32.xlu1 %v7522_v19, %s7264_s21  ;;  %1106 = vrot.lane.b32.xlu0 %v7531_v20, %s7264_s21 }
 0x198   :  { %v867_v60 = vpop.permute.xlu1 %866  ;;  %v865_v30 = vpop.permute.xlu0 %864 }
 0x199   :  { %1033 = vst.msk [vmem:[#allocation2 + $0xd9] sm:$0x7f] %vm1006_vm8, %v867_v60 }
 0x19a   :  { %1032 = vst.msk [vmem:[#allocation2 + $0xd1] sm:$0xff] %vm1004_vm9, %v865_v30  ;;  %1112 = vrot.lane.b32.xlu1 %v7536_v21, %s7264_s21  ;;  %1110 = vrot.lane.b32.xlu0 %v7541_v22, %s7264_s21 }
 0x19c   :  { %v871_v58 = vpop.permute.xlu1 %870  ;;  %v869_v29 = vpop.permute.xlu0 %868 }
 0x19d   :  { %1035 = vst.msk [vmem:[#allocation2 + $0xe9] sm:$0x7f] %vm1006_vm8, %v871_v58 }
 0x19e   :  { %1034 = vst.msk [vmem:[#allocation2 + $0xe1] sm:$0xff] %vm1004_vm9, %v869_v29  ;;  %1116 = vrot.lane.b32.xlu1 %v7552_v23, %s7264_s21  ;;  %1114 = vrot.lane.b32.xlu0 %v7557_v24, %s7264_s21 }
 0x1a0   :  { %v875_v60 = vpop.permute.xlu1 %874  ;;  %v873_v30 = vpop.permute.xlu0 %872 }
 0x1a1   :  { %1037 = vst.msk [vmem:[#allocation2 + $0xf9] sm:$0x7f] %vm1006_vm8, %v875_v60 }
 0x1a2   :  { %1036 = vst.msk [vmem:[#allocation2 + $0xf1] sm:$0xff] %vm1004_vm9, %v873_v30  ;;  %1120 = vrot.lane.b32.xlu1 %v7562_v25, %s7264_s21  ;;  %1118 = vrot.lane.b32.xlu0 %v7577_v26, %s7264_s21  ;;  %v14377_v26 = vld [vmem:[#allocation6_spill] sm:$0xff]  ;;  %v14378_v25 = vld [vmem:[#allocation7_spill] sm:$0xff] }
 0x1a4   :  { %v879_v58 = vpop.permute.xlu1 %878  ;;  %v877_v29 = vpop.permute.xlu0 %876 }
 0x1a5   :  { %1039 = vst.msk [vmem:[#allocation2 + $0x109] sm:$0x7f] %vm1006_vm8, %v879_v58 }
 0x1a6   :  { %1038 = vst.msk [vmem:[#allocation2 + $0x101] sm:$0xff] %vm1004_vm9, %v877_v29  ;;  %1124 = vrot.lane.b32.xlu1 %v7582_v27, %s7264_s21  ;;  %1122 = vrot.lane.b32.xlu0 %v7593_v28, %s7264_s21 }
 0x1a8   :  { %v883_v60 = vpop.permute.xlu1 %882  ;;  %v881_v30 = vpop.permute.xlu0 %880 }
 0x1a9   :  { %1041 = vst.msk [vmem:[#allocation2 + $0x119] sm:$0x7f] %vm1006_vm8, %v883_v60 }
 0x1aa   :  { %1040 = vst.msk [vmem:[#allocation2 + $0x111] sm:$0xff] %vm1004_vm9, %v881_v30  ;;  %1128 = vrot.lane.b32.xlu1 %v14377_v26, %s7264_s21  ;;  %1126 = vrot.lane.b32.xlu0 %v14378_v25, %s7264_s21 }
 0x1ac   :  { %v887_v58 = vpop.permute.xlu1 %886  ;;  %v885_v29 = vpop.permute.xlu0 %884 }
 0x1ad   :  { %1043 = vst.msk [vmem:[#allocation2 + $0x129] sm:$0x7f] %vm1006_vm8, %v887_v58 }
 0x1ae   :  { %1042 = vst.msk [vmem:[#allocation2 + $0x121] sm:$0xff] %vm1004_vm9, %v885_v29  ;;  %1132 = vrot.lane.b32.xlu1 %v8316_v55, %s7264_s21  ;;  %1130 = vrot.lane.b32.xlu0 %v8321_v62, %s7264_s21 }
 0x1b0   :  { %v891_v60 = vpop.permute.xlu1 %890  ;;  %v889_v30 = vpop.permute.xlu0 %888 }
 0x1b1   :  { %1045 = vst.msk [vmem:[#allocation2 + $0x139] sm:$0x7f] %vm1006_vm8, %v891_v60 }
 0x1b2   :  { %1044 = vst.msk [vmem:[#allocation2 + $0x131] sm:$0xff] %vm1004_vm9, %v889_v30  ;;  %1136 = vrot.lane.b32.xlu1 %v7612_v31, %s7264_s21  ;;  %1134 = vrot.lane.b32.xlu0 %v7617_v32, %s7264_s21 }
 0x1b4   :  { %v895_v58 = vpop.permute.xlu1 %894  ;;  %v893_v29 = vpop.permute.xlu0 %892 }
 0x1b5   :  { %1047 = vst.msk [vmem:[#allocation2 + $0x149] sm:$0x7f] %vm1006_vm8, %v895_v58 }
 0x1b6   :  { %1046 = vst.msk [vmem:[#allocation2 + $0x141] sm:$0xff] %vm1004_vm9, %v893_v29  ;;  %1140 = vrot.lane.b32.xlu1 %v7622_v33, %s7264_s21  ;;  %1138 = vrot.lane.b32.xlu0 %v7633_v34, %s7264_s21 }
 0x1b8   :  { %v899_v60 = vpop.permute.xlu1 %898  ;;  %v897_v30 = vpop.permute.xlu0 %896 }
 0x1b9   :  { %1049 = vst.msk [vmem:[#allocation2 + $0x159] sm:$0x7f] %vm1006_vm8, %v899_v60 }
 0x1ba   :  { %1048 = vst.msk [vmem:[#allocation2 + $0x151] sm:$0xff] %vm1004_vm9, %v897_v30  ;;  %1144 = vrot.lane.b32.xlu1 %v7638_v35, %s7264_s21  ;;  %1142 = vrot.lane.b32.xlu0 %v7643_v36, %s7264_s21 }
 0x1bc   :  { %v903_v58 = vpop.permute.xlu1 %902  ;;  %v901_v29 = vpop.permute.xlu0 %900 }
 0x1bd   :  { %1051 = vst.msk [vmem:[#allocation2 + $0x169] sm:$0x7f] %vm1006_vm8, %v903_v58 }
 0x1be   :  { %1050 = vst.msk [vmem:[#allocation2 + $0x161] sm:$0xff] %vm1004_vm9, %v901_v29  ;;  %1148 = vrot.lane.b32.xlu1 %v7658_v37, %s7264_s21  ;;  %1146 = vrot.lane.b32.xlu0 %v7663_v38, %s7264_s21 }
 0x1c0   :  { %v907_v60 = vpop.permute.xlu1 %906  ;;  %v905_v30 = vpop.permute.xlu0 %904 }
 0x1c1   :  { %1053 = vst.msk [vmem:[#allocation2 + $0x179] sm:$0x7f] %vm1006_vm8, %v907_v60 }
 0x1c2   :  { %1052 = vst.msk [vmem:[#allocation2 + $0x171] sm:$0xff] %vm1004_vm9, %v905_v30  ;;  %1152 = vrot.lane.b32.xlu1 %v7674_v39, %s7264_s21  ;;  %1150 = vrot.lane.b32.xlu0 %v7679_v40, %s7264_s21 }
 0x1c4   :  { %v911_v58 = vpop.permute.xlu1 %910  ;;  %v909_v29 = vpop.permute.xlu0 %908 }
 0x1c5   :  { %1055 = vst.msk [vmem:[#allocation2 + $0x189] sm:$0x7f] %vm1006_vm8, %v911_v58 }
 0x1c6   :  { %1054 = vst.msk [vmem:[#allocation2 + $0x181] sm:$0xff] %vm1004_vm9, %v909_v29  ;;  %1156 = vrot.lane.b32.xlu1 %v7684_v41, %s7264_s21  ;;  %1154 = vrot.lane.b32.xlu0 %v7693_v42, %s7264_s21 }
 0x1c8   :  { %v915_v60 = vpop.permute.xlu1 %914  ;;  %v913_v30 = vpop.permute.xlu0 %912 }
 0x1c9   :  { %1057 = vst.msk [vmem:[#allocation2 + $0x199] sm:$0x7f] %vm1006_vm8, %v915_v60 }
 0x1ca   :  { %1056 = vst.msk [vmem:[#allocation2 + $0x191] sm:$0xff] %vm1004_vm9, %v913_v30  ;;  %1160 = vrot.lane.b32.xlu1 %v7698_v43, %s7264_s21  ;;  %1158 = vrot.lane.b32.xlu0 %v7703_v44, %s7264_s21 }
 0x1cc   :  { %v919_v58 = vpop.permute.xlu1 %918  ;;  %v917_v29 = vpop.permute.xlu0 %916 }
 0x1cd   :  { %1059 = vst.msk [vmem:[#allocation2 + $0x1a9] sm:$0x7f] %vm1006_vm8, %v919_v58 }
 0x1ce   :  { %1058 = vst.msk [vmem:[#allocation2 + $0x1a1] sm:$0xff] %vm1004_vm9, %v917_v29  ;;  %1164 = vrot.lane.b32.xlu1 %v7714_v45, %s7264_s21  ;;  %1162 = vrot.lane.b32.xlu0 %v7719_v46, %s7264_s21 }
 0x1d0   :  { %v923_v60 = vpop.permute.xlu1 %922  ;;  %v921_v30 = vpop.permute.xlu0 %920 }
 0x1d1   :  { %1061 = vst.msk [vmem:[#allocation2 + $0x1b9] sm:$0x7f] %vm1006_vm8, %v923_v60 }
 0x1d2   :  { %1060 = vst.msk [vmem:[#allocation2 + $0x1b1] sm:$0xff] %vm1004_vm9, %v921_v30  ;;  %1168 = vrot.lane.b32.xlu1 %v7724_v47, %s7264_s21  ;;  %1166 = vrot.lane.b32.xlu0 %v7739_v48, %s7264_s21 }
 0x1d4   :  { %v927_v58 = vpop.permute.xlu1 %926  ;;  %v925_v29 = vpop.permute.xlu0 %924 }
 0x1d5   :  { %1063 = vst.msk [vmem:[#allocation2 + $0x1c9] sm:$0x7f] %vm1006_vm8, %v927_v58 }
 0x1d6   :  { %1062 = vst.msk [vmem:[#allocation2 + $0x1c1] sm:$0xff] %vm1004_vm9, %v925_v29  ;;  %1172 = vrot.lane.b32.xlu1 %v7744_v49, %s7264_s21  ;;  %1170 = vrot.lane.b32.xlu0 %v7755_v50, %s7264_s21  ;;  %v14379_v50 = vld [vmem:[#allocation9_spill] sm:$0xff] }
 0x1d8   :  { %v931_v60 = vpop.permute.xlu1 %930  ;;  %v929_v30 = vpop.permute.xlu0 %928 }
 0x1d9   :  { %1065 = vst.msk [vmem:[#allocation2 + $0x1d9] sm:$0x7f] %vm1006_vm8, %v931_v60 }
 0x1da   :  { %1064 = vst.msk [vmem:[#allocation2 + $0x1d1] sm:$0xff] %vm1004_vm9, %v929_v30  ;;  %1176 = vrot.lane.b32.xlu1 %v7760_v51, %s7264_s21  ;;  %1174 = vrot.lane.b32.xlu0 %v7765_v52, %s7264_s21 }
 0x1dc   :  { %v935_v58 = vpop.permute.xlu1 %934  ;;  %v933_v29 = vpop.permute.xlu0 %932 }
 0x1dd   :  { %1067 = vst.msk [vmem:[#allocation2 + $0x1e9] sm:$0x7f] %vm1006_vm8, %v935_v58 }
 0x1de   :  { %1066 = vst.msk [vmem:[#allocation2 + $0x1e1] sm:$0xff] %vm1004_vm9, %v933_v29  ;;  %1180 = vrot.lane.b32.xlu1 %v14379_v50, %s7264_s21  ;;  %1178 = vrot.lane.b32.xlu0 %v7779_v54, %s7264_s21 }
 0x1e0   :  { %v939_v60 = vpop.permute.xlu1 %938  ;;  %v937_v30 = vpop.permute.xlu0 %936 }
 0x1e1   :  { %1069 = vst.msk [vmem:[#allocation2 + $0x1f9] sm:$0x7f] %vm1006_vm8, %v939_v60  ;;  %v14380_v60 = vld [vmem:[#allocation13_spill] sm:$0xff]  ;;  %vm3514_vm8 = vcmask 63488  }
 0x1e2   :  { %1068 = vst.msk [vmem:[#allocation2 + $0x1f1] sm:$0xff] %vm1004_vm9, %v937_v30  ;;  %1184 = vrot.lane.b32.xlu1 %v14376_v3, %s7264_s21  ;;  %1182 = vrot.lane.b32.xlu0 %v7795_v56, %s7264_s21  ;;  %vm3574_vm9 = vcmask 130112  }
 0x1e4   :  { %v1073_v58 = vpop.permute.xlu1 %1072  ;;  %v1071_v29 = vpop.permute.xlu0 %1070 }
 0x1e5   :  { %1264 = vst.msk [vmem:[#allocation2 + $0x8] sm:$0xff] %vm1262_vm10, %v1073_v58  ;;  %1263 = vst.msk [vmem:[#allocation2] sm:$0xff] %vm1262_vm10, %v1071_v29  ;;  %v14381_v58 = vld [vmem:[#allocation14_spill] sm:$0xff] }
 0x1e6   :  { %1328 = vst.msk [vmem:[#allocation2 + $0xf] sm:$0x1] %vm1327_vm11, %v14374_v57  ;;  %1188 = vrot.lane.b32.xlu1 %v14375_v61, %s7264_s21  ;;  %1186 = vrot.lane.b32.xlu0 %v14380_v60, %s7264_s21 }
 0x1e8   :  { %v1077_v30 = vpop.permute.xlu1 %1076  ;;  %v1075_v3 = vpop.permute.xlu0 %1074 }
 0x1e9   :  { %1266 = vst.msk [vmem:[#allocation2 + $0x18] sm:$0xff] %vm1262_vm10, %v1077_v30  ;;  %1265 = vst.msk [vmem:[#allocation2 + $0x10] sm:$0xff] %vm1262_vm10, %v1075_v3 }
 0x1ea   :  { %1329 = vst.msk [vmem:[#allocation2 + $0x1f] sm:$0x1] %vm1327_vm11, %v14374_v57  ;;  %1192 = vrot.lane.b32.xlu1 %v7824_v59, %s7264_s21  ;;  %1190 = vrot.lane.b32.xlu0 %v14381_v58, %s7264_s21 }
 0x1ec   :  { %v1081_v29 = vpop.permute.xlu1 %1080  ;;  %v1079_v61 = vpop.permute.xlu0 %1078 }
 0x1ed   :  { %1268 = vst.msk [vmem:[#allocation2 + $0x28] sm:$0xff] %vm1262_vm10, %v1081_v29  ;;  %1267 = vst.msk [vmem:[#allocation2 + $0x20] sm:$0xff] %vm1262_vm10, %v1079_v61 }
 0x1ee   :  { %1330 = vst.msk [vmem:[#allocation2 + $0x2f] sm:$0x1] %vm1327_vm11, %v14374_v57  ;;  %1196 = vrot.lane.b32.xlu1 %v8450_v53, %s7264_s21  ;;  %1194 = vrot.lane.b32.xlu0 %v8455_v63, %s7264_s21 }
 0x1f0   :  { %v1085_v3 = vpop.permute.xlu1 %1084  ;;  %v1083_v30 = vpop.permute.xlu0 %1082 }
 0x1f1   :  { %1270 = vst.msk [vmem:[#allocation2 + $0x38] sm:$0xff] %vm1262_vm10, %v1085_v3  ;;  %1269 = vst.msk [vmem:[#allocation2 + $0x30] sm:$0xff] %vm1262_vm10, %v1083_v30 }
 0x1f2   :  { %1331 = vst.msk [vmem:[#allocation2 + $0x3f] sm:$0x1] %vm1327_vm11, %v14374_v57  ;;  %1362 = vrot.lane.b32.xlu1 %v7403_v4, %s7265_s22  ;;  %1360 = vrot.lane.b32.xlu0 %v7321_v1, %s7265_s22 }
 0x1f4   :  { %v1089_v61 = vpop.permute.xlu1 %1088  ;;  %v1087_v29 = vpop.permute.xlu0 %1086 }
 0x1f5   :  { %1272 = vst.msk [vmem:[#allocation2 + $0x48] sm:$0xff] %vm1262_vm10, %v1089_v61  ;;  %1271 = vst.msk [vmem:[#allocation2 + $0x40] sm:$0xff] %vm1262_vm10, %v1087_v29 }
 0x1f6   :  { %1332 = vst.msk [vmem:[#allocation2 + $0x4f] sm:$0x1] %vm1327_vm11, %v14374_v57  ;;  %1366 = vrot.lane.b32.xlu1 %v7326_v2, %s7265_s22  ;;  %1364 = vrot.lane.b32.xlu0 %v7316_v0, %s7265_s22 }
 0x1f8   :  { %v1093_v3 = vpop.permute.xlu1 %1092  ;;  %v1091_v4 = vpop.permute.xlu0 %1090 }
 0x1f9   :  { %1274 = vst.msk [vmem:[#allocation2 + $0x58] sm:$0xff] %vm1262_vm10, %v1093_v3  ;;  %1273 = vst.msk [vmem:[#allocation2 + $0x50] sm:$0xff] %vm1262_vm10, %v1091_v4 }
 0x1fa   :  { %1333 = vst.msk [vmem:[#allocation2 + $0x5f] sm:$0x1] %vm1327_vm11, %v14374_v57  ;;  %1370 = vrot.lane.b32.xlu1 %v7408_v5, %s7265_s22  ;;  %1368 = vrot.lane.b32.xlu0 %v7427_v6, %s7265_s22 }
 0x1fc   :  { %v1097_v1 = vpop.permute.xlu1 %1096  ;;  %v1095_v30 = vpop.permute.xlu0 %1094 }
 0x1fd   :  { %1276 = vst.msk [vmem:[#allocation2 + $0x68] sm:$0xff] %vm1262_vm10, %v1097_v1  ;;  %1275 = vst.msk [vmem:[#allocation2 + $0x60] sm:$0xff] %vm1262_vm10, %v1095_v30 }
 0x1fe   :  { %1334 = vst.msk [vmem:[#allocation2 + $0x6f] sm:$0x1] %vm1327_vm11, %v14374_v57  ;;  %1374 = vrot.lane.b32.xlu1 %v7432_v7, %s7265_s22  ;;  %1372 = vrot.lane.b32.xlu0 %v7437_v8, %s7265_s22 }
 0x200   :  { %v1101_v61 = vpop.permute.xlu1 %1100  ;;  %v1099_v29 = vpop.permute.xlu0 %1098 }
 0x201   :  { %1278 = vst.msk [vmem:[#allocation2 + $0x78] sm:$0xff] %vm1262_vm10, %v1101_v61  ;;  %1277 = vst.msk [vmem:[#allocation2 + $0x70] sm:$0xff] %vm1262_vm10, %v1099_v29 }
 0x202   :  { %1335 = vst.msk [vmem:[#allocation2 + $0x7f] sm:$0x1] %vm1327_vm11, %v14374_v57  ;;  %1378 = vrot.lane.b32.xlu1 %v7450_v9, %s7265_s22  ;;  %1376 = vrot.lane.b32.xlu0 %v7455_v10, %s7265_s22 }
 0x204   :  { %v1105_v3 = vpop.permute.xlu1 %1104  ;;  %v1103_v4 = vpop.permute.xlu0 %1102 }
 0x205   :  { %1280 = vst.msk [vmem:[#allocation2 + $0x88] sm:$0xff] %vm1262_vm10, %v1105_v3  ;;  %1279 = vst.msk [vmem:[#allocation2 + $0x80] sm:$0xff] %vm1262_vm10, %v1103_v4 }
 0x206   :  { %1336 = vst.msk [vmem:[#allocation2 + $0x8f] sm:$0x1] %vm1327_vm11, %v14374_v57  ;;  %1382 = vrot.lane.b32.xlu1 %v7460_v11, %s7265_s22  ;;  %1380 = vrot.lane.b32.xlu0 %v7471_v12, %s7265_s22 }
 0x208   :  { %v1109_v1 = vpop.permute.xlu1 %1108  ;;  %v1107_v30 = vpop.permute.xlu0 %1106 }
 0x209   :  { %1282 = vst.msk [vmem:[#allocation2 + $0x98] sm:$0xff] %vm1262_vm10, %v1109_v1  ;;  %1281 = vst.msk [vmem:[#allocation2 + $0x90] sm:$0xff] %vm1262_vm10, %v1107_v30 }
 0x20a   :  { %1337 = vst.msk [vmem:[#allocation2 + $0x9f] sm:$0x1] %vm1327_vm11, %v14374_v57  ;;  %1386 = vrot.lane.b32.xlu1 %v7476_v13, %s7265_s22  ;;  %1384 = vrot.lane.b32.xlu0 %v7481_v14, %s7265_s22 }
 0x20c   :  { %v1113_v61 = vpop.permute.xlu1 %1112  ;;  %v1111_v29 = vpop.permute.xlu0 %1110 }
 0x20d   :  { %1284 = vst.msk [vmem:[#allocation2 + $0xa8] sm:$0xff] %vm1262_vm10, %v1113_v61  ;;  %1283 = vst.msk [vmem:[#allocation2 + $0xa0] sm:$0xff] %vm1262_vm10, %v1111_v29 }
 0x20e   :  { %1338 = vst.msk [vmem:[#allocation2 + $0xaf] sm:$0x1] %vm1327_vm11, %v14374_v57  ;;  %1390 = vrot.lane.b32.xlu1 %v7496_v15, %s7265_s22  ;;  %1388 = vrot.lane.b32.xlu0 %v7501_v16, %s7265_s22 }
 0x210   :  { %v1117_v3 = vpop.permute.xlu1 %1116  ;;  %v1115_v4 = vpop.permute.xlu0 %1114 }
 0x211   :  { %1286 = vst.msk [vmem:[#allocation2 + $0xb8] sm:$0xff] %vm1262_vm10, %v1117_v3  ;;  %1285 = vst.msk [vmem:[#allocation2 + $0xb0] sm:$0xff] %vm1262_vm10, %v1115_v4 }
 0x212   :  { %1339 = vst.msk [vmem:[#allocation2 + $0xbf] sm:$0x1] %vm1327_vm11, %v14374_v57  ;;  %1394 = vrot.lane.b32.xlu1 %v7512_v17, %s7265_s22  ;;  %1392 = vrot.lane.b32.xlu0 %v7517_v18, %s7265_s22 }
 0x214   :  { %v1121_v1 = vpop.permute.xlu1 %1120  ;;  %v1119_v30 = vpop.permute.xlu0 %1118 }
 0x215   :  { %1288 = vst.msk [vmem:[#allocation2 + $0xc8] sm:$0xff] %vm1262_vm10, %v1121_v1  ;;  %1287 = vst.msk [vmem:[#allocation2 + $0xc0] sm:$0xff] %vm1262_vm10, %v1119_v30 }
 0x216   :  { %1340 = vst.msk [vmem:[#allocation2 + $0xcf] sm:$0x1] %vm1327_vm11, %v14374_v57  ;;  %1398 = vrot.lane.b32.xlu1 %v7522_v19, %s7265_s22  ;;  %1396 = vrot.lane.b32.xlu0 %v7531_v20, %s7265_s22 }
 0x218   :  { %v1125_v61 = vpop.permute.xlu1 %1124  ;;  %v1123_v29 = vpop.permute.xlu0 %1122 }
 0x219   :  { %1290 = vst.msk [vmem:[#allocation2 + $0xd8] sm:$0xff] %vm1262_vm10, %v1125_v61  ;;  %1289 = vst.msk [vmem:[#allocation2 + $0xd0] sm:$0xff] %vm1262_vm10, %v1123_v29  ;;  %v14382_v61 = vld [vmem:[#allocation4_spill] sm:$0xff]  ;;  %v14383_v29 = vld [vmem:[#allocation5_spill] sm:$0xff] }
 0x21a   :  { %1341 = vst.msk [vmem:[#allocation2 + $0xdf] sm:$0x1] %vm1327_vm11, %v14374_v57  ;;  %1402 = vrot.lane.b32.xlu1 %v7536_v21, %s7265_s22  ;;  %1400 = vrot.lane.b32.xlu0 %v7541_v22, %s7265_s22 }
 0x21c   :  { %v1129_v3 = vpop.permute.xlu1 %1128  ;;  %v1127_v4 = vpop.permute.xlu0 %1126 }
 0x21d   :  { %1292 = vst.msk [vmem:[#allocation2 + $0xe8] sm:$0xff] %vm1262_vm10, %v1129_v3  ;;  %1291 = vst.msk [vmem:[#allocation2 + $0xe0] sm:$0xff] %vm1262_vm10, %v1127_v4 }
 0x21e   :  { %1342 = vst.msk [vmem:[#allocation2 + $0xef] sm:$0x1] %vm1327_vm11, %v14374_v57  ;;  %1406 = vrot.lane.b32.xlu1 %v7552_v23, %s7265_s22  ;;  %1404 = vrot.lane.b32.xlu0 %v7557_v24, %s7265_s22 }
 0x220   :  { %v1133_v1 = vpop.permute.xlu1 %1132  ;;  %v1131_v30 = vpop.permute.xlu0 %1130 }
 0x221   :  { %1294 = vst.msk [vmem:[#allocation2 + $0xf8] sm:$0xff] %vm1262_vm10, %v1133_v1  ;;  %1293 = vst.msk [vmem:[#allocation2 + $0xf0] sm:$0xff] %vm1262_vm10, %v1131_v30 }
 0x222   :  { %1343 = vst.msk [vmem:[#allocation2 + $0xff] sm:$0x1] %vm1327_vm11, %v14374_v57  ;;  %1410 = vrot.lane.b32.xlu1 %v14382_v61, %s7265_s22  ;;  %1408 = vrot.lane.b32.xlu0 %v14383_v29, %s7265_s22 }
 0x224   :  { %v1137_v3 = vpop.permute.xlu1 %1136  ;;  %v1135_v4 = vpop.permute.xlu0 %1134 }
 0x225   :  { %1296 = vst.msk [vmem:[#allocation2 + $0x108] sm:$0xff] %vm1262_vm10, %v1137_v3  ;;  %1295 = vst.msk [vmem:[#allocation2 + $0x100] sm:$0xff] %vm1262_vm10, %v1135_v4 }
 0x226   :  { %1344 = vst.msk [vmem:[#allocation2 + $0x10f] sm:$0x1] %vm1327_vm11, %v14374_v57  ;;  %1414 = vrot.lane.b32.xlu1 %v7582_v27, %s7265_s22  ;;  %1412 = vrot.lane.b32.xlu0 %v7593_v28, %s7265_s22 }
 0x228   :  { %v1141_v1 = vpop.permute.xlu1 %1140  ;;  %v1139_v30 = vpop.permute.xlu0 %1138 }
 0x229   :  { %1298 = vst.msk [vmem:[#allocation2 + $0x118] sm:$0xff] %vm1262_vm10, %v1141_v1  ;;  %1297 = vst.msk [vmem:[#allocation2 + $0x110] sm:$0xff] %vm1262_vm10, %v1139_v30 }
 0x22a   :  { %1345 = vst.msk [vmem:[#allocation2 + $0x11f] sm:$0x1] %vm1327_vm11, %v14374_v57  ;;  %1418 = vrot.lane.b32.xlu1 %v14377_v26, %s7265_s22  ;;  %1416 = vrot.lane.b32.xlu0 %v14378_v25, %s7265_s22 }
 0x22c   :  { %v1145_v3 = vpop.permute.xlu1 %1144  ;;  %v1143_v4 = vpop.permute.xlu0 %1142 }
 0x22d   :  { %1300 = vst.msk [vmem:[#allocation2 + $0x128] sm:$0xff] %vm1262_vm10, %v1145_v3  ;;  %1299 = vst.msk [vmem:[#allocation2 + $0x120] sm:$0xff] %vm1262_vm10, %v1143_v4 }
 0x22e   :  { %1346 = vst.msk [vmem:[#allocation2 + $0x12f] sm:$0x1] %vm1327_vm11, %v14374_v57  ;;  %1422 = vrot.lane.b32.xlu1 %v8316_v55, %s7265_s22  ;;  %1420 = vrot.lane.b32.xlu0 %v8321_v62, %s7265_s22 }
 0x230   :  { %v1149_v1 = vpop.permute.xlu1 %1148  ;;  %v1147_v30 = vpop.permute.xlu0 %1146 }
 0x231   :  { %1302 = vst.msk [vmem:[#allocation2 + $0x138] sm:$0xff] %vm1262_vm10, %v1149_v1  ;;  %1301 = vst.msk [vmem:[#allocation2 + $0x130] sm:$0xff] %vm1262_vm10, %v1147_v30 }
 0x232   :  { %1347 = vst.msk [vmem:[#allocation2 + $0x13f] sm:$0x1] %vm1327_vm11, %v14374_v57  ;;  %1426 = vrot.lane.b32.xlu1 %v7612_v31, %s7265_s22  ;;  %1424 = vrot.lane.b32.xlu0 %v7617_v32, %s7265_s22 }
 0x234   :  { %v1153_v3 = vpop.permute.xlu1 %1152  ;;  %v1151_v55 = vpop.permute.xlu0 %1150 }
 0x235   :  { %1304 = vst.msk [vmem:[#allocation2 + $0x148] sm:$0xff] %vm1262_vm10, %v1153_v3  ;;  %1303 = vst.msk [vmem:[#allocation2 + $0x140] sm:$0xff] %vm1262_vm10, %v1151_v55 }
 0x236   :  { %1348 = vst.msk [vmem:[#allocation2 + $0x14f] sm:$0x1] %vm1327_vm11, %v14374_v57  ;;  %1430 = vrot.lane.b32.xlu1 %v7622_v33, %s7265_s22  ;;  %1428 = vrot.lane.b32.xlu0 %v7633_v34, %s7265_s22 }
 0x238   :  { %v1157_v62 = vpop.permute.xlu1 %1156  ;;  %v1155_v31 = vpop.permute.xlu0 %1154 }
 0x239   :  { %1306 = vst.msk [vmem:[#allocation2 + $0x158] sm:$0xff] %vm1262_vm10, %v1157_v62  ;;  %1305 = vst.msk [vmem:[#allocation2 + $0x150] sm:$0xff] %vm1262_vm10, %v1155_v31 }
 0x23a   :  { %1349 = vst.msk [vmem:[#allocation2 + $0x15f] sm:$0x1] %vm1327_vm11, %v14374_v57  ;;  %1434 = vrot.lane.b32.xlu1 %v7638_v35, %s7265_s22  ;;  %1432 = vrot.lane.b32.xlu0 %v7643_v36, %s7265_s22 }
 0x23c   :  { %v1161_v32 = vpop.permute.xlu1 %1160  ;;  %v1159_v4 = vpop.permute.xlu0 %1158 }
 0x23d   :  { %1308 = vst.msk [vmem:[#allocation2 + $0x168] sm:$0xff] %vm1262_vm10, %v1161_v32  ;;  %1307 = vst.msk [vmem:[#allocation2 + $0x160] sm:$0xff] %vm1262_vm10, %v1159_v4 }
 0x23e   :  { %1350 = vst.msk [vmem:[#allocation2 + $0x16f] sm:$0x1] %vm1327_vm11, %v14374_v57  ;;  %1438 = vrot.lane.b32.xlu1 %v7658_v37, %s7265_s22  ;;  %1436 = vrot.lane.b32.xlu0 %v7663_v38, %s7265_s22 }
 0x240   :  { %v1165_v1 = vpop.permute.xlu1 %1164  ;;  %v1163_v30 = vpop.permute.xlu0 %1162 }
 0x241   :  { %1310 = vst.msk [vmem:[#allocation2 + $0x178] sm:$0xff] %vm1262_vm10, %v1165_v1  ;;  %1309 = vst.msk [vmem:[#allocation2 + $0x170] sm:$0xff] %vm1262_vm10, %v1163_v30 }
 0x242   :  { %1351 = vst.msk [vmem:[#allocation2 + $0x17f] sm:$0x1] %vm1327_vm11, %v14374_v57  ;;  %1442 = vrot.lane.b32.xlu1 %v7674_v39, %s7265_s22  ;;  %1440 = vrot.lane.b32.xlu0 %v7679_v40, %s7265_s22 }
 0x244   :  { %v1169_v3 = vpop.permute.xlu1 %1168  ;;  %v1167_v55 = vpop.permute.xlu0 %1166 }
 0x245   :  { %1312 = vst.msk [vmem:[#allocation2 + $0x188] sm:$0xff] %vm1262_vm10, %v1169_v3  ;;  %1311 = vst.msk [vmem:[#allocation2 + $0x180] sm:$0xff] %vm1262_vm10, %v1167_v55 }
 0x246   :  { %1352 = vst.msk [vmem:[#allocation2 + $0x18f] sm:$0x1] %vm1327_vm11, %v14374_v57  ;;  %1446 = vrot.lane.b32.xlu1 %v7684_v41, %s7265_s22  ;;  %1444 = vrot.lane.b32.xlu0 %v7693_v42, %s7265_s22 }
 0x248   :  { %v1173_v62 = vpop.permute.xlu1 %1172  ;;  %v1171_v31 = vpop.permute.xlu0 %1170 }
 0x249   :  { %1314 = vst.msk [vmem:[#allocation2 + $0x198] sm:$0xff] %vm1262_vm10, %v1173_v62  ;;  %1313 = vst.msk [vmem:[#allocation2 + $0x190] sm:$0xff] %vm1262_vm10, %v1171_v31  ;;  %v14384_v62 = vld [vmem:[#allocation8_spill] sm:$0xff] }
 0x24a   :  { %1353 = vst.msk [vmem:[#allocation2 + $0x19f] sm:$0x1] %vm1327_vm11, %v14374_v57  ;;  %1450 = vrot.lane.b32.xlu1 %v7698_v43, %s7265_s22  ;;  %1448 = vrot.lane.b32.xlu0 %v7703_v44, %s7265_s22 }
 0x24c   :  { %v1177_v32 = vpop.permute.xlu1 %1176  ;;  %v1175_v4 = vpop.permute.xlu0 %1174 }
 0x24d   :  { %1316 = vst.msk [vmem:[#allocation2 + $0x1a8] sm:$0xff] %vm1262_vm10, %v1177_v32  ;;  %1315 = vst.msk [vmem:[#allocation2 + $0x1a0] sm:$0xff] %vm1262_vm10, %v1175_v4 }
 0x24e   :  { %1354 = vst.msk [vmem:[#allocation2 + $0x1af] sm:$0x1] %vm1327_vm11, %v14374_v57  ;;  %1454 = vrot.lane.b32.xlu1 %v7714_v45, %s7265_s22  ;;  %1452 = vrot.lane.b32.xlu0 %v7719_v46, %s7265_s22 }
 0x250   :  { %v1181_v1 = vpop.permute.xlu1 %1180  ;;  %v1179_v30 = vpop.permute.xlu0 %1178 }
 0x251   :  { %1318 = vst.msk [vmem:[#allocation2 + $0x1b8] sm:$0xff] %vm1262_vm10, %v1181_v1  ;;  %1317 = vst.msk [vmem:[#allocation2 + $0x1b0] sm:$0xff] %vm1262_vm10, %v1179_v30 }
 0x252   :  { %1355 = vst.msk [vmem:[#allocation2 + $0x1bf] sm:$0x1] %vm1327_vm11, %v14374_v57  ;;  %1458 = vrot.lane.b32.xlu1 %v7724_v47, %s7265_s22  ;;  %1456 = vrot.lane.b32.xlu0 %v7739_v48, %s7265_s22 }
 0x254   :  { %v1185_v3 = vpop.permute.xlu1 %1184  ;;  %v1183_v55 = vpop.permute.xlu0 %1182 }
 0x255   :  { %1320 = vst.msk [vmem:[#allocation2 + $0x1c8] sm:$0xff] %vm1262_vm10, %v1185_v3  ;;  %1319 = vst.msk [vmem:[#allocation2 + $0x1c0] sm:$0xff] %vm1262_vm10, %v1183_v55  ;;  %v14385_v55 = vld [vmem:[#allocation11_spill] sm:$0xff] }
 0x256   :  { %1356 = vst.msk [vmem:[#allocation2 + $0x1cf] sm:$0x1] %vm1327_vm11, %v14374_v57  ;;  %1462 = vrot.lane.b32.xlu1 %v7744_v49, %s7265_s22  ;;  %1460 = vrot.lane.b32.xlu0 %v14384_v62, %s7265_s22 }
 0x258   :  { %v1189_v31 = vpop.permute.xlu1 %1188  ;;  %v1187_v32 = vpop.permute.xlu0 %1186 }
 0x259   :  { %1322 = vst.msk [vmem:[#allocation2 + $0x1d8] sm:$0xff] %vm1262_vm10, %v1189_v31  ;;  %1321 = vst.msk [vmem:[#allocation2 + $0x1d0] sm:$0xff] %vm1262_vm10, %v1187_v32 }
 0x25a   :  { %1357 = vst.msk [vmem:[#allocation2 + $0x1df] sm:$0x1] %vm1327_vm11, %v14374_v57  ;;  %1466 = vrot.lane.b32.xlu1 %v7760_v51, %s7265_s22  ;;  %1464 = vrot.lane.b32.xlu0 %v7765_v52, %s7265_s22 }
 0x25c   :  { %v1193_v4 = vpop.permute.xlu1 %1192  ;;  %v1191_v1 = vpop.permute.xlu0 %1190 }
 0x25d   :  { %1324 = vst.msk [vmem:[#allocation2 + $0x1e8] sm:$0xff] %vm1262_vm10, %v1193_v4  ;;  %1323 = vst.msk [vmem:[#allocation2 + $0x1e0] sm:$0xff] %vm1262_vm10, %v1191_v1  ;;  %v14386_v4 = vld [vmem:[#allocation12_spill] sm:$0xff] }
 0x25e   :  { %1358 = vst.msk [vmem:[#allocation2 + $0x1ef] sm:$0x1] %vm1327_vm11, %v14374_v57  ;;  %1470 = vrot.lane.b32.xlu1 %v14379_v50, %s7265_s22  ;;  %1468 = vrot.lane.b32.xlu0 %v7779_v54, %s7265_s22 }
 0x260   :  { %v1197_v30 = vpop.permute.xlu1 %1196  ;;  %v1195_v3 = vpop.permute.xlu0 %1194 }
 0x261   :  { %1326 = vst.msk [vmem:[#allocation2 + $0x1f8] sm:$0xff] %vm1262_vm10, %v1197_v30  ;;  %1325 = vst.msk [vmem:[#allocation2 + $0x1f0] sm:$0xff] %vm1262_vm10, %v1195_v3  ;;  %vm3479_vm10 = vcmask 57344  }
 0x262   :  { %1359 = vst.msk [vmem:[#allocation2 + $0x1ff] sm:$0x1] %vm1327_vm11, %v14374_v57  ;;  %1474 = vrot.lane.b32.xlu1 %v14385_v55, %s7265_s22  ;;  %1472 = vrot.lane.b32.xlu0 %v7795_v56, %s7265_s22  ;;  %vm3884_vm11 = vcmask 188544  }
 0x264   :  { %v1363_v31 = vpop.permute.xlu1 %1362  ;;  %v1361_v32 = vpop.permute.xlu0 %1360 }
 0x265   :  { %1555 = vst.msk [vmem:[#allocation2 + $0x7] sm:$0xff] %vm1554_vm12, %v1363_v31 }
 0x266   :  { %1553 = vst.msk [vmem:[#allocation2 - $0x1] sm:$0xfe] %vm1552_vm13, %v1361_v32  ;;  %1478 = vrot.lane.b32.xlu1 %v14386_v4, %s7265_s22  ;;  %1476 = vrot.lane.b32.xlu0 %v14380_v60, %s7265_s22 }
 0x267   :  { %1625 = vst.msk [vmem:[#allocation2] sm:$0x1] %vm1624_vm14, %v14374_v57 }
 0x268   :  { %v1367_v1 = vpop.permute.xlu1 %1366  ;;  %v1365_v30 = vpop.permute.xlu0 %1364 }
 0x269   :  { %1557 = vst.msk [vmem:[#allocation2 + $0x17] sm:$0xff] %vm1554_vm12, %v1367_v1 }
 0x26a   :  { %1556 = vst.msk [vmem:[#allocation2 + $0xf] sm:$0xfe] %vm1552_vm13, %v1365_v30  ;;  %1482 = vrot.lane.b32.xlu1 %v7824_v59, %s7265_s22  ;;  %1480 = vrot.lane.b32.xlu0 %v14381_v58, %s7265_s22 }
 0x26b   :  { %1626 = vst.msk [vmem:[#allocation2 + $0x10] sm:$0x1] %vm1624_vm14, %v14374_v57 }
 0x26c   :  { %v1371_v3 = vpop.permute.xlu1 %1370  ;;  %v1369_v31 = vpop.permute.xlu0 %1368 }
 0x26d   :  { %1559 = vst.msk [vmem:[#allocation2 + $0x27] sm:$0xff] %vm1554_vm12, %v1371_v3 }
 0x26e   :  { %1558 = vst.msk [vmem:[#allocation2 + $0x1f] sm:$0xfe] %vm1552_vm13, %v1369_v31  ;;  %1486 = vrot.lane.b32.xlu1 %v8450_v53, %s7265_s22  ;;  %1484 = vrot.lane.b32.xlu0 %v8455_v63, %s7265_s22 }
 0x26f   :  { %1627 = vst.msk [vmem:[#allocation2 + $0x20] sm:$0x1] %vm1624_vm14, %v14374_v57 }
 0x270   :  { %v1375_v32 = vpop.permute.xlu1 %1374  ;;  %v1373_v1 = vpop.permute.xlu0 %1372 }
 0x271   :  { %1561 = vst.msk [vmem:[#allocation2 + $0x37] sm:$0xff] %vm1554_vm12, %v1375_v32 }
 0x272   :  { %1560 = vst.msk [vmem:[#allocation2 + $0x2f] sm:$0xfe] %vm1552_vm13, %v1373_v1  ;;  %1659 = vrot.lane.b32.xlu1 %v7326_v2, %s7266_s23  ;;  %1657 = vrot.lane.b32.xlu0 %v7316_v0, %s7266_s23 }
 0x273   :  { %1628 = vst.msk [vmem:[#allocation2 + $0x30] sm:$0x1] %vm1624_vm14, %v14374_v57 }
 0x274   :  { %v1379_v53 = vpop.permute.xlu1 %1378  ;;  %v1377_v30 = vpop.permute.xlu0 %1376 }
 0x275   :  { %1563 = vst.msk [vmem:[#allocation2 + $0x47] sm:$0xff] %vm1554_vm12, %v1379_v53 }
 0x276   :  { %1562 = vst.msk [vmem:[#allocation2 + $0x3f] sm:$0xfe] %vm1552_vm13, %v1377_v30  ;;  %1663 = vrot.lane.b32.xlu1 %v7408_v5, %s7266_s23  ;;  %1661 = vrot.lane.b32.xlu0 %v7427_v6, %s7266_s23 }
 0x277   :  { %1629 = vst.msk [vmem:[#allocation2 + $0x40] sm:$0x1] %vm1624_vm14, %v14374_v57 }
 0x278   :  { %v1383_v63 = vpop.permute.xlu1 %1382  ;;  %v1381_v3 = vpop.permute.xlu0 %1380 }
 0x279   :  { %1565 = vst.msk [vmem:[#allocation2 + $0x57] sm:$0xff] %vm1554_vm12, %v1383_v63 }
 0x27a   :  { %1564 = vst.msk [vmem:[#allocation2 + $0x4f] sm:$0xfe] %vm1552_vm13, %v1381_v3  ;;  %1667 = vrot.lane.b32.xlu1 %v7432_v7, %s7266_s23  ;;  %1665 = vrot.lane.b32.xlu0 %v7437_v8, %s7266_s23 }
 0x27b   :  { %1630 = vst.msk [vmem:[#allocation2 + $0x50] sm:$0x1] %vm1624_vm14, %v14374_v57 }
 0x27c   :  { %v1387_v31 = vpop.permute.xlu1 %1386  ;;  %v1385_v32 = vpop.permute.xlu0 %1384 }
 0x27d   :  { %1567 = vst.msk [vmem:[#allocation2 + $0x67] sm:$0xff] %vm1554_vm12, %v1387_v31 }
 0x27e   :  { %1566 = vst.msk [vmem:[#allocation2 + $0x5f] sm:$0xfe] %vm1552_vm13, %v1385_v32  ;;  %1671 = vrot.lane.b32.xlu1 %v7450_v9, %s7266_s23  ;;  %1669 = vrot.lane.b32.xlu0 %v7455_v10, %s7266_s23 }
 0x27f   :  { %1631 = vst.msk [vmem:[#allocation2 + $0x60] sm:$0x1] %vm1624_vm14, %v14374_v57 }
 0x280   :  { %v1391_v1 = vpop.permute.xlu1 %1390  ;;  %v1389_v53 = vpop.permute.xlu0 %1388 }
 0x281   :  { %1569 = vst.msk [vmem:[#allocation2 + $0x77] sm:$0xff] %vm1554_vm12, %v1391_v1 }
 0x282   :  { %1568 = vst.msk [vmem:[#allocation2 + $0x6f] sm:$0xfe] %vm1552_vm13, %v1389_v53  ;;  %1675 = vrot.lane.b32.xlu1 %v7460_v11, %s7266_s23  ;;  %1673 = vrot.lane.b32.xlu0 %v7471_v12, %s7266_s23 }
 0x283   :  { %1632 = vst.msk [vmem:[#allocation2 + $0x70] sm:$0x1] %vm1624_vm14, %v14374_v57 }
 0x284   :  { %v1395_v30 = vpop.permute.xlu1 %1394  ;;  %v1393_v63 = vpop.permute.xlu0 %1392 }
 0x285   :  { %1571 = vst.msk [vmem:[#allocation2 + $0x87] sm:$0xff] %vm1554_vm12, %v1395_v30 }
 0x286   :  { %1570 = vst.msk [vmem:[#allocation2 + $0x7f] sm:$0xfe] %vm1552_vm13, %v1393_v63  ;;  %1679 = vrot.lane.b32.xlu1 %v7476_v13, %s7266_s23  ;;  %1677 = vrot.lane.b32.xlu0 %v7481_v14, %s7266_s23 }
 0x287   :  { %1633 = vst.msk [vmem:[#allocation2 + $0x80] sm:$0x1] %vm1624_vm14, %v14374_v57 }
 0x288   :  { %v1399_v3 = vpop.permute.xlu1 %1398  ;;  %v1397_v31 = vpop.permute.xlu0 %1396 }
 0x289   :  { %1573 = vst.msk [vmem:[#allocation2 + $0x97] sm:$0xff] %vm1554_vm12, %v1399_v3 }
 0x28a   :  { %1572 = vst.msk [vmem:[#allocation2 + $0x8f] sm:$0xfe] %vm1552_vm13, %v1397_v31  ;;  %1683 = vrot.lane.b32.xlu1 %v7496_v15, %s7266_s23  ;;  %1681 = vrot.lane.b32.xlu0 %v7501_v16, %s7266_s23 }
 0x28b   :  { %1634 = vst.msk [vmem:[#allocation2 + $0x90] sm:$0x1] %vm1624_vm14, %v14374_v57 }
 0x28c   :  { %v1403_v32 = vpop.permute.xlu1 %1402  ;;  %v1401_v1 = vpop.permute.xlu0 %1400 }
 0x28d   :  { %1575 = vst.msk [vmem:[#allocation2 + $0xa7] sm:$0xff] %vm1554_vm12, %v1403_v32 }
 0x28e   :  { %1574 = vst.msk [vmem:[#allocation2 + $0x9f] sm:$0xfe] %vm1552_vm13, %v1401_v1  ;;  %1687 = vrot.lane.b32.xlu1 %v7512_v17, %s7266_s23  ;;  %1685 = vrot.lane.b32.xlu0 %v7517_v18, %s7266_s23 }
 0x28f   :  { %1635 = vst.msk [vmem:[#allocation2 + $0xa0] sm:$0x1] %vm1624_vm14, %v14374_v57 }
 0x290   :  { %v1407_v53 = vpop.permute.xlu1 %1406  ;;  %v1405_v30 = vpop.permute.xlu0 %1404 }
 0x291   :  { %1577 = vst.msk [vmem:[#allocation2 + $0xb7] sm:$0xff] %vm1554_vm12, %v1407_v53 }
 0x292   :  { %1576 = vst.msk [vmem:[#allocation2 + $0xaf] sm:$0xfe] %vm1552_vm13, %v1405_v30  ;;  %1691 = vrot.lane.b32.xlu1 %v7522_v19, %s7266_s23  ;;  %1689 = vrot.lane.b32.xlu0 %v7531_v20, %s7266_s23 }
 0x293   :  { %1636 = vst.msk [vmem:[#allocation2 + $0xb0] sm:$0x1] %vm1624_vm14, %v14374_v57 }
 0x294   :  { %v1411_v63 = vpop.permute.xlu1 %1410  ;;  %v1409_v3 = vpop.permute.xlu0 %1408 }
 0x295   :  { %1579 = vst.msk [vmem:[#allocation2 + $0xc7] sm:$0xff] %vm1554_vm12, %v1411_v63 }
 0x296   :  { %1578 = vst.msk [vmem:[#allocation2 + $0xbf] sm:$0xfe] %vm1552_vm13, %v1409_v3  ;;  %1695 = vrot.lane.b32.xlu1 %v7536_v21, %s7266_s23  ;;  %1693 = vrot.lane.b32.xlu0 %v7541_v22, %s7266_s23 }
 0x297   :  { %1637 = vst.msk [vmem:[#allocation2 + $0xc0] sm:$0x1] %vm1624_vm14, %v14374_v57 }
 0x298   :  { %v1415_v31 = vpop.permute.xlu1 %1414  ;;  %v1413_v32 = vpop.permute.xlu0 %1412 }
 0x299   :  { %1581 = vst.msk [vmem:[#allocation2 + $0xd7] sm:$0xff] %vm1554_vm12, %v1415_v31 }
 0x29a   :  { %1580 = vst.msk [vmem:[#allocation2 + $0xcf] sm:$0xfe] %vm1552_vm13, %v1413_v32  ;;  %1699 = vrot.lane.b32.xlu1 %v7552_v23, %s7266_s23  ;;  %1697 = vrot.lane.b32.xlu0 %v7557_v24, %s7266_s23 }
 0x29b   :  { %1638 = vst.msk [vmem:[#allocation2 + $0xd0] sm:$0x1] %vm1624_vm14, %v14374_v57 }
 0x29c   :  { %v1419_v1 = vpop.permute.xlu1 %1418  ;;  %v1417_v53 = vpop.permute.xlu0 %1416 }
 0x29d   :  { %1583 = vst.msk [vmem:[#allocation2 + $0xe7] sm:$0xff] %vm1554_vm12, %v1419_v1 }
 0x29e   :  { %1582 = vst.msk [vmem:[#allocation2 + $0xdf] sm:$0xfe] %vm1552_vm13, %v1417_v53  ;;  %1703 = vrot.lane.b32.xlu1 %v14382_v61, %s7266_s23  ;;  %1701 = vrot.lane.b32.xlu0 %v14383_v29, %s7266_s23  ;;  %v9050_v53 = vld [vmem:[%s14249_s0 + $0xf8] sm:$0xff] }
 0x29f   :  { %1639 = vst.msk [vmem:[#allocation2 + $0xe0] sm:$0x1] %vm1624_vm14, %v14374_v57 }
 0x2a0   :  { %v1423_v30 = vpop.permute.xlu1 %1422  ;;  %v1421_v63 = vpop.permute.xlu0 %1420 }
 0x2a1   :  { %1585 = vst.msk [vmem:[#allocation2 + $0xf7] sm:$0xff] %vm1554_vm12, %v1423_v30  ;;  %v9057_v30 = vld [vmem:[%s14249_s0 + $0xf0] sm:$0xff] }
 0x2a2   :  { %1584 = vst.msk [vmem:[#allocation2 + $0xef] sm:$0xfe] %vm1552_vm13, %v1421_v63  ;;  %1707 = vrot.lane.b32.xlu1 %v7582_v27, %s7266_s23  ;;  %1705 = vrot.lane.b32.xlu0 %v7593_v28, %s7266_s23 }
 0x2a3   :  { %1621 = vst.msk [vmem:[#allocation2 + $0xf8] sm:$0xff] %vm1619_vm15, %v14374_v57  ;;  %1620 = vst.msk [vmem:[#allocation2 + $0xf0] sm:$0xff] %vm1619_vm15, %v14374_v57 }
 0x2a4   :  { %1900 = vst.msk [vmem:[#allocation2 + $0xf8] sm:$0xff] %vm1898_vm0, %v14374_v57  ;;  %v1427_v3 = vpop.permute.xlu1 %1426  ;;  %v1425_v31 = vpop.permute.xlu0 %1424 }
 0x2a5   :  { %1640 = vst.msk [vmem:[#allocation2 + $0xf0] sm:$0x1] %vm1624_vm14, %v14374_v57 }
 0x2a6   :  { %2145 = vst.msk [vmem:[#allocation2 + $0xf8] sm:$0xff] %vm2143_vm1, %v14374_v57  ;;  %1711 = vrot.lane.b32.xlu1 %v14377_v26, %s7266_s23  ;;  %1709 = vrot.lane.b32.xlu0 %v14378_v25, %s7266_s23 }
 0x2a7   :  { %1899 = vst.msk [vmem:[#allocation2 + $0xf0] sm:$0xff] %vm1898_vm0, %v14374_v57 }
 0x2a8   :  { %2164 = vst.msk [vmem:[#allocation2 + $0xff] sm:$0x1] %vm2148_vm2, %v14374_v57  ;;  %v1431_v32 = vpop.permute.xlu1 %1430  ;;  %v1429_v1 = vpop.permute.xlu0 %1428 }
 0x2a9   :  { %2144 = vst.msk [vmem:[#allocation2 + $0xf0] sm:$0xff] %vm2143_vm1, %v14374_v57 }
 0x2aa   :  { %1587 = vst.msk [vmem:[#allocation2 + $0x107] sm:$0xff] %vm1554_vm12, %v1427_v3  ;;  %1589 = vst.msk [vmem:[#allocation2 + $0x117] sm:$0xff] %vm1554_vm12, %v1431_v32  ;;  %1715 = vrot.lane.b32.xlu1 %v9050_v53, %s7266_s23  ;;  %1713 = vrot.lane.b32.xlu0 %v9057_v30, %s7266_s23 }
 0x2ab   :  { %1586 = vst.msk [vmem:[#allocation2 + $0xff] sm:$0xfe] %vm1552_vm13, %v1425_v31  ;;  %1588 = vst.msk [vmem:[#allocation2 + $0x10f] sm:$0xfe] %vm1552_vm13, %v1429_v1 }
 0x2ac   :  { %1641 = vst.msk [vmem:[#allocation2 + $0x100] sm:$0x1] %vm1624_vm14, %v14374_v57  ;;  %1642 = vst.msk [vmem:[#allocation2 + $0x110] sm:$0x1] %vm1624_vm14, %v14374_v57  ;;  %v1435_v63 = vpop.permute.xlu1 %1434  ;;  %v1433_v3 = vpop.permute.xlu0 %1432 }
 0x2ad   :  { %1591 = vst.msk [vmem:[#allocation2 + $0x127] sm:$0xff] %vm1554_vm12, %v1435_v63 }
 0x2ae   :  { %1590 = vst.msk [vmem:[#allocation2 + $0x11f] sm:$0xfe] %vm1552_vm13, %v1433_v3  ;;  %1719 = vrot.lane.b32.xlu1 %v7622_v33, %s7266_s23  ;;  %1717 = vrot.lane.b32.xlu0 %v7633_v34, %s7266_s23 }
 0x2af   :  { %1643 = vst.msk [vmem:[#allocation2 + $0x120] sm:$0x1] %vm1624_vm14, %v14374_v57 }
 0x2b0   :  { %v1439_v31 = vpop.permute.xlu1 %1438  ;;  %v1437_v32 = vpop.permute.xlu0 %1436 }
 0x2b1   :  { %1593 = vst.msk [vmem:[#allocation2 + $0x137] sm:$0xff] %vm1554_vm12, %v1439_v31 }
 0x2b2   :  { %1592 = vst.msk [vmem:[#allocation2 + $0x12f] sm:$0xfe] %vm1552_vm13, %v1437_v32  ;;  %1723 = vrot.lane.b32.xlu1 %v7638_v35, %s7266_s23  ;;  %1721 = vrot.lane.b32.xlu0 %v7643_v36, %s7266_s23 }
 0x2b3   :  { %1644 = vst.msk [vmem:[#allocation2 + $0x130] sm:$0x1] %vm1624_vm14, %v14374_v57 }
 0x2b4   :  { %v1443_v1 = vpop.permute.xlu1 %1442  ;;  %v1441_v63 = vpop.permute.xlu0 %1440 }
 0x2b5   :  { %1595 = vst.msk [vmem:[#allocation2 + $0x147] sm:$0xff] %vm1554_vm12, %v1443_v1 }
 0x2b6   :  { %1594 = vst.msk [vmem:[#allocation2 + $0x13f] sm:$0xfe] %vm1552_vm13, %v1441_v63  ;;  %1727 = vrot.lane.b32.xlu1 %v7658_v37, %s7266_s23  ;;  %1725 = vrot.lane.b32.xlu0 %v7663_v38, %s7266_s23 }
 0x2b7   :  { %1645 = vst.msk [vmem:[#allocation2 + $0x140] sm:$0x1] %vm1624_vm14, %v14374_v57 }
 0x2b8   :  { %v1447_v3 = vpop.permute.xlu1 %1446  ;;  %v1445_v31 = vpop.permute.xlu0 %1444 }
 0x2b9   :  { %1597 = vst.msk [vmem:[#allocation2 + $0x157] sm:$0xff] %vm1554_vm12, %v1447_v3 }
 0x2ba   :  { %1596 = vst.msk [vmem:[#allocation2 + $0x14f] sm:$0xfe] %vm1552_vm13, %v1445_v31  ;;  %1731 = vrot.lane.b32.xlu1 %v7674_v39, %s7266_s23  ;;  %1729 = vrot.lane.b32.xlu0 %v7679_v40, %s7266_s23 }
 0x2bb   :  { %1646 = vst.msk [vmem:[#allocation2 + $0x150] sm:$0x1] %vm1624_vm14, %v14374_v57 }
 0x2bc   :  { %v1451_v32 = vpop.permute.xlu1 %1450  ;;  %v1449_v1 = vpop.permute.xlu0 %1448 }
 0x2bd   :  { %1599 = vst.msk [vmem:[#allocation2 + $0x167] sm:$0xff] %vm1554_vm12, %v1451_v32 }
 0x2be   :  { %1598 = vst.msk [vmem:[#allocation2 + $0x15f] sm:$0xfe] %vm1552_vm13, %v1449_v1  ;;  %1735 = vrot.lane.b32.xlu1 %v7684_v41, %s7266_s23  ;;  %1733 = vrot.lane.b32.xlu0 %v7693_v42, %s7266_s23 }
 0x2bf   :  { %1647 = vst.msk [vmem:[#allocation2 + $0x160] sm:$0x1] %vm1624_vm14, %v14374_v57 }
 0x2c0   :  { %v1455_v63 = vpop.permute.xlu1 %1454  ;;  %v1453_v3 = vpop.permute.xlu0 %1452 }
 0x2c1   :  { %1601 = vst.msk [vmem:[#allocation2 + $0x177] sm:$0xff] %vm1554_vm12, %v1455_v63 }
 0x2c2   :  { %1600 = vst.msk [vmem:[#allocation2 + $0x16f] sm:$0xfe] %vm1552_vm13, %v1453_v3  ;;  %1739 = vrot.lane.b32.xlu1 %v7698_v43, %s7266_s23  ;;  %1737 = vrot.lane.b32.xlu0 %v7703_v44, %s7266_s23 }
 0x2c3   :  { %1648 = vst.msk [vmem:[#allocation2 + $0x170] sm:$0x1] %vm1624_vm14, %v14374_v57 }
 0x2c4   :  { %v1459_v31 = vpop.permute.xlu1 %1458  ;;  %v1457_v32 = vpop.permute.xlu0 %1456 }
 0x2c5   :  { %1603 = vst.msk [vmem:[#allocation2 + $0x187] sm:$0xff] %vm1554_vm12, %v1459_v31 }
 0x2c6   :  { %1602 = vst.msk [vmem:[#allocation2 + $0x17f] sm:$0xfe] %vm1552_vm13, %v1457_v32  ;;  %1743 = vrot.lane.b32.xlu1 %v7714_v45, %s7266_s23  ;;  %1741 = vrot.lane.b32.xlu0 %v7719_v46, %s7266_s23 }
 0x2c7   :  { %1649 = vst.msk [vmem:[#allocation2 + $0x180] sm:$0x1] %vm1624_vm14, %v14374_v57 }
 0x2c8   :  { %v1463_v1 = vpop.permute.xlu1 %1462  ;;  %v1461_v63 = vpop.permute.xlu0 %1460 }
 0x2c9   :  { %1605 = vst.msk [vmem:[#allocation2 + $0x197] sm:$0xff] %vm1554_vm12, %v1463_v1 }
 0x2ca   :  { %1604 = vst.msk [vmem:[#allocation2 + $0x18f] sm:$0xfe] %vm1552_vm13, %v1461_v63  ;;  %1747 = vrot.lane.b32.xlu1 %v7724_v47, %s7266_s23  ;;  %1745 = vrot.lane.b32.xlu0 %v7739_v48, %s7266_s23 }
 0x2cb   :  { %1650 = vst.msk [vmem:[#allocation2 + $0x190] sm:$0x1] %vm1624_vm14, %v14374_v57 }
 0x2cc   :  { %v1467_v3 = vpop.permute.xlu1 %1466  ;;  %v1465_v31 = vpop.permute.xlu0 %1464 }
 0x2cd   :  { %1607 = vst.msk [vmem:[#allocation2 + $0x1a7] sm:$0xff] %vm1554_vm12, %v1467_v3 }
 0x2ce   :  { %1606 = vst.msk [vmem:[#allocation2 + $0x19f] sm:$0xfe] %vm1552_vm13, %v1465_v31  ;;  %1751 = vrot.lane.b32.xlu1 %v7744_v49, %s7266_s23  ;;  %1749 = vrot.lane.b32.xlu0 %v14384_v62, %s7266_s23 }
 0x2cf   :  { %1651 = vst.msk [vmem:[#allocation2 + $0x1a0] sm:$0x1] %vm1624_vm14, %v14374_v57 }
 0x2d0   :  { %v1471_v32 = vpop.permute.xlu1 %1470  ;;  %v1469_v1 = vpop.permute.xlu0 %1468 }
 0x2d1   :  { %1609 = vst.msk [vmem:[#allocation2 + $0x1b7] sm:$0xff] %vm1554_vm12, %v1471_v32 }
 0x2d2   :  { %1608 = vst.msk [vmem:[#allocation2 + $0x1af] sm:$0xfe] %vm1552_vm13, %v1469_v1  ;;  %1755 = vrot.lane.b32.xlu1 %v7760_v51, %s7266_s23  ;;  %1753 = vrot.lane.b32.xlu0 %v7765_v52, %s7266_s23 }
 0x2d3   :  { %1652 = vst.msk [vmem:[#allocation2 + $0x1b0] sm:$0x1] %vm1624_vm14, %v14374_v57 }
 0x2d4   :  { %v1475_v63 = vpop.permute.xlu1 %1474  ;;  %v1473_v3 = vpop.permute.xlu0 %1472 }
 0x2d5   :  { %1611 = vst.msk [vmem:[#allocation2 + $0x1c7] sm:$0xff] %vm1554_vm12, %v1475_v63 }
 0x2d6   :  { %1610 = vst.msk [vmem:[#allocation2 + $0x1bf] sm:$0xfe] %vm1552_vm13, %v1473_v3  ;;  %1759 = vrot.lane.b32.xlu1 %v14379_v50, %s7266_s23  ;;  %1757 = vrot.lane.b32.xlu0 %v7779_v54, %s7266_s23 }
 0x2d7   :  { %1653 = vst.msk [vmem:[#allocation2 + $0x1c0] sm:$0x1] %vm1624_vm14, %v14374_v57 }
 0x2d8   :  { %v1479_v31 = vpop.permute.xlu1 %1478  ;;  %v1477_v32 = vpop.permute.xlu0 %1476 }
 0x2d9   :  { %1613 = vst.msk [vmem:[#allocation2 + $0x1d7] sm:$0xff] %vm1554_vm12, %v1479_v31 }
 0x2da   :  { %1612 = vst.msk [vmem:[#allocation2 + $0x1cf] sm:$0xfe] %vm1552_vm13, %v1477_v32  ;;  %1763 = vrot.lane.b32.xlu1 %v14385_v55, %s7266_s23  ;;  %1761 = vrot.lane.b32.xlu0 %v7795_v56, %s7266_s23 }
 0x2db   :  { %1654 = vst.msk [vmem:[#allocation2 + $0x1d0] sm:$0x1] %vm1624_vm14, %v14374_v57 }
 0x2dc   :  { %v1483_v1 = vpop.permute.xlu1 %1482  ;;  %v1481_v63 = vpop.permute.xlu0 %1480 }
 0x2dd   :  { %1615 = vst.msk [vmem:[#allocation2 + $0x1e7] sm:$0xff] %vm1554_vm12, %v1483_v1 }
 0x2de   :  { %1614 = vst.msk [vmem:[#allocation2 + $0x1df] sm:$0xfe] %vm1552_vm13, %v1481_v63  ;;  %1767 = vrot.lane.b32.xlu1 %v14386_v4, %s7266_s23  ;;  %1765 = vrot.lane.b32.xlu0 %v14380_v60, %s7266_s23  ;;  %v9192_v63 = vld [vmem:[%s14249_s0 + $0x1f8] sm:$0xff] }
 0x2df   :  { %1655 = vst.msk [vmem:[#allocation2 + $0x1e0] sm:$0x1] %vm1624_vm14, %v14374_v57  ;;  %14387 = vst [vmem:[#allocation6_spill] sm:$0xff] %v9192_v63 }
 0x2e0   :  { %v1487_v3 = vpop.permute.xlu1 %1486  ;;  %v1485_v31 = vpop.permute.xlu0 %1484 }
 0x2e1   :  { %1617 = vst.msk [vmem:[#allocation2 + $0x1f7] sm:$0xff] %vm1554_vm12, %v1487_v3  ;;  %v9199_v3 = vld [vmem:[%s14249_s0 + $0x1f0] sm:$0xff]  ;;  %vm3879_vm12 = vcmask 195712  }
 0x2e2   :  { %1616 = vst.msk [vmem:[#allocation2 + $0x1ef] sm:$0xfe] %vm1552_vm13, %v1485_v31  ;;  %1771 = vrot.lane.b32.xlu1 %v7824_v59, %s7266_s23  ;;  %1769 = vrot.lane.b32.xlu0 %v14381_v58, %s7266_s23  ;;  %14388 = vst [vmem:[#allocation7_spill] sm:$0xff] %v9199_v3  ;;  %vm4158_vm13 = vcmask 254144  }
 0x2e3   :  { %1623 = vst.msk [vmem:[#allocation2 + $0x1f8] sm:$0xff] %vm1619_vm15, %v14374_v57  ;;  %1622 = vst.msk [vmem:[#allocation2 + $0x1f0] sm:$0xff] %vm1619_vm15, %v14374_v57 }
 0x2e4   :  { %1902 = vst.msk [vmem:[#allocation2 + $0x1f8] sm:$0xff] %vm1898_vm0, %v14374_v57  ;;  %v1660_v32 = vpop.permute.xlu1 %1659  ;;  %v1658_v1 = vpop.permute.xlu0 %1657 }
 0x2e5   :  { %1656 = vst.msk [vmem:[#allocation2 + $0x1f0] sm:$0x1] %vm1624_vm14, %v14374_v57  ;;  %vm4097_vm14 = vcmask 195713  }
 0x2e6   :  { %2147 = vst.msk [vmem:[#allocation2 + $0x1f8] sm:$0xff] %vm2143_vm1, %v14374_v57  ;;  %1775 = vrot.lane.b32.xlu1 %v9192_v63, %s7266_s23  ;;  %1773 = vrot.lane.b32.xlu0 %v9199_v3, %s7266_s23 }
 0x2e7   :  { %1901 = vst.msk [vmem:[#allocation2 + $0x1f0] sm:$0xff] %vm1898_vm0, %v14374_v57 }
 0x2e8   :  { %2180 = vst.msk [vmem:[#allocation2 + $0x1ff] sm:$0x1] %vm2148_vm2, %v14374_v57  ;;  %v1664_v31 = vpop.permute.xlu1 %1663 }
 0x2e9   :  { %2146 = vst.msk [vmem:[#allocation2 + $0x1f0] sm:$0xff] %vm2143_vm1, %v14374_v57 }
 0x2ea   :  { %1839 = vst.msk [vmem:[#allocation2 + $0x9] sm:$0x7f] %vm1838_vm3, %v1660_v32  ;;  %v1662_v32 = vpop.permute.xlu0 %1661  ;;  %1841 = vst.msk [vmem:[#allocation2 + $0x19] sm:$0x7f] %vm1838_vm3, %v1664_v31  ;;  %1905 = vrot.lane.b32.xlu1 %v7326_v2, %s7267_s10  ;;  %1903 = vrot.lane.b32.xlu0 %v7316_v0, %s7267_s10 }
 0x2eb   :  { %1837 = vst.msk [vmem:[#allocation2 + $0x1] sm:$0xff] %vm1619_vm15, %v1658_v1  ;;  %1840 = vst.msk [vmem:[#allocation2 + $0x11] sm:$0xff] %vm1619_vm15, %v1662_v32 }
 0x2ec   :  { %v1668_v1 = vpop.permute.xlu1 %1667 }
 0x2ed   :  { %1843 = vst.msk [vmem:[#allocation2 + $0x29] sm:$0x7f] %vm1838_vm3, %v1668_v1 }
 0x2ee   :  { %v1666_v63 = vpop.permute.xlu0 %1665  ;;  %1909 = vrot.lane.b32.xlu1 %v7408_v5, %s7267_s10  ;;  %1907 = vrot.lane.b32.xlu0 %v7427_v6, %s7267_s10 }
 0x2ef   :  { %1842 = vst.msk [vmem:[#allocation2 + $0x21] sm:$0xff] %vm1619_vm15, %v1666_v63 }
 0x2f0   :  { %v1672_v31 = vpop.permute.xlu1 %1671 }
 0x2f1   :  { %1845 = vst.msk [vmem:[#allocation2 + $0x39] sm:$0x7f] %vm1838_vm3, %v1672_v31 }
 0x2f2   :  { %v1670_v32 = vpop.permute.xlu0 %1669  ;;  %1913 = vrot.lane.b32.xlu1 %v7432_v7, %s7267_s10  ;;  %1911 = vrot.lane.b32.xlu0 %v7437_v8, %s7267_s10 }
 0x2f3   :  { %1844 = vst.msk [vmem:[#allocation2 + $0x31] sm:$0xff] %vm1619_vm15, %v1670_v32 }
 0x2f4   :  { %v1676_v1 = vpop.permute.xlu1 %1675 }
 0x2f5   :  { %1847 = vst.msk [vmem:[#allocation2 + $0x49] sm:$0x7f] %vm1838_vm3, %v1676_v1 }
 0x2f6   :  { %v1674_v63 = vpop.permute.xlu0 %1673  ;;  %1917 = vrot.lane.b32.xlu1 %v7450_v9, %s7267_s10  ;;  %1915 = vrot.lane.b32.xlu0 %v7455_v10, %s7267_s10 }
 0x2f7   :  { %1846 = vst.msk [vmem:[#allocation2 + $0x41] sm:$0xff] %vm1619_vm15, %v1674_v63 }
 0x2f8   :  { %v1680_v31 = vpop.permute.xlu1 %1679 }
 0x2f9   :  { %1849 = vst.msk [vmem:[#allocation2 + $0x59] sm:$0x7f] %vm1838_vm3, %v1680_v31 }
 0x2fa   :  { %v1678_v32 = vpop.permute.xlu0 %1677  ;;  %1921 = vrot.lane.b32.xlu1 %v7460_v11, %s7267_s10  ;;  %1919 = vrot.lane.b32.xlu0 %v7471_v12, %s7267_s10 }
 0x2fb   :  { %1848 = vst.msk [vmem:[#allocation2 + $0x51] sm:$0xff] %vm1619_vm15, %v1678_v32 }
 0x2fc   :  { %v1684_v1 = vpop.permute.xlu1 %1683 }
 0x2fd   :  { %1851 = vst.msk [vmem:[#allocation2 + $0x69] sm:$0x7f] %vm1838_vm3, %v1684_v1 }
 0x2fe   :  { %v1682_v63 = vpop.permute.xlu0 %1681  ;;  %1925 = vrot.lane.b32.xlu1 %v7476_v13, %s7267_s10  ;;  %1923 = vrot.lane.b32.xlu0 %v7481_v14, %s7267_s10 }
 0x2ff   :  { %1850 = vst.msk [vmem:[#allocation2 + $0x61] sm:$0xff] %vm1619_vm15, %v1682_v63 }
 0x300   :  { %v1688_v31 = vpop.permute.xlu1 %1687 }
 0x301   :  { %1853 = vst.msk [vmem:[#allocation2 + $0x79] sm:$0x7f] %vm1838_vm3, %v1688_v31 }
 0x302   :  { %v1686_v32 = vpop.permute.xlu0 %1685  ;;  %1929 = vrot.lane.b32.xlu1 %v7496_v15, %s7267_s10  ;;  %1927 = vrot.lane.b32.xlu0 %v7501_v16, %s7267_s10 }
 0x303   :  { %1852 = vst.msk [vmem:[#allocation2 + $0x71] sm:$0xff] %vm1619_vm15, %v1686_v32 }
 0x304   :  { %v1692_v1 = vpop.permute.xlu1 %1691 }
 0x305   :  { %1855 = vst.msk [vmem:[#allocation2 + $0x89] sm:$0x7f] %vm1838_vm3, %v1692_v1 }
 0x306   :  { %v1690_v63 = vpop.permute.xlu0 %1689  ;;  %1933 = vrot.lane.b32.xlu1 %v7512_v17, %s7267_s10  ;;  %1931 = vrot.lane.b32.xlu0 %v7517_v18, %s7267_s10 }
 0x307   :  { %1854 = vst.msk [vmem:[#allocation2 + $0x81] sm:$0xff] %vm1619_vm15, %v1690_v63 }
 0x308   :  { %v1696_v31 = vpop.permute.xlu1 %1695 }
 0x309   :  { %1857 = vst.msk [vmem:[#allocation2 + $0x99] sm:$0x7f] %vm1838_vm3, %v1696_v31 }
 0x30a   :  { %v1694_v32 = vpop.permute.xlu0 %1693  ;;  %1937 = vrot.lane.b32.xlu1 %v7522_v19, %s7267_s10  ;;  %1935 = vrot.lane.b32.xlu0 %v7531_v20, %s7267_s10 }
 0x30b   :  { %1856 = vst.msk [vmem:[#allocation2 + $0x91] sm:$0xff] %vm1619_vm15, %v1694_v32 }
 0x30c   :  { %v1700_v1 = vpop.permute.xlu1 %1699 }
 0x30d   :  { %1859 = vst.msk [vmem:[#allocation2 + $0xa9] sm:$0x7f] %vm1838_vm3, %v1700_v1 }
 0x30e   :  { %v1698_v63 = vpop.permute.xlu0 %1697  ;;  %1941 = vrot.lane.b32.xlu1 %v7536_v21, %s7267_s10  ;;  %1939 = vrot.lane.b32.xlu0 %v7541_v22, %s7267_s10 }
 0x30f   :  { %1858 = vst.msk [vmem:[#allocation2 + $0xa1] sm:$0xff] %vm1619_vm15, %v1698_v63 }
 0x310   :  { %v1704_v31 = vpop.permute.xlu1 %1703 }
 0x311   :  { %1861 = vst.msk [vmem:[#allocation2 + $0xb9] sm:$0x7f] %vm1838_vm3, %v1704_v31 }
 0x312   :  { %v1702_v32 = vpop.permute.xlu0 %1701  ;;  %1945 = vrot.lane.b32.xlu1 %v7552_v23, %s7267_s10  ;;  %1943 = vrot.lane.b32.xlu0 %v7557_v24, %s7267_s10 }
 0x313   :  { %1860 = vst.msk [vmem:[#allocation2 + $0xb1] sm:$0xff] %vm1619_vm15, %v1702_v32 }
 0x314   :  { %v1708_v1 = vpop.permute.xlu1 %1707 }
 0x315   :  { %1863 = vst.msk [vmem:[#allocation2 + $0xc9] sm:$0x7f] %vm1838_vm3, %v1708_v1 }
 0x316   :  { %v1706_v63 = vpop.permute.xlu0 %1705  ;;  %1949 = vrot.lane.b32.xlu1 %v14382_v61, %s7267_s10  ;;  %1947 = vrot.lane.b32.xlu0 %v14383_v29, %s7267_s10 }
 0x317   :  { %1862 = vst.msk [vmem:[#allocation2 + $0xc1] sm:$0xff] %vm1619_vm15, %v1706_v63 }
 0x318   :  { %v1712_v31 = vpop.permute.xlu1 %1711 }
 0x319   :  { %1865 = vst.msk [vmem:[#allocation2 + $0xd9] sm:$0x7f] %vm1838_vm3, %v1712_v31 }
 0x31a   :  { %v1710_v32 = vpop.permute.xlu0 %1709  ;;  %1953 = vrot.lane.b32.xlu1 %v7582_v27, %s7267_s10  ;;  %1951 = vrot.lane.b32.xlu0 %v7593_v28, %s7267_s10 }
 0x31b   :  { %1864 = vst.msk [vmem:[#allocation2 + $0xd1] sm:$0xff] %vm1619_vm15, %v1710_v32 }
 0x31c   :  { %v1716_v1 = vpop.permute.xlu1 %1715 }
 0x31d   :  { %1867 = vst.msk [vmem:[#allocation2 + $0xe9] sm:$0x7f] %vm1838_vm3, %v1716_v1 }
 0x31e   :  { %v1714_v63 = vpop.permute.xlu0 %1713  ;;  %1957 = vrot.lane.b32.xlu1 %v14377_v26, %s7267_s10  ;;  %1955 = vrot.lane.b32.xlu0 %v14378_v25, %s7267_s10 }
 0x31f   :  { %1866 = vst.msk [vmem:[#allocation2 + $0xe1] sm:$0xff] %vm1619_vm15, %v1714_v63 }
 0x320   :  { %v1720_v31 = vpop.permute.xlu1 %1719 }
 0x321   :  { %1869 = vst.msk [vmem:[#allocation2 + $0x109] sm:$0x7f] %vm1838_vm3, %v1720_v31 }
 0x322   :  { %v1718_v32 = vpop.permute.xlu0 %1717  ;;  %1961 = vrot.lane.b32.xlu1 %v9050_v53, %s7267_s10  ;;  %1959 = vrot.lane.b32.xlu0 %v9057_v30, %s7267_s10 }
 0x323   :  { %1868 = vst.msk [vmem:[#allocation2 + $0x101] sm:$0xff] %vm1619_vm15, %v1718_v32 }
 0x324   :  { %v1724_v1 = vpop.permute.xlu1 %1723 }
 0x325   :  { %1871 = vst.msk [vmem:[#allocation2 + $0x119] sm:$0x7f] %vm1838_vm3, %v1724_v1 }
 0x326   :  { %v1722_v63 = vpop.permute.xlu0 %1721  ;;  %1965 = vrot.lane.b32.xlu1 %v7622_v33, %s7267_s10  ;;  %1963 = vrot.lane.b32.xlu0 %v7633_v34, %s7267_s10 }
 0x327   :  { %1870 = vst.msk [vmem:[#allocation2 + $0x111] sm:$0xff] %vm1619_vm15, %v1722_v63 }
 0x328   :  { %v1728_v31 = vpop.permute.xlu1 %1727 }
 0x329   :  { %1873 = vst.msk [vmem:[#allocation2 + $0x129] sm:$0x7f] %vm1838_vm3, %v1728_v31 }
 0x32a   :  { %v1726_v32 = vpop.permute.xlu0 %1725  ;;  %1969 = vrot.lane.b32.xlu1 %v7638_v35, %s7267_s10  ;;  %1967 = vrot.lane.b32.xlu0 %v7643_v36, %s7267_s10 }
 0x32b   :  { %1872 = vst.msk [vmem:[#allocation2 + $0x121] sm:$0xff] %vm1619_vm15, %v1726_v32 }
 0x32c   :  { %v1732_v1 = vpop.permute.xlu1 %1731 }
 0x32d   :  { %1875 = vst.msk [vmem:[#allocation2 + $0x139] sm:$0x7f] %vm1838_vm3, %v1732_v1 }
 0x32e   :  { %v1730_v63 = vpop.permute.xlu0 %1729  ;;  %1973 = vrot.lane.b32.xlu1 %v7658_v37, %s7267_s10  ;;  %1971 = vrot.lane.b32.xlu0 %v7663_v38, %s7267_s10 }
 0x32f   :  { %1874 = vst.msk [vmem:[#allocation2 + $0x131] sm:$0xff] %vm1619_vm15, %v1730_v63 }
 0x330   :  { %v1736_v31 = vpop.permute.xlu1 %1735 }
 0x331   :  { %1877 = vst.msk [vmem:[#allocation2 + $0x149] sm:$0x7f] %vm1838_vm3, %v1736_v31 }
 0x332   :  { %v1734_v32 = vpop.permute.xlu0 %1733  ;;  %1977 = vrot.lane.b32.xlu1 %v7674_v39, %s7267_s10  ;;  %1975 = vrot.lane.b32.xlu0 %v7679_v40, %s7267_s10 }
 0x333   :  { %1876 = vst.msk [vmem:[#allocation2 + $0x141] sm:$0xff] %vm1619_vm15, %v1734_v32 }
 0x334   :  { %v1740_v1 = vpop.permute.xlu1 %1739 }
 0x335   :  { %1879 = vst.msk [vmem:[#allocation2 + $0x159] sm:$0x7f] %vm1838_vm3, %v1740_v1 }
 0x336   :  { %v1738_v63 = vpop.permute.xlu0 %1737  ;;  %1981 = vrot.lane.b32.xlu1 %v7684_v41, %s7267_s10  ;;  %1979 = vrot.lane.b32.xlu0 %v7693_v42, %s7267_s10 }
 0x337   :  { %1878 = vst.msk [vmem:[#allocation2 + $0x151] sm:$0xff] %vm1619_vm15, %v1738_v63 }
 0x338   :  { %v1744_v31 = vpop.permute.xlu1 %1743 }
 0x339   :  { %1881 = vst.msk [vmem:[#allocation2 + $0x169] sm:$0x7f] %vm1838_vm3, %v1744_v31 }
 0x33a   :  { %v1742_v32 = vpop.permute.xlu0 %1741  ;;  %1985 = vrot.lane.b32.xlu1 %v7698_v43, %s7267_s10  ;;  %1983 = vrot.lane.b32.xlu0 %v7703_v44, %s7267_s10 }
 0x33b   :  { %1880 = vst.msk [vmem:[#allocation2 + $0x161] sm:$0xff] %vm1619_vm15, %v1742_v32 }
 0x33c   :  { %v1748_v1 = vpop.permute.xlu1 %1747 }
 0x33d   :  { %1883 = vst.msk [vmem:[#allocation2 + $0x179] sm:$0x7f] %vm1838_vm3, %v1748_v1 }
 0x33e   :  { %v1746_v63 = vpop.permute.xlu0 %1745  ;;  %1989 = vrot.lane.b32.xlu1 %v7714_v45, %s7267_s10  ;;  %1987 = vrot.lane.b32.xlu0 %v7719_v46, %s7267_s10 }
 0x33f   :  { %1882 = vst.msk [vmem:[#allocation2 + $0x171] sm:$0xff] %vm1619_vm15, %v1746_v63 }
 0x340   :  { %v1752_v31 = vpop.permute.xlu1 %1751 }
 0x341   :  { %1885 = vst.msk [vmem:[#allocation2 + $0x189] sm:$0x7f] %vm1838_vm3, %v1752_v31 }
 0x342   :  { %v1750_v32 = vpop.permute.xlu0 %1749  ;;  %1993 = vrot.lane.b32.xlu1 %v7724_v47, %s7267_s10  ;;  %1991 = vrot.lane.b32.xlu0 %v7739_v48, %s7267_s10 }
 0x343   :  { %1884 = vst.msk [vmem:[#allocation2 + $0x181] sm:$0xff] %vm1619_vm15, %v1750_v32 }
 0x344   :  { %v1756_v1 = vpop.permute.xlu1 %1755 }
 0x345   :  { %1887 = vst.msk [vmem:[#allocation2 + $0x199] sm:$0x7f] %vm1838_vm3, %v1756_v1 }
 0x346   :  { %v1754_v63 = vpop.permute.xlu0 %1753  ;;  %1997 = vrot.lane.b32.xlu1 %v7744_v49, %s7267_s10  ;;  %1995 = vrot.lane.b32.xlu0 %v14384_v62, %s7267_s10 }
 0x347   :  { %1886 = vst.msk [vmem:[#allocation2 + $0x191] sm:$0xff] %vm1619_vm15, %v1754_v63 }
 0x348   :  { %v1760_v31 = vpop.permute.xlu1 %1759 }
 0x349   :  { %1889 = vst.msk [vmem:[#allocation2 + $0x1a9] sm:$0x7f] %vm1838_vm3, %v1760_v31 }
 0x34a   :  { %v1758_v32 = vpop.permute.xlu0 %1757  ;;  %2001 = vrot.lane.b32.xlu1 %v7760_v51, %s7267_s10  ;;  %1999 = vrot.lane.b32.xlu0 %v7765_v52, %s7267_s10 }
 0x34b   :  { %1888 = vst.msk [vmem:[#allocation2 + $0x1a1] sm:$0xff] %vm1619_vm15, %v1758_v32 }
 0x34c   :  { %v1764_v1 = vpop.permute.xlu1 %1763 }
 0x34d   :  { %1891 = vst.msk [vmem:[#allocation2 + $0x1b9] sm:$0x7f] %vm1838_vm3, %v1764_v1 }
 0x34e   :  { %v1762_v63 = vpop.permute.xlu0 %1761  ;;  %2005 = vrot.lane.b32.xlu1 %v14379_v50, %s7267_s10  ;;  %2003 = vrot.lane.b32.xlu0 %v7779_v54, %s7267_s10  ;;  %v7244_v54 = vld [vmem:[%s14250_s1] sm:$0xff]  }
 0x34f   :  { %1890 = vst.msk [vmem:[#allocation2 + $0x1b1] sm:$0xff] %vm1619_vm15, %v1762_v63  ;;  %7085 = vmatprep.subr.bf16.mxu0 %v7244_v54 }
 0x350   :  { %v1768_v31 = vpop.permute.xlu1 %1767  ;;  %7086 = vmatpush3.bf16.msra.mxu0 %v7244_v54  ;;  %v7246_v54 = vld [vmem:[%s14250_s1 + $0x10] ss:$0 sps:$4 sm:$0x33]  }
 0x351   :  { %1893 = vst.msk [vmem:[#allocation2 + $0x1c9] sm:$0x7f] %vm1838_vm3, %v1768_v31 }
 0x352   :  { %v1766_v32 = vpop.permute.xlu0 %1765  ;;  %2009 = vrot.lane.b32.xlu1 %v14385_v55, %s7267_s10  ;;  %2007 = vrot.lane.b32.xlu0 %v7795_v56, %s7267_s10 }
 0x353   :  { %1892 = vst.msk [vmem:[#allocation2 + $0x1c1] sm:$0xff] %vm1619_vm15, %v1766_v32 }
 0x354   :  { %v1772_v1 = vpop.permute.xlu1 %1771 }
 0x355   :  { %1895 = vst.msk [vmem:[#allocation2 + $0x1d9] sm:$0x7f] %vm1838_vm3, %v1772_v1  ;;  %v7245_v1 = vld [vmem:[%s14250_s1 + $0x8] sm:$0xff]   ;;  %s7268_s1 = smov 32  }
 0x356   :  { %v1770_v63 = vpop.permute.xlu0 %1769  ;;  %2013 = vrot.lane.b32.xlu1 %v14386_v4, %s7267_s10  ;;  %2011 = vrot.lane.b32.xlu0 %v14380_v60, %s7267_s10 }
 0x357   :  { %1894 = vst.msk [vmem:[#allocation2 + $0x1d1] sm:$0xff] %vm1619_vm15, %v1770_v63  ;;  %7087 = vmatprep.subr.bf16.mxu0 %v7245_v1 }
 0x358   :  { %v1776_v31 = vpop.permute.xlu1 %1775  ;;  %7088 = vmatpush3.bf16.msra.mxu0 %v7245_v1 }
 0x359   :  { %1897 = vst.msk [vmem:[#allocation2 + $0x1e9] sm:$0x7f] %vm1838_vm3, %v1776_v31  ;;  %v14389_v31 = vld [vmem:[#allocation6_spill] sm:$0xff]  ;;  %7229 = vmatprep.subr.msk.bf16.mxu0 %vm2637_vm4, %v7246_v54  ;;  %vm6036_vm3 = vcmask 1043456  }
 0x35a   :  { %v1774_v32 = vpop.permute.xlu0 %1773  ;;  %2017 = vrot.lane.b32.xlu1 %v7824_v59, %s7267_s10  ;;  %2015 = vrot.lane.b32.xlu0 %v14381_v58, %s7267_s10 }
 0x35b   :  { %1896 = vst.msk [vmem:[#allocation2 + $0x1e1] sm:$0xff] %vm1619_vm15, %v1774_v32  ;;  %v2639_v32 = vsel %vm2637_vm4, %v7246_v54, 0  ;;  %vm4389_vm15 = vcmask 260288   ;;  %vm4937_vm4 = vcmask 392512  }
 0x35c   :  { %v1906_v63 = vpop.permute.xlu1 %1905  ;;  %7090 = vmatpush3.bf16.msra.mxu0 %v2639_v32  ;;  %v14391_v32 = vld [vmem:[#allocation13_spill] sm:$0xff] }
 0x35d   :  { %2084 = vst.msk [vmem:[#allocation2 + $0x8] sm:$0xff] %vm1898_vm0, %v1906_v63 }
 0x35e   :  { %v1904_v60 = vpop.permute.xlu0 %1903  ;;  %2149 = vst.msk [vmem:[#allocation2 + $0xf] sm:$0x1] %vm2148_vm2, %v14374_v57  ;;  %2021 = vrot.lane.b32.xlu1 %v14389_v31, %s7267_s10  ;;  %2019 = vrot.lane.b32.xlu0 %v9199_v3, %s7267_s10 }
 0x35f   :  { %2083 = vst.msk [vmem:[#allocation2] sm:$0xff] %vm1898_vm0, %v1904_v60 }
 0x360   :  { %v1910_v1 = vpop.permute.xlu1 %1909 }
 0x361   :  { %2086 = vst.msk [vmem:[#allocation2 + $0x18] sm:$0xff] %vm1898_vm0, %v1910_v1 }
 0x362   :  { %v1908_v63 = vpop.permute.xlu0 %1907  ;;  %2150 = vst.msk [vmem:[#allocation2 + $0x1f] sm:$0x1] %vm2148_vm2, %v14374_v57  ;;  %2183 = vrot.lane.b32.xlu1 %v7326_v2, %s7268_s1  ;;  %2181 = vrot.lane.b32.xlu0 %v7316_v0, %s7268_s1 }
 0x363   :  { %2085 = vst.msk [vmem:[#allocation2 + $0x10] sm:$0xff] %vm1898_vm0, %v1908_v63  ;;  %v14392_v63 = vld [vmem:[#allocation7_spill] sm:$0xff] }
 0x364   :  { %v1914_v60 = vpop.permute.xlu1 %1913 }
 0x365   :  { %2088 = vst.msk [vmem:[#allocation2 + $0x28] sm:$0xff] %vm1898_vm0, %v1914_v60 }
 0x366   :  { %v1912_v3 = vpop.permute.xlu0 %1911  ;;  %2151 = vst.msk [vmem:[#allocation2 + $0x2f] sm:$0x1] %vm2148_vm2, %v14374_v57  ;;  %2187 = vrot.lane.b32.xlu1 %v7408_v5, %s7268_s1  ;;  %2185 = vrot.lane.b32.xlu0 %v7427_v6, %s7268_s1 }
 0x367   :  { %2087 = vst.msk [vmem:[#allocation2 + $0x20] sm:$0xff] %vm1898_vm0, %v1912_v3 }
 0x368   :  { %v1918_v54 = vpop.permute.xlu1 %1917 }
 0x369   :  { %2090 = vst.msk [vmem:[#allocation2 + $0x38] sm:$0xff] %vm1898_vm0, %v1918_v54 }
 0x36a   :  { %v1916_v2 = vpop.permute.xlu0 %1915  ;;  %2152 = vst.msk [vmem:[#allocation2 + $0x3f] sm:$0x1] %vm2148_vm2, %v14374_v57  ;;  %2191 = vrot.lane.b32.xlu1 %v7432_v7, %s7268_s1  ;;  %2189 = vrot.lane.b32.xlu0 %v7437_v8, %s7268_s1 }
 0x36b   :  { %2089 = vst.msk [vmem:[#allocation2 + $0x30] sm:$0xff] %vm1898_vm0, %v1916_v2 }
 0x36c   :  { %v1922_v0 = vpop.permute.xlu1 %1921 }
 0x36d   :  { %2092 = vst.msk [vmem:[#allocation2 + $0x48] sm:$0xff] %vm1898_vm0, %v1922_v0 }
 0x36e   :  { %v1920_v5 = vpop.permute.xlu0 %1919  ;;  %2153 = vst.msk [vmem:[#allocation2 + $0x4f] sm:$0x1] %vm2148_vm2, %v14374_v57  ;;  %2195 = vrot.lane.b32.xlu1 %v7450_v9, %s7268_s1  ;;  %2193 = vrot.lane.b32.xlu0 %v7455_v10, %s7268_s1 }
 0x36f   :  { %2091 = vst.msk [vmem:[#allocation2 + $0x40] sm:$0xff] %vm1898_vm0, %v1920_v5 }
 0x370   :  { %v1926_v6 = vpop.permute.xlu1 %1925 }
 0x371   :  { %2094 = vst.msk [vmem:[#allocation2 + $0x58] sm:$0xff] %vm1898_vm0, %v1926_v6 }
 0x372   :  { %v1924_v7 = vpop.permute.xlu0 %1923  ;;  %2154 = vst.msk [vmem:[#allocation2 + $0x5f] sm:$0x1] %vm2148_vm2, %v14374_v57  ;;  %2199 = vrot.lane.b32.xlu1 %v7460_v11, %s7268_s1  ;;  %2197 = vrot.lane.b32.xlu0 %v7471_v12, %s7268_s1 }
 0x373   :  { %2093 = vst.msk [vmem:[#allocation2 + $0x50] sm:$0xff] %vm1898_vm0, %v1924_v7 }
 0x374   :  { %v1930_v8 = vpop.permute.xlu1 %1929 }
 0x375   :  { %2096 = vst.msk [vmem:[#allocation2 + $0x68] sm:$0xff] %vm1898_vm0, %v1930_v8 }
 0x376   :  { %v1928_v9 = vpop.permute.xlu0 %1927  ;;  %2155 = vst.msk [vmem:[#allocation2 + $0x6f] sm:$0x1] %vm2148_vm2, %v14374_v57  ;;  %2203 = vrot.lane.b32.xlu1 %v7476_v13, %s7268_s1  ;;  %2201 = vrot.lane.b32.xlu0 %v7481_v14, %s7268_s1 }
 0x377   :  { %2095 = vst.msk [vmem:[#allocation2 + $0x60] sm:$0xff] %vm1898_vm0, %v1928_v9 }
 0x378   :  { %v1934_v10 = vpop.permute.xlu1 %1933 }
 0x379   :  { %2098 = vst.msk [vmem:[#allocation2 + $0x78] sm:$0xff] %vm1898_vm0, %v1934_v10 }
 0x37a   :  { %v1932_v11 = vpop.permute.xlu0 %1931  ;;  %2156 = vst.msk [vmem:[#allocation2 + $0x7f] sm:$0x1] %vm2148_vm2, %v14374_v57  ;;  %2207 = vrot.lane.b32.xlu1 %v7496_v15, %s7268_s1  ;;  %2205 = vrot.lane.b32.xlu0 %v7501_v16, %s7268_s1 }
 0x37b   :  { %2097 = vst.msk [vmem:[#allocation2 + $0x70] sm:$0xff] %vm1898_vm0, %v1932_v11 }
 0x37c   :  { %v1938_v12 = vpop.permute.xlu1 %1937 }
 0x37d   :  { %2100 = vst.msk [vmem:[#allocation2 + $0x88] sm:$0xff] %vm1898_vm0, %v1938_v12 }
 0x37e   :  { %v1936_v13 = vpop.permute.xlu0 %1935  ;;  %2157 = vst.msk [vmem:[#allocation2 + $0x8f] sm:$0x1] %vm2148_vm2, %v14374_v57  ;;  %2211 = vrot.lane.b32.xlu1 %v7512_v17, %s7268_s1  ;;  %2209 = vrot.lane.b32.xlu0 %v7517_v18, %s7268_s1 }
 0x37f   :  { %2099 = vst.msk [vmem:[#allocation2 + $0x80] sm:$0xff] %vm1898_vm0, %v1936_v13 }
 0x380   :  { %v1942_v14 = vpop.permute.xlu1 %1941 }
 0x381   :  { %2102 = vst.msk [vmem:[#allocation2 + $0x98] sm:$0xff] %vm1898_vm0, %v1942_v14 }
 0x382   :  { %v1940_v15 = vpop.permute.xlu0 %1939  ;;  %2158 = vst.msk [vmem:[#allocation2 + $0x9f] sm:$0x1] %vm2148_vm2, %v14374_v57  ;;  %2215 = vrot.lane.b32.xlu1 %v7522_v19, %s7268_s1  ;;  %2213 = vrot.lane.b32.xlu0 %v7531_v20, %s7268_s1 }
 0x383   :  { %2101 = vst.msk [vmem:[#allocation2 + $0x90] sm:$0xff] %vm1898_vm0, %v1940_v15 }
 0x384   :  { %v1946_v16 = vpop.permute.xlu1 %1945 }
 0x385   :  { %2104 = vst.msk [vmem:[#allocation2 + $0xa8] sm:$0xff] %vm1898_vm0, %v1946_v16 }
 0x386   :  { %v1944_v17 = vpop.permute.xlu0 %1943  ;;  %2159 = vst.msk [vmem:[#allocation2 + $0xaf] sm:$0x1] %vm2148_vm2, %v14374_v57  ;;  %2219 = vrot.lane.b32.xlu1 %v7536_v21, %s7268_s1  ;;  %2217 = vrot.lane.b32.xlu0 %v7541_v22, %s7268_s1 }
 0x387   :  { %2103 = vst.msk [vmem:[#allocation2 + $0xa0] sm:$0xff] %vm1898_vm0, %v1944_v17 }
 0x388   :  { %v1950_v18 = vpop.permute.xlu1 %1949 }
 0x389   :  { %2106 = vst.msk [vmem:[#allocation2 + $0xb8] sm:$0xff] %vm1898_vm0, %v1950_v18 }
 0x38a   :  { %v1948_v19 = vpop.permute.xlu0 %1947  ;;  %2160 = vst.msk [vmem:[#allocation2 + $0xbf] sm:$0x1] %vm2148_vm2, %v14374_v57  ;;  %2223 = vrot.lane.b32.xlu1 %v7552_v23, %s7268_s1  ;;  %2221 = vrot.lane.b32.xlu0 %v7557_v24, %s7268_s1 }
 0x38b   :  { %2105 = vst.msk [vmem:[#allocation2 + $0xb0] sm:$0xff] %vm1898_vm0, %v1948_v19 }
 0x38c   :  { %v1954_v20 = vpop.permute.xlu1 %1953 }
 0x38d   :  { %2108 = vst.msk [vmem:[#allocation2 + $0xc8] sm:$0xff] %vm1898_vm0, %v1954_v20 }
 0x38e   :  { %v1952_v21 = vpop.permute.xlu0 %1951  ;;  %2161 = vst.msk [vmem:[#allocation2 + $0xcf] sm:$0x1] %vm2148_vm2, %v14374_v57  ;;  %2227 = vrot.lane.b32.xlu1 %v14382_v61, %s7268_s1  ;;  %2225 = vrot.lane.b32.xlu0 %v14383_v29, %s7268_s1 }
 0x38f   :  { %2107 = vst.msk [vmem:[#allocation2 + $0xc0] sm:$0xff] %vm1898_vm0, %v1952_v21 }
 0x390   :  { %v1958_v22 = vpop.permute.xlu1 %1957 }
 0x391   :  { %2110 = vst.msk [vmem:[#allocation2 + $0xd8] sm:$0xff] %vm1898_vm0, %v1958_v22 }
 0x392   :  { %v1956_v23 = vpop.permute.xlu0 %1955  ;;  %2162 = vst.msk [vmem:[#allocation2 + $0xdf] sm:$0x1] %vm2148_vm2, %v14374_v57  ;;  %2231 = vrot.lane.b32.xlu1 %v7582_v27, %s7268_s1  ;;  %2229 = vrot.lane.b32.xlu0 %v7593_v28, %s7268_s1 }
 0x393   :  { %2109 = vst.msk [vmem:[#allocation2 + $0xd0] sm:$0xff] %vm1898_vm0, %v1956_v23 }
 0x394   :  { %v1962_v24 = vpop.permute.xlu1 %1961 }
 0x395   :  { %2112 = vst.msk [vmem:[#allocation2 + $0xe8] sm:$0xff] %vm1898_vm0, %v1962_v24 }
 0x396   :  { %v1960_v61 = vpop.permute.xlu0 %1959  ;;  %2163 = vst.msk [vmem:[#allocation2 + $0xef] sm:$0x1] %vm2148_vm2, %v14374_v57  ;;  %2235 = vrot.lane.b32.xlu1 %v14377_v26, %s7268_s1  ;;  %2233 = vrot.lane.b32.xlu0 %v14378_v25, %s7268_s1 }
 0x397   :  { %2111 = vst.msk [vmem:[#allocation2 + $0xe0] sm:$0xff] %vm1898_vm0, %v1960_v61 }
 0x398   :  { %v1966_v29 = vpop.permute.xlu1 %1965 }
 0x399   :  { %2114 = vst.msk [vmem:[#allocation2 + $0x108] sm:$0xff] %vm1898_vm0, %v1966_v29 }
 0x39a   :  { %v1964_v27 = vpop.permute.xlu0 %1963  ;;  %2165 = vst.msk [vmem:[#allocation2 + $0x10f] sm:$0x1] %vm2148_vm2, %v14374_v57  ;;  %2239 = vrot.lane.b32.xlu1 %v9050_v53, %s7268_s1  ;;  %2237 = vrot.lane.b32.xlu0 %v9057_v30, %s7268_s1 }
 0x39b   :  { %2113 = vst.msk [vmem:[#allocation2 + $0x100] sm:$0xff] %vm1898_vm0, %v1964_v27 }
 0x39c   :  { %v1970_v28 = vpop.permute.xlu1 %1969 }
 0x39d   :  { %2116 = vst.msk [vmem:[#allocation2 + $0x118] sm:$0xff] %vm1898_vm0, %v1970_v28 }
 0x39e   :  { %v1968_v26 = vpop.permute.xlu0 %1967  ;;  %2166 = vst.msk [vmem:[#allocation2 + $0x11f] sm:$0x1] %vm2148_vm2, %v14374_v57  ;;  %2243 = vrot.lane.b32.xlu1 %v7622_v33, %s7268_s1  ;;  %2241 = vrot.lane.b32.xlu0 %v7633_v34, %s7268_s1 }
 0x39f   :  { %2115 = vst.msk [vmem:[#allocation2 + $0x110] sm:$0xff] %vm1898_vm0, %v1968_v26 }
 0x3a0   :  { %v1974_v25 = vpop.permute.xlu1 %1973 }
 0x3a1   :  { %2118 = vst.msk [vmem:[#allocation2 + $0x128] sm:$0xff] %vm1898_vm0, %v1974_v25 }
 0x3a2   :  { %v1972_v53 = vpop.permute.xlu0 %1971  ;;  %2167 = vst.msk [vmem:[#allocation2 + $0x12f] sm:$0x1] %vm2148_vm2, %v14374_v57  ;;  %2247 = vrot.lane.b32.xlu1 %v7638_v35, %s7268_s1  ;;  %2245 = vrot.lane.b32.xlu0 %v7643_v36, %s7268_s1 }
 0x3a3   :  { %2117 = vst.msk [vmem:[#allocation2 + $0x120] sm:$0xff] %vm1898_vm0, %v1972_v53 }
 0x3a4   :  { %v1978_v30 = vpop.permute.xlu1 %1977 }
 0x3a5   :  { %2120 = vst.msk [vmem:[#allocation2 + $0x138] sm:$0xff] %vm1898_vm0, %v1978_v30 }
 0x3a6   :  { %v1976_v33 = vpop.permute.xlu0 %1975  ;;  %2168 = vst.msk [vmem:[#allocation2 + $0x13f] sm:$0x1] %vm2148_vm2, %v14374_v57  ;;  %2251 = vrot.lane.b32.xlu1 %v7658_v37, %s7268_s1  ;;  %2249 = vrot.lane.b32.xlu0 %v7663_v38, %s7268_s1 }
 0x3a7   :  { %2119 = vst.msk [vmem:[#allocation2 + $0x130] sm:$0xff] %vm1898_vm0, %v1976_v33 }
 0x3a8   :  { %v1982_v34 = vpop.permute.xlu1 %1981 }
 0x3a9   :  { %2122 = vst.msk [vmem:[#allocation2 + $0x148] sm:$0xff] %vm1898_vm0, %v1982_v34 }
 0x3aa   :  { %v1980_v35 = vpop.permute.xlu0 %1979  ;;  %2169 = vst.msk [vmem:[#allocation2 + $0x14f] sm:$0x1] %vm2148_vm2, %v14374_v57  ;;  %2255 = vrot.lane.b32.xlu1 %v7674_v39, %s7268_s1  ;;  %2253 = vrot.lane.b32.xlu0 %v7679_v40, %s7268_s1 }
 0x3ab   :  { %2121 = vst.msk [vmem:[#allocation2 + $0x140] sm:$0xff] %vm1898_vm0, %v1980_v35 }
 0x3ac   :  { %v1986_v36 = vpop.permute.xlu1 %1985 }
 0x3ad   :  { %2124 = vst.msk [vmem:[#allocation2 + $0x158] sm:$0xff] %vm1898_vm0, %v1986_v36 }
 0x3ae   :  { %v1984_v37 = vpop.permute.xlu0 %1983  ;;  %2170 = vst.msk [vmem:[#allocation2 + $0x15f] sm:$0x1] %vm2148_vm2, %v14374_v57  ;;  %2259 = vrot.lane.b32.xlu1 %v7684_v41, %s7268_s1  ;;  %2257 = vrot.lane.b32.xlu0 %v7693_v42, %s7268_s1 }
 0x3af   :  { %2123 = vst.msk [vmem:[#allocation2 + $0x150] sm:$0xff] %vm1898_vm0, %v1984_v37 }
 0x3b0   :  { %v1990_v38 = vpop.permute.xlu1 %1989 }
 0x3b1   :  { %2126 = vst.msk [vmem:[#allocation2 + $0x168] sm:$0xff] %vm1898_vm0, %v1990_v38 }
 0x3b2   :  { %v1988_v39 = vpop.permute.xlu0 %1987  ;;  %2171 = vst.msk [vmem:[#allocation2 + $0x16f] sm:$0x1] %vm2148_vm2, %v14374_v57  ;;  %2263 = vrot.lane.b32.xlu1 %v7698_v43, %s7268_s1  ;;  %2261 = vrot.lane.b32.xlu0 %v7703_v44, %s7268_s1 }
 0x3b3   :  { %2125 = vst.msk [vmem:[#allocation2 + $0x160] sm:$0xff] %vm1898_vm0, %v1988_v39 }
 0x3b4   :  { %v1994_v40 = vpop.permute.xlu1 %1993 }
 0x3b5   :  { %2128 = vst.msk [vmem:[#allocation2 + $0x178] sm:$0xff] %vm1898_vm0, %v1994_v40 }
 0x3b6   :  { %v1992_v41 = vpop.permute.xlu0 %1991  ;;  %2172 = vst.msk [vmem:[#allocation2 + $0x17f] sm:$0x1] %vm2148_vm2, %v14374_v57  ;;  %2267 = vrot.lane.b32.xlu1 %v7714_v45, %s7268_s1  ;;  %2265 = vrot.lane.b32.xlu0 %v7719_v46, %s7268_s1 }
 0x3b7   :  { %2127 = vst.msk [vmem:[#allocation2 + $0x170] sm:$0xff] %vm1898_vm0, %v1992_v41 }
 0x3b8   :  { %v1998_v42 = vpop.permute.xlu1 %1997 }
 0x3b9   :  { %2130 = vst.msk [vmem:[#allocation2 + $0x188] sm:$0xff] %vm1898_vm0, %v1998_v42 }
 0x3ba   :  { %v1996_v43 = vpop.permute.xlu0 %1995  ;;  %2173 = vst.msk [vmem:[#allocation2 + $0x18f] sm:$0x1] %vm2148_vm2, %v14374_v57  ;;  %2271 = vrot.lane.b32.xlu1 %v7724_v47, %s7268_s1  ;;  %2269 = vrot.lane.b32.xlu0 %v7739_v48, %s7268_s1 }
 0x3bb   :  { %2129 = vst.msk [vmem:[#allocation2 + $0x180] sm:$0xff] %vm1898_vm0, %v1996_v43 }
 0x3bc   :  { %v2002_v44 = vpop.permute.xlu1 %2001 }
 0x3bd   :  { %2132 = vst.msk [vmem:[#allocation2 + $0x198] sm:$0xff] %vm1898_vm0, %v2002_v44 }
 0x3be   :  { %v2000_v45 = vpop.permute.xlu0 %1999  ;;  %2174 = vst.msk [vmem:[#allocation2 + $0x19f] sm:$0x1] %vm2148_vm2, %v14374_v57  ;;  %2275 = vrot.lane.b32.xlu1 %v7744_v49, %s7268_s1  ;;  %2273 = vrot.lane.b32.xlu0 %v14384_v62, %s7268_s1  ;;  %v14390_v62 = vld [vmem:[#allocation10_spill] sm:$0xff] }
 0x3bf   :  { %2131 = vst.msk [vmem:[#allocation2 + $0x190] sm:$0xff] %vm1898_vm0, %v2000_v45 }
 0x3c0   :  { %v2006_v46 = vpop.permute.xlu1 %2005 }
 0x3c1   :  { %2134 = vst.msk [vmem:[#allocation2 + $0x1a8] sm:$0xff] %vm1898_vm0, %v2006_v46 }
 0x3c2   :  { %v2004_v47 = vpop.permute.xlu0 %2003  ;;  %2175 = vst.msk [vmem:[#allocation2 + $0x1af] sm:$0x1] %vm2148_vm2, %v14374_v57  ;;  %2279 = vrot.lane.b32.xlu1 %v7760_v51, %s7268_s1  ;;  %2277 = vrot.lane.b32.xlu0 %v7765_v52, %s7268_s1 }
 0x3c3   :  { %2133 = vst.msk [vmem:[#allocation2 + $0x1a0] sm:$0xff] %vm1898_vm0, %v2004_v47 }
 0x3c4   :  { %v2010_v48 = vpop.permute.xlu1 %2009 }
 0x3c5   :  { %2136 = vst.msk [vmem:[#allocation2 + $0x1b8] sm:$0xff] %vm1898_vm0, %v2010_v48 }
 0x3c6   :  { %v2008_v49 = vpop.permute.xlu0 %2007  ;;  %2176 = vst.msk [vmem:[#allocation2 + $0x1bf] sm:$0x1] %vm2148_vm2, %v14374_v57  ;;  %2283 = vrot.lane.b32.xlu1 %v14379_v50, %s7268_s1  ;;  %2281 = vrot.lane.b32.xlu0 %v14390_v62, %s7268_s1 }
 0x3c7   :  { %2135 = vst.msk [vmem:[#allocation2 + $0x1b0] sm:$0xff] %vm1898_vm0, %v2008_v49 }
 0x3c8   :  { %v2014_v3 = vpop.permute.xlu1 %2013 }
 0x3c9   :  { %2138 = vst.msk [vmem:[#allocation2 + $0x1c8] sm:$0xff] %vm1898_vm0, %v2014_v3 }
 0x3ca   :  { %v2012_v51 = vpop.permute.xlu0 %2011  ;;  %2177 = vst.msk [vmem:[#allocation2 + $0x1cf] sm:$0x1] %vm2148_vm2, %v14374_v57  ;;  %2287 = vrot.lane.b32.xlu1 %v14385_v55, %s7268_s1  ;;  %2285 = vrot.lane.b32.xlu0 %v7795_v56, %s7268_s1 }
 0x3cb   :  { %2137 = vst.msk [vmem:[#allocation2 + $0x1c0] sm:$0xff] %vm1898_vm0, %v2012_v51 }
 0x3cc   :  { %v2018_v52 = vpop.permute.xlu1 %2017 }
 0x3cd   :  { %2140 = vst.msk [vmem:[#allocation2 + $0x1d8] sm:$0xff] %vm1898_vm0, %v2018_v52 }
 0x3ce   :  { %v2016_v50 = vpop.permute.xlu0 %2015  ;;  %2178 = vst.msk [vmem:[#allocation2 + $0x1df] sm:$0x1] %vm2148_vm2, %v14374_v57  ;;  %2291 = vrot.lane.b32.xlu1 %v14386_v4, %s7268_s1  ;;  %2289 = vrot.lane.b32.xlu0 %v14391_v32, %s7268_s1 }
 0x3cf   :  { %2139 = vst.msk [vmem:[#allocation2 + $0x1d0] sm:$0xff] %vm1898_vm0, %v2016_v50 }
 0x3d0   :  { %v2022_v1 = vpop.permute.xlu1 %2021 }
 0x3d1   :  { %2142 = vst.msk [vmem:[#allocation2 + $0x1e8] sm:$0xff] %vm1898_vm0, %v2022_v1 }
 0x3d2   :  { %v2020_v55 = vpop.permute.xlu0 %2019  ;;  %2179 = vst.msk [vmem:[#allocation2 + $0x1ef] sm:$0x1] %vm2148_vm2, %v14374_v57  ;;  %2295 = vrot.lane.b32.xlu1 %v7824_v59, %s7268_s1  ;;  %2293 = vrot.lane.b32.xlu0 %v14381_v58, %s7268_s1  ;;  %vm4710_vm2 = vcmask 385344  }
 0x3d3   :  { %2141 = vst.msk [vmem:[#allocation2 + $0x1e0] sm:$0xff] %vm1898_vm0, %v2020_v55  ;;  %vm4387_vm0 = vcmask 261312  }
 0x3d4   :  { %v2184_v56 = vpop.permute.xlu1 %2183 }
 0x3d5   :  { %2363 = vst.msk [vmem:[#allocation2 + $0x7] sm:$0xff] %vm2143_vm1, %v2184_v56 }
 0x3d6   :  { %v2182_v4 = vpop.permute.xlu0 %2181  ;;  %2299 = vrot.lane.b32.xlu1 %v14389_v31, %s7268_s1  ;;  %2297 = vrot.lane.b32.xlu0 %v14392_v63, %s7268_s1 }
 0x3d7   :  { %2362 = vst.msk [vmem:[#allocation2 - $0x1] sm:$0xfe] %vm2361_vm5, %v2182_v4 }
 0x3d8   :  { %v2188_v60 = vpop.permute.xlu1 %2187 }
 0x3d9   :  { %2365 = vst.msk [vmem:[#allocation2 + $0x17] sm:$0xff] %vm2143_vm1, %v2188_v60 }
 0x3da   :  { %v2186_v54 = vpop.permute.xlu0 %2185 }
 0x3db   :  { %2364 = vst.msk [vmem:[#allocation2 + $0xf] sm:$0xfe] %vm2361_vm5, %v2186_v54 }
 0x3dc   :  { %v2192_v59 = vpop.permute.xlu1 %2191  ;;  %v2425_v0 = vld [vmem:[#allocation2 + $0x8] sm:$0xff] }
 0x3dd   :  { %2367 = vst.msk [vmem:[#allocation2 + $0x27] sm:$0xff] %vm2143_vm1, %v2192_v59 }
 0x3de   :  { %v2190_v58 = vpop.permute.xlu0 %2189  ;;  %v2424_v2 = vld [vmem:[#allocation2] sm:$0xff] }
 0x3df   :  { %2366 = vst.msk [vmem:[#allocation2 + $0x1f] sm:$0xfe] %vm2361_vm5, %v2190_v58  ;;  %v2488_v5 = vpack.c.bf16 %v2425_v0, %v2424_v2 }
 0x3e0   :  { %v2196_v31 = vpop.permute.xlu1 %2195  ;;  %v2427_v8 = vld [vmem:[#allocation2 + $0x18] sm:$0xff] }
 0x3e1   :  { %7091 = vmatprep.mubr.msk.bf16.mxu0 %vm2540_vm6, %v2488_v5  ;;  %2369 = vst.msk [vmem:[#allocation2 + $0x37] sm:$0xff] %vm2143_vm1, %v2196_v31 }
 0x3e2   :  { %v2194_v6 = vpop.permute.xlu0 %2193  ;;  %v2426_v7 = vld [vmem:[#allocation2 + $0x10] sm:$0xff] }
 0x3e3   :  { %2368 = vst.msk [vmem:[#allocation2 + $0x2f] sm:$0xfe] %vm2361_vm5, %v2194_v6  ;;  %v2489_v9 = vpack.c.bf16 %v2427_v8, %v2426_v7  ;;  %v2454_v7 = vld [vmem:[#allocation2 + $0xf0] sm:$0xff] }
 0x3e4   :  { %v2200_v10 = vpop.permute.xlu1 %2199  ;;  %v2429_v13 = vld [vmem:[#allocation2 + $0x28] sm:$0xff] }
 0x3e5   :  { %7092 = vmatmul.mubr.msk.bf16.vlgmr.msra.gmra.mrb[0].mxu0 %vm2540_vm6, %v2489_v9  ;;  %2371 = vst.msk [vmem:[#allocation2 + $0x47] sm:$0xff] %vm2143_vm1, %v2200_v10 }
 0x3e6   :  { %v2198_v11 = vpop.permute.xlu0 %2197  ;;  %v2428_v12 = vld [vmem:[#allocation2 + $0x20] sm:$0xff] }
 0x3e7   :  { %2370 = vst.msk [vmem:[#allocation2 + $0x3f] sm:$0xfe] %vm2361_vm5, %v2198_v11  ;;  %v2490_v14 = vpack.c.bf16 %v2429_v13, %v2428_v12  ;;  %v2455_v12 = vld [vmem:[#allocation2 + $0xf8] sm:$0xff] }
 0x3e8   :  { %v2204_v15 = vpop.permute.xlu1 %2203  ;;  %v2431_v18 = vld [vmem:[#allocation2 + $0x38] sm:$0xff] }
 0x3e9   :  { %7095 = vmatprep.mubr.msk.bf16.mxu0 %vm2540_vm6, %v2490_v14  ;;  %2373 = vst.msk [vmem:[#allocation2 + $0x57] sm:$0xff] %vm2143_vm1, %v2204_v15  ;;  %v2503_v14 = vpack.c.bf16 %v2455_v12, %v2454_v7 }
 0x3ea   :  { %v2202_v16 = vpop.permute.xlu0 %2201  ;;  %v2430_v17 = vld [vmem:[#allocation2 + $0x30] sm:$0xff] }
 0x3eb   :  { %2372 = vst.msk [vmem:[#allocation2 + $0x4f] sm:$0xfe] %vm2361_vm5, %v2202_v16  ;;  %v2491_v19 = vpack.c.bf16 %v2431_v18, %v2430_v17 }
 0x3ec   :  { %v2208_v20 = vpop.permute.xlu1 %2207  ;;  %v2433_v23 = vld [vmem:[#allocation2 + $0x48] sm:$0xff] }
 0x3ed   :  { %7096 = vmatmul.mubr.msk.bf16.gmra.mrb[4].mxu0 %vm2540_vm6, %v2491_v19  ;;  %2375 = vst.msk [vmem:[#allocation2 + $0x67] sm:$0xff] %vm2143_vm1, %v2208_v20 }
 0x3ee   :  { %v2206_v21 = vpop.permute.xlu0 %2205  ;;  %v2432_v22 = vld [vmem:[#allocation2 + $0x40] sm:$0xff] }
 0x3ef   :  { %2374 = vst.msk [vmem:[#allocation2 + $0x5f] sm:$0xfe] %vm2361_vm5, %v2206_v21  ;;  %v2492_v24 = vpack.c.bf16 %v2433_v23, %v2432_v22 }
 0x3f0   :  { %v2212_v61 = vpop.permute.xlu1 %2211  ;;  %v2435_v28 = vld [vmem:[#allocation2 + $0x58] sm:$0xff] }
 0x3f1   :  { %7099 = vmatprep.mubr.msk.bf16.mxu0 %vm2540_vm6, %v2492_v24  ;;  %2377 = vst.msk [vmem:[#allocation2 + $0x77] sm:$0xff] %vm2143_vm1, %v2212_v61 }
 0x3f2   :  { %v2210_v29 = vpop.permute.xlu0 %2209  ;;  %v2434_v27 = vld [vmem:[#allocation2 + $0x50] sm:$0xff] }
 0x3f3   :  { %2376 = vst.msk [vmem:[#allocation2 + $0x6f] sm:$0xfe] %vm2361_vm5, %v2210_v29  ;;  %v2493_v26 = vpack.c.bf16 %v2435_v28, %v2434_v27 }
 0x3f4   :  { %v2216_v25 = vpop.permute.xlu1 %2215  ;;  %v2437_v33 = vld [vmem:[#allocation2 + $0x68] sm:$0xff] }
 0x3f5   :  { %7100 = vmatmul.mubr.msk.bf16.gmra.mrb[8].mxu0 %vm2540_vm6, %v2493_v26  ;;  %2379 = vst.msk [vmem:[#allocation2 + $0x87] sm:$0xff] %vm2143_vm1, %v2216_v25 }
 0x3f6   :  { %v2214_v53 = vpop.permute.xlu0 %2213  ;;  %v2436_v30 = vld [vmem:[#allocation2 + $0x60] sm:$0xff] }
 0x3f7   :  { %2378 = vst.msk [vmem:[#allocation2 + $0x7f] sm:$0xfe] %vm2361_vm5, %v2214_v53  ;;  %v2494_v34 = vpack.c.bf16 %v2437_v33, %v2436_v30 }
 0x3f8   :  { %v2220_v35 = vpop.permute.xlu1 %2219  ;;  %v2439_v38 = vld [vmem:[#allocation2 + $0x78] sm:$0xff] }
 0x3f9   :  { %7103 = vmatprep.mubr.msk.bf16.mxu0 %vm2540_vm6, %v2494_v34  ;;  %2381 = vst.msk [vmem:[#allocation2 + $0x97] sm:$0xff] %vm2143_vm1, %v2220_v35 }
 0x3fa   :  { %v2218_v36 = vpop.permute.xlu0 %2217  ;;  %v2438_v37 = vld [vmem:[#allocation2 + $0x70] sm:$0xff] }
 0x3fb   :  { %2380 = vst.msk [vmem:[#allocation2 + $0x8f] sm:$0xfe] %vm2361_vm5, %v2218_v36  ;;  %v2495_v39 = vpack.c.bf16 %v2439_v38, %v2438_v37 }
 0x3fc   :  { %v2224_v40 = vpop.permute.xlu1 %2223  ;;  %v2441_v43 = vld [vmem:[#allocation2 + $0x88] sm:$0xff] }
 0x3fd   :  { %7104 = vmatmul.mubr.msk.bf16.gmra.mrb[12].mxu0 %vm2540_vm6, %v2495_v39  ;;  %2383 = vst.msk [vmem:[#allocation2 + $0xa7] sm:$0xff] %vm2143_vm1, %v2224_v40 }
 0x3fe   :  { %v2222_v41 = vpop.permute.xlu0 %2221  ;;  %v2440_v42 = vld [vmem:[#allocation2 + $0x80] sm:$0xff] }
 0x3ff   :  { %2382 = vst.msk [vmem:[#allocation2 + $0x9f] sm:$0xfe] %vm2361_vm5, %v2222_v41  ;;  %v2496_v44 = vpack.c.bf16 %v2441_v43, %v2440_v42 }
 0x400   :  { %v2228_v45 = vpop.permute.xlu1 %2227  ;;  %v2443_v48 = vld [vmem:[#allocation2 + $0x98] sm:$0xff] }
 0x401   :  { %7107 = vmatprep.mubr.msk.bf16.mxu0 %vm2540_vm6, %v2496_v44  ;;  %2385 = vst.msk [vmem:[#allocation2 + $0xb7] sm:$0xff] %vm2143_vm1, %v2228_v45 }
 0x402   :  { %v2226_v46 = vpop.permute.xlu0 %2225  ;;  %v2442_v47 = vld [vmem:[#allocation2 + $0x90] sm:$0xff] }
 0x403   :  { %2384 = vst.msk [vmem:[#allocation2 + $0xaf] sm:$0xfe] %vm2361_vm5, %v2226_v46  ;;  %v2497_v49 = vpack.c.bf16 %v2443_v48, %v2442_v47 }
 0x404   :  { %v2232_v62 = vpop.permute.xlu1 %2231  ;;  %v2445_v52 = vld [vmem:[#allocation2 + $0xa8] sm:$0xff] }
 0x405   :  { %7108 = vmatmul.mubr.msk.bf16.gmra.mrb[16].mxu0 %vm2540_vm6, %v2497_v49  ;;  %2387 = vst.msk [vmem:[#allocation2 + $0xc7] sm:$0xff] %vm2143_vm1, %v2232_v62 }
 0x406   :  { %v2230_v3 = vpop.permute.xlu0 %2229  ;;  %v2444_v51 = vld [vmem:[#allocation2 + $0xa0] sm:$0xff] }
 0x407   :  { %2386 = vst.msk [vmem:[#allocation2 + $0xbf] sm:$0xfe] %vm2361_vm5, %v2230_v3  ;;  %v2498_v50 = vpack.c.bf16 %v2445_v52, %v2444_v51 }
 0x408   :  { %v2236_v32 = vpop.permute.xlu1 %2235  ;;  %v2447_v56 = vld [vmem:[#allocation2 + $0xb8] sm:$0xff] }
 0x409   :  { %7111 = vmatprep.mubr.msk.bf16.mxu0 %vm2540_vm6, %v2498_v50  ;;  %2389 = vst.msk [vmem:[#allocation2 + $0xd7] sm:$0xff] %vm2143_vm1, %v2236_v32 }
 0x40a   :  { %v2234_v1 = vpop.permute.xlu0 %2233  ;;  %v2446_v55 = vld [vmem:[#allocation2 + $0xb0] sm:$0xff] }
 0x40b   :  { %2388 = vst.msk [vmem:[#allocation2 + $0xcf] sm:$0xfe] %vm2361_vm5, %v2234_v1  ;;  %v2499_v4 = vpack.c.bf16 %v2447_v56, %v2446_v55 }
 0x40c   :  { %v2240_v63 = vpop.permute.xlu1 %2239  ;;  %v2449_v59 = vld [vmem:[#allocation2 + $0xc8] sm:$0xff] }
 0x40d   :  { %7112 = vmatmul.mubr.msk.bf16.gmra.mrb[20].mxu0 %vm2540_vm6, %v2499_v4  ;;  %2391 = vst.msk [vmem:[#allocation2 + $0xe7] sm:$0xff] %vm2143_vm1, %v2240_v63 }
 0x40e   :  { %v2238_v60 = vpop.permute.xlu0 %2237  ;;  %v2448_v54 = vld [vmem:[#allocation2 + $0xc0] sm:$0xff] }
 0x40f   :  { %2390 = vst.msk [vmem:[#allocation2 + $0xdf] sm:$0xfe] %vm2361_vm5, %v2238_v60  ;;  %v2500_v58 = vpack.c.bf16 %v2449_v59, %v2448_v54 }
 0x410   :  { %v2451_v0 = vld [vmem:[#allocation2 + $0xd8] sm:$0xff]  ;;  %v2244_v5 = vpop.permute.xlu1 %2243 }
 0x411   :  { %7115 = vmatprep.mubr.msk.bf16.mxu0 %vm2540_vm6, %v2500_v58  ;;  %2393 = vst.msk [vmem:[#allocation2 + $0x107] sm:$0xff] %vm2143_vm1, %v2244_v5 }
 0x412   :  { %v2450_v2 = vld [vmem:[#allocation2 + $0xd0] sm:$0xff]  ;;  %v2242_v31 = vpop.permute.xlu0 %2241 }
 0x413   :  { %v2501_v6 = vpack.c.bf16 %v2451_v0, %v2450_v2  ;;  %2392 = vst.msk [vmem:[#allocation2 + $0xff] sm:$0xfe] %vm2361_vm5, %v2242_v31 }
 0x414   :  { %v2248_v8 = vpop.permute.xlu1 %2247  ;;  %v2453_v11 = vld [vmem:[#allocation2 + $0xe8] sm:$0xff] }
 0x415   :  { %7116 = vmatmul.mubr.msk.bf16.gmra.mrb[24].mxu0 %vm2540_vm6, %v2501_v6  ;;  %2395 = vst.msk [vmem:[#allocation2 + $0x117] sm:$0xff] %vm2143_vm1, %v2248_v8 }
 0x416   :  { %v2246_v9 = vpop.permute.xlu0 %2245  ;;  %v2452_v10 = vld [vmem:[#allocation2 + $0xe0] sm:$0xff] }
 0x417   :  { %2394 = vst.msk [vmem:[#allocation2 + $0x10f] sm:$0xfe] %vm2361_vm5, %v2246_v9  ;;  %v2502_v13 = vpack.c.bf16 %v2453_v11, %v2452_v10 }
 0x418   :  { %v2252_v15 = vpop.permute.xlu1 %2251  ;;  %v2457_v18 = vld [vmem:[#allocation2 + $0x108] sm:$0xff] }
 0x419   :  { %7119 = vmatprep.mubr.msk.bf16.mxu0 %vm2540_vm6, %v2502_v13  ;;  %2397 = vst.msk [vmem:[#allocation2 + $0x127] sm:$0xff] %vm2143_vm1, %v2252_v15 }
 0x41a   :  { %v2250_v16 = vpop.permute.xlu0 %2249  ;;  %v2456_v17 = vld [vmem:[#allocation2 + $0x100] sm:$0xff] }
 0x41b   :  { %2396 = vst.msk [vmem:[#allocation2 + $0x11f] sm:$0xfe] %vm2361_vm5, %v2250_v16  ;;  %v2504_v19 = vpack.c.bf16 %v2457_v18, %v2456_v17 }
 0x41c   :  { %v2256_v20 = vpop.permute.xlu1 %2255  ;;  %v2459_v23 = vld [vmem:[#allocation2 + $0x118] sm:$0xff] }
 0x41d   :  { %7120 = vmatmul.mubr.msk.bf16.gmra.mrb[28].mxu0 %vm2540_vm6, %v2503_v14  ;;  %2399 = vst.msk [vmem:[#allocation2 + $0x137] sm:$0xff] %vm2143_vm1, %v2256_v20 }
 0x41e   :  { %7123 = vmatprep.mubr.msk.bf16.mxu0 %vm2540_vm6, %v2504_v19  ;;  %v2254_v21 = vpop.permute.xlu0 %2253  ;;  %v2458_v22 = vld [vmem:[#allocation2 + $0x110] sm:$0xff] }
 0x41f   :  { %2398 = vst.msk [vmem:[#allocation2 + $0x12f] sm:$0xfe] %vm2361_vm5, %v2254_v21  ;;  %v2505_v24 = vpack.c.bf16 %v2459_v23, %v2458_v22  ;;  %v2486_v23 = vld [vmem:[#allocation2 + $0x1f0] sm:$0xff] }
 0x420   :  { %v2260_v61 = vpop.permute.xlu1 %2259  ;;  %v2461_v28 = vld [vmem:[#allocation2 + $0x128] sm:$0xff] }
 0x421   :  { %2401 = vst.msk [vmem:[#allocation2 + $0x147] sm:$0xff] %vm2143_vm1, %v2260_v61 }
 0x422   :  { %v2258_v29 = vpop.permute.xlu0 %2257  ;;  %v2460_v27 = vld [vmem:[#allocation2 + $0x120] sm:$0xff] }
 0x423   :  { %2400 = vst.msk [vmem:[#allocation2 + $0x13f] sm:$0xfe] %vm2361_vm5, %v2258_v29  ;;  %v2506_v26 = vpack.c.bf16 %v2461_v28, %v2460_v27 }
 0x424   :  { %v2264_v25 = vpop.permute.xlu1 %2263  ;;  %v2463_v33 = vld [vmem:[#allocation2 + $0x138] sm:$0xff] }
 0x425   :  { %7124 = vmatmul.mubr.msk.bf16.gmra.mrb[32].mxu0 %vm2540_vm6, %v2505_v24  ;;  %2403 = vst.msk [vmem:[#allocation2 + $0x157] sm:$0xff] %vm2143_vm1, %v2264_v25  ;;  %v2487_v24 = vld [vmem:[#allocation2 + $0x1f8] sm:$0xff] }
 0x426   :  { %7127 = vmatprep.mubr.msk.bf16.mxu0 %vm2540_vm6, %v2506_v26  ;;  %v2262_v53 = vpop.permute.xlu0 %2261  ;;  %v2462_v30 = vld [vmem:[#allocation2 + $0x130] sm:$0xff]  ;;  %v2519_v61 = vpack.c.bf16 %v2487_v24, %v2486_v23 }
 0x427   :  { %2402 = vst.msk [vmem:[#allocation2 + $0x14f] sm:$0xfe] %vm2361_vm5, %v2262_v53  ;;  %v2507_v34 = vpack.c.bf16 %v2463_v33, %v2462_v30 }
 0x428   :  { %v2268_v35 = vpop.permute.xlu1 %2267  ;;  %v2465_v38 = vld [vmem:[#allocation2 + $0x148] sm:$0xff] }
 0x429   :  { %2405 = vst.msk [vmem:[#allocation2 + $0x167] sm:$0xff] %vm2143_vm1, %v2268_v35 }
 0x42a   :  { %v2266_v36 = vpop.permute.xlu0 %2265  ;;  %v2464_v37 = vld [vmem:[#allocation2 + $0x140] sm:$0xff] }
 0x42b   :  { %2404 = vst.msk [vmem:[#allocation2 + $0x15f] sm:$0xfe] %vm2361_vm5, %v2266_v36  ;;  %v2508_v39 = vpack.c.bf16 %v2465_v38, %v2464_v37 }
 0x42c   :  { %v2272_v40 = vpop.permute.xlu1 %2271  ;;  %v2467_v43 = vld [vmem:[#allocation2 + $0x158] sm:$0xff] }
 0x42d   :  { %7128 = vmatmul.mubr.msk.bf16.gmra.mrb[36].mxu0 %vm2540_vm6, %v2507_v34  ;;  %2407 = vst.msk [vmem:[#allocation2 + $0x177] sm:$0xff] %vm2143_vm1, %v2272_v40 }
 0x42e   :  { %7131 = vmatprep.mubr.msk.bf16.mxu0 %vm2540_vm6, %v2508_v39  ;;  %v2270_v41 = vpop.permute.xlu0 %2269  ;;  %v2466_v42 = vld [vmem:[#allocation2 + $0x150] sm:$0xff] }
 0x42f   :  { %2406 = vst.msk [vmem:[#allocation2 + $0x16f] sm:$0xfe] %vm2361_vm5, %v2270_v41  ;;  %v2509_v44 = vpack.c.bf16 %v2467_v43, %v2466_v42 }
 0x430   :  { %v2276_v45 = vpop.permute.xlu1 %2275  ;;  %v2469_v48 = vld [vmem:[#allocation2 + $0x168] sm:$0xff] }
 0x431   :  { %2409 = vst.msk [vmem:[#allocation2 + $0x187] sm:$0xff] %vm2143_vm1, %v2276_v45 }
 0x432   :  { %v2274_v46 = vpop.permute.xlu0 %2273  ;;  %v2468_v47 = vld [vmem:[#allocation2 + $0x160] sm:$0xff] }
 0x433   :  { %2408 = vst.msk [vmem:[#allocation2 + $0x17f] sm:$0xfe] %vm2361_vm5, %v2274_v46  ;;  %v2510_v49 = vpack.c.bf16 %v2469_v48, %v2468_v47 }
 0x434   :  { %v2280_v62 = vpop.permute.xlu1 %2279  ;;  %v2471_v52 = vld [vmem:[#allocation2 + $0x178] sm:$0xff] }
 0x435   :  { %7132 = vmatmul.mubr.msk.bf16.gmra.mrb[40].mxu0 %vm2540_vm6, %v2509_v44  ;;  %2411 = vst.msk [vmem:[#allocation2 + $0x197] sm:$0xff] %vm2143_vm1, %v2280_v62 }
 0x436   :  { %7135 = vmatprep.mubr.msk.bf16.mxu0 %vm2540_vm6, %v2510_v49  ;;  %v2278_v3 = vpop.permute.xlu0 %2277  ;;  %v2470_v51 = vld [vmem:[#allocation2 + $0x170] sm:$0xff] }
 0x437   :  { %2410 = vst.msk [vmem:[#allocation2 + $0x18f] sm:$0xfe] %vm2361_vm5, %v2278_v3  ;;  %v2511_v50 = vpack.c.bf16 %v2471_v52, %v2470_v51 }
 0x438   :  { %v2284_v32 = vpop.permute.xlu1 %2283  ;;  %v2473_v56 = vld [vmem:[#allocation2 + $0x188] sm:$0xff] }
 0x439   :  { %2413 = vst.msk [vmem:[#allocation2 + $0x1a7] sm:$0xff] %vm2143_vm1, %v2284_v32 }
 0x43a   :  { %v2282_v1 = vpop.permute.xlu0 %2281  ;;  %v2472_v55 = vld [vmem:[#allocation2 + $0x180] sm:$0xff] }
 0x43b   :  { %2412 = vst.msk [vmem:[#allocation2 + $0x19f] sm:$0xfe] %vm2361_vm5, %v2282_v1  ;;  %v2512_v4 = vpack.c.bf16 %v2473_v56, %v2472_v55 }
 0x43c   :  { %v2288_v63 = vpop.permute.xlu1 %2287  ;;  %v2475_v59 = vld [vmem:[#allocation2 + $0x198] sm:$0xff] }
 0x43d   :  { %7136 = vmatmul.mubr.msk.bf16.gmra.mrb[44].mxu0 %vm2540_vm6, %v2511_v50  ;;  %2415 = vst.msk [vmem:[#allocation2 + $0x1b7] sm:$0xff] %vm2143_vm1, %v2288_v63 }
 0x43e   :  { %7139 = vmatprep.mubr.msk.bf16.mxu0 %vm2540_vm6, %v2512_v4  ;;  %v2286_v60 = vpop.permute.xlu0 %2285  ;;  %v2474_v54 = vld [vmem:[#allocation2 + $0x190] sm:$0xff] }
 0x43f   :  { %2414 = vst.msk [vmem:[#allocation2 + $0x1af] sm:$0xfe] %vm2361_vm5, %v2286_v60  ;;  %v2513_v58 = vpack.c.bf16 %v2475_v59, %v2474_v54 }
 0x440   :  { %v2292_v2 = vpop.permute.xlu1 %2291  ;;  %v2477_v31 = vld [vmem:[#allocation2 + $0x1a8] sm:$0xff] }
 0x441   :  { %2417 = vst.msk [vmem:[#allocation2 + $0x1c7] sm:$0xff] %vm2143_vm1, %v2292_v2 }
 0x442   :  { %v2290_v0 = vpop.permute.xlu0 %2289  ;;  %v2476_v5 = vld [vmem:[#allocation2 + $0x1a0] sm:$0xff] }
 0x443   :  { %2416 = vst.msk [vmem:[#allocation2 + $0x1bf] sm:$0xfe] %vm2361_vm5, %v2290_v0  ;;  %v2514_v6 = vpack.c.bf16 %v2477_v31, %v2476_v5 }
 0x444   :  { %v2296_v7 = vpop.permute.xlu1 %2295  ;;  %v2479_v10 = vld [vmem:[#allocation2 + $0x1b8] sm:$0xff] }
 0x445   :  { %7140 = vmatmul.mubr.msk.bf16.gmra.mrb[48].mxu0 %vm2540_vm6, %v2513_v58  ;;  %2419 = vst.msk [vmem:[#allocation2 + $0x1d7] sm:$0xff] %vm2143_vm1, %v2296_v7 }
 0x446   :  { %7143 = vmatprep.mubr.msk.bf16.mxu0 %vm2540_vm6, %v2514_v6  ;;  %v2294_v8 = vpop.permute.xlu0 %2293  ;;  %v2478_v9 = vld [vmem:[#allocation2 + $0x1b0] sm:$0xff] }
 0x447   :  { %2418 = vst.msk [vmem:[#allocation2 + $0x1cf] sm:$0xfe] %vm2361_vm5, %v2294_v8  ;;  %v2515_v11 = vpack.c.bf16 %v2479_v10, %v2478_v9 }
 0x448   :  { %v2300_v12 = vpop.permute.xlu1 %2299  ;;  %v2481_v15 = vld [vmem:[#allocation2 + $0x1c8] sm:$0xff] }
 0x449   :  { %2421 = vst.msk [vmem:[#allocation2 + $0x1e7] sm:$0xff] %vm2143_vm1, %v2300_v12  ;;  %vm4645_vm1 = vcmask 326912  }
 0x44a   :  { %v2298_v13 = vpop.permute.xlu0 %2297  ;;  %v2480_v14 = vld [vmem:[#allocation2 + $0x1c0] sm:$0xff] }
 0x44b   :  { %2420 = vst.msk [vmem:[#allocation2 + $0x1df] sm:$0xfe] %vm2361_vm5, %v2298_v13  ;;  %v2516_v16 = vpack.c.bf16 %v2481_v15, %v2480_v14  ;;  %vm4935_vm5 = vcmask 392513  }
 0x44c   :  { %v2483_v18 = vld [vmem:[#allocation2 + $0x1d8] sm:$0xff] }
 0x44d   :  { %7144 = vmatmul.mubr.msk.bf16.gmra.mrb[52].mxu0 %vm2540_vm6, %v2515_v11 }
 0x44e   :  { %7147 = vmatprep.mubr.msk.bf16.mxu0 %vm2540_vm6, %v2516_v16  ;;  %v2482_v17 = vld [vmem:[#allocation2 + $0x1d0] sm:$0xff] }
 0x44f   :  { %v2517_v19 = vpack.c.bf16 %v2483_v18, %v2482_v17 }
 0x450   :  { %v2485_v21 = vld [vmem:[#allocation2 + $0x1e8] sm:$0xff] }
 0x452   :  { %v2484_v20 = vld [vmem:[#allocation2 + $0x1e0] sm:$0xff] }
 0x453   :  { %v2518_v22 = vpack.c.bf16 %v2485_v21, %v2484_v20 }
 0x455   :  { %7148 = vmatmul.mubr.msk.bf16.gmra.mrb[56].mxu0 %vm2540_vm6, %v2517_v19 }
 0x456   :  { %7151 = vmatprep.mubr.msk.bf16.mxu0 %vm2540_vm6, %v2518_v22 }
 0x45d   :  { %7152 = vmatmul.mubr.msk.bf16.gmra.mrb[60].mxu0 %vm2540_vm6, %v2519_v61  ;;  %vm5007_vm6 = vcmask 450944  }
 0x4b8   :  { %v9730_v29 = vpop.f32.mrb[0].mxu0 }
 0x4b9   :  { %v9732_v27 = vpop.f32.mrb[1].mxu0  ;;  %v3067_v53 = vmul.f32 %v9730_v29, %v9730_v29  ;;  %v2934_v36 = vsel %vm2930_vm7, %v9730_v29, 0.0 }
 0x4ba   :  { %v3065_v28 = vmul.f32 %v9732_v27, %v9732_v27  ;;  %v9736_v26 = vpop.f32.mrb[2].mxu0  ;;  %v2931_v30 = vsel %vm2930_vm7, %v9732_v27, 0.0 }
 0x4bb   :  { %v9738_v25 = vpop.f32.mrb[3].mxu0  ;;  %v3068_v38 = vmul.f32 %v9736_v26, %v9736_v26  ;;  %v3132_v42 = vsel %vm2930_vm7, %v3067_v53, 0.0  ;;  %v2936_v43 = vsel %vm2930_vm7, %v9736_v26, 0.0 }
 0x4bc   :  { %v2932_v33 = vsel %vm2930_vm7, %v9738_v25, 0.0  ;;  %v3066_v34 = vmul.f32 %v9738_v25, %v9738_v25  ;;  %v3129_v37 = vsel %vm2930_vm7, %v3065_v28, 0.0 }
 0x4bd   :  { %v2933_v35 = vadd.f32 %v2932_v33, %v2931_v30  ;;  %v3134_v48 = vsel %vm2930_vm7, %v3068_v38, 0.0 }
 0x4be   :  { %v3130_v39 = vsel %vm2930_vm7, %v3066_v34, 0.0 }
 0x4bf   :  { %v2935_v40 = vadd.f32 %v2934_v36, %v2933_v35  ;;  %v3131_v41 = vadd.f32 %v3130_v39, %v3129_v37 }
 0x4c0   :  { %v9757_v44 = vpop.f32.mrb[4].mxu0 }
 0x4c1   :  { %v3133_v45 = vadd.f32 %v3132_v42, %v3131_v41  ;;  %v9759_v46 = vpop.f32.mrb[5].mxu0  ;;  %v2937_v47 = vadd.f32 %v2936_v43, %v2935_v40  ;;  %v3071_v32 = vmul.f32 %v9757_v44, %v9757_v44  ;;  %v2942_v60 = vsel %vm2930_vm7, %v9757_v44, 0.0 }
 0x4c2   :  { %v2938_v49 = vsel %vm2930_vm7, %v9759_v46, 0.0  ;;  %v3069_v62 = vmul.f32 %v9759_v46, %v9759_v46  ;;  %v9766_v3 = vpop.f32.mrb[6].mxu0 }
 0x4c3   :  { %v2939_v51 = vadd.f32 %v2938_v49, %v2937_v47  ;;  %v3135_v52 = vadd.f32 %v3134_v48, %v3133_v45  ;;  %v9768_v50 = vpop.f32.mrb[7].mxu0  ;;  %v3072_v54 = vmul.f32 %v9766_v3, %v9766_v3  ;;  %v3140_v0 = vsel %vm2930_vm7, %v3071_v32, 0.0 }
 0x4c4   :  { %v3136_v1 = vsel %vm2930_vm7, %v3069_v62, 0.0  ;;  %v2940_v55 = vsel %vm2930_vm7, %v9768_v50, 0.0  ;;  %v3070_v56 = vmul.f32 %v9768_v50, %v9768_v50  ;;  %v2944_v5 = vsel %vm2930_vm7, %v9766_v3, 0.0 }
 0x4c5   :  { %v3137_v4 = vadd.f32 %v3136_v1, %v3135_v52  ;;  %v2941_v63 = vadd.f32 %v2940_v55, %v2939_v51  ;;  %v3142_v9 = vsel %vm2930_vm7, %v3072_v54, 0.0 }
 0x4c6   :  { %v3138_v59 = vsel %vm2930_vm7, %v3070_v56, 0.0 }
 0x4c7   :  { %v2943_v58 = vadd.f32 %v2942_v60, %v2941_v63  ;;  %v3139_v2 = vadd.f32 %v3138_v59, %v3137_v4 }
 0x4c8   :  { %v9785_v31 = vpop.f32.mrb[8].mxu0 }
 0x4c9   :  { %v3141_v6 = vadd.f32 %v3140_v0, %v3139_v2  ;;  %v9787_v7 = vpop.f32.mrb[9].mxu0  ;;  %v2945_v8 = vadd.f32 %v2944_v5, %v2943_v58  ;;  %v3075_v16 = vmul.f32 %v9785_v31, %v9785_v31  ;;  %v2950_v22 = vsel %vm2930_vm7, %v9785_v31, 0.0 }
 0x4ca   :  { %v2946_v10 = vsel %vm2930_vm7, %v9787_v7, 0.0  ;;  %v3073_v11 = vmul.f32 %v9787_v7, %v9787_v7  ;;  %v9794_v12 = vpop.f32.mrb[10].mxu0 }
 0x4cb   :  { %v2947_v13 = vadd.f32 %v2946_v10, %v2945_v8  ;;  %v3143_v14 = vadd.f32 %v3142_v9, %v3141_v6  ;;  %v9796_v15 = vpop.f32.mrb[11].mxu0  ;;  %v3076_v23 = vmul.f32 %v9794_v12, %v9794_v12  ;;  %v3148_v53 = vsel %vm2930_vm7, %v3075_v16, 0.0 }
 0x4cc   :  { %v3144_v17 = vsel %vm2930_vm7, %v3073_v11, 0.0  ;;  %v2948_v18 = vsel %vm2930_vm7, %v9796_v15, 0.0  ;;  %v3074_v19 = vmul.f32 %v9796_v15, %v9796_v15  ;;  %v2952_v30 = vsel %vm2930_vm7, %v9794_v12, 0.0 }
 0x4cd   :  { %v3145_v20 = vadd.f32 %v3144_v17, %v3143_v14  ;;  %v2949_v21 = vadd.f32 %v2948_v18, %v2947_v13  ;;  %v3150_v37 = vsel %vm2930_vm7, %v3076_v23, 0.0 }
 0x4ce   :  { %v3146_v24 = vsel %vm2930_vm7, %v3074_v19, 0.0 }
 0x4cf   :  { %v2951_v61 = vadd.f32 %v2950_v22, %v2949_v21  ;;  %v3147_v28 = vadd.f32 %v3146_v24, %v3145_v20 }
 0x4d0   :  { %v9813_v33 = vpop.f32.mrb[12].mxu0 }
 0x4d1   :  { %v3149_v34 = vadd.f32 %v3148_v53, %v3147_v28  ;;  %v9815_v35 = vpop.f32.mrb[13].mxu0  ;;  %v2953_v36 = vadd.f32 %v2952_v30, %v2951_v61  ;;  %v3079_v45 = vmul.f32 %v9813_v33, %v9813_v33  ;;  %v2958_v52 = vsel %vm2930_vm7, %v9813_v33, 0.0 }
 0x4d2   :  { %v2954_v38 = vsel %vm2930_vm7, %v9815_v35, 0.0  ;;  %v3077_v39 = vmul.f32 %v9815_v35, %v9815_v35  ;;  %v9822_v40 = vpop.f32.mrb[14].mxu0 }
 0x4d3   :  { %v2955_v41 = vadd.f32 %v2954_v38, %v2953_v36  ;;  %v3151_v42 = vadd.f32 %v3150_v37, %v3149_v34  ;;  %v9824_v43 = vpop.f32.mrb[15].mxu0  ;;  %v3080_v32 = vmul.f32 %v9822_v40, %v9822_v40  ;;  %v3156_v4 = vsel %vm2930_vm7, %v3079_v45, 0.0 }
 0x4d4   :  { %v3152_v47 = vsel %vm2930_vm7, %v3077_v39, 0.0  ;;  %v2956_v48 = vsel %vm2930_vm7, %v9824_v43, 0.0  ;;  %v3078_v49 = vmul.f32 %v9824_v43, %v9824_v43  ;;  %v2960_v63 = vsel %vm2930_vm7, %v9822_v40, 0.0 }
 0x4d5   :  { %v3153_v62 = vadd.f32 %v3152_v47, %v3151_v42  ;;  %v2957_v51 = vadd.f32 %v2956_v48, %v2955_v41  ;;  %v3158_v2 = vsel %vm2930_vm7, %v3080_v32, 0.0 }
 0x4d6   :  { %v3154_v1 = vsel %vm2930_vm7, %v3078_v49, 0.0 }
 0x4d7   :  { %v2959_v55 = vadd.f32 %v2958_v52, %v2957_v51  ;;  %v3155_v56 = vadd.f32 %v3154_v1, %v3153_v62 }
 0x4d8   :  { %v9841_v60 = vpop.f32.mrb[16].mxu0 }
 0x4d9   :  { %v3157_v54 = vadd.f32 %v3156_v4, %v3155_v56  ;;  %v9843_v59 = vpop.f32.mrb[17].mxu0  ;;  %v2961_v58 = vadd.f32 %v2960_v63, %v2959_v55  ;;  %v3083_v11 = vmul.f32 %v9841_v60, %v9841_v60  ;;  %v2966_v19 = vsel %vm2930_vm7, %v9841_v60, 0.0 }
 0x4da   :  { %v2962_v0 = vsel %vm2930_vm7, %v9843_v59, 0.0  ;;  %v3081_v5 = vmul.f32 %v9843_v59, %v9843_v59  ;;  %v9850_v6 = vpop.f32.mrb[18].mxu0 }
 0x4db   :  { %v2963_v8 = vadd.f32 %v2962_v0, %v2961_v58  ;;  %v3159_v9 = vadd.f32 %v3158_v2, %v3157_v54  ;;  %v9852_v10 = vpop.f32.mrb[19].mxu0  ;;  %v3084_v20 = vmul.f32 %v9850_v6, %v9850_v6  ;;  %v3164_v24 = vsel %vm2930_vm7, %v3083_v11, 0.0 }
 0x4dc   :  { %v3160_v13 = vsel %vm2930_vm7, %v3081_v5, 0.0  ;;  %v2964_v14 = vsel %vm2930_vm7, %v9852_v10, 0.0  ;;  %v3082_v16 = vmul.f32 %v9852_v10, %v9852_v10  ;;  %v2968_v61 = vsel %vm2930_vm7, %v9850_v6, 0.0 }
 0x4dd   :  { %v3161_v17 = vadd.f32 %v3160_v13, %v3159_v9  ;;  %v2965_v18 = vadd.f32 %v2964_v14, %v2963_v8  ;;  %v3166_v36 = vsel %vm2930_vm7, %v3084_v20, 0.0 }
 0x4de   :  { %v3162_v21 = vsel %vm2930_vm7, %v3082_v16, 0.0 }
 0x4df   :  { %v2967_v22 = vadd.f32 %v2966_v19, %v2965_v18  ;;  %v3163_v23 = vadd.f32 %v3162_v21, %v3161_v17 }
 0x4e0   :  { %v9869_v28 = vpop.f32.mrb[20].mxu0 }
 0x4e1   :  { %v3165_v53 = vadd.f32 %v3164_v24, %v3163_v23  ;;  %v9871_v30 = vpop.f32.mrb[21].mxu0  ;;  %v2969_v34 = vadd.f32 %v2968_v61, %v2967_v22  ;;  %v3087_v47 = vmul.f32 %v9869_v28, %v9869_v28  ;;  %v2974_v32 = vsel %vm2930_vm7, %v9869_v28, 0.0 }
 0x4e2   :  { %v2970_v37 = vsel %vm2930_vm7, %v9871_v30, 0.0  ;;  %v3085_v38 = vmul.f32 %v9871_v30, %v9871_v30  ;;  %v9878_v39 = vpop.f32.mrb[22].mxu0 }
 0x4e3   :  { %v2971_v41 = vadd.f32 %v2970_v37, %v2969_v34  ;;  %v3167_v42 = vadd.f32 %v3166_v36, %v3165_v53  ;;  %v9880_v45 = vpop.f32.mrb[23].mxu0  ;;  %v3088_v1 = vmul.f32 %v9878_v39, %v9878_v39  ;;  %v3172_v63 = vsel %vm2930_vm7, %v3087_v47, 0.0 }
 0x4e4   :  { %v3168_v48 = vsel %vm2930_vm7, %v3085_v38, 0.0  ;;  %v2972_v49 = vsel %vm2930_vm7, %v9880_v45, 0.0  ;;  %v3086_v62 = vmul.f32 %v9880_v45, %v9880_v45  ;;  %v2976_v54 = vsel %vm2930_vm7, %v9878_v39, 0.0 }
 0x4e5   :  { %v3169_v51 = vadd.f32 %v3168_v48, %v3167_v42  ;;  %v2973_v52 = vadd.f32 %v2972_v49, %v2971_v41  ;;  %v3174_v8 = vsel %vm2930_vm7, %v3088_v1, 0.0 }
 0x4e6   :  { %v3170_v55 = vsel %vm2930_vm7, %v3086_v62, 0.0 }
 0x4e7   :  { %v2975_v56 = vadd.f32 %v2974_v32, %v2973_v52  ;;  %v3171_v4 = vadd.f32 %v3170_v55, %v3169_v51 }
 0x4e8   :  { %v9897_v58 = vpop.f32.mrb[24].mxu0 }
 0x4e9   :  { %v3173_v2 = vadd.f32 %v3172_v63, %v3171_v4  ;;  %v9899_v0 = vpop.f32.mrb[25].mxu0  ;;  %v2977_v5 = vadd.f32 %v2976_v54, %v2975_v56  ;;  %v3091_v18 = vmul.f32 %v9897_v58, %v9897_v58  ;;  %v2982_v24 = vsel %vm2930_vm7, %v9897_v58, 0.0 }
 0x4ea   :  { %v2978_v9 = vsel %vm2930_vm7, %v9899_v0, 0.0  ;;  %v3089_v11 = vmul.f32 %v9899_v0, %v9899_v0  ;;  %v9906_v13 = vpop.f32.mrb[26].mxu0 }
 0x4eb   :  { %v2979_v14 = vadd.f32 %v2978_v9, %v2977_v5  ;;  %v3175_v16 = vadd.f32 %v3174_v8, %v3173_v2  ;;  %v9908_v17 = vpop.f32.mrb[27].mxu0  ;;  %v3092_v61 = vmul.f32 %v9906_v13, %v9906_v13  ;;  %v3180_v37 = vsel %vm2930_vm7, %v3091_v18, 0.0 }
 0x4ec   :  { %v3176_v19 = vsel %vm2930_vm7, %v3089_v11, 0.0  ;;  %v2980_v20 = vsel %vm2930_vm7, %v9908_v17, 0.0  ;;  %v3090_v21 = vmul.f32 %v9908_v17, %v9908_v17  ;;  %v2984_v38 = vsel %vm2930_vm7, %v9906_v13, 0.0 }
 0x4ed   :  { %v3177_v22 = vadd.f32 %v3176_v19, %v3175_v16  ;;  %v2981_v23 = vadd.f32 %v2980_v20, %v2979_v14  ;;  %v3182_v49 = vsel %vm2930_vm7, %v3092_v61, 0.0 }
 0x4ee   :  { %v3178_v53 = vsel %vm2930_vm7, %v3090_v21, 0.0 }
 0x4ef   :  { %v2983_v34 = vadd.f32 %v2982_v24, %v2981_v23  ;;  %v3179_v36 = vadd.f32 %v3178_v53, %v3177_v22 }
 0x4f0   :  { %v9925_v41 = vpop.f32.mrb[28].mxu0 }
 0x4f1   :  { %v3181_v42 = vadd.f32 %v3180_v37, %v3179_v36  ;;  %v9927_v47 = vpop.f32.mrb[29].mxu0  ;;  %v2985_v48 = vadd.f32 %v2984_v38, %v2983_v34  ;;  %v3095_v56 = vmul.f32 %v9925_v41, %v9925_v41  ;;  %v2990_v8 = vsel %vm2930_vm7, %v9925_v41, 0.0 }
 0x4f2   :  { %v2986_v62 = vsel %vm2930_vm7, %v9927_v47, 0.0  ;;  %v3093_v51 = vmul.f32 %v9927_v47, %v9927_v47  ;;  %v9934_v52 = vpop.f32.mrb[30].mxu0 }
 0x4f3   :  { %v2987_v32 = vadd.f32 %v2986_v62, %v2985_v48  ;;  %v3183_v1 = vadd.f32 %v3182_v49, %v3181_v42  ;;  %v9936_v55 = vpop.f32.mrb[31].mxu0  ;;  %v3096_v9 = vmul.f32 %v9934_v52, %v9934_v52  ;;  %v3188_v18 = vsel %vm2930_vm7, %v3095_v56, 0.0 }
 0x4f4   :  { %v3184_v4 = vsel %vm2930_vm7, %v3093_v51, 0.0  ;;  %v2988_v63 = vsel %vm2930_vm7, %v9936_v55, 0.0  ;;  %v3094_v54 = vmul.f32 %v9936_v55, %v9936_v55  ;;  %v2992_v19 = vsel %vm2930_vm7, %v9934_v52, 0.0 }
 0x4f5   :  { %v3185_v2 = vadd.f32 %v3184_v4, %v3183_v1  ;;  %v2989_v5 = vadd.f32 %v2988_v63, %v2987_v32  ;;  %v3190_v24 = vsel %vm2930_vm7, %v3096_v9, 0.0 }
 0x4f6   :  { %v3186_v11 = vsel %vm2930_vm7, %v3094_v54, 0.0 }
 0x4f7   :  { %v2991_v14 = vadd.f32 %v2990_v8, %v2989_v5  ;;  %v3187_v16 = vadd.f32 %v3186_v11, %v3185_v2 }
 0x4f8   :  { %v9953_v20 = vpop.f32.mrb[32].mxu0 }
 0x4f9   :  { %v3189_v21 = vadd.f32 %v3188_v18, %v3187_v16  ;;  %v9955_v22 = vpop.f32.mrb[33].mxu0  ;;  %v2993_v23 = vadd.f32 %v2992_v19, %v2991_v14  ;;  %v3099_v42 = vmul.f32 %v9953_v20, %v9953_v20  ;;  %v2998_v1 = vsel %vm2930_vm7, %v9953_v20, 0.0 }
 0x4fa   :  { %v2994_v61 = vsel %vm2930_vm7, %v9955_v22, 0.0  ;;  %v3097_v53 = vmul.f32 %v9955_v22, %v9955_v22  ;;  %v9962_v34 = vpop.f32.mrb[34].mxu0 }
 0x4fb   :  { %v2995_v36 = vadd.f32 %v2994_v61, %v2993_v23  ;;  %v3191_v37 = vadd.f32 %v3190_v24, %v3189_v21  ;;  %v9964_v38 = vpop.f32.mrb[35].mxu0  ;;  %v3100_v56 = vmul.f32 %v9962_v34, %v9962_v34  ;;  %v3196_v2 = vsel %vm2930_vm7, %v3099_v42, 0.0 }
 0x4fc   :  { %v3192_v48 = vsel %vm2930_vm7, %v3097_v53, 0.0  ;;  %v2996_v49 = vsel %vm2930_vm7, %v9964_v38, 0.0  ;;  %v3098_v62 = vmul.f32 %v9964_v38, %v9964_v38  ;;  %v3000_v5 = vsel %vm2930_vm7, %v9962_v34, 0.0 }
 0x4fd   :  { %v3193_v51 = vadd.f32 %v3192_v48, %v3191_v37  ;;  %v2997_v32 = vadd.f32 %v2996_v49, %v2995_v36  ;;  %v3198_v16 = vsel %vm2930_vm7, %v3100_v56, 0.0 }
 0x4fe   :  { %v3194_v4 = vsel %vm2930_vm7, %v3098_v62, 0.0 }
 0x4ff   :  { %v2999_v63 = vadd.f32 %v2998_v1, %v2997_v32  ;;  %v3195_v54 = vadd.f32 %v3194_v4, %v3193_v51 }
 0x500   :  { %v9981_v8 = vpop.f32.mrb[36].mxu0 }
 0x501   :  { %v3197_v9 = vadd.f32 %v3196_v2, %v3195_v54  ;;  %v9983_v11 = vpop.f32.mrb[37].mxu0  ;;  %v3001_v14 = vadd.f32 %v3000_v5, %v2999_v63  ;;  %v3103_v53 = vmul.f32 %v9981_v8, %v9981_v8  ;;  %v3006_v62 = vsel %vm2930_vm7, %v9981_v8, 0.0 }
 0x502   :  { %v3002_v18 = vsel %vm2930_vm7, %v9983_v11, 0.0  ;;  %v3101_v19 = vmul.f32 %v9983_v11, %v9983_v11  ;;  %v9990_v21 = vpop.f32.mrb[38].mxu0 }
 0x503   :  { %14393 = vst [vmem:[#allocation9_spill] sm:$0xff] %v9990_v21  ;;  %v3003_v23 = vadd.f32 %v3002_v18, %v3001_v14  ;;  %v3199_v24 = vadd.f32 %v3198_v16, %v3197_v9  ;;  %v9992_v61 = vpop.f32.mrb[39].mxu0  ;;  %v3104_v51 = vmul.f32 %v9990_v21, %v9990_v21  ;;  %v3204_v4 = vsel %vm2930_vm7, %v3103_v53, 0.0 }
 0x504   :  { %v3200_v36 = vsel %vm2930_vm7, %v3101_v19, 0.0  ;;  %v3004_v37 = vsel %vm2930_vm7, %v9992_v61, 0.0  ;;  %v3102_v42 = vmul.f32 %v9992_v61, %v9992_v61  ;;  %v3008_v63 = vsel %vm2930_vm7, %v9990_v21, 0.0 }
 0x505   :  { %v3201_v48 = vadd.f32 %v3200_v36, %v3199_v24  ;;  %v3005_v49 = vadd.f32 %v3004_v37, %v3003_v23  ;;  %v3206_v14 = vsel %vm2930_vm7, %v3104_v51, 0.0 }
 0x506   :  { %v3202_v32 = vsel %vm2930_vm7, %v3102_v42, 0.0 }
 0x507   :  { %v3007_v1 = vadd.f32 %v3006_v62, %v3005_v49  ;;  %v3203_v56 = vadd.f32 %v3202_v32, %v3201_v48 }
 0x508   :  { %v10009_v54 = vpop.f32.mrb[40].mxu0 }
 0x509   :  { %14394 = vst [vmem:[#allocation14_spill] sm:$0xff] %v10009_v54  ;;  %v3205_v2 = vadd.f32 %v3204_v4, %v3203_v56  ;;  %v10011_v5 = vpop.f32.mrb[41].mxu0  ;;  %v3009_v9 = vadd.f32 %v3008_v63, %v3007_v1  ;;  %v3107_v36 = vmul.f32 %v10009_v54, %v10009_v54  ;;  %v3014_v51 = vsel %vm2930_vm7, %v10009_v54, 0.0 }
 0x50a   :  { %14395 = vst [vmem:[#allocation4_spill] sm:$0xff] %v10011_v5  ;;  %v3010_v16 = vsel %vm2930_vm7, %v10011_v5, 0.0  ;;  %v3105_v18 = vmul.f32 %v10011_v5, %v10011_v5  ;;  %v10018_v19 = vpop.f32.mrb[42].mxu0 }
 0x50b   :  { %14396 = vst [vmem:[#allocation5_spill] sm:$0xff] %v10018_v19  ;;  %v3011_v23 = vadd.f32 %v3010_v16, %v3009_v9  ;;  %v3207_v24 = vadd.f32 %v3206_v14, %v3205_v2  ;;  %v10020_v53 = vpop.f32.mrb[43].mxu0  ;;  %v3108_v32 = vmul.f32 %v10018_v19, %v10018_v19  ;;  %v3212_v63 = vsel %vm2930_vm7, %v3107_v36, 0.0 }
 0x50c   :  { %14397 = vst [vmem:[#allocation8_spill] sm:$0xff] %v10020_v53  ;;  %v3208_v37 = vsel %vm2930_vm7, %v3105_v18, 0.0  ;;  %v3012_v42 = vsel %vm2930_vm7, %v10020_v53, 0.0  ;;  %v3106_v48 = vmul.f32 %v10020_v53, %v10020_v53  ;;  %v3016_v2 = vsel %vm2930_vm7, %v10018_v19, 0.0 }
 0x50d   :  { %v3209_v49 = vadd.f32 %v3208_v37, %v3207_v24  ;;  %v3013_v62 = vadd.f32 %v3012_v42, %v3011_v23  ;;  %v3214_v23 = vsel %vm2930_vm7, %v3108_v32, 0.0 }
 0x50e   :  { %v3210_v1 = vsel %vm2930_vm7, %v3106_v48, 0.0 }
 0x50f   :  { %v3015_v56 = vadd.f32 %v3014_v51, %v3013_v62  ;;  %v3211_v4 = vadd.f32 %v3210_v1, %v3209_v49 }
 0x510   :  { %v10037_v9 = vpop.f32.mrb[44].mxu0 }
 0x511   :  { %14398 = vst [vmem:[#allocation11_spill] sm:$0xff] %v10037_v9  ;;  %v3213_v14 = vadd.f32 %v3212_v63, %v3211_v4  ;;  %v10039_v16 = vpop.f32.mrb[45].mxu0  ;;  %v3017_v18 = vadd.f32 %v3016_v2, %v3015_v56  ;;  %v3111_v62 = vmul.f32 %v10037_v9, %v10037_v9  ;;  %v3022_v63 = vsel %vm2930_vm7, %v10037_v9, 0.0 }
 0x512   :  { %14399 = vst [vmem:[#allocation12_spill] sm:$0xff] %v10039_v16  ;;  %v3018_v24 = vsel %vm2930_vm7, %v10039_v16, 0.0  ;;  %v3109_v37 = vmul.f32 %v10039_v16, %v10039_v16  ;;  %v10046_v42 = vpop.f32.mrb[46].mxu0 }
 0x513   :  { %14400 = vst [vmem:[#allocation6_spill] sm:$0xff] %v10046_v42  ;;  %v3019_v36 = vadd.f32 %v3018_v24, %v3017_v18  ;;  %v3215_v48 = vadd.f32 %v3214_v23, %v3213_v14  ;;  %v10048_v49 = vpop.f32.mrb[47].mxu0  ;;  %v3112_v2 = vmul.f32 %v10046_v42, %v10046_v42  ;;  %v3220_v24 = vsel %vm2930_vm7, %v3111_v62, 0.0 }
 0x514   :  { %14401 = vst [vmem:[#allocation10_spill] sm:$0xff] %v10048_v49  ;;  %v3216_v51 = vsel %vm2930_vm7, %v3109_v37, 0.0  ;;  %v3020_v32 = vsel %vm2930_vm7, %v10048_v49, 0.0  ;;  %v3110_v1 = vmul.f32 %v10048_v49, %v10048_v49  ;;  %v3024_v37 = vsel %vm2930_vm7, %v10046_v42, 0.0 }
 0x515   :  { %v3217_v56 = vadd.f32 %v3216_v51, %v3215_v48  ;;  %v3021_v4 = vadd.f32 %v3020_v32, %v3019_v36  ;;  %v3222_v51 = vsel %vm2930_vm7, %v3112_v2, 0.0 }
 0x516   :  { %v3218_v14 = vsel %vm2930_vm7, %v3110_v1, 0.0 }
 0x517   :  { %v3023_v18 = vadd.f32 %v3022_v63, %v3021_v4  ;;  %v3219_v23 = vadd.f32 %v3218_v14, %v3217_v56 }
 0x518   :  { %v10065_v57 = vpop.f32.mrb[48].mxu0 }
 0x519   :  { %14402 = vst [vmem:[#allocation13_spill] sm:$0xff] %v10065_v57  ;;  %v3221_v49 = vadd.f32 %v3220_v24, %v3219_v23  ;;  %v10067_v48 = vpop.f32.mrb[49].mxu0  ;;  %v3025_v36 = vadd.f32 %v3024_v37, %v3023_v18  ;;  %v3115_v14 = vmul.f32 %v10065_v57, %v10065_v57 }
 0x51a   :  { %14403 = vst [vmem:[#allocation7_spill] sm:$0xff] %v10067_v48  ;;  %v3026_v32 = vsel %vm2930_vm7, %v10067_v48, 0.0  ;;  %v3113_v1 = vmul.f32 %v10067_v48, %v10067_v48  ;;  %v10074_v56 = vpop.f32.mrb[50].mxu0  ;;  %v3030_v48 = vsel %vm2930_vm7, %v10065_v57, 0.0 }
 0x51b   :  { %14404 = vst [vmem:[#allocation15_spill] sm:$0xff] %v10074_v56  ;;  %v3027_v62 = vadd.f32 %v3026_v32, %v3025_v36  ;;  %v3223_v4 = vadd.f32 %v3222_v51, %v3221_v49  ;;  %v10076_v63 = vpop.f32.mrb[51].mxu0  ;;  %v3116_v49 = vmul.f32 %v10074_v56, %v10074_v56  ;;  %v3032_v42 = vsel %vm2930_vm7, %v10074_v56, 0.0 }
 0x51c   :  { %14405 = vst [vmem:[#allocation16_spill] sm:$0xff] %v10076_v63  ;;  %v3224_v23 = vsel %vm2930_vm7, %v3113_v1, 0.0  ;;  %v3028_v2 = vsel %vm2930_vm7, %v10076_v63, 0.0  ;;  %v3114_v18 = vmul.f32 %v10076_v63, %v10076_v63  ;;  %v3228_v1 = vsel %vm2930_vm7, %v3115_v14, 0.0 }
 0x51d   :  { %v3225_v24 = vadd.f32 %v3224_v23, %v3223_v4  ;;  %v3029_v37 = vadd.f32 %v3028_v2, %v3027_v62  ;;  %v3230_v23 = vsel %vm2930_vm7, %v3116_v49, 0.0 }
 0x51e   :  { %v3226_v36 = vsel %vm2930_vm7, %v3114_v18, 0.0 }
 0x51f   :  { %v3031_v51 = vadd.f32 %v3030_v48, %v3029_v37  ;;  %v3227_v32 = vadd.f32 %v3226_v36, %v3225_v24 }
 0x520   :  { %v10093_v9 = vpop.f32.mrb[52].mxu0 }
 0x521   :  { %14406 = vst [vmem:[#allocation17_spill] sm:$0xff] %v10093_v9  ;;  %v3229_v63 = vadd.f32 %v3228_v1, %v3227_v32  ;;  %v10095_v4 = vpop.f32.mrb[53].mxu0  ;;  %v3033_v62 = vadd.f32 %v3032_v42, %v3031_v51  ;;  %v3119_v36 = vmul.f32 %v10093_v9, %v10093_v9 }
 0x522   :  { %14407 = vst [vmem:[#allocation18_spill] sm:$0xff] %v10095_v4  ;;  %v3034_v2 = vsel %vm2930_vm7, %v10095_v4, 0.0  ;;  %v3117_v48 = vmul.f32 %v10095_v4, %v10095_v4  ;;  %v10102_v18 = vpop.f32.mrb[54].mxu0  ;;  %v3038_v4 = vsel %vm2930_vm7, %v10093_v9, 0.0 }
 0x523   :  { %14408 = vst [vmem:[#allocation19_spill] sm:$0xff] %v10102_v18  ;;  %v3035_v14 = vadd.f32 %v3034_v2, %v3033_v62  ;;  %v3231_v24 = vadd.f32 %v3230_v23, %v3229_v63  ;;  %v10104_v37 = vpop.f32.mrb[55].mxu0  ;;  %v3120_v63 = vmul.f32 %v10102_v18, %v10102_v18  ;;  %v3040_v56 = vsel %vm2930_vm7, %v10102_v18, 0.0 }
 0x524   :  { %14409 = vst [vmem:[#allocation20_spill] sm:$0xff] %v10104_v37  ;;  %v3232_v32 = vsel %vm2930_vm7, %v3117_v48, 0.0  ;;  %v3036_v42 = vsel %vm2930_vm7, %v10104_v37, 0.0  ;;  %v3118_v49 = vmul.f32 %v10104_v37, %v10104_v37  ;;  %v3236_v48 = vsel %vm2930_vm7, %v3119_v36, 0.0 }
 0x525   :  { %v3233_v51 = vadd.f32 %v3232_v32, %v3231_v24  ;;  %v3037_v1 = vadd.f32 %v3036_v42, %v3035_v14  ;;  %v3238_v32 = vsel %vm2930_vm7, %v3120_v63, 0.0 }
 0x526   :  { %v3234_v62 = vsel %vm2930_vm7, %v3118_v49, 0.0 }
 0x527   :  { %v3039_v23 = vadd.f32 %v3038_v4, %v3037_v1  ;;  %v3235_v2 = vadd.f32 %v3234_v62, %v3233_v51 }
 0x528   :  { %v10121_v57 = vpop.f32.mrb[56].mxu0 }
 0x529   :  { %14410 = vst [vmem:[#allocation21_spill] sm:$0xff] %v10121_v57  ;;  %v3237_v37 = vadd.f32 %v3236_v48, %v3235_v2  ;;  %v10123_v24 = vpop.f32.mrb[57].mxu0  ;;  %v3041_v14 = vadd.f32 %v3040_v56, %v3039_v23  ;;  %v3123_v62 = vmul.f32 %v10121_v57, %v10121_v57 }
 0x52a   :  { %14411 = vst [vmem:[#allocation22_spill] sm:$0xff] %v10123_v24  ;;  %v3042_v42 = vsel %vm2930_vm7, %v10123_v24, 0.0  ;;  %v3121_v4 = vmul.f32 %v10123_v24, %v10123_v24  ;;  %v10130_v49 = vpop.f32.mrb[58].mxu0  ;;  %v3046_v24 = vsel %vm2930_vm7, %v10121_v57, 0.0 }
 0x52b   :  { %14412 = vst [vmem:[#allocation23_spill] sm:$0xff] %v10130_v49  ;;  %v3043_v36 = vadd.f32 %v3042_v42, %v3041_v14  ;;  %v3239_v51 = vadd.f32 %v3238_v32, %v3237_v37  ;;  %v10132_v1 = vpop.f32.mrb[59].mxu0  ;;  %v3124_v37 = vmul.f32 %v10130_v49, %v10130_v49  ;;  %v3048_v18 = vsel %vm2930_vm7, %v10130_v49, 0.0 }
 0x52c   :  { %14413 = vst [vmem:[#allocation24_spill] sm:$0xff] %v10132_v1  ;;  %v3240_v2 = vsel %vm2930_vm7, %v3121_v4, 0.0  ;;  %v3044_v56 = vsel %vm2930_vm7, %v10132_v1, 0.0  ;;  %v3122_v63 = vmul.f32 %v10132_v1, %v10132_v1  ;;  %v3244_v4 = vsel %vm2930_vm7, %v3123_v62, 0.0 }
 0x52d   :  { %v3241_v23 = vadd.f32 %v3240_v2, %v3239_v51  ;;  %v3045_v48 = vadd.f32 %v3044_v56, %v3043_v36  ;;  %v3246_v2 = vsel %vm2930_vm7, %v3124_v37, 0.0 }
 0x52e   :  { %v3242_v14 = vsel %vm2930_vm7, %v3122_v63, 0.0 }
 0x52f   :  { %v3047_v32 = vadd.f32 %v3046_v24, %v3045_v48  ;;  %v3243_v42 = vadd.f32 %v3242_v14, %v3241_v23 }
 0x530   :  { %v10149_v9 = vpop.f32.mrb[60].mxu0 }
 0x531   :  { %14414 = vst [vmem:[#allocation25_spill] sm:$0xff] %v10149_v9  ;;  %v3245_v1 = vadd.f32 %v3244_v4, %v3243_v42  ;;  %v10151_v51 = vpop.f32.mrb[61].mxu0  ;;  %v3049_v36 = vadd.f32 %v3048_v18, %v3047_v32  ;;  %v3127_v14 = vmul.f32 %v10149_v9, %v10149_v9  ;;  %v3054_v49 = vsel %vm2930_vm7, %v10149_v9, 0.0 }
 0x532   :  { %14415 = vst [vmem:[#allocation26_spill] sm:$0xff] %v10151_v51  ;;  %v3050_v56 = vsel %vm2930_vm7, %v10151_v51, 0.0  ;;  %v3125_v24 = vmul.f32 %v10151_v51, %v10151_v51  ;;  %v10158_v63 = vpop.f32.mrb[62].mxu0 }
 0x533   :  { %14416 = vst [vmem:[#allocation27_spill] sm:$0xff] %v10158_v63  ;;  %v3051_v62 = vadd.f32 %v3050_v56, %v3049_v36  ;;  %v3247_v23 = vadd.f32 %v3246_v2, %v3245_v1  ;;  %v2918_v48 = vpop.f32.mrb[63].mxu0  ;;  %v3128_v51 = vmul.f32 %v10158_v63, %v10158_v63  ;;  %v3252_v56 = vsel %vm2930_vm7, %v3127_v14, 0.0 }
 0x534   :  { %v3248_v42 = vsel %vm2930_vm7, %v3125_v24, 0.0  ;;  %v3052_v18 = vsel %vm2930_vm7, %v2918_v48, 0.0  ;;  %v3126_v32 = vmul.f32 %v2918_v48, %v2918_v48  ;;  %v3056_v24 = vsel %vm2930_vm7, %v10158_v63, 0.0 }
 0x535   :  { %v3249_v37 = vadd.f32 %v3248_v42, %v3247_v23  ;;  %v3053_v4 = vadd.f32 %v3052_v18, %v3051_v62  ;;  %v3254_v23 = vsel %vm2930_vm7, %v3128_v51, 0.0  ;;  %v3272_v51 = vlaneseq }
 0x536   :  { %v3250_v36 = vsel %vm2930_vm7, %v3126_v32, 0.0 }
 0x537   :  { %v3055_v1 = vadd.f32 %v3054_v49, %v3053_v4  ;;  %v3251_v2 = vadd.f32 %v3250_v36, %v3249_v37 }
 0x539   :  { %v3057_v57 = vadd.f32 %v3056_v24, %v3055_v1  ;;  %v3253_v16 = vadd.f32 %v3252_v56, %v3251_v2 }
 0x53b   :  { %v3058_v62 = vrot.slane %v3057_v57, 4  ;;  %v3255_v42 = vadd.f32 %v3254_v23, %v3253_v16  ;;  %v3273_v16 = vshrl.u32 %v3272_v51, 7 }
 0x53d   :  { %v3059_v18 = vadd.f32 %v3058_v62, %v3057_v57  ;;  %v3256_v9 = vrot.slane %v3255_v42, 4  ;;  %v2422_v57 = vld [vmem:[%s14251_s2] sm:$0x1]  ;;  %s7269_s2 = smov 40  }
 0x53f   :  { %v3060_v19 = vrot.slane %v3059_v18, 2  ;;  %v3257_v54 = vadd.f32 %v3256_v9, %v3255_v42 }
 0x541   :  { %v3061_v53 = vadd.f32 %v3060_v19, %v3059_v18  ;;  %v3258_v5 = vrot.slane %v3257_v54, 2  ;;  %v10176_v19 = vsub.s32 0, %v3273_v16  ;;  %v14425_v16 = vld [vmem:[#allocation10_spill] sm:$0xff] }
 0x543   :  { %v3062_v32 = vrot.slane %v3061_v53, 1  ;;  %v3259_v49 = vadd.f32 %v3258_v5, %v3257_v54  ;;  %14417 = vst [vmem:[#allocation28_spill] sm:$0xff] %v10176_v19  ;;  %v2423_v5 = vld [vmem:[%s14252_s3] sm:$0x1]  ;;  %s7270_s3 = smov 48  }
 0x545   :  { %v3063_v37 = vadd.f32 %v3062_v32, %v3061_v53  ;;  %v3260_v4 = vrot.slane %v3259_v49, 1 }
 0x547   :  { %v3064_v14 = vmul.f32 0.001953125, %v3063_v37  ;;  %v3261_v36 = vadd.f32 %v3260_v4, %v3259_v49  ;;  %v14419_v4 = vld [vmem:[#allocation9_spill] sm:$0xff] }
 0x549   :  { %v3262_v21 = vmul.f32 0.001953125, %v3261_v36  ;;  %v3263_v63 = vmul.f32 %v3064_v14, %v3064_v14  ;;  %v14421_v36 = vld [vmem:[#allocation8_spill] sm:$0xff] }
 0x54b   :  { %v3264_v1 = vsub.f32 %v3262_v21, %v3263_v63 }
 0x54d   :  { %v3265_v2 = vmax.f32 %v3264_v1, 0.0  ;;  %v14422_v1 = vld [vmem:[#allocation14_spill] sm:$0xff] }
 0x54f   :  { %v3266_v56 = vadd.f32 1e-05, %v3265_v2  ;;  %v14423_v2 = vld [vmem:[#allocation5_spill] sm:$0xff] }
 0x551   :  { %7252 = vrsqrt.f32 %v3266_v56  ;;  %v14424_v56 = vld [vmem:[#allocation12_spill] sm:$0xff] }
 0x55b   :  { %v7253_v9 = vpop.eup %7252 }
 0x55c   :  { %v3268_v54 = vmul.f32 %v7253_v9, %v2422_v57  ;;  %v14426_v9 = vld [vmem:[#allocation11_spill] sm:$0xff] }
 0x55e   :  { %v3269_v53 = vmul.f32 %v3268_v54, %v3064_v14  ;;  %v10182_v21 = vrot.slane %v3268_v54, %v10176_v19  ;;  %v14420_v14 = vld [vmem:[#allocation4_spill] sm:$0xff] }
 0x560   :  { %v3270_v63 = vsub.f32 %v2423_v5, %v3269_v53  ;;  %v3338_v24 = vmul.f32 %v10182_v21, %v2918_v48  ;;  %v10187_v23 = vmul.f32 %v10182_v21, %v9732_v27  ;;  %v10191_v62 = vmul.f32 %v10182_v21, %v9738_v25  ;;  %v14427_v5 = vld [vmem:[#allocation6_spill] sm:$0xff] }
 0x561   :  { %v10195_v42 = vmul.f32 %v9730_v29, %v10182_v21  ;;  %v10199_v18 = vmul.f32 %v9736_v26, %v10182_v21  ;;  %v10203_v32 = vmul.f32 %v10182_v21, %v9759_v46  ;;  %v10207_v27 = vmul.f32 %v10182_v21, %v9768_v50 }
 0x562   :  { %v10210_v48 = vrot.slane %v3270_v63, %v10176_v19  ;;  %v10214_v25 = vmul.f32 %v9757_v44, %v10182_v21  ;;  %v10218_v29 = vmul.f32 %v9766_v3, %v10182_v21  ;;  %v10222_v26 = vmul.f32 %v10182_v21, %v9787_v7  ;;  %v14428_v63 = vld [vmem:[#allocation7_spill] sm:$0xff] }
 0x563   :  { %v10226_v46 = vmul.f32 %v10182_v21, %v9796_v15  ;;  %v10230_v50 = vmul.f32 %v9785_v31, %v10182_v21  ;;  %v10234_v44 = vmul.f32 %v9794_v12, %v10182_v21  ;;  %v10238_v3 = vmul.f32 %v10182_v21, %v9815_v35  ;;  %v14439_v19 = vld [vmem:[#allocation19_spill] sm:$0xff] }
 0x564   :  { %v3408_v49 = vadd.f32 %v10210_v48, %v3338_v24  ;;  %v10243_v7 = vmul.f32 %v10182_v21, %v9824_v43  ;;  %v10247_v15 = vmul.f32 %v9813_v33, %v10182_v21  ;;  %v10251_v31 = vmul.f32 %v9822_v40, %v10182_v21 }
 0x565   :  { %v10255_v12 = vmul.f32 %v10182_v21, %v9843_v59  ;;  %v10259_v35 = vmul.f32 %v10182_v21, %v9852_v10  ;;  %v10263_v43 = vmul.f32 %v9841_v60, %v10182_v21  ;;  %v10267_v33 = vmul.f32 %v9850_v6, %v10182_v21 }
 0x566   :  { %v10269_v37 = vmax.f32 %v3408_v49, 0.0  ;;  %v10273_v40 = vmul.f32 %v10182_v21, %v9871_v30  ;;  %v10277_v59 = vmul.f32 %v10182_v21, %v9880_v45  ;;  %v10281_v10 = vmul.f32 %v9869_v28, %v10182_v21  ;;  %v14429_v49 = vld [vmem:[#allocation16_spill] sm:$0xff] }
 0x567   :  { %v10285_v60 = vmul.f32 %v9878_v39, %v10182_v21  ;;  %v10289_v6 = vmul.f32 %v10182_v21, %v9899_v0  ;;  %v10293_v30 = vmul.f32 %v10182_v21, %v9908_v17  ;;  %v10297_v45 = vmul.f32 %v9897_v58, %v10182_v21 }
 0x568   :  { %14418 = vst [vmem:[#allocation29_spill] sm:$0xff] %v10269_v37  ;;  %v10301_v28 = vmul.f32 %v9906_v13, %v10182_v21  ;;  %v10305_v39 = vmul.f32 %v10182_v21, %v9927_v47  ;;  %v10309_v0 = vmul.f32 %v10182_v21, %v9936_v55  ;;  %v10313_v17 = vmul.f32 %v9925_v41, %v10182_v21 }
 0x569   :  { %3573 = vst.msk [vmem:[#allocation3 + $0x1f9] sm:$0x7f] %vm3514_vm8, %v10269_v37  ;;  %v10319_v58 = vmul.f32 %v9934_v52, %v10182_v21  ;;  %v10323_v13 = vmul.f32 %v10182_v21, %v9955_v22  ;;  %v10327_v47 = vmul.f32 %v10182_v21, %v9964_v38  ;;  %v10331_v55 = vmul.f32 %v9953_v20, %v10182_v21  ;;  %v14441_v37 = vld [vmem:[#allocation22_spill] sm:$0xff] }
 0x56a   :  { %v10335_v41 = vmul.f32 %v9962_v34, %v10182_v21  ;;  %v10339_v52 = vmul.f32 %v10182_v21, %v9983_v11  ;;  %v10343_v22 = vmul.f32 %v10182_v21, %v9992_v61  ;;  %v10347_v38 = vmul.f32 %v9981_v8, %v10182_v21 }
 0x56b   :  { %v10351_v20 = vmul.f32 %v14419_v4, %v10182_v21  ;;  %v10355_v34 = vmul.f32 %v10182_v21, %v14420_v14  ;;  %v10359_v11 = vmul.f32 %v10182_v21, %v14421_v36  ;;  %v10363_v61 = vmul.f32 %v14422_v1, %v10182_v21  ;;  %v14430_v14 = vld [vmem:[#allocation13_spill] sm:$0xff]  ;;  %v14431_v1 = vld [vmem:[#allocation15_spill] sm:$0xff] }
 0x56c   :  { %v10367_v8 = vmul.f32 %v14423_v2, %v10182_v21  ;;  %v10371_v51 = vmul.f32 %v10182_v21, %v14424_v56  ;;  %v10375_v57 = vmul.f32 %v10182_v21, %v14425_v16  ;;  %v10379_v54 = vmul.f32 %v14426_v9, %v10182_v21  ;;  %v14433_v56 = vld [vmem:[#allocation18_spill] sm:$0xff]  ;;  %v14435_v9 = vld [vmem:[#allocation20_spill] sm:$0xff] }
 0x56d   :  { %v10383_v53 = vmul.f32 %v14427_v5, %v10182_v21  ;;  %v10387_v24 = vmul.f32 %v10182_v21, %v14428_v63  ;;  %v10391_v4 = vmul.f32 %v10182_v21, %v14429_v49  ;;  %v10395_v36 = vmul.f32 %v14430_v14, %v10182_v21  ;;  %v14437_v63 = vld [vmem:[#allocation17_spill] sm:$0xff] }
 0x56e   :  { %v10399_v2 = vmul.f32 %v14431_v1, %v10182_v21  ;;  %v10403_v16 = vmul.f32 %v10182_v21, %v14433_v56  ;;  %v10407_v5 = vmul.f32 %v10182_v21, %v14435_v9  ;;  %v10411_v49 = vmul.f32 %v14437_v63, %v10182_v21 }
 0x56f   :  { %v10415_v14 = vmul.f32 %v14439_v19, %v10182_v21  ;;  %v10419_v1 = vmul.f32 %v10182_v21, %v14441_v37 }
 0x570   :  { %14432 = vst [vmem:[#allocation9_spill] sm:$0xff] %v10399_v2  ;;  %14434 = vst [vmem:[#allocation4_spill] sm:$0xff] %v10403_v16  ;;  %v14443_v2 = vld [vmem:[#allocation24_spill] sm:$0xff]  ;;  %v14444_v16 = vld [vmem:[#allocation21_spill] sm:$0xff] }
 0x571   :  { %14436 = vst [vmem:[#allocation8_spill] sm:$0xff] %v10407_v5  ;;  %14438 = vst [vmem:[#allocation14_spill] sm:$0xff] %v10411_v49  ;;  %v10423_v56 = vmul.f32 %v10182_v21, %v14443_v2  ;;  %v10427_v9 = vmul.f32 %v14444_v16, %v10182_v21  ;;  %v14446_v5 = vld [vmem:[#allocation23_spill] sm:$0xff]  ;;  %v14447_v49 = vld [vmem:[#allocation26_spill] sm:$0xff]  ;;  %v3348_v16 = vadd.f32 %v10210_v48, %v10191_v62 }
 0x572   :  { %14440 = vst [vmem:[#allocation5_spill] sm:$0xff] %v10415_v14  ;;  %14442 = vst [vmem:[#allocation12_spill] sm:$0xff] %v10419_v1  ;;  %v10431_v63 = vmul.f32 %v14446_v5, %v10182_v21  ;;  %v10435_v19 = vmul.f32 %v10182_v21, %v14447_v49  ;;  %v14448_v14 = vld [vmem:[#allocation25_spill] sm:$0xff]  ;;  %v14449_v1 = vld [vmem:[#allocation27_spill] sm:$0xff]  ;;  %v10453_v5 = vadd.f32 %v10210_v48, %v10195_v42 }
 0x573   :  { %14445 = vst [vmem:[#allocation10_spill] sm:$0xff] %v10427_v9  ;;  %v10439_v37 = vmul.f32 %v14448_v14, %v10182_v21  ;;  %v10443_v2 = vmul.f32 %v14449_v1, %v10182_v21  ;;  %v10449_v9 = vadd.f32 %v10210_v48, %v10187_v23  ;;  %v10457_v49 = vadd.f32 %v10210_v48, %v10199_v18 }
 0x574   :  { %v10461_v14 = vadd.f32 %v10210_v48, %v10203_v32  ;;  %v10465_v21 = vadd.f32 %v10210_v48, %v10207_v27  ;;  %v10469_v23 = vadd.f32 %v10210_v48, %v10214_v25  ;;  %v10473_v62 = vadd.f32 %v10210_v48, %v10218_v29 }
 0x575   :  { %v10475_v42 = vmax.f32 %v3348_v16, 0.0  ;;  %v10479_v18 = vadd.f32 %v10210_v48, %v10222_v26  ;;  %v10483_v32 = vadd.f32 %v10210_v48, %v10226_v46  ;;  %v10487_v27 = vadd.f32 %v10210_v48, %v10230_v50 }
 0x576   :  { %v10491_v25 = vadd.f32 %v10210_v48, %v10234_v44  ;;  %v10495_v29 = vadd.f32 %v10210_v48, %v10238_v3  ;;  %v10499_v26 = vadd.f32 %v10210_v48, %v10243_v7  ;;  %v10503_v46 = vadd.f32 %v10210_v48, %v10247_v15 }
 0x577   :  { %14450 = vst [vmem:[#allocation11_spill] sm:$0xff] %v10475_v42  ;;  %3641 = vrot.lane.b32.xlu1 %v10475_v42, %s7262_s12  ;;  %v10509_v50 = vadd.f32 %v10210_v48, %v10251_v31  ;;  %v10513_v44 = vadd.f32 %v10210_v48, %v10255_v12  ;;  %v10517_v3 = vadd.f32 %v10210_v48, %v10259_v35  ;;  %3515 = vst.msk [vmem:[#allocation3 + $0x19] sm:$0x7f] %vm3514_vm8, %v10475_v42  ;;  %v14454_v1 = vld [vmem:[#allocation9_spill] sm:$0xff]  ;;  %v14455_v16 = vld [vmem:[#allocation4_spill] sm:$0xff] }
 0x578   :  { %v10521_v7 = vadd.f32 %v10210_v48, %v10263_v43  ;;  %v10527_v15 = vadd.f32 %v10210_v48, %v10267_v33  ;;  %v10531_v31 = vadd.f32 %v10210_v48, %v10273_v40  ;;  %v10535_v12 = vadd.f32 %v10210_v48, %v10277_v59 }
 0x579   :  { %v10539_v35 = vadd.f32 %v10210_v48, %v10281_v10  ;;  %v10543_v43 = vadd.f32 %v10210_v48, %v10285_v60  ;;  %v10547_v33 = vadd.f32 %v10210_v48, %v10289_v6  ;;  %v10551_v40 = vadd.f32 %v10210_v48, %v10293_v30  ;;  %v14459_v42 = vld [vmem:[#allocation5_spill] sm:$0xff] }
 0x57a   :  { %v10555_v59 = vadd.f32 %v10210_v48, %v10297_v45  ;;  %v10559_v10 = vadd.f32 %v10210_v48, %v10301_v28  ;;  %v10563_v60 = vadd.f32 %v10210_v48, %v10305_v39  ;;  %v10567_v6 = vadd.f32 %v10210_v48, %v10309_v0 }
 0x57b   :  { %v10571_v30 = vadd.f32 %v10210_v48, %v10313_v17  ;;  %v10575_v45 = vadd.f32 %v10210_v48, %v10319_v58  ;;  %v10579_v28 = vadd.f32 %v10210_v48, %v10323_v13  ;;  %v10583_v39 = vadd.f32 %v10210_v48, %v10327_v47 }
 0x57c   :  { %v10587_v0 = vadd.f32 %v10210_v48, %v10331_v55  ;;  %v10591_v17 = vadd.f32 %v10210_v48, %v10335_v41  ;;  %v10595_v58 = vadd.f32 %v10210_v48, %v10339_v52  ;;  %v10599_v13 = vadd.f32 %v10210_v48, %v10343_v22 }
 0x57d   :  { %14451 = vst [vmem:[#allocation6_spill] sm:$0xff] %v10571_v30  ;;  %14452 = vst [vmem:[#allocation7_spill] sm:$0xff] %v10575_v45  ;;  %v10603_v47 = vadd.f32 %v10210_v48, %v10347_v38  ;;  %v10607_v55 = vadd.f32 %v10210_v48, %v10351_v20  ;;  %v10611_v41 = vadd.f32 %v10210_v48, %v10355_v34  ;;  %v14457_v30 = vld [vmem:[#allocation8_spill] sm:$0xff]  ;;  %v14458_v45 = vld [vmem:[#allocation14_spill] sm:$0xff] }
 0x57e   :  { %v10615_v52 = vadd.f32 %v10210_v48, %v10359_v11  ;;  %v10619_v22 = vadd.f32 %v10210_v48, %v10363_v61  ;;  %v10623_v38 = vadd.f32 %v10210_v48, %v10367_v8  ;;  %v10627_v20 = vadd.f32 %v10210_v48, %v10371_v51 }
 0x57f   :  { %v10631_v34 = vadd.f32 %v10210_v48, %v10375_v57  ;;  %v10635_v11 = vadd.f32 %v10210_v48, %v10379_v54  ;;  %v10639_v61 = vadd.f32 %v10210_v48, %v10383_v53  ;;  %v10643_v8 = vadd.f32 %v10210_v48, %v10387_v24 }
 0x580   :  { %v10647_v51 = vadd.f32 %v10210_v48, %v10391_v4  ;;  %v10651_v57 = vadd.f32 %v10210_v48, %v10395_v36  ;;  %v10655_v54 = vadd.f32 %v10210_v48, %v14454_v1  ;;  %v10659_v53 = vadd.f32 %v10210_v48, %v14455_v16 }
 0x581   :  { %v10663_v24 = vadd.f32 %v10210_v48, %v14457_v30  ;;  %v10667_v4 = vadd.f32 %v10210_v48, %v14458_v45  ;;  %v10671_v36 = vadd.f32 %v10210_v48, %v14459_v42  ;;  %v10679_v16 = vadd.f32 %v10210_v48, %v10423_v56 }
 0x582   :  { %14453 = vst [vmem:[#allocation16_spill] sm:$0xff] %v10651_v57  ;;  %14456 = vst [vmem:[#allocation13_spill] sm:$0xff] %v10659_v53  ;;  %v14460_v57 = vld [vmem:[#allocation12_spill] sm:$0xff]  ;;  %v14462_v53 = vld [vmem:[#allocation10_spill] sm:$0xff]  ;;  %v10687_v45 = vadd.f32 %v10210_v48, %v10431_v63  ;;  %v10691_v42 = vadd.f32 %v10210_v48, %v10435_v19  ;;  %v10699_v56 = vadd.f32 %v10210_v48, %v10443_v2  ;;  %v10708_v63 = vmax.f32 %v10457_v49, 0.0 }
 0x583   :  { %v10675_v1 = vadd.f32 %v10210_v48, %v14460_v57  ;;  %14461 = vst [vmem:[#allocation15_spill] sm:$0xff] %v10679_v16  ;;  %v10683_v30 = vadd.f32 %v10210_v48, %v14462_v53  ;;  %v10695_v57 = vadd.f32 %v10210_v48, %v10439_v37  ;;  %v10702_v16 = vmax.f32 %v10449_v9, 0.0 }
 0x584   :  { %14463 = vst [vmem:[#allocation18_spill] sm:$0xff] %v10691_v42  ;;  %14465 = vst [vmem:[#allocation17_spill] sm:$0xff] %v10699_v56  ;;  %v10705_v53 = vmax.f32 %v10453_v5, 0.0  ;;  %v10711_v19 = vmax.f32 %v10461_v14, 0.0  ;;  %v10714_v42 = vmax.f32 %v10465_v21, 0.0  ;;  %v10717_v37 = vmax.f32 %v10469_v23, 0.0  ;;  %3645 = vrot.lane.b32.xlu1 %v10708_v63, %s7262_s12 }
 0x585   :  { %14464 = vst [vmem:[#allocation20_spill] sm:$0xff] %v10695_v57  ;;  %v10720_v48 = vmax.f32 %v10473_v62, 0.0  ;;  %v10723_v9 = vmax.f32 %v10479_v18, 0.0  ;;  %3639 = vrot.lane.b32.xlu0 %v10702_v16, %s7262_s12  ;;  %v10728_v2 = vmax.f32 %v10483_v32, 0.0  ;;  %v10731_v5 = vmax.f32 %v10487_v27, 0.0  ;;  %3513 = vst.msk [vmem:[#allocation3 + $0x11] sm:$0xff] %vm2930_vm7, %v10702_v16 }
 0x586   :  { %v10734_v49 = vmax.f32 %v10491_v25, 0.0  ;;  %v10737_v14 = vmax.f32 %v10495_v29, 0.0  ;;  %3516 = vst.msk [vmem:[#allocation3 + $0x21] sm:$0xff] %vm2930_vm7, %v10705_v53  ;;  %3518 = vst.msk [vmem:[#allocation3 + $0x31] sm:$0xff] %vm2930_vm7, %v10711_v19  ;;  %v10750_v21 = vmax.f32 %v10499_v26, 0.0  ;;  %v10753_v23 = vmax.f32 %v10503_v46, 0.0 }
 0x587   :  { %3517 = vst.msk [vmem:[#allocation3 + $0x29] sm:$0x7f] %vm3514_vm8, %v10708_v63  ;;  %v10756_v62 = vmax.f32 %v10509_v50, 0.0  ;;  %v10759_v18 = vmax.f32 %v10513_v44, 0.0  ;;  %3519 = vst.msk [vmem:[#allocation3 + $0x39] sm:$0x7f] %vm3514_vm8, %v10714_v42 }
 0x588   :  { %3520 = vst.msk [vmem:[#allocation3 + $0x41] sm:$0xff] %vm2930_vm7, %v10717_v37  ;;  %3522 = vst.msk [vmem:[#allocation3 + $0x51] sm:$0xff] %vm2930_vm7, %v10723_v9  ;;  %v10770_v32 = vmax.f32 %v10517_v3, 0.0  ;;  %v10773_v27 = vmax.f32 %v10521_v7, 0.0  ;;  %v10776_v25 = vmax.f32 %v10527_v15, 0.0  ;;  %v10779_v29 = vmax.f32 %v10531_v31, 0.0  ;;  %3649 = vrot.lane.b32.xlu1 %v10714_v42, %s7262_s12 }
 0x589   :  { %3521 = vst.msk [vmem:[#allocation3 + $0x49] sm:$0x7f] %vm3514_vm8, %v10720_v48  ;;  %3523 = vst.msk [vmem:[#allocation3 + $0x59] sm:$0x7f] %vm3514_vm8, %v10728_v2  ;;  %v10790_v26 = vmax.f32 %v10535_v12, 0.0  ;;  %v10793_v46 = vmax.f32 %v10539_v35, 0.0  ;;  %3643 = vrot.lane.b32.xlu0 %v10705_v53, %s7262_s12 }
 0x58a   :  { %3524 = vst.msk [vmem:[#allocation3 + $0x61] sm:$0xff] %vm2930_vm7, %v10731_v5  ;;  %3526 = vst.msk [vmem:[#allocation3 + $0x71] sm:$0xff] %vm2930_vm7, %v10737_v14  ;;  %v10796_v50 = vmax.f32 %v10543_v43, 0.0  ;;  %v10799_v44 = vmax.f32 %v10547_v33, 0.0  ;;  %v10810_v3 = vmax.f32 %v10551_v40, 0.0  ;;  %v10813_v7 = vmax.f32 %v10555_v59, 0.0 }
 0x58b   :  { %3525 = vst.msk [vmem:[#allocation3 + $0x69] sm:$0x7f] %vm3514_vm8, %v10734_v49  ;;  %3527 = vst.msk [vmem:[#allocation3 + $0x79] sm:$0x7f] %vm3514_vm8, %v10750_v21  ;;  %v10816_v15 = vmax.f32 %v10559_v10, 0.0  ;;  %v10819_v31 = vmax.f32 %v10563_v60, 0.0 }
 0x58c   :  { %14466 = vst [vmem:[#allocation19_spill] sm:$0xff] %v10799_v44  ;;  %3528 = vst.msk [vmem:[#allocation3 + $0x81] sm:$0xff] %vm2930_vm7, %v10753_v23  ;;  %v10834_v12 = vmax.f32 %v10567_v6, 0.0  ;;  %v10837_v35 = vmax.f32 %v10579_v28, 0.0  ;;  %v10848_v43 = vmax.f32 %v10583_v39, 0.0  ;;  %v10851_v33 = vmax.f32 %v10587_v0, 0.0  ;;  %3653 = vrot.lane.b32.xlu1 %v10720_v48, %s7262_s12 }
 0x58d   :  { %3530 = vst.msk [vmem:[#allocation3 + $0x91] sm:$0xff] %vm2930_vm7, %v10759_v18  ;;  %14467 = vst [vmem:[#allocation22_spill] sm:$0xff] %v10810_v3  ;;  %v10854_v40 = vmax.f32 %v10591_v17, 0.0  ;;  %v10857_v59 = vmax.f32 %v10595_v58, 0.0  ;;  %v10868_v10 = vmax.f32 %v10599_v13, 0.0  ;;  %v10871_v60 = vmax.f32 %v10603_v47, 0.0  ;;  %3647 = vrot.lane.b32.xlu0 %v10711_v19, %s7262_s12 }
 0x58e   :  { %3529 = vst.msk [vmem:[#allocation3 + $0x89] sm:$0x7f] %vm3514_vm8, %v10756_v62  ;;  %14468 = vst [vmem:[#allocation24_spill] sm:$0xff] %v10816_v15  ;;  %v10874_v6 = vmax.f32 %v10607_v55, 0.0  ;;  %v10877_v28 = vmax.f32 %v10611_v41, 0.0  ;;  %v10884_v39 = vmax.f32 %v10615_v52, 0.0 }
 0x58f   :  { %3532 = vst.msk [vmem:[#allocation3 + $0xa1] sm:$0xff] %vm2930_vm7, %v10773_v27  ;;  %3534 = vst.msk [vmem:[#allocation3 + $0xb1] sm:$0xff] %vm2930_vm7, %v10779_v29  ;;  %v10887_v0 = vmax.f32 %v10619_v22, 0.0  ;;  %v10890_v17 = vmax.f32 %v10623_v38, 0.0  ;;  %v10893_v58 = vmax.f32 %v10627_v20, 0.0  ;;  %v10908_v13 = vmax.f32 %v10631_v34, 0.0 }
 0x590   :  { %3531 = vst.msk [vmem:[#allocation3 + $0x99] sm:$0x7f] %vm3514_vm8, %v10770_v32  ;;  %3533 = vst.msk [vmem:[#allocation3 + $0xa9] sm:$0x7f] %vm3514_vm8, %v10776_v25  ;;  %v10911_v47 = vmax.f32 %v10635_v11, 0.0  ;;  %v10914_v55 = vmax.f32 %v10639_v61, 0.0  ;;  %3657 = vrot.lane.b32.xlu1 %v10728_v2, %s7262_s12 }
 0x591   :  { %14469 = vst [vmem:[#allocation21_spill] sm:$0xff] %v10834_v12  ;;  %3536 = vst.msk [vmem:[#allocation3 + $0xc1] sm:$0xff] %vm2930_vm7, %v10793_v46  ;;  %v10917_v41 = vmax.f32 %v10643_v8, 0.0  ;;  %v10928_v52 = vmax.f32 %v10647_v51, 0.0  ;;  %v14470_v22 = vld [vmem:[#allocation16_spill] sm:$0xff]  ;;  %v10934_v20 = vmax.f32 %v10655_v54, 0.0  ;;  %3651 = vrot.lane.b32.xlu0 %v10717_v37, %s7262_s12 }
 0x592   :  { %3538 = vst.msk [vmem:[#allocation3 + $0xd1] sm:$0xff] %vm2930_vm7, %v10799_v44  ;;  %3540 = vst.msk [vmem:[#allocation3 + $0xe1] sm:$0xff] %vm2930_vm7, %v10813_v7  ;;  %v10931_v38 = vmax.f32 %v14470_v22, 0.0  ;;  %v14471_v34 = vld [vmem:[#allocation13_spill] sm:$0xff]  ;;  %v10948_v61 = vmax.f32 %v10663_v24, 0.0  ;;  %v10951_v8 = vmax.f32 %v10667_v4, 0.0 }
 0x593   :  { %3535 = vst.msk [vmem:[#allocation3 + $0xb9] sm:$0x7f] %vm3514_vm8, %v10790_v26  ;;  %3537 = vst.msk [vmem:[#allocation3 + $0xc9] sm:$0x7f] %vm3514_vm8, %v10796_v50  ;;  %v10937_v11 = vmax.f32 %v14471_v34, 0.0  ;;  %v10954_v51 = vmax.f32 %v10671_v36, 0.0 }
 0x594   :  { %3542 = vst.msk [vmem:[#allocation3 + $0xf1] sm:$0xff] %vm2930_vm7, %v10819_v31  ;;  %3544 = vst.msk [vmem:[#allocation3 + $0x111] sm:$0xff] %vm2930_vm7, %v10837_v35  ;;  %v10957_v54 = vmax.f32 %v10675_v1, 0.0  ;;  %v14475_v24 = vld [vmem:[#allocation15_spill] sm:$0xff]  ;;  %v10971_v36 = vmax.f32 %v10683_v30, 0.0  ;;  %v10974_v1 = vmax.f32 %v10687_v45, 0.0  ;;  %3661 = vrot.lane.b32.xlu1 %v10734_v49, %s7262_s12 }
 0x595   :  { %3539 = vst.msk [vmem:[#allocation3 + $0xd9] sm:$0x7f] %vm3514_vm8, %v10810_v3  ;;  %3541 = vst.msk [vmem:[#allocation3 + $0xe9] sm:$0x7f] %vm3514_vm8, %v10816_v15  ;;  %v10968_v4 = vmax.f32 %v14475_v24, 0.0  ;;  %v14478_v22 = vld [vmem:[#allocation18_spill] sm:$0xff]  ;;  %3655 = vrot.lane.b32.xlu0 %v10723_v9, %s7262_s12 }
 0x596   :  { %3543 = vst.msk [vmem:[#allocation3 + $0xf9] sm:$0x7f] %vm3514_vm8, %v10834_v12  ;;  %3545 = vst.msk [vmem:[#allocation3 + $0x119] sm:$0x7f] %vm3514_vm8, %v10848_v43  ;;  %v10977_v34 = vmax.f32 %v14478_v22, 0.0  ;;  %v14479_v30 = vmov 0.0  }
 0x597   :  { %3546 = vst.msk [vmem:[#allocation3 + $0x121] sm:$0xff] %vm2930_vm7, %v10851_v33  ;;  %3548 = vst.msk [vmem:[#allocation3 + $0x131] sm:$0xff] %vm2930_vm7, %v10857_v59  ;;  %v14480_v24 = vld [vmem:[#allocation29_spill] sm:$0xff]  ;;  %v14481_v57 = vld [vmem:[#allocation11_spill] sm:$0xff] }
 0x598   :  { %3547 = vst.msk [vmem:[#allocation3 + $0x129] sm:$0x7f] %vm3514_vm8, %v10854_v40  ;;  %3549 = vst.msk [vmem:[#allocation3 + $0x139] sm:$0x7f] %vm3514_vm8, %v10868_v10  ;;  %3665 = vrot.lane.b32.xlu1 %v10750_v21, %s7262_s12 }
 0x599   :  { %3550 = vst.msk [vmem:[#allocation3 + $0x141] sm:$0xff] %vm2930_vm7, %v10871_v60  ;;  %3552 = vst.msk [vmem:[#allocation3 + $0x151] sm:$0xff] %vm2930_vm7, %v10877_v28  ;;  %3659 = vrot.lane.b32.xlu0 %v10731_v5, %s7262_s12 }
 0x59a   :  { %3551 = vst.msk [vmem:[#allocation3 + $0x149] sm:$0x7f] %vm3514_vm8, %v10874_v6  ;;  %3553 = vst.msk [vmem:[#allocation3 + $0x159] sm:$0x7f] %vm3514_vm8, %v10884_v39 }
 0x59b   :  { %3554 = vst.msk [vmem:[#allocation3 + $0x161] sm:$0xff] %vm2930_vm7, %v10887_v0  ;;  %3556 = vst.msk [vmem:[#allocation3 + $0x171] sm:$0xff] %vm2930_vm7, %v10893_v58 }
 0x59c   :  { %3555 = vst.msk [vmem:[#allocation3 + $0x169] sm:$0x7f] %vm3514_vm8, %v10890_v17  ;;  %14472 = vst [vmem:[#allocation23_spill] sm:$0xff] %v10951_v8  ;;  %3669 = vrot.lane.b32.xlu1 %v10756_v62, %s7262_s12 }
 0x59d   :  { %14473 = vst [vmem:[#allocation26_spill] sm:$0xff] %v10954_v51  ;;  %14474 = vst [vmem:[#allocation25_spill] sm:$0xff] %v10957_v54  ;;  %3663 = vrot.lane.b32.xlu0 %v10737_v14, %s7262_s12 }
 0x59e   :  { %3558 = vst.msk [vmem:[#allocation3 + $0x181] sm:$0xff] %vm2930_vm7, %v10911_v47  ;;  %3560 = vst.msk [vmem:[#allocation3 + $0x191] sm:$0xff] %vm2930_vm7, %v10917_v41 }
 0x59f   :  { %3557 = vst.msk [vmem:[#allocation3 + $0x179] sm:$0x7f] %vm3514_vm8, %v10908_v13  ;;  %3559 = vst.msk [vmem:[#allocation3 + $0x189] sm:$0x7f] %vm3514_vm8, %v10914_v55 }
 0x5a0   :  { %14476 = vst [vmem:[#allocation27_spill] sm:$0xff] %v10968_v4  ;;  %14477 = vst [vmem:[#allocation9_spill] sm:$0xff] %v10971_v36  ;;  %3673 = vrot.lane.b32.xlu1 %v10770_v32, %s7262_s12 }
 0x5a1   :  { %3562 = vst.msk [vmem:[#allocation3 + $0x1a1] sm:$0xff] %vm2930_vm7, %v10931_v38  ;;  %3564 = vst.msk [vmem:[#allocation3 + $0x1b1] sm:$0xff] %vm2930_vm7, %v10937_v11  ;;  %3667 = vrot.lane.b32.xlu0 %v10753_v23, %s7262_s12 }
 0x5a2   :  { %3561 = vst.msk [vmem:[#allocation3 + $0x199] sm:$0x7f] %vm3514_vm8, %v10928_v52  ;;  %3563 = vst.msk [vmem:[#allocation3 + $0x1a9] sm:$0x7f] %vm3514_vm8, %v10934_v20 }
 0x5a3   :  { %3566 = vst.msk [vmem:[#allocation3 + $0x1c1] sm:$0xff] %vm2930_vm7, %v10951_v8  ;;  %3568 = vst.msk [vmem:[#allocation3 + $0x1d1] sm:$0xff] %vm2930_vm7, %v10957_v54 }
 0x5a4   :  { %3565 = vst.msk [vmem:[#allocation3 + $0x1b9] sm:$0x7f] %vm3514_vm8, %v10948_v61  ;;  %3567 = vst.msk [vmem:[#allocation3 + $0x1c9] sm:$0x7f] %vm3514_vm8, %v10954_v51  ;;  %3677 = vrot.lane.b32.xlu1 %v10776_v25, %s7262_s12 }
 0x5a5   :  { %3570 = vst.msk [vmem:[#allocation3 + $0x1e1] sm:$0xff] %vm2930_vm7, %v10971_v36  ;;  %3572 = vst.msk [vmem:[#allocation3 + $0x1f1] sm:$0xff] %vm2930_vm7, %v10977_v34  ;;  %3671 = vrot.lane.b32.xlu0 %v10759_v18, %s7262_s12 }
 0x5a6   :  { %3569 = vst.msk [vmem:[#allocation3 + $0x1d9] sm:$0x7f] %vm3514_vm8, %v10968_v4  ;;  %3571 = vst.msk [vmem:[#allocation3 + $0x1e9] sm:$0x7f] %vm3514_vm8, %v10974_v1  ;;  %vm5002_vm8 = vcmask 458112  }
 0x5a7   :  { %3576 = vst.msk [vmem:[#allocation3 + $0x8] sm:$0xff] %vm3574_vm9, %v14479_v30  ;;  %3578 = vst.msk [vmem:[#allocation3 + $0x108] sm:$0xff] %vm3574_vm9, %v14479_v30 }
 0x5a8   :  { %3481 = vst.msk [vmem:[#allocation3 + $0x10] sm:$0x1] %vm3479_vm10, %v14479_v30  ;;  %3480 = vst.msk [vmem:[#allocation3] sm:$0x1] %vm3479_vm10, %v14479_v30  ;;  %3681 = vrot.lane.b32.xlu1 %v10790_v26, %s7262_s12 }
 0x5a9   :  { %3482 = vst.msk [vmem:[#allocation3 + $0x20] sm:$0x1] %vm3479_vm10, %v14479_v30  ;;  %3483 = vst.msk [vmem:[#allocation3 + $0x30] sm:$0x1] %vm3479_vm10, %v14479_v30  ;;  %3675 = vrot.lane.b32.xlu0 %v10773_v27, %s7262_s12 }
 0x5aa   :  { %3484 = vst.msk [vmem:[#allocation3 + $0x40] sm:$0x1] %vm3479_vm10, %v14479_v30  ;;  %3485 = vst.msk [vmem:[#allocation3 + $0x50] sm:$0x1] %vm3479_vm10, %v14479_v30 }
 0x5ab   :  { %3486 = vst.msk [vmem:[#allocation3 + $0x60] sm:$0x1] %vm3479_vm10, %v14479_v30  ;;  %3487 = vst.msk [vmem:[#allocation3 + $0x70] sm:$0x1] %vm3479_vm10, %v14479_v30 }
 0x5ac   :  { %3488 = vst.msk [vmem:[#allocation3 + $0x80] sm:$0x1] %vm3479_vm10, %v14479_v30  ;;  %3489 = vst.msk [vmem:[#allocation3 + $0x90] sm:$0x1] %vm3479_vm10, %v14479_v30  ;;  %3685 = vrot.lane.b32.xlu1 %v10796_v50, %s7262_s12 }
 0x5ad   :  { %3490 = vst.msk [vmem:[#allocation3 + $0xa0] sm:$0x1] %vm3479_vm10, %v14479_v30  ;;  %3491 = vst.msk [vmem:[#allocation3 + $0xb0] sm:$0x1] %vm3479_vm10, %v14479_v30  ;;  %3679 = vrot.lane.b32.xlu0 %v10779_v29, %s7262_s12 }
 0x5ae   :  { %3492 = vst.msk [vmem:[#allocation3 + $0xc0] sm:$0x1] %vm3479_vm10, %v14479_v30  ;;  %3493 = vst.msk [vmem:[#allocation3 + $0xd0] sm:$0x1] %vm3479_vm10, %v14479_v30 }
 0x5af   :  { %3494 = vst.msk [vmem:[#allocation3 + $0xe0] sm:$0x1] %vm3479_vm10, %v14479_v30  ;;  %3495 = vst.msk [vmem:[#allocation3 + $0xf0] sm:$0x1] %vm3479_vm10, %v14479_v30 }
 0x5b0   :  { %3496 = vst.msk [vmem:[#allocation3 + $0x100] sm:$0x1] %vm3479_vm10, %v14479_v30  ;;  %3497 = vst.msk [vmem:[#allocation3 + $0x110] sm:$0x1] %vm3479_vm10, %v14479_v30  ;;  %3689 = vrot.lane.b32.xlu1 %v10810_v3, %s7262_s12 }
 0x5b1   :  { %3498 = vst.msk [vmem:[#allocation3 + $0x120] sm:$0x1] %vm3479_vm10, %v14479_v30  ;;  %3499 = vst.msk [vmem:[#allocation3 + $0x130] sm:$0x1] %vm3479_vm10, %v14479_v30  ;;  %3683 = vrot.lane.b32.xlu0 %v10793_v46, %s7262_s12 }
 0x5b2   :  { %3500 = vst.msk [vmem:[#allocation3 + $0x140] sm:$0x1] %vm3479_vm10, %v14479_v30  ;;  %3501 = vst.msk [vmem:[#allocation3 + $0x150] sm:$0x1] %vm3479_vm10, %v14479_v30 }
 0x5b3   :  { %3502 = vst.msk [vmem:[#allocation3 + $0x160] sm:$0x1] %vm3479_vm10, %v14479_v30  ;;  %3503 = vst.msk [vmem:[#allocation3 + $0x170] sm:$0x1] %vm3479_vm10, %v14479_v30 }
 0x5b4   :  { %3504 = vst.msk [vmem:[#allocation3 + $0x180] sm:$0x1] %vm3479_vm10, %v14479_v30  ;;  %3505 = vst.msk [vmem:[#allocation3 + $0x190] sm:$0x1] %vm3479_vm10, %v14479_v30  ;;  %3693 = vrot.lane.b32.xlu1 %v10816_v15, %s7262_s12 }
 0x5b5   :  { %3506 = vst.msk [vmem:[#allocation3 + $0x1a0] sm:$0x1] %vm3479_vm10, %v14479_v30  ;;  %3507 = vst.msk [vmem:[#allocation3 + $0x1b0] sm:$0x1] %vm3479_vm10, %v14479_v30  ;;  %3687 = vrot.lane.b32.xlu0 %v10799_v44, %s7262_s12 }
 0x5b6   :  { %3508 = vst.msk [vmem:[#allocation3 + $0x1c0] sm:$0x1] %vm3479_vm10, %v14479_v30  ;;  %3509 = vst.msk [vmem:[#allocation3 + $0x1d0] sm:$0x1] %vm3479_vm10, %v14479_v30 }
 0x5b7   :  { %3510 = vst.msk [vmem:[#allocation3 + $0x1e0] sm:$0x1] %vm3479_vm10, %v14479_v30  ;;  %3511 = vst.msk [vmem:[#allocation3 + $0x1f0] sm:$0x1] %vm3479_vm10, %v14479_v30  ;;  %vm5281_vm10 = vcmask 523712  }
 0x5b8   :  { %3575 = vst.msk [vmem:[#allocation3] sm:$0xff] %vm3574_vm9, %v14479_v30  ;;  %3577 = vst.msk [vmem:[#allocation3 + $0x100] sm:$0xff] %vm3574_vm9, %v14479_v30  ;;  %3697 = vrot.lane.b32.xlu1 %v10834_v12, %s7262_s12 }
 0x5b9   :  { %3691 = vrot.lane.b32.xlu0 %v10813_v7, %s7262_s12  ;;  %3880 = vst.msk [vmem:[#allocation3] sm:$0xff] %vm3879_vm12, %v14479_v30  ;;  %3881 = vst.msk [vmem:[#allocation3 + $0x8] sm:$0xff] %vm3879_vm12, %v14479_v30 }
 0x5ba   :  { %3882 = vst.msk [vmem:[#allocation3 + $0x100] sm:$0xff] %vm3879_vm12, %v14479_v30  ;;  %3883 = vst.msk [vmem:[#allocation3 + $0x108] sm:$0xff] %vm3879_vm12, %v14479_v30 }
 0x5bb   :  { %3885 = vst.msk [vmem:[#allocation3 + $0xf] sm:$0x1] %vm3884_vm11, %v14479_v30  ;;  %3901 = vst.msk [vmem:[#allocation3 + $0x10f] sm:$0x1] %vm3884_vm11, %v14479_v30 }
 0x5bc   :  { %3701 = vrot.lane.b32.xlu1 %v10848_v43, %s7262_s12  ;;  %4159 = vst.msk [vmem:[#allocation3] sm:$0x1] %vm4158_vm13, %v14479_v30  ;;  %4175 = vst.msk [vmem:[#allocation3 + $0x100] sm:$0x1] %vm4158_vm13, %v14479_v30 }
 0x5bd   :  { %3695 = vrot.lane.b32.xlu0 %v10819_v31, %s7262_s12 }
 0x5c0   :  { %3705 = vrot.lane.b32.xlu1 %v10854_v40, %s7262_s12 }
 0x5c1   :  { %3699 = vrot.lane.b32.xlu0 %v10837_v35, %s7262_s12 }
 0x5c4   :  { %3709 = vrot.lane.b32.xlu1 %v10868_v10, %s7262_s12 }
 0x5c5   :  { %3703 = vrot.lane.b32.xlu0 %v10851_v33, %s7262_s12 }
 0x5c8   :  { %3713 = vrot.lane.b32.xlu1 %v10874_v6, %s7262_s12 }
 0x5c9   :  { %3707 = vrot.lane.b32.xlu0 %v10857_v59, %s7262_s12 }
 0x5cc   :  { %3717 = vrot.lane.b32.xlu1 %v10884_v39, %s7262_s12 }
 0x5cd   :  { %3711 = vrot.lane.b32.xlu0 %v10871_v60, %s7262_s12 }
 0x5d0   :  { %3721 = vrot.lane.b32.xlu1 %v10890_v17, %s7262_s12 }
 0x5d1   :  { %3715 = vrot.lane.b32.xlu0 %v10877_v28, %s7262_s12 }
 0x5d4   :  { %3725 = vrot.lane.b32.xlu1 %v10908_v13, %s7262_s12 }
 0x5d5   :  { %3719 = vrot.lane.b32.xlu0 %v10887_v0, %s7262_s12 }
 0x5d8   :  { %3729 = vrot.lane.b32.xlu1 %v10914_v55, %s7262_s12 }
 0x5d9   :  { %3723 = vrot.lane.b32.xlu0 %v10893_v58, %s7262_s12 }
 0x5dc   :  { %3733 = vrot.lane.b32.xlu1 %v10928_v52, %s7262_s12 }
 0x5dd   :  { %3727 = vrot.lane.b32.xlu0 %v10911_v47, %s7262_s12 }
 0x5e0   :  { %3737 = vrot.lane.b32.xlu1 %v10934_v20, %s7262_s12 }
 0x5e1   :  { %3731 = vrot.lane.b32.xlu0 %v10917_v41, %s7262_s12 }
 0x5e4   :  { %3741 = vrot.lane.b32.xlu1 %v10948_v61, %s7262_s12 }
 0x5e5   :  { %3735 = vrot.lane.b32.xlu0 %v10931_v38, %s7262_s12 }
 0x5e8   :  { %3745 = vrot.lane.b32.xlu1 %v10954_v51, %s7262_s12 }
 0x5e9   :  { %3739 = vrot.lane.b32.xlu0 %v10937_v11, %s7262_s12  ;;  %v3642_v45 = vpop.permute.xlu1 %3641 }
 0x5ea   :  { %3820 = vst.msk [vmem:[#allocation3 + $0x18] sm:$0xff] %vm3574_vm9, %v3642_v45 }
 0x5eb   :  { %3886 = vst.msk [vmem:[#allocation3 + $0x1f] sm:$0x1] %vm3884_vm11, %v14479_v30 }
 0x5ec   :  { %3749 = vrot.lane.b32.xlu1 %v10968_v4, %s7262_s12 }
 0x5ed   :  { %3743 = vrot.lane.b32.xlu0 %v10951_v8, %s7262_s12 }
 0x5f0   :  { %3753 = vrot.lane.b32.xlu1 %v10974_v1, %s7262_s12 }
 0x5f1   :  { %3747 = vrot.lane.b32.xlu0 %v10957_v54, %s7262_s12 }
 0x5f4   :  { %3757 = vrot.lane.b32.xlu1 %v14480_v24, %s7262_s12 }
 0x5f5   :  { %3751 = vrot.lane.b32.xlu0 %v10971_v36, %s7262_s12 }
 0x5f6   :  { %v3646_v45 = vpop.permute.xlu1 %3645 }
 0x5f7   :  { %v3640_v22 = vpop.permute.xlu0 %3639  ;;  %3822 = vst.msk [vmem:[#allocation3 + $0x28] sm:$0xff] %vm3574_vm9, %v3646_v45 }
 0x5f8   :  { %3819 = vst.msk [vmem:[#allocation3 + $0x10] sm:$0xff] %vm3574_vm9, %v3640_v22  ;;  %3919 = vrot.lane.b32.xlu1 %v14481_v57, %s7264_s21 }
 0x5f9   :  { %3755 = vrot.lane.b32.xlu0 %v10977_v34, %s7262_s12  ;;  %3887 = vst.msk [vmem:[#allocation3 + $0x2f] sm:$0x1] %vm3884_vm11, %v14479_v30 }
 0x5fa   :  { %v3650_v36 = vpop.permute.xlu1 %3649 }
 0x5fb   :  { %v3644_v56 = vpop.permute.xlu0 %3643  ;;  %3824 = vst.msk [vmem:[#allocation3 + $0x38] sm:$0xff] %vm3574_vm9, %v3650_v36 }
 0x5fc   :  { %3821 = vst.msk [vmem:[#allocation3 + $0x20] sm:$0xff] %vm3574_vm9, %v3644_v56  ;;  %3923 = vrot.lane.b32.xlu1 %v10708_v63, %s7264_s21 }
 0x5fd   :  { %3917 = vrot.lane.b32.xlu0 %v10702_v16, %s7264_s21  ;;  %3888 = vst.msk [vmem:[#allocation3 + $0x3f] sm:$0x1] %vm3884_vm11, %v14479_v30 }
 0x5fe   :  { %v3654_v45 = vpop.permute.xlu1 %3653 }
 0x5ff   :  { %v3648_v22 = vpop.permute.xlu0 %3647  ;;  %3826 = vst.msk [vmem:[#allocation3 + $0x48] sm:$0xff] %vm3574_vm9, %v3654_v45 }
 0x600   :  { %3823 = vst.msk [vmem:[#allocation3 + $0x30] sm:$0xff] %vm3574_vm9, %v3648_v22  ;;  %3927 = vrot.lane.b32.xlu1 %v10714_v42, %s7264_s21 }
 0x601   :  { %3921 = vrot.lane.b32.xlu0 %v10705_v53, %s7264_s21  ;;  %3889 = vst.msk [vmem:[#allocation3 + $0x4f] sm:$0x1] %vm3884_vm11, %v14479_v30 }
 0x602   :  { %v3658_v36 = vpop.permute.xlu1 %3657 }
 0x603   :  { %v3652_v56 = vpop.permute.xlu0 %3651  ;;  %3828 = vst.msk [vmem:[#allocation3 + $0x58] sm:$0xff] %vm3574_vm9, %v3658_v36 }
 0x604   :  { %3825 = vst.msk [vmem:[#allocation3 + $0x40] sm:$0xff] %vm3574_vm9, %v3652_v56  ;;  %3931 = vrot.lane.b32.xlu1 %v10720_v48, %s7264_s21 }
 0x605   :  { %3925 = vrot.lane.b32.xlu0 %v10711_v19, %s7264_s21  ;;  %3890 = vst.msk [vmem:[#allocation3 + $0x5f] sm:$0x1] %vm3884_vm11, %v14479_v30 }
 0x606   :  { %v3662_v45 = vpop.permute.xlu1 %3661 }
 0x607   :  { %v3656_v22 = vpop.permute.xlu0 %3655  ;;  %3830 = vst.msk [vmem:[#allocation3 + $0x68] sm:$0xff] %vm3574_vm9, %v3662_v45 }
 0x608   :  { %3827 = vst.msk [vmem:[#allocation3 + $0x50] sm:$0xff] %vm3574_vm9, %v3656_v22  ;;  %3935 = vrot.lane.b32.xlu1 %v10728_v2, %s7264_s21 }
 0x609   :  { %3929 = vrot.lane.b32.xlu0 %v10717_v37, %s7264_s21  ;;  %3891 = vst.msk [vmem:[#allocation3 + $0x6f] sm:$0x1] %vm3884_vm11, %v14479_v30 }
 0x60a   :  { %v3666_v36 = vpop.permute.xlu1 %3665 }
 0x60b   :  { %v3660_v56 = vpop.permute.xlu0 %3659  ;;  %3832 = vst.msk [vmem:[#allocation3 + $0x78] sm:$0xff] %vm3574_vm9, %v3666_v36 }
 0x60c   :  { %3829 = vst.msk [vmem:[#allocation3 + $0x60] sm:$0xff] %vm3574_vm9, %v3660_v56  ;;  %3939 = vrot.lane.b32.xlu1 %v10734_v49, %s7264_s21 }
 0x60d   :  { %3933 = vrot.lane.b32.xlu0 %v10723_v9, %s7264_s21  ;;  %3892 = vst.msk [vmem:[#allocation3 + $0x7f] sm:$0x1] %vm3884_vm11, %v14479_v30 }
 0x60e   :  { %v3670_v45 = vpop.permute.xlu1 %3669 }
 0x60f   :  { %v3664_v22 = vpop.permute.xlu0 %3663  ;;  %3834 = vst.msk [vmem:[#allocation3 + $0x88] sm:$0xff] %vm3574_vm9, %v3670_v45 }
 0x610   :  { %3831 = vst.msk [vmem:[#allocation3 + $0x70] sm:$0xff] %vm3574_vm9, %v3664_v22  ;;  %3943 = vrot.lane.b32.xlu1 %v10750_v21, %s7264_s21 }
 0x611   :  { %3937 = vrot.lane.b32.xlu0 %v10731_v5, %s7264_s21  ;;  %3893 = vst.msk [vmem:[#allocation3 + $0x8f] sm:$0x1] %vm3884_vm11, %v14479_v30 }
 0x612   :  { %v3674_v36 = vpop.permute.xlu1 %3673 }
 0x613   :  { %v3668_v56 = vpop.permute.xlu0 %3667  ;;  %3836 = vst.msk [vmem:[#allocation3 + $0x98] sm:$0xff] %vm3574_vm9, %v3674_v36 }
 0x614   :  { %3833 = vst.msk [vmem:[#allocation3 + $0x80] sm:$0xff] %vm3574_vm9, %v3668_v56  ;;  %3947 = vrot.lane.b32.xlu1 %v10756_v62, %s7264_s21 }
 0x615   :  { %3941 = vrot.lane.b32.xlu0 %v10737_v14, %s7264_s21  ;;  %3894 = vst.msk [vmem:[#allocation3 + $0x9f] sm:$0x1] %vm3884_vm11, %v14479_v30 }
 0x616   :  { %v3678_v45 = vpop.permute.xlu1 %3677 }
 0x617   :  { %v3672_v22 = vpop.permute.xlu0 %3671  ;;  %3838 = vst.msk [vmem:[#allocation3 + $0xa8] sm:$0xff] %vm3574_vm9, %v3678_v45 }
 0x618   :  { %3835 = vst.msk [vmem:[#allocation3 + $0x90] sm:$0xff] %vm3574_vm9, %v3672_v22  ;;  %3951 = vrot.lane.b32.xlu1 %v10770_v32, %s7264_s21 }
 0x619   :  { %3945 = vrot.lane.b32.xlu0 %v10753_v23, %s7264_s21  ;;  %3895 = vst.msk [vmem:[#allocation3 + $0xaf] sm:$0x1] %vm3884_vm11, %v14479_v30 }
 0x61a   :  { %v3682_v36 = vpop.permute.xlu1 %3681 }
 0x61b   :  { %v3676_v56 = vpop.permute.xlu0 %3675  ;;  %3840 = vst.msk [vmem:[#allocation3 + $0xb8] sm:$0xff] %vm3574_vm9, %v3682_v36 }
 0x61c   :  { %3837 = vst.msk [vmem:[#allocation3 + $0xa0] sm:$0xff] %vm3574_vm9, %v3676_v56  ;;  %3955 = vrot.lane.b32.xlu1 %v10776_v25, %s7264_s21 }
 0x61d   :  { %3949 = vrot.lane.b32.xlu0 %v10759_v18, %s7264_s21  ;;  %3896 = vst.msk [vmem:[#allocation3 + $0xbf] sm:$0x1] %vm3884_vm11, %v14479_v30 }
 0x61e   :  { %v3686_v45 = vpop.permute.xlu1 %3685 }
 0x61f   :  { %v3680_v22 = vpop.permute.xlu0 %3679  ;;  %3842 = vst.msk [vmem:[#allocation3 + $0xc8] sm:$0xff] %vm3574_vm9, %v3686_v45 }
 0x620   :  { %3839 = vst.msk [vmem:[#allocation3 + $0xb0] sm:$0xff] %vm3574_vm9, %v3680_v22  ;;  %3959 = vrot.lane.b32.xlu1 %v10790_v26, %s7264_s21 }
 0x621   :  { %3953 = vrot.lane.b32.xlu0 %v10773_v27, %s7264_s21  ;;  %3897 = vst.msk [vmem:[#allocation3 + $0xcf] sm:$0x1] %vm3884_vm11, %v14479_v30 }
 0x622   :  { %v3690_v36 = vpop.permute.xlu1 %3689 }
 0x623   :  { %v3684_v56 = vpop.permute.xlu0 %3683  ;;  %3844 = vst.msk [vmem:[#allocation3 + $0xd8] sm:$0xff] %vm3574_vm9, %v3690_v36 }
 0x624   :  { %3841 = vst.msk [vmem:[#allocation3 + $0xc0] sm:$0xff] %vm3574_vm9, %v3684_v56  ;;  %3963 = vrot.lane.b32.xlu1 %v10796_v50, %s7264_s21 }
 0x625   :  { %3957 = vrot.lane.b32.xlu0 %v10779_v29, %s7264_s21  ;;  %3898 = vst.msk [vmem:[#allocation3 + $0xdf] sm:$0x1] %vm3884_vm11, %v14479_v30 }
 0x626   :  { %v3694_v45 = vpop.permute.xlu1 %3693 }
 0x627   :  { %v3688_v22 = vpop.permute.xlu0 %3687  ;;  %3846 = vst.msk [vmem:[#allocation3 + $0xe8] sm:$0xff] %vm3574_vm9, %v3694_v45 }
 0x628   :  { %3843 = vst.msk [vmem:[#allocation3 + $0xd0] sm:$0xff] %vm3574_vm9, %v3688_v22  ;;  %3967 = vrot.lane.b32.xlu1 %v10810_v3, %s7264_s21 }
 0x629   :  { %3961 = vrot.lane.b32.xlu0 %v10793_v46, %s7264_s21  ;;  %3899 = vst.msk [vmem:[#allocation3 + $0xef] sm:$0x1] %vm3884_vm11, %v14479_v30 }
 0x62a   :  { %v3698_v36 = vpop.permute.xlu1 %3697 }
 0x62b   :  { %v3692_v56 = vpop.permute.xlu0 %3691  ;;  %3848 = vst.msk [vmem:[#allocation3 + $0xf8] sm:$0xff] %vm3574_vm9, %v3698_v36 }
 0x62c   :  { %3845 = vst.msk [vmem:[#allocation3 + $0xe0] sm:$0xff] %vm3574_vm9, %v3692_v56  ;;  %3971 = vrot.lane.b32.xlu1 %v10816_v15, %s7264_s21 }
 0x62d   :  { %3965 = vrot.lane.b32.xlu0 %v10799_v44, %s7264_s21  ;;  %3900 = vst.msk [vmem:[#allocation3 + $0xff] sm:$0x1] %vm3884_vm11, %v14479_v30 }
 0x62e   :  { %v3702_v45 = vpop.permute.xlu1 %3701 }
 0x62f   :  { %v3696_v22 = vpop.permute.xlu0 %3695  ;;  %3850 = vst.msk [vmem:[#allocation3 + $0x118] sm:$0xff] %vm3574_vm9, %v3702_v45 }
 0x630   :  { %3847 = vst.msk [vmem:[#allocation3 + $0xf0] sm:$0xff] %vm3574_vm9, %v3696_v22  ;;  %3975 = vrot.lane.b32.xlu1 %v10834_v12, %s7264_s21 }
 0x631   :  { %3969 = vrot.lane.b32.xlu0 %v10813_v7, %s7264_s21  ;;  %3902 = vst.msk [vmem:[#allocation3 + $0x11f] sm:$0x1] %vm3884_vm11, %v14479_v30 }
 0x632   :  { %v3706_v36 = vpop.permute.xlu1 %3705 }
 0x633   :  { %v3700_v56 = vpop.permute.xlu0 %3699  ;;  %3852 = vst.msk [vmem:[#allocation3 + $0x128] sm:$0xff] %vm3574_vm9, %v3706_v36 }
 0x634   :  { %3849 = vst.msk [vmem:[#allocation3 + $0x110] sm:$0xff] %vm3574_vm9, %v3700_v56  ;;  %3979 = vrot.lane.b32.xlu1 %v10848_v43, %s7264_s21 }
 0x635   :  { %3973 = vrot.lane.b32.xlu0 %v10819_v31, %s7264_s21  ;;  %3903 = vst.msk [vmem:[#allocation3 + $0x12f] sm:$0x1] %vm3884_vm11, %v14479_v30 }
 0x636   :  { %v3710_v45 = vpop.permute.xlu1 %3709 }
 0x637   :  { %v3704_v22 = vpop.permute.xlu0 %3703  ;;  %3854 = vst.msk [vmem:[#allocation3 + $0x138] sm:$0xff] %vm3574_vm9, %v3710_v45 }
 0x638   :  { %3851 = vst.msk [vmem:[#allocation3 + $0x120] sm:$0xff] %vm3574_vm9, %v3704_v22  ;;  %3983 = vrot.lane.b32.xlu1 %v10854_v40, %s7264_s21 }
 0x639   :  { %3977 = vrot.lane.b32.xlu0 %v10837_v35, %s7264_s21  ;;  %3904 = vst.msk [vmem:[#allocation3 + $0x13f] sm:$0x1] %vm3884_vm11, %v14479_v30 }
 0x63a   :  { %v3714_v36 = vpop.permute.xlu1 %3713 }
 0x63b   :  { %v3708_v56 = vpop.permute.xlu0 %3707  ;;  %3856 = vst.msk [vmem:[#allocation3 + $0x148] sm:$0xff] %vm3574_vm9, %v3714_v36 }
 0x63c   :  { %3853 = vst.msk [vmem:[#allocation3 + $0x130] sm:$0xff] %vm3574_vm9, %v3708_v56  ;;  %3987 = vrot.lane.b32.xlu1 %v10868_v10, %s7264_s21 }
 0x63d   :  { %3981 = vrot.lane.b32.xlu0 %v10851_v33, %s7264_s21  ;;  %3905 = vst.msk [vmem:[#allocation3 + $0x14f] sm:$0x1] %vm3884_vm11, %v14479_v30 }
 0x63e   :  { %v3718_v45 = vpop.permute.xlu1 %3717 }
 0x63f   :  { %v3712_v22 = vpop.permute.xlu0 %3711  ;;  %3858 = vst.msk [vmem:[#allocation3 + $0x158] sm:$0xff] %vm3574_vm9, %v3718_v45 }
 0x640   :  { %3855 = vst.msk [vmem:[#allocation3 + $0x140] sm:$0xff] %vm3574_vm9, %v3712_v22  ;;  %3991 = vrot.lane.b32.xlu1 %v10874_v6, %s7264_s21 }
 0x641   :  { %3985 = vrot.lane.b32.xlu0 %v10857_v59, %s7264_s21  ;;  %3906 = vst.msk [vmem:[#allocation3 + $0x15f] sm:$0x1] %vm3884_vm11, %v14479_v30 }
 0x642   :  { %v3722_v36 = vpop.permute.xlu1 %3721 }
 0x643   :  { %v3716_v56 = vpop.permute.xlu0 %3715  ;;  %3860 = vst.msk [vmem:[#allocation3 + $0x168] sm:$0xff] %vm3574_vm9, %v3722_v36 }
 0x644   :  { %3857 = vst.msk [vmem:[#allocation3 + $0x150] sm:$0xff] %vm3574_vm9, %v3716_v56  ;;  %3995 = vrot.lane.b32.xlu1 %v10884_v39, %s7264_s21 }
 0x645   :  { %3989 = vrot.lane.b32.xlu0 %v10871_v60, %s7264_s21  ;;  %3907 = vst.msk [vmem:[#allocation3 + $0x16f] sm:$0x1] %vm3884_vm11, %v14479_v30 }
 0x646   :  { %v3726_v45 = vpop.permute.xlu1 %3725 }
 0x647   :  { %v3720_v22 = vpop.permute.xlu0 %3719  ;;  %3862 = vst.msk [vmem:[#allocation3 + $0x178] sm:$0xff] %vm3574_vm9, %v3726_v45 }
 0x648   :  { %3859 = vst.msk [vmem:[#allocation3 + $0x160] sm:$0xff] %vm3574_vm9, %v3720_v22  ;;  %3999 = vrot.lane.b32.xlu1 %v10890_v17, %s7264_s21 }
 0x649   :  { %3993 = vrot.lane.b32.xlu0 %v10877_v28, %s7264_s21  ;;  %3908 = vst.msk [vmem:[#allocation3 + $0x17f] sm:$0x1] %vm3884_vm11, %v14479_v30 }
 0x64a   :  { %v3730_v36 = vpop.permute.xlu1 %3729 }
 0x64b   :  { %v3724_v56 = vpop.permute.xlu0 %3723  ;;  %3864 = vst.msk [vmem:[#allocation3 + $0x188] sm:$0xff] %vm3574_vm9, %v3730_v36 }
 0x64c   :  { %3861 = vst.msk [vmem:[#allocation3 + $0x170] sm:$0xff] %vm3574_vm9, %v3724_v56  ;;  %4003 = vrot.lane.b32.xlu1 %v10908_v13, %s7264_s21 }
 0x64d   :  { %3997 = vrot.lane.b32.xlu0 %v10887_v0, %s7264_s21  ;;  %3909 = vst.msk [vmem:[#allocation3 + $0x18f] sm:$0x1] %vm3884_vm11, %v14479_v30 }
 0x64e   :  { %v3734_v45 = vpop.permute.xlu1 %3733 }
 0x64f   :  { %v3728_v22 = vpop.permute.xlu0 %3727  ;;  %3866 = vst.msk [vmem:[#allocation3 + $0x198] sm:$0xff] %vm3574_vm9, %v3734_v45 }
 0x650   :  { %3863 = vst.msk [vmem:[#allocation3 + $0x180] sm:$0xff] %vm3574_vm9, %v3728_v22  ;;  %4007 = vrot.lane.b32.xlu1 %v10914_v55, %s7264_s21 }
 0x651   :  { %4001 = vrot.lane.b32.xlu0 %v10893_v58, %s7264_s21  ;;  %3910 = vst.msk [vmem:[#allocation3 + $0x19f] sm:$0x1] %vm3884_vm11, %v14479_v30 }
 0x652   :  { %v3738_v36 = vpop.permute.xlu1 %3737 }
 0x653   :  { %v3732_v56 = vpop.permute.xlu0 %3731  ;;  %3868 = vst.msk [vmem:[#allocation3 + $0x1a8] sm:$0xff] %vm3574_vm9, %v3738_v36 }
 0x654   :  { %3865 = vst.msk [vmem:[#allocation3 + $0x190] sm:$0xff] %vm3574_vm9, %v3732_v56  ;;  %4011 = vrot.lane.b32.xlu1 %v10928_v52, %s7264_s21 }
 0x655   :  { %4005 = vrot.lane.b32.xlu0 %v10911_v47, %s7264_s21  ;;  %3911 = vst.msk [vmem:[#allocation3 + $0x1af] sm:$0x1] %vm3884_vm11, %v14479_v30 }
 0x656   :  { %v3742_v45 = vpop.permute.xlu1 %3741 }
 0x657   :  { %v3736_v22 = vpop.permute.xlu0 %3735  ;;  %3870 = vst.msk [vmem:[#allocation3 + $0x1b8] sm:$0xff] %vm3574_vm9, %v3742_v45 }
 0x658   :  { %3867 = vst.msk [vmem:[#allocation3 + $0x1a0] sm:$0xff] %vm3574_vm9, %v3736_v22  ;;  %4015 = vrot.lane.b32.xlu1 %v10934_v20, %s7264_s21 }
 0x659   :  { %4009 = vrot.lane.b32.xlu0 %v10917_v41, %s7264_s21  ;;  %3912 = vst.msk [vmem:[#allocation3 + $0x1bf] sm:$0x1] %vm3884_vm11, %v14479_v30 }
 0x65a   :  { %v3746_v36 = vpop.permute.xlu1 %3745 }
 0x65b   :  { %v3740_v56 = vpop.permute.xlu0 %3739  ;;  %3872 = vst.msk [vmem:[#allocation3 + $0x1c8] sm:$0xff] %vm3574_vm9, %v3746_v36 }
 0x65c   :  { %3869 = vst.msk [vmem:[#allocation3 + $0x1b0] sm:$0xff] %vm3574_vm9, %v3740_v56  ;;  %4019 = vrot.lane.b32.xlu1 %v10948_v61, %s7264_s21 }
 0x65d   :  { %4013 = vrot.lane.b32.xlu0 %v10931_v38, %s7264_s21  ;;  %3913 = vst.msk [vmem:[#allocation3 + $0x1cf] sm:$0x1] %vm3884_vm11, %v14479_v30 }
 0x65e   :  { %v3750_v45 = vpop.permute.xlu1 %3749 }
 0x65f   :  { %v3744_v22 = vpop.permute.xlu0 %3743  ;;  %3874 = vst.msk [vmem:[#allocation3 + $0x1d8] sm:$0xff] %vm3574_vm9, %v3750_v45 }
 0x660   :  { %3871 = vst.msk [vmem:[#allocation3 + $0x1c0] sm:$0xff] %vm3574_vm9, %v3744_v22  ;;  %4023 = vrot.lane.b32.xlu1 %v10954_v51, %s7264_s21 }
 0x661   :  { %4017 = vrot.lane.b32.xlu0 %v10937_v11, %s7264_s21  ;;  %3914 = vst.msk [vmem:[#allocation3 + $0x1df] sm:$0x1] %vm3884_vm11, %v14479_v30 }
 0x662   :  { %v3754_v36 = vpop.permute.xlu1 %3753 }
 0x663   :  { %v3748_v56 = vpop.permute.xlu0 %3747  ;;  %3876 = vst.msk [vmem:[#allocation3 + $0x1e8] sm:$0xff] %vm3574_vm9, %v3754_v36 }
 0x664   :  { %3873 = vst.msk [vmem:[#allocation3 + $0x1d0] sm:$0xff] %vm3574_vm9, %v3748_v56  ;;  %4027 = vrot.lane.b32.xlu1 %v10968_v4, %s7264_s21  ;;  %v14482_v4 = vld [vmem:[#allocation9_spill] sm:$0xff] }
 0x665   :  { %4021 = vrot.lane.b32.xlu0 %v10951_v8, %s7264_s21  ;;  %3915 = vst.msk [vmem:[#allocation3 + $0x1ef] sm:$0x1] %vm3884_vm11, %v14479_v30 }
 0x666   :  { %v3758_v45 = vpop.permute.xlu1 %3757 }
 0x667   :  { %v3752_v22 = vpop.permute.xlu0 %3751  ;;  %3878 = vst.msk [vmem:[#allocation3 + $0x1f8] sm:$0xff] %vm3574_vm9, %v3758_v45 }
 0x668   :  { %3875 = vst.msk [vmem:[#allocation3 + $0x1e0] sm:$0xff] %vm3574_vm9, %v3752_v22  ;;  %4031 = vrot.lane.b32.xlu1 %v10974_v1, %s7264_s21 }
 0x669   :  { %4025 = vrot.lane.b32.xlu0 %v10957_v54, %s7264_s21  ;;  %3916 = vst.msk [vmem:[#allocation3 + $0x1ff] sm:$0x1] %vm3884_vm11, %v14479_v30  ;;  %vm5744_vm11 = vcmask 589313  }
 0x66a   :  { %v3920_v36 = vpop.permute.xlu1 %3919 }
 0x66b   :  { %v3756_v56 = vpop.permute.xlu0 %3755  ;;  %4099 = vst.msk [vmem:[#allocation3 + $0x17] sm:$0xff] %vm3879_vm12, %v3920_v36 }
 0x66c   :  { %3877 = vst.msk [vmem:[#allocation3 + $0x1f0] sm:$0xff] %vm3574_vm9, %v3756_v56  ;;  %4035 = vrot.lane.b32.xlu1 %v14480_v24, %s7264_s21  ;;  %vm5221_vm9 = vcmask 457088  }
 0x66d   :  { %4029 = vrot.lane.b32.xlu0 %v14482_v4, %s7264_s21 }
 0x66e   :  { %v3924_v45 = vpop.permute.xlu1 %3923 }
 0x66f   :  { %v3918_v22 = vpop.permute.xlu0 %3917  ;;  %4101 = vst.msk [vmem:[#allocation3 + $0x27] sm:$0xff] %vm3879_vm12, %v3924_v45 }
 0x670   :  { %4098 = vst.msk [vmem:[#allocation3 + $0xf] sm:$0xfe] %vm4097_vm14, %v3918_v22  ;;  %4197 = vrot.lane.b32.xlu1 %v14481_v57, %s7266_s23 }
 0x671   :  { %4160 = vst.msk [vmem:[#allocation3 + $0x10] sm:$0x1] %vm4158_vm13, %v14479_v30  ;;  %4033 = vrot.lane.b32.xlu0 %v10977_v34, %s7264_s21  ;;  %s7271_s21 = smov 56  }
 0x672   :  { %v3928_v36 = vpop.permute.xlu1 %3927 }
 0x673   :  { %v3922_v56 = vpop.permute.xlu0 %3921  ;;  %4103 = vst.msk [vmem:[#allocation3 + $0x37] sm:$0xff] %vm3879_vm12, %v3928_v36 }
 0x674   :  { %4100 = vst.msk [vmem:[#allocation3 + $0x1f] sm:$0xfe] %vm4097_vm14, %v3922_v56  ;;  %4201 = vrot.lane.b32.xlu1 %v10708_v63, %s7266_s23 }
 0x675   :  { %4161 = vst.msk [vmem:[#allocation3 + $0x20] sm:$0x1] %vm4158_vm13, %v14479_v30  ;;  %4195 = vrot.lane.b32.xlu0 %v10702_v16, %s7266_s23 }
 0x676   :  { %v3932_v45 = vpop.permute.xlu1 %3931 }
 0x677   :  { %v3926_v22 = vpop.permute.xlu0 %3925  ;;  %4105 = vst.msk [vmem:[#allocation3 + $0x47] sm:$0xff] %vm3879_vm12, %v3932_v45 }
 0x678   :  { %4102 = vst.msk [vmem:[#allocation3 + $0x2f] sm:$0xfe] %vm4097_vm14, %v3926_v22  ;;  %4205 = vrot.lane.b32.xlu1 %v10714_v42, %s7266_s23 }
 0x679   :  { %4162 = vst.msk [vmem:[#allocation3 + $0x30] sm:$0x1] %vm4158_vm13, %v14479_v30  ;;  %4199 = vrot.lane.b32.xlu0 %v10705_v53, %s7266_s23 }
 0x67a   :  { %v3936_v36 = vpop.permute.xlu1 %3935 }
 0x67b   :  { %v3930_v56 = vpop.permute.xlu0 %3929  ;;  %4107 = vst.msk [vmem:[#allocation3 + $0x57] sm:$0xff] %vm3879_vm12, %v3936_v36 }
 0x67c   :  { %4104 = vst.msk [vmem:[#allocation3 + $0x3f] sm:$0xfe] %vm4097_vm14, %v3930_v56  ;;  %4209 = vrot.lane.b32.xlu1 %v10720_v48, %s7266_s23 }
 0x67d   :  { %4163 = vst.msk [vmem:[#allocation3 + $0x40] sm:$0x1] %vm4158_vm13, %v14479_v30  ;;  %4203 = vrot.lane.b32.xlu0 %v10711_v19, %s7266_s23 }
 0x67e   :  { %v3940_v45 = vpop.permute.xlu1 %3939 }
 0x67f   :  { %v3934_v22 = vpop.permute.xlu0 %3933  ;;  %4109 = vst.msk [vmem:[#allocation3 + $0x67] sm:$0xff] %vm3879_vm12, %v3940_v45 }
 0x680   :  { %4106 = vst.msk [vmem:[#allocation3 + $0x4f] sm:$0xfe] %vm4097_vm14, %v3934_v22  ;;  %4213 = vrot.lane.b32.xlu1 %v10728_v2, %s7266_s23 }
 0x681   :  { %4164 = vst.msk [vmem:[#allocation3 + $0x50] sm:$0x1] %vm4158_vm13, %v14479_v30  ;;  %4207 = vrot.lane.b32.xlu0 %v10717_v37, %s7266_s23 }
 0x682   :  { %v3944_v36 = vpop.permute.xlu1 %3943 }
 0x683   :  { %v3938_v56 = vpop.permute.xlu0 %3937  ;;  %4111 = vst.msk [vmem:[#allocation3 + $0x77] sm:$0xff] %vm3879_vm12, %v3944_v36 }
 0x684   :  { %4108 = vst.msk [vmem:[#allocation3 + $0x5f] sm:$0xfe] %vm4097_vm14, %v3938_v56  ;;  %4217 = vrot.lane.b32.xlu1 %v10734_v49, %s7266_s23 }
 0x685   :  { %4165 = vst.msk [vmem:[#allocation3 + $0x60] sm:$0x1] %vm4158_vm13, %v14479_v30  ;;  %4211 = vrot.lane.b32.xlu0 %v10723_v9, %s7266_s23 }
 0x686   :  { %v3948_v45 = vpop.permute.xlu1 %3947 }
 0x687   :  { %v3942_v22 = vpop.permute.xlu0 %3941  ;;  %4113 = vst.msk [vmem:[#allocation3 + $0x87] sm:$0xff] %vm3879_vm12, %v3948_v45 }
 0x688   :  { %4110 = vst.msk [vmem:[#allocation3 + $0x6f] sm:$0xfe] %vm4097_vm14, %v3942_v22  ;;  %4221 = vrot.lane.b32.xlu1 %v10750_v21, %s7266_s23 }
 0x689   :  { %4166 = vst.msk [vmem:[#allocation3 + $0x70] sm:$0x1] %vm4158_vm13, %v14479_v30  ;;  %4215 = vrot.lane.b32.xlu0 %v10731_v5, %s7266_s23 }
 0x68a   :  { %v3952_v36 = vpop.permute.xlu1 %3951 }
 0x68b   :  { %v3946_v56 = vpop.permute.xlu0 %3945  ;;  %4115 = vst.msk [vmem:[#allocation3 + $0x97] sm:$0xff] %vm3879_vm12, %v3952_v36 }
 0x68c   :  { %4112 = vst.msk [vmem:[#allocation3 + $0x7f] sm:$0xfe] %vm4097_vm14, %v3946_v56  ;;  %4225 = vrot.lane.b32.xlu1 %v10756_v62, %s7266_s23 }
 0x68d   :  { %4167 = vst.msk [vmem:[#allocation3 + $0x80] sm:$0x1] %vm4158_vm13, %v14479_v30  ;;  %4219 = vrot.lane.b32.xlu0 %v10737_v14, %s7266_s23 }
 0x68e   :  { %v3956_v45 = vpop.permute.xlu1 %3955 }
 0x68f   :  { %v3950_v22 = vpop.permute.xlu0 %3949  ;;  %4117 = vst.msk [vmem:[#allocation3 + $0xa7] sm:$0xff] %vm3879_vm12, %v3956_v45 }
 0x690   :  { %4114 = vst.msk [vmem:[#allocation3 + $0x8f] sm:$0xfe] %vm4097_vm14, %v3950_v22  ;;  %4229 = vrot.lane.b32.xlu1 %v10770_v32, %s7266_s23 }
 0x691   :  { %4168 = vst.msk [vmem:[#allocation3 + $0x90] sm:$0x1] %vm4158_vm13, %v14479_v30  ;;  %4223 = vrot.lane.b32.xlu0 %v10753_v23, %s7266_s23 }
 0x692   :  { %v3960_v36 = vpop.permute.xlu1 %3959 }
 0x693   :  { %v3954_v56 = vpop.permute.xlu0 %3953  ;;  %4119 = vst.msk [vmem:[#allocation3 + $0xb7] sm:$0xff] %vm3879_vm12, %v3960_v36 }
 0x694   :  { %4116 = vst.msk [vmem:[#allocation3 + $0x9f] sm:$0xfe] %vm4097_vm14, %v3954_v56  ;;  %4233 = vrot.lane.b32.xlu1 %v10776_v25, %s7266_s23 }
 0x695   :  { %4169 = vst.msk [vmem:[#allocation3 + $0xa0] sm:$0x1] %vm4158_vm13, %v14479_v30  ;;  %4227 = vrot.lane.b32.xlu0 %v10759_v18, %s7266_s23 }
 0x696   :  { %v3964_v45 = vpop.permute.xlu1 %3963 }
 0x697   :  { %v3958_v22 = vpop.permute.xlu0 %3957  ;;  %4121 = vst.msk [vmem:[#allocation3 + $0xc7] sm:$0xff] %vm3879_vm12, %v3964_v45 }
 0x698   :  { %4118 = vst.msk [vmem:[#allocation3 + $0xaf] sm:$0xfe] %vm4097_vm14, %v3958_v22  ;;  %4237 = vrot.lane.b32.xlu1 %v10790_v26, %s7266_s23 }
 0x699   :  { %4170 = vst.msk [vmem:[#allocation3 + $0xb0] sm:$0x1] %vm4158_vm13, %v14479_v30  ;;  %4231 = vrot.lane.b32.xlu0 %v10773_v27, %s7266_s23 }
 0x69a   :  { %v3968_v36 = vpop.permute.xlu1 %3967 }
 0x69b   :  { %v3962_v56 = vpop.permute.xlu0 %3961  ;;  %4123 = vst.msk [vmem:[#allocation3 + $0xd7] sm:$0xff] %vm3879_vm12, %v3968_v36 }
 0x69c   :  { %4120 = vst.msk [vmem:[#allocation3 + $0xbf] sm:$0xfe] %vm4097_vm14, %v3962_v56  ;;  %4241 = vrot.lane.b32.xlu1 %v10796_v50, %s7266_s23 }
 0x69d   :  { %4171 = vst.msk [vmem:[#allocation3 + $0xc0] sm:$0x1] %vm4158_vm13, %v14479_v30  ;;  %4235 = vrot.lane.b32.xlu0 %v10779_v29, %s7266_s23 }
 0x69e   :  { %v3972_v45 = vpop.permute.xlu1 %3971 }
 0x69f   :  { %v3966_v22 = vpop.permute.xlu0 %3965  ;;  %4125 = vst.msk [vmem:[#allocation3 + $0xe7] sm:$0xff] %vm3879_vm12, %v3972_v45 }
 0x6a0   :  { %4122 = vst.msk [vmem:[#allocation3 + $0xcf] sm:$0xfe] %vm4097_vm14, %v3966_v22  ;;  %4245 = vrot.lane.b32.xlu1 %v10810_v3, %s7266_s23 }
 0x6a1   :  { %4172 = vst.msk [vmem:[#allocation3 + $0xd0] sm:$0x1] %vm4158_vm13, %v14479_v30  ;;  %4239 = vrot.lane.b32.xlu0 %v10793_v46, %s7266_s23 }
 0x6a2   :  { %v3976_v36 = vpop.permute.xlu1 %3975 }
 0x6a3   :  { %v3970_v56 = vpop.permute.xlu0 %3969  ;;  %4127 = vst.msk [vmem:[#allocation3 + $0xf7] sm:$0xff] %vm3879_vm12, %v3976_v36 }
 0x6a4   :  { %4124 = vst.msk [vmem:[#allocation3 + $0xdf] sm:$0xfe] %vm4097_vm14, %v3970_v56  ;;  %4249 = vrot.lane.b32.xlu1 %v10816_v15, %s7266_s23  ;;  %v14483_v56 = vld [vmem:[#allocation7_spill] sm:$0xff] }
 0x6a5   :  { %4173 = vst.msk [vmem:[#allocation3 + $0xe0] sm:$0x1] %vm4158_vm13, %v14479_v30  ;;  %4243 = vrot.lane.b32.xlu0 %v10799_v44, %s7266_s23  ;;  %v11557_v36 = vmax.f32 %v14483_v56, 0.0 }
 0x6a6   :  { %v3980_v45 = vpop.permute.xlu1 %3979 }
 0x6a7   :  { %v3974_v22 = vpop.permute.xlu0 %3973  ;;  %4129 = vst.msk [vmem:[#allocation3 + $0x117] sm:$0xff] %vm3879_vm12, %v3980_v45 }
 0x6a8   :  { %4126 = vst.msk [vmem:[#allocation3 + $0xef] sm:$0xfe] %vm4097_vm14, %v3974_v22  ;;  %4253 = vrot.lane.b32.xlu1 %v10834_v12, %s7266_s23  ;;  %v14484_v22 = vld [vmem:[#allocation6_spill] sm:$0xff] }
 0x6a9   :  { %4174 = vst.msk [vmem:[#allocation3 + $0xf0] sm:$0x1] %vm4158_vm13, %v14479_v30  ;;  %4247 = vrot.lane.b32.xlu0 %v10813_v7, %s7266_s23  ;;  %v11568_v45 = vmax.f32 %v14484_v22, 0.0 }
 0x6aa   :  { %v3984_v15 = vpop.permute.xlu1 %3983 }
 0x6ab   :  { %v3978_v44 = vpop.permute.xlu0 %3977  ;;  %4131 = vst.msk [vmem:[#allocation3 + $0x127] sm:$0xff] %vm3879_vm12, %v3984_v15 }
 0x6ac   :  { %4128 = vst.msk [vmem:[#allocation3 + $0x10f] sm:$0xfe] %vm4097_vm14, %v3978_v44  ;;  %4257 = vrot.lane.b32.xlu1 %v11557_v36, %s7266_s23 }
 0x6ad   :  { %4176 = vst.msk [vmem:[#allocation3 + $0x110] sm:$0x1] %vm4158_vm13, %v14479_v30  ;;  %4251 = vrot.lane.b32.xlu0 %v10819_v31, %s7266_s23 }
 0x6ae   :  { %v3988_v12 = vpop.permute.xlu1 %3987 }
 0x6af   :  { %v3982_v56 = vpop.permute.xlu0 %3981  ;;  %4133 = vst.msk [vmem:[#allocation3 + $0x137] sm:$0xff] %vm3879_vm12, %v3988_v12 }
 0x6b0   :  { %4130 = vst.msk [vmem:[#allocation3 + $0x11f] sm:$0xfe] %vm4097_vm14, %v3982_v56  ;;  %4261 = vrot.lane.b32.xlu1 %v10848_v43, %s7266_s23 }
 0x6b1   :  { %4177 = vst.msk [vmem:[#allocation3 + $0x120] sm:$0x1] %vm4158_vm13, %v14479_v30  ;;  %4255 = vrot.lane.b32.xlu0 %v11568_v45, %s7266_s23 }
 0x6b2   :  { %v3992_v15 = vpop.permute.xlu1 %3991 }
 0x6b3   :  { %v3986_v44 = vpop.permute.xlu0 %3985  ;;  %4135 = vst.msk [vmem:[#allocation3 + $0x147] sm:$0xff] %vm3879_vm12, %v3992_v15 }
 0x6b4   :  { %4132 = vst.msk [vmem:[#allocation3 + $0x12f] sm:$0xfe] %vm4097_vm14, %v3986_v44  ;;  %4265 = vrot.lane.b32.xlu1 %v10854_v40, %s7266_s23 }
 0x6b5   :  { %4178 = vst.msk [vmem:[#allocation3 + $0x130] sm:$0x1] %vm4158_vm13, %v14479_v30  ;;  %4259 = vrot.lane.b32.xlu0 %v10837_v35, %s7266_s23 }
 0x6b6   :  { %v3996_v22 = vpop.permute.xlu1 %3995 }
 0x6b7   :  { %v3990_v12 = vpop.permute.xlu0 %3989  ;;  %4137 = vst.msk [vmem:[#allocation3 + $0x157] sm:$0xff] %vm3879_vm12, %v3996_v22 }
 0x6b8   :  { %4134 = vst.msk [vmem:[#allocation3 + $0x13f] sm:$0xfe] %vm4097_vm14, %v3990_v12  ;;  %4269 = vrot.lane.b32.xlu1 %v10868_v10, %s7266_s23 }
 0x6b9   :  { %4179 = vst.msk [vmem:[#allocation3 + $0x140] sm:$0x1] %vm4158_vm13, %v14479_v30  ;;  %4263 = vrot.lane.b32.xlu0 %v10851_v33, %s7266_s23 }
 0x6ba   :  { %v4000_v44 = vpop.permute.xlu1 %3999 }
 0x6bb   :  { %v3994_v56 = vpop.permute.xlu0 %3993  ;;  %4139 = vst.msk [vmem:[#allocation3 + $0x167] sm:$0xff] %vm3879_vm12, %v4000_v44 }
 0x6bc   :  { %4136 = vst.msk [vmem:[#allocation3 + $0x14f] sm:$0xfe] %vm4097_vm14, %v3994_v56  ;;  %4273 = vrot.lane.b32.xlu1 %v10874_v6, %s7266_s23 }
 0x6bd   :  { %4180 = vst.msk [vmem:[#allocation3 + $0x150] sm:$0x1] %vm4158_vm13, %v14479_v30  ;;  %4267 = vrot.lane.b32.xlu0 %v10857_v59, %s7266_s23 }
 0x6be   :  { %v4004_v12 = vpop.permute.xlu1 %4003 }
 0x6bf   :  { %v3998_v15 = vpop.permute.xlu0 %3997  ;;  %4141 = vst.msk [vmem:[#allocation3 + $0x177] sm:$0xff] %vm3879_vm12, %v4004_v12 }
 0x6c0   :  { %4138 = vst.msk [vmem:[#allocation3 + $0x15f] sm:$0xfe] %vm4097_vm14, %v3998_v15  ;;  %4277 = vrot.lane.b32.xlu1 %v10884_v39, %s7266_s23 }
 0x6c1   :  { %4181 = vst.msk [vmem:[#allocation3 + $0x160] sm:$0x1] %vm4158_vm13, %v14479_v30  ;;  %4271 = vrot.lane.b32.xlu0 %v10871_v60, %s7266_s23 }
 0x6c2   :  { %v4008_v56 = vpop.permute.xlu1 %4007 }
 0x6c3   :  { %v4002_v22 = vpop.permute.xlu0 %4001  ;;  %4143 = vst.msk [vmem:[#allocation3 + $0x187] sm:$0xff] %vm3879_vm12, %v4008_v56 }
 0x6c4   :  { %4140 = vst.msk [vmem:[#allocation3 + $0x16f] sm:$0xfe] %vm4097_vm14, %v4002_v22  ;;  %4281 = vrot.lane.b32.xlu1 %v10890_v17, %s7266_s23 }
 0x6c5   :  { %4182 = vst.msk [vmem:[#allocation3 + $0x170] sm:$0x1] %vm4158_vm13, %v14479_v30  ;;  %4275 = vrot.lane.b32.xlu0 %v10877_v28, %s7266_s23 }
 0x6c6   :  { %v4012_v15 = vpop.permute.xlu1 %4011 }
 0x6c7   :  { %v4006_v44 = vpop.permute.xlu0 %4005  ;;  %4145 = vst.msk [vmem:[#allocation3 + $0x197] sm:$0xff] %vm3879_vm12, %v4012_v15 }
 0x6c8   :  { %4142 = vst.msk [vmem:[#allocation3 + $0x17f] sm:$0xfe] %vm4097_vm14, %v4006_v44  ;;  %4285 = vrot.lane.b32.xlu1 %v10908_v13, %s7266_s23 }
 0x6c9   :  { %4183 = vst.msk [vmem:[#allocation3 + $0x180] sm:$0x1] %vm4158_vm13, %v14479_v30  ;;  %4279 = vrot.lane.b32.xlu0 %v10887_v0, %s7266_s23 }
 0x6ca   :  { %v4016_v22 = vpop.permute.xlu1 %4015 }
 0x6cb   :  { %v4010_v12 = vpop.permute.xlu0 %4009  ;;  %4147 = vst.msk [vmem:[#allocation3 + $0x1a7] sm:$0xff] %vm3879_vm12, %v4016_v22 }
 0x6cc   :  { %4144 = vst.msk [vmem:[#allocation3 + $0x18f] sm:$0xfe] %vm4097_vm14, %v4010_v12  ;;  %4289 = vrot.lane.b32.xlu1 %v10914_v55, %s7266_s23 }
 0x6cd   :  { %4184 = vst.msk [vmem:[#allocation3 + $0x190] sm:$0x1] %vm4158_vm13, %v14479_v30  ;;  %4283 = vrot.lane.b32.xlu0 %v10893_v58, %s7266_s23 }
 0x6ce   :  { %v4020_v44 = vpop.permute.xlu1 %4019 }
 0x6cf   :  { %v4014_v56 = vpop.permute.xlu0 %4013  ;;  %4149 = vst.msk [vmem:[#allocation3 + $0x1b7] sm:$0xff] %vm3879_vm12, %v4020_v44 }
 0x6d0   :  { %4146 = vst.msk [vmem:[#allocation3 + $0x19f] sm:$0xfe] %vm4097_vm14, %v4014_v56  ;;  %4293 = vrot.lane.b32.xlu1 %v10928_v52, %s7266_s23 }
 0x6d1   :  { %4185 = vst.msk [vmem:[#allocation3 + $0x1a0] sm:$0x1] %vm4158_vm13, %v14479_v30  ;;  %4287 = vrot.lane.b32.xlu0 %v10911_v47, %s7266_s23 }
 0x6d2   :  { %v4024_v12 = vpop.permute.xlu1 %4023 }
 0x6d3   :  { %v4018_v15 = vpop.permute.xlu0 %4017  ;;  %4151 = vst.msk [vmem:[#allocation3 + $0x1c7] sm:$0xff] %vm3879_vm12, %v4024_v12 }
 0x6d4   :  { %4148 = vst.msk [vmem:[#allocation3 + $0x1af] sm:$0xfe] %vm4097_vm14, %v4018_v15  ;;  %4297 = vrot.lane.b32.xlu1 %v10934_v20, %s7266_s23 }
 0x6d5   :  { %4186 = vst.msk [vmem:[#allocation3 + $0x1b0] sm:$0x1] %vm4158_vm13, %v14479_v30  ;;  %4291 = vrot.lane.b32.xlu0 %v10917_v41, %s7266_s23 }
 0x6d6   :  { %v4028_v56 = vpop.permute.xlu1 %4027 }
 0x6d7   :  { %v4022_v22 = vpop.permute.xlu0 %4021  ;;  %4153 = vst.msk [vmem:[#allocation3 + $0x1d7] sm:$0xff] %vm3879_vm12, %v4028_v56  ;;  %v14485_v56 = vld [vmem:[#allocation27_spill] sm:$0xff] }
 0x6d8   :  { %4150 = vst.msk [vmem:[#allocation3 + $0x1bf] sm:$0xfe] %vm4097_vm14, %v4022_v22  ;;  %4301 = vrot.lane.b32.xlu1 %v10948_v61, %s7266_s23 }
 0x6d9   :  { %4187 = vst.msk [vmem:[#allocation3 + $0x1c0] sm:$0x1] %vm4158_vm13, %v14479_v30  ;;  %4295 = vrot.lane.b32.xlu0 %v10931_v38, %s7266_s23 }
 0x6da   :  { %v4032_v15 = vpop.permute.xlu1 %4031 }
 0x6db   :  { %v4026_v44 = vpop.permute.xlu0 %4025  ;;  %4155 = vst.msk [vmem:[#allocation3 + $0x1e7] sm:$0xff] %vm3879_vm12, %v4032_v15 }
 0x6dc   :  { %4152 = vst.msk [vmem:[#allocation3 + $0x1cf] sm:$0xfe] %vm4097_vm14, %v4026_v44  ;;  %4305 = vrot.lane.b32.xlu1 %v10954_v51, %s7266_s23 }
 0x6dd   :  { %4188 = vst.msk [vmem:[#allocation3 + $0x1d0] sm:$0x1] %vm4158_vm13, %v14479_v30  ;;  %4299 = vrot.lane.b32.xlu0 %v10937_v11, %s7266_s23 }
 0x6de   :  { %v4036_v22 = vpop.permute.xlu1 %4035 }
 0x6df   :  { %v4030_v12 = vpop.permute.xlu0 %4029  ;;  %4157 = vst.msk [vmem:[#allocation3 + $0x1f7] sm:$0xff] %vm3879_vm12, %v4036_v22  ;;  %vm5531_vm12 = vcmask 582144  }
 0x6e0   :  { %4154 = vst.msk [vmem:[#allocation3 + $0x1df] sm:$0xfe] %vm4097_vm14, %v4030_v12  ;;  %4309 = vrot.lane.b32.xlu1 %v14485_v56, %s7266_s23 }
 0x6e1   :  { %4189 = vst.msk [vmem:[#allocation3 + $0x1e0] sm:$0x1] %vm4158_vm13, %v14479_v30  ;;  %4303 = vrot.lane.b32.xlu0 %v10951_v8, %s7266_s23 }
 0x6e2   :  { %v4198_v15 = vpop.permute.xlu1 %4197 }
 0x6e3   :  { %v4034_v44 = vpop.permute.xlu0 %4033  ;;  %4390 = vst.msk [vmem:[#allocation3 + $0x9] sm:$0x7f] %vm4389_vm15, %v4198_v15 }
 0x6e4   :  { %4156 = vst.msk [vmem:[#allocation3 + $0x1ef] sm:$0xfe] %vm4097_vm14, %v4034_v44  ;;  %4313 = vrot.lane.b32.xlu1 %v10974_v1, %s7266_s23  ;;  %v14486_v44 = vld [vmem:[#allocation17_spill] sm:$0xff]  ;;  %vm5939_vm14 = vcmask 588800  }
 0x6e5   :  { %4190 = vst.msk [vmem:[#allocation3 + $0x1f0] sm:$0x1] %vm4158_vm13, %v14479_v30  ;;  %4307 = vrot.lane.b32.xlu0 %v10957_v54, %s7266_s23  ;;  %v11689_v15 = vmax.f32 %v14486_v44, 0.0  ;;  %vm5526_vm13 = vcmask 589312  }
 0x6e6   :  { %v4202_v22 = vpop.permute.xlu1 %4201 }
 0x6e7   :  { %v4196_v12 = vpop.permute.xlu0 %4195  ;;  %4392 = vst.msk [vmem:[#allocation3 + $0x19] sm:$0x7f] %vm4389_vm15, %v4202_v22 }
 0x6e8   :  { %4388 = vst.msk [vmem:[#allocation3 + $0x1] sm:$0xff] %vm4387_vm0, %v4196_v12  ;;  %4317 = vrot.lane.b32.xlu1 %v14480_v24, %s7266_s23  ;;  %v14487_v12 = vld [vmem:[#allocation20_spill] sm:$0xff] }
 0x6e9   :  { %4311 = vrot.lane.b32.xlu0 %v14482_v4, %s7266_s23  ;;  %v11698_v22 = vmax.f32 %v14487_v12, 0.0 }
 0x6ea   :  { %v4206_v54 = vpop.permute.xlu1 %4205 }
 0x6eb   :  { %v4200_v30 = vpop.permute.xlu0 %4199  ;;  %4394 = vst.msk [vmem:[#allocation3 + $0x29] sm:$0x7f] %vm4389_vm15, %v4206_v54 }
 0x6ec   :  { %4391 = vst.msk [vmem:[#allocation3 + $0x11] sm:$0xff] %vm4387_vm0, %v4200_v30  ;;  %4321 = vrot.lane.b32.xlu1 %v11689_v15, %s7266_s23 }
 0x6ed   :  { %4315 = vrot.lane.b32.xlu0 %v10977_v34, %s7266_s23 }
 0x6ee   :  { %v4210_v24 = vpop.permute.xlu1 %4209 }
 0x6ef   :  { %v4204_v4 = vpop.permute.xlu0 %4203  ;;  %4396 = vst.msk [vmem:[#allocation3 + $0x39] sm:$0x7f] %vm4389_vm15, %v4210_v24 }
 0x6f0   :  { %4393 = vst.msk [vmem:[#allocation3 + $0x21] sm:$0xff] %vm4387_vm0, %v4204_v4  ;;  %4455 = vrot.lane.b32.xlu1 %v14481_v57, %s7268_s1 }
 0x6f1   :  { %4319 = vrot.lane.b32.xlu0 %v11698_v22, %s7266_s23 }
 0x6f2   :  { %v4214_v30 = vpop.permute.xlu1 %4213 }
 0x6f3   :  { %v4208_v54 = vpop.permute.xlu0 %4207  ;;  %4398 = vst.msk [vmem:[#allocation3 + $0x49] sm:$0x7f] %vm4389_vm15, %v4214_v30 }
 0x6f4   :  { %4395 = vst.msk [vmem:[#allocation3 + $0x31] sm:$0xff] %vm4387_vm0, %v4208_v54  ;;  %4459 = vrot.lane.b32.xlu1 %v10708_v63, %s7268_s1 }
 0x6f5   :  { %4453 = vrot.lane.b32.xlu0 %v10702_v16, %s7268_s1 }
 0x6f6   :  { %v4218_v24 = vpop.permute.xlu1 %4217 }
 0x6f7   :  { %v4212_v4 = vpop.permute.xlu0 %4211  ;;  %4400 = vst.msk [vmem:[#allocation3 + $0x59] sm:$0x7f] %vm4389_vm15, %v4218_v24 }
 0x6f8   :  { %4397 = vst.msk [vmem:[#allocation3 + $0x41] sm:$0xff] %vm4387_vm0, %v4212_v4  ;;  %4463 = vrot.lane.b32.xlu1 %v10714_v42, %s7268_s1 }
 0x6f9   :  { %4457 = vrot.lane.b32.xlu0 %v10705_v53, %s7268_s1 }
 0x6fa   :  { %v4222_v12 = vpop.permute.xlu1 %4221 }
 0x6fb   :  { %v4216_v44 = vpop.permute.xlu0 %4215  ;;  %4402 = vst.msk [vmem:[#allocation3 + $0x69] sm:$0x7f] %vm4389_vm15, %v4222_v12 }
 0x6fc   :  { %4399 = vst.msk [vmem:[#allocation3 + $0x51] sm:$0xff] %vm4387_vm0, %v4216_v44  ;;  %4467 = vrot.lane.b32.xlu1 %v10720_v48, %s7268_s1 }
 0x6fd   :  { %4461 = vrot.lane.b32.xlu0 %v10711_v19, %s7268_s1 }
 0x6fe   :  { %v4226_v30 = vpop.permute.xlu1 %4225 }
 0x6ff   :  { %v4220_v54 = vpop.permute.xlu0 %4219  ;;  %4404 = vst.msk [vmem:[#allocation3 + $0x79] sm:$0x7f] %vm4389_vm15, %v4226_v30 }
 0x700   :  { %4401 = vst.msk [vmem:[#allocation3 + $0x61] sm:$0xff] %vm4387_vm0, %v4220_v54  ;;  %4471 = vrot.lane.b32.xlu1 %v10728_v2, %s7268_s1 }
 0x701   :  { %4465 = vrot.lane.b32.xlu0 %v10717_v37, %s7268_s1 }
 0x702   :  { %v4230_v24 = vpop.permute.xlu1 %4229 }
 0x703   :  { %v4224_v4 = vpop.permute.xlu0 %4223  ;;  %4406 = vst.msk [vmem:[#allocation3 + $0x89] sm:$0x7f] %vm4389_vm15, %v4230_v24 }
 0x704   :  { %4403 = vst.msk [vmem:[#allocation3 + $0x71] sm:$0xff] %vm4387_vm0, %v4224_v4  ;;  %4475 = vrot.lane.b32.xlu1 %v10734_v49, %s7268_s1 }
 0x705   :  { %4469 = vrot.lane.b32.xlu0 %v10723_v9, %s7268_s1 }
 0x706   :  { %v4234_v12 = vpop.permute.xlu1 %4233 }
 0x707   :  { %v4228_v44 = vpop.permute.xlu0 %4227  ;;  %4408 = vst.msk [vmem:[#allocation3 + $0x99] sm:$0x7f] %vm4389_vm15, %v4234_v12 }
 0x708   :  { %4405 = vst.msk [vmem:[#allocation3 + $0x81] sm:$0xff] %vm4387_vm0, %v4228_v44  ;;  %4479 = vrot.lane.b32.xlu1 %v10750_v21, %s7268_s1 }
 0x709   :  { %4473 = vrot.lane.b32.xlu0 %v10731_v5, %s7268_s1 }
 0x70a   :  { %v4238_v30 = vpop.permute.xlu1 %4237 }
 0x70b   :  { %v4232_v54 = vpop.permute.xlu0 %4231  ;;  %4410 = vst.msk [vmem:[#allocation3 + $0xa9] sm:$0x7f] %vm4389_vm15, %v4238_v30 }
 0x70c   :  { %4407 = vst.msk [vmem:[#allocation3 + $0x91] sm:$0xff] %vm4387_vm0, %v4232_v54  ;;  %4483 = vrot.lane.b32.xlu1 %v10756_v62, %s7268_s1 }
 0x70d   :  { %4477 = vrot.lane.b32.xlu0 %v10737_v14, %s7268_s1 }
 0x70e   :  { %v4242_v24 = vpop.permute.xlu1 %4241 }
 0x70f   :  { %v4236_v4 = vpop.permute.xlu0 %4235  ;;  %4412 = vst.msk [vmem:[#allocation3 + $0xb9] sm:$0x7f] %vm4389_vm15, %v4242_v24 }
 0x710   :  { %4409 = vst.msk [vmem:[#allocation3 + $0xa1] sm:$0xff] %vm4387_vm0, %v4236_v4  ;;  %4487 = vrot.lane.b32.xlu1 %v10770_v32, %s7268_s1 }
 0x711   :  { %4481 = vrot.lane.b32.xlu0 %v10753_v23, %s7268_s1 }
 0x712   :  { %v4246_v12 = vpop.permute.xlu1 %4245 }
 0x713   :  { %v4240_v44 = vpop.permute.xlu0 %4239  ;;  %4414 = vst.msk [vmem:[#allocation3 + $0xc9] sm:$0x7f] %vm4389_vm15, %v4246_v12 }
 0x714   :  { %4411 = vst.msk [vmem:[#allocation3 + $0xb1] sm:$0xff] %vm4387_vm0, %v4240_v44  ;;  %4491 = vrot.lane.b32.xlu1 %v10776_v25, %s7268_s1 }
 0x715   :  { %4485 = vrot.lane.b32.xlu0 %v10759_v18, %s7268_s1 }
 0x716   :  { %v4250_v30 = vpop.permute.xlu1 %4249 }
 0x717   :  { %v4244_v54 = vpop.permute.xlu0 %4243  ;;  %4416 = vst.msk [vmem:[#allocation3 + $0xd9] sm:$0x7f] %vm4389_vm15, %v4250_v30 }
 0x718   :  { %4413 = vst.msk [vmem:[#allocation3 + $0xc1] sm:$0xff] %vm4387_vm0, %v4244_v54  ;;  %4495 = vrot.lane.b32.xlu1 %v10790_v26, %s7268_s1 }
 0x719   :  { %4489 = vrot.lane.b32.xlu0 %v10773_v27, %s7268_s1 }
 0x71a   :  { %v4254_v24 = vpop.permute.xlu1 %4253 }
 0x71b   :  { %v4248_v4 = vpop.permute.xlu0 %4247  ;;  %4418 = vst.msk [vmem:[#allocation3 + $0xe9] sm:$0x7f] %vm4389_vm15, %v4254_v24  ;;  %v14489_v24 = vld [vmem:[#allocation24_spill] sm:$0xff] }
 0x71c   :  { %4415 = vst.msk [vmem:[#allocation3 + $0xd1] sm:$0xff] %vm4387_vm0, %v4248_v4  ;;  %4499 = vrot.lane.b32.xlu1 %v10796_v50, %s7268_s1  ;;  %v14488_v4 = vld [vmem:[#allocation19_spill] sm:$0xff] }
 0x71d   :  { %4493 = vrot.lane.b32.xlu0 %v10779_v29, %s7268_s1 }
 0x71e   :  { %v4258_v12 = vpop.permute.xlu1 %4257 }
 0x71f   :  { %v4252_v44 = vpop.permute.xlu0 %4251  ;;  %4420 = vst.msk [vmem:[#allocation3 + $0xf9] sm:$0x7f] %vm4389_vm15, %v4258_v12 }
 0x720   :  { %4417 = vst.msk [vmem:[#allocation3 + $0xe1] sm:$0xff] %vm4387_vm0, %v4252_v44  ;;  %4503 = vrot.lane.b32.xlu1 %v10810_v3, %s7268_s1  ;;  %v14490_v3 = vld [vmem:[#allocation21_spill] sm:$0xff] }
 0x721   :  { %4497 = vrot.lane.b32.xlu0 %v10793_v46, %s7268_s1 }
 0x722   :  { %v4262_v30 = vpop.permute.xlu1 %4261 }
 0x723   :  { %v4256_v54 = vpop.permute.xlu0 %4255  ;;  %4422 = vst.msk [vmem:[#allocation3 + $0x109] sm:$0x7f] %vm4389_vm15, %v4262_v30 }
 0x724   :  { %4419 = vst.msk [vmem:[#allocation3 + $0xf1] sm:$0xff] %vm4387_vm0, %v4256_v54  ;;  %4507 = vrot.lane.b32.xlu1 %v14489_v24, %s7268_s1 }
 0x725   :  { %4501 = vrot.lane.b32.xlu0 %v14488_v4, %s7268_s1 }
 0x726   :  { %v4266_v12 = vpop.permute.xlu1 %4265 }
 0x727   :  { %v4260_v44 = vpop.permute.xlu0 %4259  ;;  %4424 = vst.msk [vmem:[#allocation3 + $0x119] sm:$0x7f] %vm4389_vm15, %v4266_v12 }
 0x728   :  { %4421 = vst.msk [vmem:[#allocation3 + $0x101] sm:$0xff] %vm4387_vm0, %v4260_v44  ;;  %4511 = vrot.lane.b32.xlu1 %v14490_v3, %s7268_s1 }
 0x729   :  { %4505 = vrot.lane.b32.xlu0 %v10813_v7, %s7268_s1 }
 0x72a   :  { %v4270_v30 = vpop.permute.xlu1 %4269 }
 0x72b   :  { %v4264_v54 = vpop.permute.xlu0 %4263  ;;  %4426 = vst.msk [vmem:[#allocation3 + $0x129] sm:$0x7f] %vm4389_vm15, %v4270_v30 }
 0x72c   :  { %4423 = vst.msk [vmem:[#allocation3 + $0x111] sm:$0xff] %vm4387_vm0, %v4264_v54  ;;  %4515 = vrot.lane.b32.xlu1 %v11557_v36, %s7268_s1 }
 0x72d   :  { %4509 = vrot.lane.b32.xlu0 %v10819_v31, %s7268_s1 }
 0x72e   :  { %v4274_v12 = vpop.permute.xlu1 %4273 }
 0x72f   :  { %v4268_v44 = vpop.permute.xlu0 %4267  ;;  %4428 = vst.msk [vmem:[#allocation3 + $0x139] sm:$0x7f] %vm4389_vm15, %v4274_v12 }
 0x730   :  { %4425 = vst.msk [vmem:[#allocation3 + $0x121] sm:$0xff] %vm4387_vm0, %v4268_v44  ;;  %4519 = vrot.lane.b32.xlu1 %v10848_v43, %s7268_s1 }
 0x731   :  { %4513 = vrot.lane.b32.xlu0 %v11568_v45, %s7268_s1 }
 0x732   :  { %v4278_v30 = vpop.permute.xlu1 %4277 }
 0x733   :  { %v4272_v54 = vpop.permute.xlu0 %4271  ;;  %4430 = vst.msk [vmem:[#allocation3 + $0x149] sm:$0x7f] %vm4389_vm15, %v4278_v30 }
 0x734   :  { %4427 = vst.msk [vmem:[#allocation3 + $0x131] sm:$0xff] %vm4387_vm0, %v4272_v54  ;;  %4523 = vrot.lane.b32.xlu1 %v10854_v40, %s7268_s1 }
 0x735   :  { %4517 = vrot.lane.b32.xlu0 %v10837_v35, %s7268_s1 }
 0x736   :  { %v4282_v12 = vpop.permute.xlu1 %4281 }
 0x737   :  { %v4276_v44 = vpop.permute.xlu0 %4275  ;;  %4432 = vst.msk [vmem:[#allocation3 + $0x159] sm:$0x7f] %vm4389_vm15, %v4282_v12 }
 0x738   :  { %4429 = vst.msk [vmem:[#allocation3 + $0x141] sm:$0xff] %vm4387_vm0, %v4276_v44  ;;  %4527 = vrot.lane.b32.xlu1 %v10868_v10, %s7268_s1 }
 0x739   :  { %4521 = vrot.lane.b32.xlu0 %v10851_v33, %s7268_s1 }
 0x73a   :  { %v4286_v30 = vpop.permute.xlu1 %4285 }
 0x73b   :  { %v4280_v54 = vpop.permute.xlu0 %4279  ;;  %4434 = vst.msk [vmem:[#allocation3 + $0x169] sm:$0x7f] %vm4389_vm15, %v4286_v30 }
 0x73c   :  { %4431 = vst.msk [vmem:[#allocation3 + $0x151] sm:$0xff] %vm4387_vm0, %v4280_v54  ;;  %4531 = vrot.lane.b32.xlu1 %v10874_v6, %s7268_s1 }
 0x73d   :  { %4525 = vrot.lane.b32.xlu0 %v10857_v59, %s7268_s1 }
 0x73e   :  { %v4290_v12 = vpop.permute.xlu1 %4289 }
 0x73f   :  { %v4284_v44 = vpop.permute.xlu0 %4283  ;;  %4436 = vst.msk [vmem:[#allocation3 + $0x179] sm:$0x7f] %vm4389_vm15, %v4290_v12 }
 0x740   :  { %4433 = vst.msk [vmem:[#allocation3 + $0x161] sm:$0xff] %vm4387_vm0, %v4284_v44  ;;  %4535 = vrot.lane.b32.xlu1 %v10884_v39, %s7268_s1 }
 0x741   :  { %4529 = vrot.lane.b32.xlu0 %v10871_v60, %s7268_s1 }
 0x742   :  { %v4294_v30 = vpop.permute.xlu1 %4293 }
 0x743   :  { %v4288_v54 = vpop.permute.xlu0 %4287  ;;  %4438 = vst.msk [vmem:[#allocation3 + $0x189] sm:$0x7f] %vm4389_vm15, %v4294_v30 }
 0x744   :  { %4435 = vst.msk [vmem:[#allocation3 + $0x171] sm:$0xff] %vm4387_vm0, %v4288_v54  ;;  %4539 = vrot.lane.b32.xlu1 %v10890_v17, %s7268_s1 }
 0x745   :  { %4533 = vrot.lane.b32.xlu0 %v10877_v28, %s7268_s1 }
 0x746   :  { %v4298_v12 = vpop.permute.xlu1 %4297 }
 0x747   :  { %v4292_v44 = vpop.permute.xlu0 %4291  ;;  %4440 = vst.msk [vmem:[#allocation3 + $0x199] sm:$0x7f] %vm4389_vm15, %v4298_v12 }
 0x748   :  { %4437 = vst.msk [vmem:[#allocation3 + $0x181] sm:$0xff] %vm4387_vm0, %v4292_v44  ;;  %4543 = vrot.lane.b32.xlu1 %v10908_v13, %s7268_s1 }
 0x749   :  { %4537 = vrot.lane.b32.xlu0 %v10887_v0, %s7268_s1 }
 0x74a   :  { %v4302_v30 = vpop.permute.xlu1 %4301 }
 0x74b   :  { %v4296_v54 = vpop.permute.xlu0 %4295  ;;  %4442 = vst.msk [vmem:[#allocation3 + $0x1a9] sm:$0x7f] %vm4389_vm15, %v4302_v30 }
 0x74c   :  { %4439 = vst.msk [vmem:[#allocation3 + $0x191] sm:$0xff] %vm4387_vm0, %v4296_v54  ;;  %4547 = vrot.lane.b32.xlu1 %v10914_v55, %s7268_s1 }
 0x74d   :  { %4541 = vrot.lane.b32.xlu0 %v10893_v58, %s7268_s1 }
 0x74e   :  { %v4306_v12 = vpop.permute.xlu1 %4305 }
 0x74f   :  { %v4300_v44 = vpop.permute.xlu0 %4299  ;;  %4444 = vst.msk [vmem:[#allocation3 + $0x1b9] sm:$0x7f] %vm4389_vm15, %v4306_v12 }
 0x750   :  { %4441 = vst.msk [vmem:[#allocation3 + $0x1a1] sm:$0xff] %vm4387_vm0, %v4300_v44  ;;  %4551 = vrot.lane.b32.xlu1 %v10928_v52, %s7268_s1 }
 0x751   :  { %4545 = vrot.lane.b32.xlu0 %v10911_v47, %s7268_s1 }
 0x752   :  { %v4310_v30 = vpop.permute.xlu1 %4309 }
 0x753   :  { %v4304_v54 = vpop.permute.xlu0 %4303  ;;  %4446 = vst.msk [vmem:[#allocation3 + $0x1c9] sm:$0x7f] %vm4389_vm15, %v4310_v30 }
 0x754   :  { %4443 = vst.msk [vmem:[#allocation3 + $0x1b1] sm:$0xff] %vm4387_vm0, %v4304_v54  ;;  %4555 = vrot.lane.b32.xlu1 %v10934_v20, %s7268_s1 }
 0x755   :  { %4549 = vrot.lane.b32.xlu0 %v10917_v41, %s7268_s1 }
 0x756   :  { %v4314_v12 = vpop.permute.xlu1 %4313 }
 0x757   :  { %v4308_v44 = vpop.permute.xlu0 %4307  ;;  %4448 = vst.msk [vmem:[#allocation3 + $0x1d9] sm:$0x7f] %vm4389_vm15, %v4314_v12 }
 0x758   :  { %4445 = vst.msk [vmem:[#allocation3 + $0x1c1] sm:$0xff] %vm4387_vm0, %v4308_v44  ;;  %4559 = vrot.lane.b32.xlu1 %v10948_v61, %s7268_s1 }
 0x759   :  { %4553 = vrot.lane.b32.xlu0 %v10931_v38, %s7268_s1 }
 0x75a   :  { %v4318_v30 = vpop.permute.xlu1 %4317 }
 0x75b   :  { %v4312_v54 = vpop.permute.xlu0 %4311  ;;  %4450 = vst.msk [vmem:[#allocation3 + $0x1e9] sm:$0x7f] %vm4389_vm15, %v4318_v30 }
 0x75c   :  { %4447 = vst.msk [vmem:[#allocation3 + $0x1d1] sm:$0xff] %vm4387_vm0, %v4312_v54  ;;  %4563 = vrot.lane.b32.xlu1 %v10954_v51, %s7268_s1  ;;  %v14491_v51 = vld [vmem:[#allocation25_spill] sm:$0xff] }
 0x75d   :  { %4557 = vrot.lane.b32.xlu0 %v10937_v11, %s7268_s1 }
 0x75e   :  { %v4322_v12 = vpop.permute.xlu1 %4321 }
 0x75f   :  { %v4316_v44 = vpop.permute.xlu0 %4315  ;;  %4452 = vst.msk [vmem:[#allocation3 + $0x1f9] sm:$0x7f] %vm4389_vm15, %v4322_v12 }
 0x760   :  { %4449 = vst.msk [vmem:[#allocation3 + $0x1e1] sm:$0xff] %vm4387_vm0, %v4316_v44  ;;  %4567 = vrot.lane.b32.xlu1 %v14485_v56, %s7268_s1  ;;  %v14492_v44 = vmov 0.0   ;;  %v14493_v56 = vld [vmem:[#allocation9_spill] sm:$0xff] }
 0x761   :  { %4561 = vrot.lane.b32.xlu0 %v10951_v8, %s7268_s1 }
 0x762   :  { %v4456_v30 = vpop.permute.xlu1 %4455 }
 0x763   :  { %v4320_v54 = vpop.permute.xlu0 %4319  ;;  %4647 = vst.msk [vmem:[#allocation3 + $0x8] sm:$0xff] %vm4645_vm1, %v4456_v30 }
 0x764   :  { %4451 = vst.msk [vmem:[#allocation3 + $0x1f1] sm:$0xff] %vm4387_vm0, %v4320_v54  ;;  %4571 = vrot.lane.b32.xlu1 %v10974_v1, %s7268_s1  ;;  %v14494_v54 = vld [vmem:[#allocation29_spill] sm:$0xff] }
 0x765   :  { %4565 = vrot.lane.b32.xlu0 %v14491_v51, %s7268_s1  ;;  %4711 = vst.msk [vmem:[#allocation3 + $0xf] sm:$0x1] %vm4710_vm2, %v14492_v44 }
 0x766   :  { %v4460_v8 = vpop.permute.xlu1 %4459 }
 0x767   :  { %v4454_v12 = vpop.permute.xlu0 %4453  ;;  %4649 = vst.msk [vmem:[#allocation3 + $0x18] sm:$0xff] %vm4645_vm1, %v4460_v8 }
 0x768   :  { %4646 = vst.msk [vmem:[#allocation3] sm:$0xff] %vm4645_vm1, %v4454_v12  ;;  %4575 = vrot.lane.b32.xlu1 %v14494_v54, %s7268_s1 }
 0x769   :  { %4569 = vrot.lane.b32.xlu0 %v14493_v56, %s7268_s1  ;;  %4712 = vst.msk [vmem:[#allocation3 + $0x1f] sm:$0x1] %vm4710_vm2, %v14492_v44 }
 0x76a   :  { %v4464_v51 = vpop.permute.xlu1 %4463 }
 0x76b   :  { %v4458_v30 = vpop.permute.xlu0 %4457  ;;  %4651 = vst.msk [vmem:[#allocation3 + $0x28] sm:$0xff] %vm4645_vm1, %v4464_v51 }
 0x76c   :  { %4648 = vst.msk [vmem:[#allocation3 + $0x10] sm:$0xff] %vm4645_vm1, %v4458_v30  ;;  %4579 = vrot.lane.b32.xlu1 %v11689_v15, %s7268_s1 }
 0x76d   :  { %4573 = vrot.lane.b32.xlu0 %v10977_v34, %s7268_s1  ;;  %4713 = vst.msk [vmem:[#allocation3 + $0x2f] sm:$0x1] %vm4710_vm2, %v14492_v44 }
 0x76e   :  { %v4468_v12 = vpop.permute.xlu1 %4467 }
 0x76f   :  { %v4462_v8 = vpop.permute.xlu0 %4461  ;;  %4653 = vst.msk [vmem:[#allocation3 + $0x38] sm:$0xff] %vm4645_vm1, %v4468_v12 }
 0x770   :  { %4650 = vst.msk [vmem:[#allocation3 + $0x20] sm:$0xff] %vm4645_vm1, %v4462_v8  ;;  %4745 = vrot.lane.b32.xlu1 %v14481_v57, %s7269_s2 }
 0x771   :  { %4577 = vrot.lane.b32.xlu0 %v11698_v22, %s7268_s1  ;;  %4714 = vst.msk [vmem:[#allocation3 + $0x3f] sm:$0x1] %vm4710_vm2, %v14492_v44 }
 0x772   :  { %v4472_v30 = vpop.permute.xlu1 %4471 }
 0x773   :  { %v4466_v51 = vpop.permute.xlu0 %4465  ;;  %4655 = vst.msk [vmem:[#allocation3 + $0x48] sm:$0xff] %vm4645_vm1, %v4472_v30 }
 0x774   :  { %4652 = vst.msk [vmem:[#allocation3 + $0x30] sm:$0xff] %vm4645_vm1, %v4466_v51  ;;  %4749 = vrot.lane.b32.xlu1 %v10708_v63, %s7269_s2 }
 0x775   :  { %4743 = vrot.lane.b32.xlu0 %v10702_v16, %s7269_s2  ;;  %4715 = vst.msk [vmem:[#allocation3 + $0x4f] sm:$0x1] %vm4710_vm2, %v14492_v44 }
 0x776   :  { %v4476_v12 = vpop.permute.xlu1 %4475 }
 0x777   :  { %v4470_v8 = vpop.permute.xlu0 %4469  ;;  %4657 = vst.msk [vmem:[#allocation3 + $0x58] sm:$0xff] %vm4645_vm1, %v4476_v12 }
 0x778   :  { %4654 = vst.msk [vmem:[#allocation3 + $0x40] sm:$0xff] %vm4645_vm1, %v4470_v8  ;;  %4753 = vrot.lane.b32.xlu1 %v10714_v42, %s7269_s2 }
 0x779   :  { %4747 = vrot.lane.b32.xlu0 %v10705_v53, %s7269_s2  ;;  %4716 = vst.msk [vmem:[#allocation3 + $0x5f] sm:$0x1] %vm4710_vm2, %v14492_v44 }
 0x77a   :  { %v4480_v57 = vpop.permute.xlu1 %4479 }
 0x77b   :  { %v4474_v16 = vpop.permute.xlu0 %4473  ;;  %4659 = vst.msk [vmem:[#allocation3 + $0x68] sm:$0xff] %vm4645_vm1, %v4480_v57 }
 0x77c   :  { %4656 = vst.msk [vmem:[#allocation3 + $0x50] sm:$0xff] %vm4645_vm1, %v4474_v16  ;;  %4757 = vrot.lane.b32.xlu1 %v10720_v48, %s7269_s2 }
 0x77d   :  { %4751 = vrot.lane.b32.xlu0 %v10711_v19, %s7269_s2  ;;  %4717 = vst.msk [vmem:[#allocation3 + $0x6f] sm:$0x1] %vm4710_vm2, %v14492_v44 }
 0x77e   :  { %v4484_v30 = vpop.permute.xlu1 %4483 }
 0x77f   :  { %v4478_v51 = vpop.permute.xlu0 %4477  ;;  %4661 = vst.msk [vmem:[#allocation3 + $0x78] sm:$0xff] %vm4645_vm1, %v4484_v30 }
 0x780   :  { %4658 = vst.msk [vmem:[#allocation3 + $0x60] sm:$0xff] %vm4645_vm1, %v4478_v51  ;;  %4761 = vrot.lane.b32.xlu1 %v10728_v2, %s7269_s2 }
 0x781   :  { %4755 = vrot.lane.b32.xlu0 %v10717_v37, %s7269_s2  ;;  %4718 = vst.msk [vmem:[#allocation3 + $0x7f] sm:$0x1] %vm4710_vm2, %v14492_v44 }
 0x782   :  { %v4488_v12 = vpop.permute.xlu1 %4487 }
 0x783   :  { %v4482_v8 = vpop.permute.xlu0 %4481  ;;  %4663 = vst.msk [vmem:[#allocation3 + $0x88] sm:$0xff] %vm4645_vm1, %v4488_v12 }
 0x784   :  { %4660 = vst.msk [vmem:[#allocation3 + $0x70] sm:$0xff] %vm4645_vm1, %v4482_v8  ;;  %4765 = vrot.lane.b32.xlu1 %v10734_v49, %s7269_s2 }
 0x785   :  { %4759 = vrot.lane.b32.xlu0 %v10723_v9, %s7269_s2  ;;  %4719 = vst.msk [vmem:[#allocation3 + $0x8f] sm:$0x1] %vm4710_vm2, %v14492_v44 }
 0x786   :  { %v4492_v57 = vpop.permute.xlu1 %4491 }
 0x787   :  { %v4486_v16 = vpop.permute.xlu0 %4485  ;;  %4665 = vst.msk [vmem:[#allocation3 + $0x98] sm:$0xff] %vm4645_vm1, %v4492_v57 }
 0x788   :  { %4662 = vst.msk [vmem:[#allocation3 + $0x80] sm:$0xff] %vm4645_vm1, %v4486_v16  ;;  %4769 = vrot.lane.b32.xlu1 %v10750_v21, %s7269_s2  ;;  %v7247_v16 = vld [vmem:[%s14253_s4] sm:$0xff]  }
 0x789   :  { %4763 = vrot.lane.b32.xlu0 %v10731_v5, %s7269_s2  ;;  %4720 = vst.msk [vmem:[#allocation3 + $0x9f] sm:$0x1] %vm4710_vm2, %v14492_v44  ;;  %7155 = vmatprep.subr.bf16.mxu1 %v7247_v16 }
 0x78a   :  { %v4496_v30 = vpop.permute.xlu1 %4495  ;;  %7156 = vmatpush3.bf16.msra.mxu1 %v7247_v16  ;;  %v7249_v16 = vld [vmem:[%s14253_s4 + $0x10] sm:$0xff]  }
 0x78b   :  { %v4490_v51 = vpop.permute.xlu0 %4489  ;;  %4667 = vst.msk [vmem:[#allocation3 + $0xa8] sm:$0xff] %vm4645_vm1, %v4496_v30  ;;  %v7248_v30 = vld [vmem:[%s14253_s4 + $0x8] sm:$0xff]  }
 0x78c   :  { %4664 = vst.msk [vmem:[#allocation3 + $0x90] sm:$0xff] %vm4645_vm1, %v4490_v51  ;;  %5040 = vrot.lane.b32.xlu1 %v10705_v53, %s7270_s3  ;;  %7157 = vmatprep.subr.bf16.mxu1 %v7248_v30 }
 0x78d   :  { %4767 = vrot.lane.b32.xlu0 %v10737_v14, %s7269_s2  ;;  %4721 = vst.msk [vmem:[#allocation3 + $0xaf] sm:$0x1] %vm4710_vm2, %v14492_v44 }
 0x78e   :  { %v4500_v12 = vpop.permute.xlu1 %4499  ;;  %7158 = vmatpush3.bf16.msra.mxu1 %v7248_v30  ;;  %v7250_v30 = vld [vmem:[%s14253_s4 + $0x18] sm:$0xff]  }
 0x78f   :  { %v4494_v8 = vpop.permute.xlu0 %4493  ;;  %4669 = vst.msk [vmem:[#allocation3 + $0xb8] sm:$0xff] %vm4645_vm1, %v4500_v12  ;;  %7159 = vmatprep.subr.bf16.mxu1 %v7249_v16 }
 0x790   :  { %4666 = vst.msk [vmem:[#allocation3 + $0xa0] sm:$0xff] %vm4645_vm1, %v4494_v8  ;;  %5044 = vrot.lane.b32.xlu1 %v10711_v19, %s7270_s3 }
 0x791   :  { %4771 = vrot.lane.b32.xlu0 %v10753_v23, %s7269_s2  ;;  %4722 = vst.msk [vmem:[#allocation3 + $0xbf] sm:$0x1] %vm4710_vm2, %v14492_v44 }
 0x792   :  { %v4504_v51 = vpop.permute.xlu1 %4503  ;;  %7160 = vmatpush3.bf16.msra.mxu1 %v7249_v16 }
 0x793   :  { %v4498_v57 = vpop.permute.xlu0 %4497  ;;  %4671 = vst.msk [vmem:[#allocation3 + $0xc8] sm:$0xff] %vm4645_vm1, %v4504_v51  ;;  %7161 = vmatprep.subr.bf16.mxu1 %v7250_v30 }
 0x794   :  { %4668 = vst.msk [vmem:[#allocation3 + $0xb0] sm:$0xff] %vm4645_vm1, %v4498_v57  ;;  %5286 = vrot.lane.b32.xlu1 %v10705_v53, %s7271_s21 }
 0x795   :  { %5042 = vrot.lane.b32.xlu0 %v10708_v63, %s7270_s3  ;;  %4723 = vst.msk [vmem:[#allocation3 + $0xcf] sm:$0x1] %vm4710_vm2, %v14492_v44 }
 0x796   :  { %v4508_v12 = vpop.permute.xlu1 %4507  ;;  %7162 = vmatpush3.bf16.msra.mxu1 %v7250_v30 }
 0x797   :  { %v4502_v8 = vpop.permute.xlu0 %4501  ;;  %4673 = vst.msk [vmem:[#allocation3 + $0xd8] sm:$0xff] %vm4645_vm1, %v4508_v12 }
 0x798   :  { %4670 = vst.msk [vmem:[#allocation3 + $0xc0] sm:$0xff] %vm4645_vm1, %v4502_v8  ;;  %5290 = vrot.lane.b32.xlu1 %v10711_v19, %s7271_s21 }
 0x799   :  { %5046 = vrot.lane.b32.xlu0 %v10714_v42, %s7270_s3  ;;  %4724 = vst.msk [vmem:[#allocation3 + $0xdf] sm:$0x1] %vm4710_vm2, %v14492_v44 }
 0x79a   :  { %v4512_v51 = vpop.permute.xlu1 %4511 }
 0x79b   :  { %v4506_v57 = vpop.permute.xlu0 %4505  ;;  %4675 = vst.msk [vmem:[#allocation3 + $0xe8] sm:$0xff] %vm4645_vm1, %v4512_v51 }
 0x79c   :  { %4672 = vst.msk [vmem:[#allocation3 + $0xd0] sm:$0xff] %vm4645_vm1, %v4506_v57  ;;  %5564 = vrot.lane.b32.xlu1 %v10705_v53, %s7272_s26  ;;  %v7251_v53 = vld [vmem:[%s14253_s4 + $0x20] ss:$0 sps:$4 sm:$0xff]  }
 0x79d   :  { %5288 = vrot.lane.b32.xlu0 %v10708_v63, %s7271_s21  ;;  %4725 = vst.msk [vmem:[#allocation3 + $0xef] sm:$0x1] %vm4710_vm2, %v14492_v44  ;;  %7230 = vmatprep.subr.msk.bf16.mxu1 %vm6036_vm3, %v7251_v53  ;;  %v6038_v51 = vsel %vm6036_vm3, %v7251_v53, 0 }
 0x79e   :  { %v4516_v12 = vpop.permute.xlu1 %4515  ;;  %7164 = vmatpush3.bf16.msra.mxu1 %v6038_v51 }
 0x79f   :  { %v4510_v8 = vpop.permute.xlu0 %4509  ;;  %4677 = vst.msk [vmem:[#allocation3 + $0xf8] sm:$0xff] %vm4645_vm1, %v4516_v12 }
 0x7a0   :  { %4674 = vst.msk [vmem:[#allocation3 + $0xe0] sm:$0xff] %vm4645_vm1, %v4510_v8  ;;  %5568 = vrot.lane.b32.xlu1 %v10711_v19, %s7272_s26 }
 0x7a1   :  { %5292 = vrot.lane.b32.xlu0 %v10714_v42, %s7271_s21  ;;  %4726 = vst.msk [vmem:[#allocation3 + $0xff] sm:$0x1] %vm4710_vm2, %v14492_v44 }
 0x7a2   :  { %v4520_v57 = vpop.permute.xlu1 %4519 }
 0x7a3   :  { %v4514_v16 = vpop.permute.xlu0 %4513  ;;  %4679 = vst.msk [vmem:[#allocation3 + $0x108] sm:$0xff] %vm4645_vm1, %v4520_v57 }
 0x7a4   :  { %4676 = vst.msk [vmem:[#allocation3 + $0xf0] sm:$0xff] %vm4645_vm1, %v4514_v16  ;;  %5048 = vrot.lane.b32.xlu1 %v10717_v37, %s7270_s3 }
 0x7a5   :  { %5566 = vrot.lane.b32.xlu0 %v10708_v63, %s7272_s26  ;;  %4727 = vst.msk [vmem:[#allocation3 + $0x10f] sm:$0x1] %vm4710_vm2, %v14492_v44 }
 0x7a6   :  { %v4524_v30 = vpop.permute.xlu1 %4523 }
 0x7a7   :  { %v4518_v19 = vpop.permute.xlu0 %4517  ;;  %4681 = vst.msk [vmem:[#allocation3 + $0x118] sm:$0xff] %vm4645_vm1, %v4524_v30 }
 0x7a8   :  { %4678 = vst.msk [vmem:[#allocation3 + $0x100] sm:$0xff] %vm4645_vm1, %v4518_v19  ;;  %5052 = vrot.lane.b32.xlu1 %v10723_v9, %s7270_s3 }
 0x7a9   :  { %5570 = vrot.lane.b32.xlu0 %v10714_v42, %s7272_s26  ;;  %4728 = vst.msk [vmem:[#allocation3 + $0x11f] sm:$0x1] %vm4710_vm2, %v14492_v44 }
 0x7aa   :  { %v4528_v8 = vpop.permute.xlu1 %4527 }
 0x7ab   :  { %v4522_v63 = vpop.permute.xlu0 %4521  ;;  %4683 = vst.msk [vmem:[#allocation3 + $0x128] sm:$0xff] %vm4645_vm1, %v4528_v8 }
 0x7ac   :  { %4680 = vst.msk [vmem:[#allocation3 + $0x110] sm:$0xff] %vm4645_vm1, %v4522_v63  ;;  %5294 = vrot.lane.b32.xlu1 %v10717_v37, %s7271_s21 }
 0x7ad   :  { %5050 = vrot.lane.b32.xlu0 %v10720_v48, %s7270_s3  ;;  %4729 = vst.msk [vmem:[#allocation3 + $0x12f] sm:$0x1] %vm4710_vm2, %v14492_v44 }
 0x7ae   :  { %v4532_v12 = vpop.permute.xlu1 %4531 }
 0x7af   :  { %v4526_v42 = vpop.permute.xlu0 %4525  ;;  %4685 = vst.msk [vmem:[#allocation3 + $0x138] sm:$0xff] %vm4645_vm1, %v4532_v12 }
 0x7b0   :  { %4682 = vst.msk [vmem:[#allocation3 + $0x120] sm:$0xff] %vm4645_vm1, %v4526_v42  ;;  %5298 = vrot.lane.b32.xlu1 %v10723_v9, %s7271_s21 }
 0x7b1   :  { %5054 = vrot.lane.b32.xlu0 %v10728_v2, %s7270_s3  ;;  %4730 = vst.msk [vmem:[#allocation3 + $0x13f] sm:$0x1] %vm4710_vm2, %v14492_v44 }
 0x7b2   :  { %v4536_v16 = vpop.permute.xlu1 %4535 }
 0x7b3   :  { %v4530_v53 = vpop.permute.xlu0 %4529  ;;  %4687 = vst.msk [vmem:[#allocation3 + $0x148] sm:$0xff] %vm4645_vm1, %v4536_v16 }
 0x7b4   :  { %4684 = vst.msk [vmem:[#allocation3 + $0x130] sm:$0xff] %vm4645_vm1, %v4530_v53  ;;  %5572 = vrot.lane.b32.xlu1 %v10717_v37, %s7272_s26 }
 0x7b5   :  { %5296 = vrot.lane.b32.xlu0 %v10720_v48, %s7271_s21  ;;  %4731 = vst.msk [vmem:[#allocation3 + $0x14f] sm:$0x1] %vm4710_vm2, %v14492_v44 }
 0x7b6   :  { %v4540_v51 = vpop.permute.xlu1 %4539 }
 0x7b7   :  { %v4534_v57 = vpop.permute.xlu0 %4533  ;;  %4689 = vst.msk [vmem:[#allocation3 + $0x158] sm:$0xff] %vm4645_vm1, %v4540_v51 }
 0x7b8   :  { %4686 = vst.msk [vmem:[#allocation3 + $0x140] sm:$0xff] %vm4645_vm1, %v4534_v57  ;;  %5576 = vrot.lane.b32.xlu1 %v10723_v9, %s7272_s26 }
 0x7b9   :  { %5300 = vrot.lane.b32.xlu0 %v10728_v2, %s7271_s21  ;;  %4732 = vst.msk [vmem:[#allocation3 + $0x15f] sm:$0x1] %vm4710_vm2, %v14492_v44 }
 0x7ba   :  { %v4544_v30 = vpop.permute.xlu1 %4543 }
 0x7bb   :  { %v4538_v19 = vpop.permute.xlu0 %4537  ;;  %4691 = vst.msk [vmem:[#allocation3 + $0x168] sm:$0xff] %vm4645_vm1, %v4544_v30 }
 0x7bc   :  { %4688 = vst.msk [vmem:[#allocation3 + $0x150] sm:$0xff] %vm4645_vm1, %v4538_v19  ;;  %5056 = vrot.lane.b32.xlu1 %v10731_v5, %s7270_s3 }
 0x7bd   :  { %5574 = vrot.lane.b32.xlu0 %v10720_v48, %s7272_s26  ;;  %4733 = vst.msk [vmem:[#allocation3 + $0x16f] sm:$0x1] %vm4710_vm2, %v14492_v44 }
 0x7be   :  { %v4548_v63 = vpop.permute.xlu1 %4547 }
 0x7bf   :  { %v4542_v37 = vpop.permute.xlu0 %4541  ;;  %4693 = vst.msk [vmem:[#allocation3 + $0x178] sm:$0xff] %vm4645_vm1, %v4548_v63 }
 0x7c0   :  { %4690 = vst.msk [vmem:[#allocation3 + $0x160] sm:$0xff] %vm4645_vm1, %v4542_v37  ;;  %5060 = vrot.lane.b32.xlu1 %v10737_v14, %s7270_s3 }
 0x7c1   :  { %5578 = vrot.lane.b32.xlu0 %v10728_v2, %s7272_s26  ;;  %4734 = vst.msk [vmem:[#allocation3 + $0x17f] sm:$0x1] %vm4710_vm2, %v14492_v44 }
 0x7c2   :  { %v4552_v9 = vpop.permute.xlu1 %4551 }
 0x7c3   :  { %v4546_v48 = vpop.permute.xlu0 %4545  ;;  %4695 = vst.msk [vmem:[#allocation3 + $0x188] sm:$0xff] %vm4645_vm1, %v4552_v9 }
 0x7c4   :  { %4692 = vst.msk [vmem:[#allocation3 + $0x170] sm:$0xff] %vm4645_vm1, %v4546_v48  ;;  %5302 = vrot.lane.b32.xlu1 %v10731_v5, %s7271_s21 }
 0x7c5   :  { %5058 = vrot.lane.b32.xlu0 %v10734_v49, %s7270_s3  ;;  %4735 = vst.msk [vmem:[#allocation3 + $0x18f] sm:$0x1] %vm4710_vm2, %v14492_v44 }
 0x7c6   :  { %v4556_v8 = vpop.permute.xlu1 %4555 }
 0x7c7   :  { %v4550_v2 = vpop.permute.xlu0 %4549  ;;  %4697 = vst.msk [vmem:[#allocation3 + $0x198] sm:$0xff] %vm4645_vm1, %v4556_v8 }
 0x7c8   :  { %4694 = vst.msk [vmem:[#allocation3 + $0x180] sm:$0xff] %vm4645_vm1, %v4550_v2  ;;  %5306 = vrot.lane.b32.xlu1 %v10737_v14, %s7271_s21 }
 0x7c9   :  { %5062 = vrot.lane.b32.xlu0 %v10750_v21, %s7270_s3  ;;  %4736 = vst.msk [vmem:[#allocation3 + $0x19f] sm:$0x1] %vm4710_vm2, %v14492_v44 }
 0x7ca   :  { %v4560_v12 = vpop.permute.xlu1 %4559 }
 0x7cb   :  { %v4554_v42 = vpop.permute.xlu0 %4553  ;;  %4699 = vst.msk [vmem:[#allocation3 + $0x1a8] sm:$0xff] %vm4645_vm1, %v4560_v12 }
 0x7cc   :  { %4696 = vst.msk [vmem:[#allocation3 + $0x190] sm:$0xff] %vm4645_vm1, %v4554_v42  ;;  %5580 = vrot.lane.b32.xlu1 %v10731_v5, %s7272_s26 }
 0x7cd   :  { %5304 = vrot.lane.b32.xlu0 %v10734_v49, %s7271_s21  ;;  %4737 = vst.msk [vmem:[#allocation3 + $0x1af] sm:$0x1] %vm4710_vm2, %v14492_v44 }
 0x7ce   :  { %v4564_v16 = vpop.permute.xlu1 %4563 }
 0x7cf   :  { %v4558_v53 = vpop.permute.xlu0 %4557  ;;  %4701 = vst.msk [vmem:[#allocation3 + $0x1b8] sm:$0xff] %vm4645_vm1, %v4564_v16 }
 0x7d0   :  { %4698 = vst.msk [vmem:[#allocation3 + $0x1a0] sm:$0xff] %vm4645_vm1, %v4558_v53  ;;  %5584 = vrot.lane.b32.xlu1 %v10737_v14, %s7272_s26 }
 0x7d1   :  { %5308 = vrot.lane.b32.xlu0 %v10750_v21, %s7271_s21  ;;  %4738 = vst.msk [vmem:[#allocation3 + $0x1bf] sm:$0x1] %vm4710_vm2, %v14492_v44 }
 0x7d2   :  { %v4568_v51 = vpop.permute.xlu1 %4567 }
 0x7d3   :  { %v4562_v57 = vpop.permute.xlu0 %4561  ;;  %4703 = vst.msk [vmem:[#allocation3 + $0x1c8] sm:$0xff] %vm4645_vm1, %v4568_v51 }
 0x7d4   :  { %4700 = vst.msk [vmem:[#allocation3 + $0x1b0] sm:$0xff] %vm4645_vm1, %v4562_v57  ;;  %4773 = vrot.lane.b32.xlu1 %v10756_v62, %s7269_s2 }
 0x7d5   :  { %5582 = vrot.lane.b32.xlu0 %v10734_v49, %s7272_s26  ;;  %4739 = vst.msk [vmem:[#allocation3 + $0x1cf] sm:$0x1] %vm4710_vm2, %v14492_v44 }
 0x7d6   :  { %v4572_v19 = vpop.permute.xlu1 %4571 }
 0x7d7   :  { %v4566_v5 = vpop.permute.xlu0 %4565  ;;  %4705 = vst.msk [vmem:[#allocation3 + $0x1d8] sm:$0xff] %vm4645_vm1, %v4572_v19 }
 0x7d8   :  { %4702 = vst.msk [vmem:[#allocation3 + $0x1c0] sm:$0xff] %vm4645_vm1, %v4566_v5  ;;  %5066 = vrot.lane.b32.xlu1 %v10756_v62, %s7270_s3 }
 0x7d9   :  { %5586 = vrot.lane.b32.xlu0 %v10750_v21, %s7272_s26  ;;  %4740 = vst.msk [vmem:[#allocation3 + $0x1df] sm:$0x1] %vm4710_vm2, %v14492_v44 }
 0x7da   :  { %v4576_v14 = vpop.permute.xlu1 %4575 }
 0x7db   :  { %v4570_v49 = vpop.permute.xlu0 %4569  ;;  %4707 = vst.msk [vmem:[#allocation3 + $0x1e8] sm:$0xff] %vm4645_vm1, %v4576_v14 }
 0x7dc   :  { %4704 = vst.msk [vmem:[#allocation3 + $0x1d0] sm:$0xff] %vm4645_vm1, %v4570_v49  ;;  %5070 = vrot.lane.b32.xlu1 %v10770_v32, %s7270_s3 }
 0x7dd   :  { %5064 = vrot.lane.b32.xlu0 %v10753_v23, %s7270_s3  ;;  %4741 = vst.msk [vmem:[#allocation3 + $0x1ef] sm:$0x1] %vm4710_vm2, %v14492_v44 }
 0x7de   :  { %v4580_v30 = vpop.permute.xlu1 %4579 }
 0x7df   :  { %v4574_v21 = vpop.permute.xlu0 %4573  ;;  %4709 = vst.msk [vmem:[#allocation3 + $0x1f8] sm:$0xff] %vm4645_vm1, %v4580_v30 }
 0x7e0   :  { %4706 = vst.msk [vmem:[#allocation3 + $0x1e0] sm:$0xff] %vm4645_vm1, %v4574_v21  ;;  %5312 = vrot.lane.b32.xlu1 %v10756_v62, %s7271_s21 }
 0x7e1   :  { %5068 = vrot.lane.b32.xlu0 %v10759_v18, %s7270_s3  ;;  %4742 = vst.msk [vmem:[#allocation3 + $0x1ff] sm:$0x1] %vm4710_vm2, %v14492_v44 }
 0x7e2   :  { %v4746_v63 = vpop.permute.xlu1 %4745 }
 0x7e3   :  { %v4578_v37 = vpop.permute.xlu0 %4577  ;;  %4938 = vst.msk [vmem:[#allocation3 + $0x7] sm:$0xff] %vm4937_vm4, %v4746_v63 }
 0x7e4   :  { %4708 = vst.msk [vmem:[#allocation3 + $0x1f0] sm:$0xff] %vm4645_vm1, %v4578_v37  ;;  %5316 = vrot.lane.b32.xlu1 %v10770_v32, %s7271_s21 }
 0x7e5   :  { %5310 = vrot.lane.b32.xlu0 %v10753_v23, %s7271_s21 }
 0x7e6   :  { %v4750_v9 = vpop.permute.xlu1 %4749 }
 0x7e7   :  { %v4744_v48 = vpop.permute.xlu0 %4743  ;;  %4940 = vst.msk [vmem:[#allocation3 + $0x17] sm:$0xff] %vm4937_vm4, %v4750_v9 }
 0x7e8   :  { %4936 = vst.msk [vmem:[#allocation3 - $0x1] sm:$0xfe] %vm4935_vm5, %v4744_v48  ;;  %5590 = vrot.lane.b32.xlu1 %v10756_v62, %s7272_s26 }
 0x7e9   :  { %5008 = vst.msk [vmem:[#allocation3] sm:$0x1] %vm5007_vm6, %v14492_v44  ;;  %5314 = vrot.lane.b32.xlu0 %v10759_v18, %s7271_s21 }
 0x7ea   :  { %v4754_v8 = vpop.permute.xlu1 %4753 }
 0x7eb   :  { %v4748_v2 = vpop.permute.xlu0 %4747  ;;  %4942 = vst.msk [vmem:[#allocation3 + $0x27] sm:$0xff] %vm4937_vm4, %v4754_v8 }
 0x7ec   :  { %4939 = vst.msk [vmem:[#allocation3 + $0xf] sm:$0xfe] %vm4935_vm5, %v4748_v2  ;;  %5594 = vrot.lane.b32.xlu1 %v10770_v32, %s7272_s26 }
 0x7ed   :  { %5009 = vst.msk [vmem:[#allocation3 + $0x10] sm:$0x1] %vm5007_vm6, %v14492_v44  ;;  %5588 = vrot.lane.b32.xlu0 %v10753_v23, %s7272_s26 }
 0x7ee   :  { %v4758_v12 = vpop.permute.xlu1 %4757 }
 0x7ef   :  { %v4752_v42 = vpop.permute.xlu0 %4751  ;;  %4944 = vst.msk [vmem:[#allocation3 + $0x37] sm:$0xff] %vm4937_vm4, %v4758_v12 }
 0x7f0   :  { %4941 = vst.msk [vmem:[#allocation3 + $0x1f] sm:$0xfe] %vm4935_vm5, %v4752_v42  ;;  %4777 = vrot.lane.b32.xlu1 %v10770_v32, %s7269_s2 }
 0x7f1   :  { %5010 = vst.msk [vmem:[#allocation3 + $0x20] sm:$0x1] %vm5007_vm6, %v14492_v44  ;;  %5592 = vrot.lane.b32.xlu0 %v10759_v18, %s7272_s26 }
 0x7f2   :  { %v4762_v23 = vpop.permute.xlu1 %4761 }
 0x7f3   :  { %v4756_v62 = vpop.permute.xlu0 %4755  ;;  %4946 = vst.msk [vmem:[#allocation3 + $0x47] sm:$0xff] %vm4937_vm4, %v4762_v23 }
 0x7f4   :  { %4943 = vst.msk [vmem:[#allocation3 + $0x2f] sm:$0xfe] %vm4935_vm5, %v4756_v62  ;;  %4781 = vrot.lane.b32.xlu1 %v10776_v25, %s7269_s2 }
 0x7f5   :  { %5011 = vst.msk [vmem:[#allocation3 + $0x30] sm:$0x1] %vm5007_vm6, %v14492_v44  ;;  %4775 = vrot.lane.b32.xlu0 %v10759_v18, %s7269_s2 }
 0x7f6   :  { %v4766_v16 = vpop.permute.xlu1 %4765 }
 0x7f7   :  { %v4760_v53 = vpop.permute.xlu0 %4759  ;;  %4948 = vst.msk [vmem:[#allocation3 + $0x57] sm:$0xff] %vm4937_vm4, %v4766_v16 }
 0x7f8   :  { %4945 = vst.msk [vmem:[#allocation3 + $0x3f] sm:$0xfe] %vm4935_vm5, %v4760_v53  ;;  %5074 = vrot.lane.b32.xlu1 %v10776_v25, %s7270_s3 }
 0x7f9   :  { %5012 = vst.msk [vmem:[#allocation3 + $0x40] sm:$0x1] %vm5007_vm6, %v14492_v44  ;;  %4779 = vrot.lane.b32.xlu0 %v10773_v27, %s7269_s2 }
 0x7fa   :  { %v4770_v18 = vpop.permute.xlu1 %4769 }
 0x7fb   :  { %v4764_v32 = vpop.permute.xlu0 %4763  ;;  %4950 = vst.msk [vmem:[#allocation3 + $0x67] sm:$0xff] %vm4937_vm4, %v4770_v18 }
 0x7fc   :  { %4947 = vst.msk [vmem:[#allocation3 + $0x4f] sm:$0xfe] %vm4935_vm5, %v4764_v32  ;;  %5078 = vrot.lane.b32.xlu1 %v10790_v26, %s7270_s3 }
 0x7fd   :  { %5013 = vst.msk [vmem:[#allocation3 + $0x50] sm:$0x1] %vm5007_vm6, %v14492_v44  ;;  %5072 = vrot.lane.b32.xlu0 %v10773_v27, %s7270_s3 }
 0x7fe   :  { %v5041_v51 = vpop.permute.xlu1 %5040 }
 0x7ff   :  { %v4768_v57 = vpop.permute.xlu0 %4767  ;;  %5220 = vst.msk [vmem:[#allocation3 + $0x1] sm:$0xff] %vm5002_vm8, %v5041_v51 }
 0x800   :  { %4949 = vst.msk [vmem:[#allocation3 + $0x5f] sm:$0xfe] %vm4935_vm5, %v4768_v57  ;;  %5320 = vrot.lane.b32.xlu1 %v10776_v25, %s7271_s21 }
 0x801   :  { %5014 = vst.msk [vmem:[#allocation3 + $0x60] sm:$0x1] %vm5007_vm6, %v14492_v44  ;;  %5076 = vrot.lane.b32.xlu0 %v10779_v29, %s7270_s3 }
 0x802   :  { %v5045_v19 = vpop.permute.xlu1 %5044 }
 0x803   :  { %v4772_v5 = vpop.permute.xlu0 %4771  ;;  %5223 = vst.msk [vmem:[#allocation3 + $0x11] sm:$0xff] %vm5002_vm8, %v5045_v19 }
 0x804   :  { %4951 = vst.msk [vmem:[#allocation3 + $0x6f] sm:$0xfe] %vm4935_vm5, %v4772_v5  ;;  %5324 = vrot.lane.b32.xlu1 %v10790_v26, %s7271_s21 }
 0x805   :  { %5015 = vst.msk [vmem:[#allocation3 + $0x70] sm:$0x1] %vm5007_vm6, %v14492_v44  ;;  %5318 = vrot.lane.b32.xlu0 %v10773_v27, %s7271_s21 }
 0x806   :  { %v5287_v14 = vpop.permute.xlu1 %5286 }
 0x807   :  { %v5043_v49 = vpop.permute.xlu0 %5042  ;;  %5466 = vst.msk [vmem:[#allocation3] sm:$0xff] %vm5281_vm10, %v5287_v14 }
 0x808   :  { %5222 = vst.msk [vmem:[#allocation3 + $0x9] sm:$0x7f] %vm5221_vm9, %v5043_v49  ;;  %5598 = vrot.lane.b32.xlu1 %v10776_v25, %s7272_s26 }
 0x809   :  { %5322 = vrot.lane.b32.xlu0 %v10779_v29, %s7271_s21 }
 0x80a   :  { %v5291_v30 = vpop.permute.xlu1 %5290 }
 0x80b   :  { %v5047_v21 = vpop.permute.xlu0 %5046  ;;  %5468 = vst.msk [vmem:[#allocation3 + $0x10] sm:$0xff] %vm5281_vm10, %v5291_v30 }
 0x80c   :  { %5224 = vst.msk [vmem:[#allocation3 + $0x19] sm:$0x7f] %vm5221_vm9, %v5047_v21  ;;  %5602 = vrot.lane.b32.xlu1 %v10790_v26, %s7272_s26 }
 0x80d   :  { %5596 = vrot.lane.b32.xlu0 %v10773_v27, %s7272_s26 }
 0x80e   :  { %v5565_v63 = vpop.permute.xlu1 %5564 }
 0x80f   :  { %v5289_v37 = vpop.permute.xlu0 %5288  ;;  %5745 = vst.msk [vmem:[#allocation3 - $0x1] sm:$0xfe] %vm5744_vm11, %v5565_v63 }
 0x810   :  { %5467 = vst.msk [vmem:[#allocation3 + $0x8] sm:$0xff] %vm5281_vm10, %v5289_v37  ;;  %4785 = vrot.lane.b32.xlu1 %v10790_v26, %s7269_s2 }
 0x811   :  { %5532 = vst.msk [vmem:[#allocation3 + $0xf] sm:$0x1] %vm5531_vm12, %v14492_v44  ;;  %5600 = vrot.lane.b32.xlu0 %v10779_v29, %s7272_s26 }
 0x812   :  { %v5569_v25 = vpop.permute.xlu1 %5568 }
 0x813   :  { %v5293_v27 = vpop.permute.xlu0 %5292  ;;  %5747 = vst.msk [vmem:[#allocation3 + $0xf] sm:$0xfe] %vm5744_vm11, %v5569_v25 }
 0x814   :  { %5469 = vst.msk [vmem:[#allocation3 + $0x18] sm:$0xff] %vm5281_vm10, %v5293_v27  ;;  %4789 = vrot.lane.b32.xlu1 %v10796_v50, %s7269_s2 }
 0x815   :  { %5533 = vst.msk [vmem:[#allocation3 + $0x1f] sm:$0x1] %vm5531_vm12, %v14492_v44  ;;  %4783 = vrot.lane.b32.xlu0 %v10779_v29, %s7269_s2  ;;  %v14495_v29 = vld [vmem:[#allocation22_spill] sm:$0xff] }
 0x816   :  { %v5049_v9 = vpop.permute.xlu1 %5048 }
 0x817   :  { %v5567_v48 = vpop.permute.xlu0 %5566  ;;  %5225 = vst.msk [vmem:[#allocation3 + $0x21] sm:$0xff] %vm5002_vm8, %v5049_v9 }
 0x818   :  { %5746 = vst.msk [vmem:[#allocation3 + $0x7] sm:$0xff] %vm5526_vm13, %v5567_v48  ;;  %5082 = vrot.lane.b32.xlu1 %v10796_v50, %s7270_s3 }
 0x819   :  { %4787 = vrot.lane.b32.xlu0 %v10793_v46, %s7269_s2 }
 0x81a   :  { %v5053_v2 = vpop.permute.xlu1 %5052 }
 0x81b   :  { %v5571_v26 = vpop.permute.xlu0 %5570  ;;  %5227 = vst.msk [vmem:[#allocation3 + $0x31] sm:$0xff] %vm5002_vm8, %v5053_v2 }
 0x81c   :  { %5748 = vst.msk [vmem:[#allocation3 + $0x17] sm:$0xff] %vm5526_vm13, %v5571_v26  ;;  %5086 = vrot.lane.b32.xlu1 %v14495_v29, %s7270_s3 }
 0x81d   :  { %5080 = vrot.lane.b32.xlu0 %v10793_v46, %s7270_s3 }
 0x81e   :  { %v5295_v62 = vpop.permute.xlu1 %5294 }
 0x81f   :  { %v5051_v8 = vpop.permute.xlu0 %5050  ;;  %v5807_v42 = vld [vmem:[#allocation3] sm:$0xff]  ;;  %v5808_v12 = vld [vmem:[#allocation3 + $0x8] sm:$0xff]  ;;  %5470 = vst.msk [vmem:[#allocation3 + $0x20] sm:$0xff] %vm5281_vm10, %v5295_v62 }
 0x820   :  { %5226 = vst.msk [vmem:[#allocation3 + $0x29] sm:$0x7f] %vm5221_vm9, %v5051_v8  ;;  %v5871_v23 = vpack.c.bf16 %v5808_v12, %v5807_v42  ;;  %5328 = vrot.lane.b32.xlu1 %v10796_v50, %s7271_s21 }
 0x821   :  { %5084 = vrot.lane.b32.xlu0 %v14488_v4, %s7270_s3 }
 0x822   :  { %7165 = vmatprep.mubr.msk.bf16.mxu1 %vm5939_vm14, %v5871_v23  ;;  %v5299_v18 = vpop.permute.xlu1 %5298 }
 0x823   :  { %v5055_v53 = vpop.permute.xlu0 %5054  ;;  %v5809_v16 = vld [vmem:[#allocation3 + $0x10] sm:$0xff]  ;;  %v5810_v32 = vld [vmem:[#allocation3 + $0x18] sm:$0xff]  ;;  %5472 = vst.msk [vmem:[#allocation3 + $0x30] sm:$0xff] %vm5281_vm10, %v5299_v18 }
 0x824   :  { %5228 = vst.msk [vmem:[#allocation3 + $0x39] sm:$0x7f] %vm5221_vm9, %v5055_v53  ;;  %v5872_v57 = vpack.c.bf16 %v5810_v32, %v5809_v16  ;;  %5332 = vrot.lane.b32.xlu1 %v14495_v29, %s7271_s21 }
 0x825   :  { %5326 = vrot.lane.b32.xlu0 %v10793_v46, %s7271_s21 }
 0x826   :  { %7166 = vmatmul.mubr.msk.bf16.vlgmr.msra.gmra.mrb[0].mxu1 %vm5939_vm14, %v5872_v57  ;;  %v5573_v5 = vpop.permute.xlu1 %5572 }
 0x827   :  { %v5297_v51 = vpop.permute.xlu0 %5296  ;;  %5749 = vst.msk [vmem:[#allocation3 + $0x1f] sm:$0xfe] %vm5744_vm11, %v5573_v5 }
 0x828   :  { %5471 = vst.msk [vmem:[#allocation3 + $0x28] sm:$0xff] %vm5281_vm10, %v5297_v51  ;;  %5606 = vrot.lane.b32.xlu1 %v10796_v50, %s7272_s26 }
 0x829   :  { %5534 = vst.msk [vmem:[#allocation3 + $0x2f] sm:$0x1] %vm5531_vm12, %v14492_v44  ;;  %5330 = vrot.lane.b32.xlu0 %v14488_v4, %s7271_s21 }
 0x82a   :  { %v5577_v49 = vpop.permute.xlu1 %5576 }
 0x82b   :  { %v5301_v19 = vpop.permute.xlu0 %5300  ;;  %5751 = vst.msk [vmem:[#allocation3 + $0x2f] sm:$0xfe] %vm5744_vm11, %v5577_v49 }
 0x82c   :  { %5473 = vst.msk [vmem:[#allocation3 + $0x38] sm:$0xff] %vm5281_vm10, %v5301_v19  ;;  %5610 = vrot.lane.b32.xlu1 %v14495_v29, %s7272_s26 }
 0x82d   :  { %5535 = vst.msk [vmem:[#allocation3 + $0x3f] sm:$0x1] %vm5531_vm12, %v14492_v44  ;;  %5604 = vrot.lane.b32.xlu0 %v10793_v46, %s7272_s26 }
 0x82e   :  { %v5057_v21 = vpop.permute.xlu1 %5056 }
 0x82f   :  { %v5575_v14 = vpop.permute.xlu0 %5574  ;;  %5229 = vst.msk [vmem:[#allocation3 + $0x41] sm:$0xff] %vm5002_vm8, %v5057_v21 }
 0x830   :  { %5750 = vst.msk [vmem:[#allocation3 + $0x27] sm:$0xff] %vm5526_vm13, %v5575_v14  ;;  %4793 = vrot.lane.b32.xlu1 %v14495_v29, %s7269_s2 }
 0x831   :  { %5608 = vrot.lane.b32.xlu0 %v14488_v4, %s7272_s26 }
 0x832   :  { %v5061_v30 = vpop.permute.xlu1 %5060 }
 0x833   :  { %v5579_v50 = vpop.permute.xlu0 %5578  ;;  %5231 = vst.msk [vmem:[#allocation3 + $0x51] sm:$0xff] %vm5002_vm8, %v5061_v30 }
 0x834   :  { %5752 = vst.msk [vmem:[#allocation3 + $0x37] sm:$0xff] %vm5526_vm13, %v5579_v50  ;;  %4797 = vrot.lane.b32.xlu1 %v14489_v24, %s7269_s2 }
 0x835   :  { %4791 = vrot.lane.b32.xlu0 %v14488_v4, %s7269_s2 }
 0x836   :  { %v5303_v27 = vpop.permute.xlu1 %5302 }
 0x837   :  { %v5059_v46 = vpop.permute.xlu0 %5058  ;;  %v5811_v37 = vld [vmem:[#allocation3 + $0x20] sm:$0xff]  ;;  %v5812_v63 = vld [vmem:[#allocation3 + $0x28] sm:$0xff]  ;;  %5474 = vst.msk [vmem:[#allocation3 + $0x40] sm:$0xff] %vm5281_vm10, %v5303_v27 }
 0x838   :  { %5230 = vst.msk [vmem:[#allocation3 + $0x49] sm:$0x7f] %vm5221_vm9, %v5059_v46  ;;  %v5873_v25 = vpack.c.bf16 %v5812_v63, %v5811_v37  ;;  %5090 = vrot.lane.b32.xlu1 %v14489_v24, %s7270_s3 }
 0x839   :  { %4795 = vrot.lane.b32.xlu0 %v10813_v7, %s7269_s2 }
 0x83a   :  { %7169 = vmatprep.mubr.msk.bf16.mxu1 %vm5939_vm14, %v5873_v25  ;;  %v5307_v26 = vpop.permute.xlu1 %5306 }
 0x83b   :  { %v5063_v4 = vpop.permute.xlu0 %5062  ;;  %v5813_v48 = vld [vmem:[#allocation3 + $0x30] sm:$0xff]  ;;  %v5814_v9 = vld [vmem:[#allocation3 + $0x38] sm:$0xff]  ;;  %5476 = vst.msk [vmem:[#allocation3 + $0x50] sm:$0xff] %vm5281_vm10, %v5307_v26 }
 0x83c   :  { %5232 = vst.msk [vmem:[#allocation3 + $0x59] sm:$0x7f] %vm5221_vm9, %v5063_v4  ;;  %v5874_v2 = vpack.c.bf16 %v5814_v9, %v5813_v48  ;;  %5094 = vrot.lane.b32.xlu1 %v14490_v3, %s7270_s3 }
 0x83d   :  { %5088 = vrot.lane.b32.xlu0 %v10813_v7, %s7270_s3 }
 0x83e   :  { %7170 = vmatmul.mubr.msk.bf16.gmra.mrb[4].mxu1 %vm5939_vm14, %v5874_v2  ;;  %v5581_v8 = vpop.permute.xlu1 %5580 }
 0x83f   :  { %v5305_v29 = vpop.permute.xlu0 %5304  ;;  %5753 = vst.msk [vmem:[#allocation3 + $0x3f] sm:$0xfe] %vm5744_vm11, %v5581_v8 }
 0x840   :  { %5475 = vst.msk [vmem:[#allocation3 + $0x48] sm:$0xff] %vm5281_vm10, %v5305_v29  ;;  %5336 = vrot.lane.b32.xlu1 %v14489_v24, %s7271_s21 }
 0x841   :  { %5536 = vst.msk [vmem:[#allocation3 + $0x4f] sm:$0x1] %vm5531_vm12, %v14492_v44  ;;  %5092 = vrot.lane.b32.xlu0 %v10819_v31, %s7270_s3 }
 0x842   :  { %v5585_v12 = vpop.permute.xlu1 %5584 }
 0x843   :  { %v5309_v42 = vpop.permute.xlu0 %5308  ;;  %5755 = vst.msk [vmem:[#allocation3 + $0x4f] sm:$0xfe] %vm5744_vm11, %v5585_v12 }
 0x844   :  { %5477 = vst.msk [vmem:[#allocation3 + $0x58] sm:$0xff] %vm5281_vm10, %v5309_v42  ;;  %5340 = vrot.lane.b32.xlu1 %v14490_v3, %s7271_s21 }
 0x845   :  { %5537 = vst.msk [vmem:[#allocation3 + $0x5f] sm:$0x1] %vm5531_vm12, %v14492_v44  ;;  %5334 = vrot.lane.b32.xlu0 %v10813_v7, %s7271_s21 }
 0x846   :  { %v4774_v23 = vpop.permute.xlu1 %4773 }
 0x847   :  { %v5583_v62 = vpop.permute.xlu0 %5582  ;;  %4952 = vst.msk [vmem:[#allocation3 + $0x77] sm:$0xff] %vm4937_vm4, %v4774_v23 }
 0x848   :  { %5754 = vst.msk [vmem:[#allocation3 + $0x47] sm:$0xff] %vm5526_vm13, %v5583_v62  ;;  %5614 = vrot.lane.b32.xlu1 %v14489_v24, %s7272_s26 }
 0x849   :  { %5338 = vrot.lane.b32.xlu0 %v10819_v31, %s7271_s21 }
 0x84a   :  { %v5067_v16 = vpop.permute.xlu1 %5066 }
 0x84b   :  { %v5587_v53 = vpop.permute.xlu0 %5586  ;;  %5234 = vst.msk [vmem:[#allocation3 + $0x69] sm:$0x7f] %vm5221_vm9, %v5067_v16 }
 0x84c   :  { %5756 = vst.msk [vmem:[#allocation3 + $0x57] sm:$0xff] %vm5526_vm13, %v5587_v53  ;;  %5618 = vrot.lane.b32.xlu1 %v14490_v3, %s7272_s26 }
 0x84d   :  { %5612 = vrot.lane.b32.xlu0 %v10813_v7, %s7272_s26 }
 0x84e   :  { %v5071_v51 = vpop.permute.xlu1 %5070 }
 0x84f   :  { %v5065_v32 = vpop.permute.xlu0 %5064  ;;  %v5815_v18 = vld [vmem:[#allocation3 + $0x40] sm:$0xff]  ;;  %v5816_v57 = vld [vmem:[#allocation3 + $0x48] sm:$0xff]  ;;  %5236 = vst.msk [vmem:[#allocation3 + $0x79] sm:$0x7f] %vm5221_vm9, %v5071_v51 }
 0x850   :  { %5233 = vst.msk [vmem:[#allocation3 + $0x61] sm:$0xff] %vm5002_vm8, %v5065_v32  ;;  %v5875_v5 = vpack.c.bf16 %v5816_v57, %v5815_v18  ;;  %4801 = vrot.lane.b32.xlu1 %v14490_v3, %s7269_s2 }
 0x851   :  { %5616 = vrot.lane.b32.xlu0 %v10819_v31, %s7272_s26 }
 0x852   :  { %7173 = vmatprep.mubr.msk.bf16.mxu1 %vm5939_vm14, %v5875_v5  ;;  %v5313_v49 = vpop.permute.xlu1 %5312 }
 0x853   :  { %v5069_v7 = vpop.permute.xlu0 %5068  ;;  %v5817_v24 = vld [vmem:[#allocation3 + $0x50] sm:$0xff]  ;;  %v5818_v19 = vld [vmem:[#allocation3 + $0x58] sm:$0xff]  ;;  %5479 = vst.msk [vmem:[#allocation3 + $0x68] sm:$0xff] %vm5281_vm10, %v5313_v49 }
 0x854   :  { %5235 = vst.msk [vmem:[#allocation3 + $0x71] sm:$0xff] %vm5002_vm8, %v5069_v7  ;;  %v5876_v14 = vpack.c.bf16 %v5818_v19, %v5817_v24  ;;  %4805 = vrot.lane.b32.xlu1 %v11557_v36, %s7269_s2 }
 0x855   :  { %4799 = vrot.lane.b32.xlu0 %v10819_v31, %s7269_s2  ;;  %5538 = vst.msk [vmem:[#allocation3 + $0x6f] sm:$0x1] %vm5531_vm12, %v14492_v44 }
 0x856   :  { %7174 = vmatmul.mubr.msk.bf16.gmra.mrb[8].mxu1 %vm5939_vm14, %v5876_v14  ;;  %v5317_v21 = vpop.permute.xlu1 %5316 }
 0x857   :  { %v5311_v3 = vpop.permute.xlu0 %5310  ;;  %5481 = vst.msk [vmem:[#allocation3 + $0x78] sm:$0xff] %vm5281_vm10, %v5317_v21 }
 0x858   :  { %5478 = vst.msk [vmem:[#allocation3 + $0x60] sm:$0xff] %vm5281_vm10, %v5311_v3  ;;  %5098 = vrot.lane.b32.xlu1 %v11557_v36, %s7270_s3 }
 0x859   :  { %4803 = vrot.lane.b32.xlu0 %v11568_v45, %s7269_s2  ;;  %5539 = vst.msk [vmem:[#allocation3 + $0x7f] sm:$0x1] %vm5531_vm12, %v14492_v44 }
 0x85a   :  { %v5591_v50 = vpop.permute.xlu1 %5590 }
 0x85b   :  { %v5315_v31 = vpop.permute.xlu0 %5314  ;;  %5758 = vst.msk [vmem:[#allocation3 + $0x67] sm:$0xff] %vm5526_vm13, %v5591_v50 }
 0x85c   :  { %5480 = vst.msk [vmem:[#allocation3 + $0x70] sm:$0xff] %vm5281_vm10, %v5315_v31  ;;  %5344 = vrot.lane.b32.xlu1 %v11557_v36, %s7271_s21 }
 0x85d   :  { %5096 = vrot.lane.b32.xlu0 %v11568_v45, %s7270_s3 }
 0x85e   :  { %v5595_v46 = vpop.permute.xlu1 %5594 }
 0x85f   :  { %v5589_v30 = vpop.permute.xlu0 %5588  ;;  %5760 = vst.msk [vmem:[#allocation3 + $0x77] sm:$0xff] %vm5526_vm13, %v5595_v46 }
 0x860   :  { %5757 = vst.msk [vmem:[#allocation3 + $0x5f] sm:$0xfe] %vm5744_vm11, %v5589_v30  ;;  %5622 = vrot.lane.b32.xlu1 %v11557_v36, %s7272_s26 }
 0x861   :  { %5342 = vrot.lane.b32.xlu0 %v11568_v45, %s7271_s21 }
 0x862   :  { %v4778_v63 = vpop.permute.xlu1 %4777  ;;  %v5820_v27 = vld [vmem:[#allocation3 + $0x68] sm:$0xff] }
 0x863   :  { %v5593_v37 = vpop.permute.xlu0 %5592  ;;  %4954 = vst.msk [vmem:[#allocation3 + $0x87] sm:$0xff] %vm4937_vm4, %v4778_v63 }
 0x864   :  { %5759 = vst.msk [vmem:[#allocation3 + $0x6f] sm:$0xfe] %vm5744_vm11, %v5593_v37  ;;  %4809 = vrot.lane.b32.xlu1 %v10848_v43, %s7269_s2 }
 0x865   :  { %5620 = vrot.lane.b32.xlu0 %v11568_v45, %s7272_s26 }
 0x866   :  { %v4782_v48 = vpop.permute.xlu1 %4781  ;;  %v5822_v36 = vld [vmem:[#allocation3 + $0x78] sm:$0xff] }
 0x867   :  { %v4776_v25 = vpop.permute.xlu0 %4775  ;;  %v5819_v4 = vld [vmem:[#allocation3 + $0x60] sm:$0xff]  ;;  %4956 = vst.msk [vmem:[#allocation3 + $0x97] sm:$0xff] %vm4937_vm4, %v4782_v48 }
 0x868   :  { %4953 = vst.msk [vmem:[#allocation3 + $0x7f] sm:$0xfe] %vm4935_vm5, %v4776_v25  ;;  %v5877_v9 = vpack.c.bf16 %v5820_v27, %v5819_v4  ;;  %4813 = vrot.lane.b32.xlu1 %v10854_v40, %s7269_s2 }
 0x869   :  { %5016 = vst.msk [vmem:[#allocation3 + $0x80] sm:$0x1] %vm5007_vm6, %v14492_v44  ;;  %4807 = vrot.lane.b32.xlu0 %v10837_v35, %s7269_s2 }
 0x86a   :  { %7177 = vmatprep.mubr.msk.bf16.mxu1 %vm5939_vm14, %v5877_v9  ;;  %v5075_v26 = vpop.permute.xlu1 %5074 }
 0x86b   :  { %v4780_v43 = vpop.permute.xlu0 %4779  ;;  %v5821_v45 = vld [vmem:[#allocation3 + $0x70] sm:$0xff]  ;;  %5238 = vst.msk [vmem:[#allocation3 + $0x89] sm:$0x7f] %vm5221_vm9, %v5075_v26 }
 0x86c   :  { %4955 = vst.msk [vmem:[#allocation3 + $0x8f] sm:$0xfe] %vm4935_vm5, %v4780_v43  ;;  %v5878_v2 = vpack.c.bf16 %v5822_v36, %v5821_v45  ;;  %5102 = vrot.lane.b32.xlu1 %v10854_v40, %s7270_s3 }
 0x86d   :  { %5017 = vst.msk [vmem:[#allocation3 + $0x90] sm:$0x1] %vm5007_vm6, %v14492_v44  ;;  %4811 = vrot.lane.b32.xlu0 %v10851_v33, %s7269_s2 }
 0x86e   :  { %7178 = vmatmul.mubr.msk.bf16.gmra.mrb[12].mxu1 %vm5939_vm14, %v5878_v2  ;;  %v5079_v29 = vpop.permute.xlu1 %5078 }
 0x86f   :  { %v5073_v35 = vpop.permute.xlu0 %5072  ;;  %5240 = vst.msk [vmem:[#allocation3 + $0x99] sm:$0x7f] %vm5221_vm9, %v5079_v29 }
 0x870   :  { %5237 = vst.msk [vmem:[#allocation3 + $0x81] sm:$0xff] %vm5002_vm8, %v5073_v35  ;;  %5106 = vrot.lane.b32.xlu1 %v10868_v10, %s7270_s3 }
 0x871   :  { %5100 = vrot.lane.b32.xlu0 %v10851_v33, %s7270_s3 }
 0x872   :  { %v5321_v42 = vpop.permute.xlu1 %5320 }
 0x873   :  { %v5077_v8 = vpop.permute.xlu0 %5076  ;;  %5483 = vst.msk [vmem:[#allocation3 + $0x88] sm:$0xff] %vm5281_vm10, %v5321_v42 }
 0x874   :  { %5239 = vst.msk [vmem:[#allocation3 + $0x91] sm:$0xff] %vm5002_vm8, %v5077_v8  ;;  %5348 = vrot.lane.b32.xlu1 %v10854_v40, %s7271_s21 }
 0x875   :  { %5104 = vrot.lane.b32.xlu0 %v10857_v59, %s7270_s3  ;;  %5540 = vst.msk [vmem:[#allocation3 + $0x8f] sm:$0x1] %vm5531_vm12, %v14492_v44 }
 0x876   :  { %v5325_v62 = vpop.permute.xlu1 %5324 }
 0x877   :  { %v5319_v12 = vpop.permute.xlu0 %5318  ;;  %5485 = vst.msk [vmem:[#allocation3 + $0x98] sm:$0xff] %vm5281_vm10, %v5325_v62 }
 0x878   :  { %5482 = vst.msk [vmem:[#allocation3 + $0x80] sm:$0xff] %vm5281_vm10, %v5319_v12  ;;  %5352 = vrot.lane.b32.xlu1 %v10868_v10, %s7271_s21 }
 0x879   :  { %5346 = vrot.lane.b32.xlu0 %v10851_v33, %s7271_s21  ;;  %5541 = vst.msk [vmem:[#allocation3 + $0x9f] sm:$0x1] %vm5531_vm12, %v14492_v44 }
 0x87a   :  { %v5599_v53 = vpop.permute.xlu1 %5598 }
 0x87b   :  { %v5323_v23 = vpop.permute.xlu0 %5322  ;;  %5762 = vst.msk [vmem:[#allocation3 + $0x87] sm:$0xff] %vm5526_vm13, %v5599_v53 }
 0x87c   :  { %5484 = vst.msk [vmem:[#allocation3 + $0x90] sm:$0xff] %vm5281_vm10, %v5323_v23  ;;  %5626 = vrot.lane.b32.xlu1 %v10854_v40, %s7272_s26 }
 0x87d   :  { %5350 = vrot.lane.b32.xlu0 %v10857_v59, %s7271_s21 }
 0x87e   :  { %v5603_v32 = vpop.permute.xlu1 %5602 }
 0x87f   :  { %v5597_v16 = vpop.permute.xlu0 %5596  ;;  %5764 = vst.msk [vmem:[#allocation3 + $0x97] sm:$0xff] %vm5526_vm13, %v5603_v32 }
 0x880   :  { %5761 = vst.msk [vmem:[#allocation3 + $0x7f] sm:$0xfe] %vm5744_vm11, %v5597_v16  ;;  %5630 = vrot.lane.b32.xlu1 %v10868_v10, %s7272_s26 }
 0x881   :  { %5624 = vrot.lane.b32.xlu0 %v10851_v33, %s7272_s26 }
 0x882   :  { %v4786_v57 = vpop.permute.xlu1 %4785  ;;  %v5824_v40 = vld [vmem:[#allocation3 + $0x88] sm:$0xff] }
 0x883   :  { %v5601_v18 = vpop.permute.xlu0 %5600  ;;  %4958 = vst.msk [vmem:[#allocation3 + $0xa7] sm:$0xff] %vm4937_vm4, %v4786_v57 }
 0x884   :  { %5763 = vst.msk [vmem:[#allocation3 + $0x8f] sm:$0xfe] %vm5744_vm11, %v5601_v18  ;;  %4817 = vrot.lane.b32.xlu1 %v10868_v10, %s7269_s2 }
 0x885   :  { %5628 = vrot.lane.b32.xlu0 %v10857_v59, %s7272_s26 }
 0x886   :  { %v4790_v7 = vpop.permute.xlu1 %4789  ;;  %v5826_v24 = vld [vmem:[#allocation3 + $0x98] sm:$0xff] }
 0x887   :  { %v4784_v51 = vpop.permute.xlu0 %4783  ;;  %v5823_v5 = vld [vmem:[#allocation3 + $0x80] sm:$0xff]  ;;  %4960 = vst.msk [vmem:[#allocation3 + $0xb7] sm:$0xff] %vm4937_vm4, %v4790_v7 }
 0x888   :  { %4957 = vst.msk [vmem:[#allocation3 + $0x9f] sm:$0xfe] %vm4935_vm5, %v4784_v51  ;;  %v5879_v33 = vpack.c.bf16 %v5824_v40, %v5823_v5  ;;  %4821 = vrot.lane.b32.xlu1 %v10874_v6, %s7269_s2 }
 0x889   :  { %5018 = vst.msk [vmem:[#allocation3 + $0xa0] sm:$0x1] %vm5007_vm6, %v14492_v44  ;;  %4815 = vrot.lane.b32.xlu0 %v10857_v59, %s7269_s2 }
 0x88a   :  { %7181 = vmatprep.mubr.msk.bf16.mxu1 %vm5939_vm14, %v5879_v33  ;;  %v5083_v49 = vpop.permute.xlu1 %5082 }
 0x88b   :  { %v4788_v10 = vpop.permute.xlu0 %4787  ;;  %v5825_v19 = vld [vmem:[#allocation3 + $0x90] sm:$0xff]  ;;  %5242 = vst.msk [vmem:[#allocation3 + $0xa9] sm:$0x7f] %vm5221_vm9, %v5083_v49 }
 0x88c   :  { %4959 = vst.msk [vmem:[#allocation3 + $0xaf] sm:$0xfe] %vm4935_vm5, %v4788_v10  ;;  %v5880_v14 = vpack.c.bf16 %v5826_v24, %v5825_v19  ;;  %5110 = vrot.lane.b32.xlu1 %v10874_v6, %s7270_s3 }
 0x88d   :  { %5019 = vst.msk [vmem:[#allocation3 + $0xb0] sm:$0x1] %vm5007_vm6, %v14492_v44  ;;  %4819 = vrot.lane.b32.xlu0 %v10871_v60, %s7269_s2 }
 0x88e   :  { %7182 = vmatmul.mubr.msk.bf16.gmra.mrb[16].mxu1 %vm5939_vm14, %v5880_v14  ;;  %v5087_v3 = vpop.permute.xlu1 %5086 }
 0x88f   :  { %v5081_v59 = vpop.permute.xlu0 %5080  ;;  %5244 = vst.msk [vmem:[#allocation3 + $0xb9] sm:$0x7f] %vm5221_vm9, %v5087_v3 }
 0x890   :  { %5241 = vst.msk [vmem:[#allocation3 + $0xa1] sm:$0xff] %vm5002_vm8, %v5081_v59  ;;  %5114 = vrot.lane.b32.xlu1 %v10884_v39, %s7270_s3 }
 0x891   :  { %5108 = vrot.lane.b32.xlu0 %v10871_v60, %s7270_s3 }
 0x892   :  { %v5329_v31 = vpop.permute.xlu1 %5328 }
 0x893   :  { %v5085_v21 = vpop.permute.xlu0 %5084  ;;  %5487 = vst.msk [vmem:[#allocation3 + $0xa8] sm:$0xff] %vm5281_vm10, %v5329_v31 }
 0x894   :  { %5243 = vst.msk [vmem:[#allocation3 + $0xb1] sm:$0xff] %vm5002_vm8, %v5085_v21  ;;  %5356 = vrot.lane.b32.xlu1 %v10874_v6, %s7271_s21 }
 0x895   :  { %5112 = vrot.lane.b32.xlu0 %v10877_v28, %s7270_s3  ;;  %5542 = vst.msk [vmem:[#allocation3 + $0xaf] sm:$0x1] %vm5531_vm12, %v14492_v44 }
 0x896   :  { %v5333_v30 = vpop.permute.xlu1 %5332 }
 0x897   :  { %v5327_v50 = vpop.permute.xlu0 %5326  ;;  %5489 = vst.msk [vmem:[#allocation3 + $0xb8] sm:$0xff] %vm5281_vm10, %v5333_v30 }
 0x898   :  { %5486 = vst.msk [vmem:[#allocation3 + $0xa0] sm:$0xff] %vm5281_vm10, %v5327_v50  ;;  %5360 = vrot.lane.b32.xlu1 %v10884_v39, %s7271_s21 }
 0x899   :  { %5354 = vrot.lane.b32.xlu0 %v10871_v60, %s7271_s21  ;;  %5543 = vst.msk [vmem:[#allocation3 + $0xbf] sm:$0x1] %vm5531_vm12, %v14492_v44 }
 0x89a   :  { %v5607_v37 = vpop.permute.xlu1 %5606 }
 0x89b   :  { %v5331_v46 = vpop.permute.xlu0 %5330  ;;  %5766 = vst.msk [vmem:[#allocation3 + $0xa7] sm:$0xff] %vm5526_vm13, %v5607_v37 }
 0x89c   :  { %5488 = vst.msk [vmem:[#allocation3 + $0xb0] sm:$0xff] %vm5281_vm10, %v5331_v46  ;;  %5634 = vrot.lane.b32.xlu1 %v10874_v6, %s7272_s26 }
 0x89d   :  { %5358 = vrot.lane.b32.xlu0 %v10877_v28, %s7271_s21 }
 0x89e   :  { %v5611_v27 = vpop.permute.xlu1 %5610 }
 0x89f   :  { %v5605_v63 = vpop.permute.xlu0 %5604  ;;  %5768 = vst.msk [vmem:[#allocation3 + $0xb7] sm:$0xff] %vm5526_vm13, %v5611_v27 }
 0x8a0   :  { %5765 = vst.msk [vmem:[#allocation3 + $0x9f] sm:$0xfe] %vm5744_vm11, %v5605_v63  ;;  %5638 = vrot.lane.b32.xlu1 %v10884_v39, %s7272_s26 }
 0x8a1   :  { %5632 = vrot.lane.b32.xlu0 %v10871_v60, %s7272_s26 }
 0x8a2   :  { %v4794_v4 = vpop.permute.xlu1 %4793  ;;  %v5828_v6 = vld [vmem:[#allocation3 + $0xa8] sm:$0xff] }
 0x8a3   :  { %v5609_v25 = vpop.permute.xlu0 %5608  ;;  %4962 = vst.msk [vmem:[#allocation3 + $0xc7] sm:$0xff] %vm4937_vm4, %v4794_v4 }
 0x8a4   :  { %5767 = vst.msk [vmem:[#allocation3 + $0xaf] sm:$0xfe] %vm5744_vm11, %v5609_v25  ;;  %4825 = vrot.lane.b32.xlu1 %v10884_v39, %s7269_s2 }
 0x8a5   :  { %5636 = vrot.lane.b32.xlu0 %v10877_v28, %s7272_s26 }
 0x8a6   :  { %v4798_v36 = vpop.permute.xlu1 %4797  ;;  %v5830_v43 = vld [vmem:[#allocation3 + $0xb8] sm:$0xff] }
 0x8a7   :  { %v4792_v48 = vpop.permute.xlu0 %4791  ;;  %v5827_v9 = vld [vmem:[#allocation3 + $0xa0] sm:$0xff]  ;;  %4964 = vst.msk [vmem:[#allocation3 + $0xd7] sm:$0xff] %vm4937_vm4, %v4798_v36 }
 0x8a8   :  { %4961 = vst.msk [vmem:[#allocation3 + $0xbf] sm:$0xfe] %vm4935_vm5, %v4792_v48  ;;  %v5881_v60 = vpack.c.bf16 %v5828_v6, %v5827_v9  ;;  %4829 = vrot.lane.b32.xlu1 %v10890_v17, %s7269_s2 }
 0x8a9   :  { %5020 = vst.msk [vmem:[#allocation3 + $0xc0] sm:$0x1] %vm5007_vm6, %v14492_v44  ;;  %4823 = vrot.lane.b32.xlu0 %v10877_v28, %s7269_s2 }
 0x8aa   :  { %7185 = vmatprep.mubr.msk.bf16.mxu1 %vm5939_vm14, %v5881_v60  ;;  %v5091_v26 = vpop.permute.xlu1 %5090 }
 0x8ab   :  { %v4796_v39 = vpop.permute.xlu0 %4795  ;;  %v5829_v45 = vld [vmem:[#allocation3 + $0xb0] sm:$0xff]  ;;  %5246 = vst.msk [vmem:[#allocation3 + $0xc9] sm:$0x7f] %vm5221_vm9, %v5091_v26 }
 0x8ac   :  { %4963 = vst.msk [vmem:[#allocation3 + $0xcf] sm:$0xfe] %vm4935_vm5, %v4796_v39  ;;  %v5882_v2 = vpack.c.bf16 %v5830_v43, %v5829_v45  ;;  %5118 = vrot.lane.b32.xlu1 %v10890_v17, %s7270_s3 }
 0x8ad   :  { %5021 = vst.msk [vmem:[#allocation3 + $0xd0] sm:$0x1] %vm5007_vm6, %v14492_v44  ;;  %4827 = vrot.lane.b32.xlu0 %v10887_v0, %s7269_s2 }
 0x8ae   :  { %7186 = vmatmul.mubr.msk.bf16.gmra.mrb[20].mxu1 %vm5939_vm14, %v5882_v2  ;;  %v5095_v35 = vpop.permute.xlu1 %5094 }
 0x8af   :  { %v5089_v28 = vpop.permute.xlu0 %5088  ;;  %5248 = vst.msk [vmem:[#allocation3 + $0xd9] sm:$0x7f] %vm5221_vm9, %v5095_v35 }
 0x8b0   :  { %5245 = vst.msk [vmem:[#allocation3 + $0xc1] sm:$0xff] %vm5002_vm8, %v5089_v28  ;;  %5122 = vrot.lane.b32.xlu1 %v10908_v13, %s7270_s3 }
 0x8b1   :  { %5116 = vrot.lane.b32.xlu0 %v10887_v0, %s7270_s3 }
 0x8b2   :  { %v5337_v8 = vpop.permute.xlu1 %5336 }
 0x8b3   :  { %v5093_v29 = vpop.permute.xlu0 %5092  ;;  %5491 = vst.msk [vmem:[#allocation3 + $0xc8] sm:$0xff] %vm5281_vm10, %v5337_v8 }
 0x8b4   :  { %5247 = vst.msk [vmem:[#allocation3 + $0xd1] sm:$0xff] %vm5002_vm8, %v5093_v29  ;;  %5364 = vrot.lane.b32.xlu1 %v10890_v17, %s7271_s21 }
 0x8b5   :  { %5120 = vrot.lane.b32.xlu0 %v10893_v58, %s7270_s3  ;;  %5544 = vst.msk [vmem:[#allocation3 + $0xcf] sm:$0x1] %vm5531_vm12, %v14492_v44 }
 0x8b6   :  { %v5341_v12 = vpop.permute.xlu1 %5340 }
 0x8b7   :  { %v5335_v42 = vpop.permute.xlu0 %5334  ;;  %5493 = vst.msk [vmem:[#allocation3 + $0xd8] sm:$0xff] %vm5281_vm10, %v5341_v12 }
 0x8b8   :  { %5490 = vst.msk [vmem:[#allocation3 + $0xc0] sm:$0xff] %vm5281_vm10, %v5335_v42  ;;  %5368 = vrot.lane.b32.xlu1 %v10908_v13, %s7271_s21 }
 0x8b9   :  { %5362 = vrot.lane.b32.xlu0 %v10887_v0, %s7271_s21  ;;  %5545 = vst.msk [vmem:[#allocation3 + $0xdf] sm:$0x1] %vm5531_vm12, %v14492_v44 }
 0x8ba   :  { %v5615_v23 = vpop.permute.xlu1 %5614 }
 0x8bb   :  { %v5339_v62 = vpop.permute.xlu0 %5338  ;;  %5770 = vst.msk [vmem:[#allocation3 + $0xc7] sm:$0xff] %vm5526_vm13, %v5615_v23 }
 0x8bc   :  { %5492 = vst.msk [vmem:[#allocation3 + $0xd0] sm:$0xff] %vm5281_vm10, %v5339_v62  ;;  %5642 = vrot.lane.b32.xlu1 %v10890_v17, %s7272_s26 }
 0x8bd   :  { %5366 = vrot.lane.b32.xlu0 %v10893_v58, %s7271_s21 }
 0x8be   :  { %v5619_v16 = vpop.permute.xlu1 %5618 }
 0x8bf   :  { %v5613_v53 = vpop.permute.xlu0 %5612  ;;  %5772 = vst.msk [vmem:[#allocation3 + $0xd7] sm:$0xff] %vm5526_vm13, %v5619_v16 }
 0x8c0   :  { %5769 = vst.msk [vmem:[#allocation3 + $0xbf] sm:$0xfe] %vm5744_vm11, %v5613_v53  ;;  %5646 = vrot.lane.b32.xlu1 %v10908_v13, %s7272_s26 }
 0x8c1   :  { %5640 = vrot.lane.b32.xlu0 %v10887_v0, %s7272_s26 }
 0x8c2   :  { %v4802_v18 = vpop.permute.xlu1 %4801  ;;  %v5832_v17 = vld [vmem:[#allocation3 + $0xc8] sm:$0xff] }
 0x8c3   :  { %v5617_v32 = vpop.permute.xlu0 %5616  ;;  %4966 = vst.msk [vmem:[#allocation3 + $0xe7] sm:$0xff] %vm4937_vm4, %v4802_v18 }
 0x8c4   :  { %5771 = vst.msk [vmem:[#allocation3 + $0xcf] sm:$0xfe] %vm5744_vm11, %v5617_v32  ;;  %4833 = vrot.lane.b32.xlu1 %v10908_v13, %s7269_s2 }
 0x8c5   :  { %5644 = vrot.lane.b32.xlu0 %v10893_v58, %s7272_s26 }
 0x8c6   :  { %v4806_v51 = vpop.permute.xlu1 %4805  ;;  %v5834_v13 = vld [vmem:[#allocation3 + $0xd8] sm:$0xff] }
 0x8c7   :  { %v4800_v57 = vpop.permute.xlu0 %4799  ;;  %v5831_v40 = vld [vmem:[#allocation3 + $0xc0] sm:$0xff]  ;;  %4968 = vst.msk [vmem:[#allocation3 + $0xf7] sm:$0xff] %vm4937_vm4, %v4806_v51 }
 0x8c8   :  { %4965 = vst.msk [vmem:[#allocation3 + $0xdf] sm:$0xfe] %vm4935_vm5, %v4800_v57  ;;  %v5883_v0 = vpack.c.bf16 %v5832_v17, %v5831_v40  ;;  %4837 = vrot.lane.b32.xlu1 %v10914_v55, %s7269_s2 }
 0x8c9   :  { %5022 = vst.msk [vmem:[#allocation3 + $0xe0] sm:$0x1] %vm5007_vm6, %v14492_v44  ;;  %4831 = vrot.lane.b32.xlu0 %v10893_v58, %s7269_s2 }
 0x8ca   :  { %5004 = vst.msk [vmem:[#allocation3 + $0xf8] sm:$0xff] %vm5002_vm8, %v14492_v44  ;;  %7189 = vmatprep.mubr.msk.bf16.mxu1 %vm5939_vm14, %v5883_v0  ;;  %v5099_v33 = vpop.permute.xlu1 %5098 }
 0x8cb   :  { %5283 = vst.msk [vmem:[#allocation3 + $0xf8] sm:$0xff] %vm5281_vm10, %v14492_v44  ;;  %v4804_v5 = vpop.permute.xlu0 %4803  ;;  %v5833_v7 = vld [vmem:[#allocation3 + $0xd0] sm:$0xff] }
 0x8cc   :  { %5528 = vst.msk [vmem:[#allocation3 + $0xf8] sm:$0xff] %vm5526_vm13, %v14492_v44  ;;  %v5884_v58 = vpack.c.bf16 %v5834_v13, %v5833_v7  ;;  %5126 = vrot.lane.b32.xlu1 %v10914_v55, %s7270_s3 }
 0x8cd   :  { %5547 = vst.msk [vmem:[#allocation3 + $0xff] sm:$0x1] %vm5531_vm12, %v14492_v44  ;;  %4835 = vrot.lane.b32.xlu0 %v10911_v47, %s7269_s2 }
 0x8ce   :  { %4967 = vst.msk [vmem:[#allocation3 + $0xef] sm:$0xfe] %vm4935_vm5, %v4804_v5  ;;  %7190 = vmatmul.mubr.msk.bf16.gmra.mrb[24].mxu1 %vm5939_vm14, %v5884_v58  ;;  %v5345_v10 = vpop.permute.xlu1 %5344 }
 0x8cf   :  { %5250 = vst.msk [vmem:[#allocation3 + $0xe9] sm:$0x7f] %vm5221_vm9, %v5099_v33  ;;  %v5097_v24 = vpop.permute.xlu0 %5096 }
 0x8d0   :  { %5003 = vst.msk [vmem:[#allocation3 + $0xf0] sm:$0xff] %vm5002_vm8, %v14492_v44  ;;  %5249 = vst.msk [vmem:[#allocation3 + $0xe1] sm:$0xff] %vm5002_vm8, %v5097_v24  ;;  %5130 = vrot.lane.b32.xlu1 %v10928_v52, %s7270_s3 }
 0x8d1   :  { %5023 = vst.msk [vmem:[#allocation3 + $0xf0] sm:$0x1] %vm5007_vm6, %v14492_v44  ;;  %5124 = vrot.lane.b32.xlu0 %v10911_v47, %s7270_s3 }
 0x8d2   :  { %5282 = vst.msk [vmem:[#allocation3 + $0xf0] sm:$0xff] %vm5281_vm10, %v14492_v44  ;;  %5495 = vst.msk [vmem:[#allocation3 + $0xe8] sm:$0xff] %vm5281_vm10, %v5345_v10  ;;  %v5623_v49 = vpop.permute.xlu1 %5622 }
 0x8d3   :  { %5527 = vst.msk [vmem:[#allocation3 + $0xf0] sm:$0xff] %vm5526_vm13, %v14492_v44  ;;  %v5343_v19 = vpop.permute.xlu0 %5342 }
 0x8d4   :  { %5546 = vst.msk [vmem:[#allocation3 + $0xef] sm:$0x1] %vm5531_vm12, %v14492_v44  ;;  %5372 = vrot.lane.b32.xlu1 %v10914_v55, %s7271_s21  ;;  %v5838_v50 = vld [vmem:[#allocation3 + $0xf8] sm:$0xff] }
 0x8d5   :  { %5494 = vst.msk [vmem:[#allocation3 + $0xe0] sm:$0xff] %vm5281_vm10, %v5343_v19  ;;  %5128 = vrot.lane.b32.xlu0 %v10917_v41, %s7270_s3 }
 0x8d6   :  { %5774 = vst.msk [vmem:[#allocation3 + $0xe7] sm:$0xff] %vm5526_vm13, %v5623_v49  ;;  %v4810_v59 = vpop.permute.xlu1 %4809 }
 0x8d7   :  { %v5621_v14 = vpop.permute.xlu0 %5620  ;;  %4970 = vst.msk [vmem:[#allocation3 + $0x107] sm:$0xff] %vm4937_vm4, %v4810_v59 }
 0x8d8   :  { %5773 = vst.msk [vmem:[#allocation3 + $0xdf] sm:$0xfe] %vm5744_vm11, %v5621_v14  ;;  %5376 = vrot.lane.b32.xlu1 %v10928_v52, %s7271_s21 }
 0x8d9   :  { %5370 = vrot.lane.b32.xlu0 %v10911_v47, %s7271_s21 }
 0x8da   :  { %v4814_v21 = vpop.permute.xlu1 %4813  ;;  %v5837_v31 = vld [vmem:[#allocation3 + $0xf0] sm:$0xff] }
 0x8db   :  { %v4808_v3 = vpop.permute.xlu0 %4807  ;;  %4972 = vst.msk [vmem:[#allocation3 + $0x117] sm:$0xff] %vm4937_vm4, %v4814_v21  ;;  %v5886_v27 = vpack.c.bf16 %v5838_v50, %v5837_v31  ;;  %v14496_v50 = vld [vmem:[#allocation26_spill] sm:$0xff] }
 0x8dc   :  { %4969 = vst.msk [vmem:[#allocation3 + $0xff] sm:$0xfe] %vm4935_vm5, %v4808_v3  ;;  %5650 = vrot.lane.b32.xlu1 %v10914_v55, %s7272_s26 }
 0x8dd   :  { %5024 = vst.msk [vmem:[#allocation3 + $0x100] sm:$0x1] %vm5007_vm6, %v14492_v44  ;;  %5374 = vrot.lane.b32.xlu0 %v10917_v41, %s7271_s21  ;;  %v5836_v30 = vld [vmem:[#allocation3 + $0xe8] sm:$0xff] }
 0x8de   :  { %v5103_v63 = vpop.permute.xlu1 %5102 }
 0x8df   :  { %v4812_v46 = vpop.permute.xlu0 %4811  ;;  %v5835_v37 = vld [vmem:[#allocation3 + $0xe0] sm:$0xff]  ;;  %5252 = vst.msk [vmem:[#allocation3 + $0x109] sm:$0x7f] %vm5221_vm9, %v5103_v63 }
 0x8e0   :  { %4971 = vst.msk [vmem:[#allocation3 + $0x10f] sm:$0xfe] %vm4935_vm5, %v4812_v46  ;;  %v5885_v25 = vpack.c.bf16 %v5836_v30, %v5835_v37  ;;  %5654 = vrot.lane.b32.xlu1 %v10928_v52, %s7272_s26 }
 0x8e1   :  { %5025 = vst.msk [vmem:[#allocation3 + $0x110] sm:$0x1] %vm5007_vm6, %v14492_v44  ;;  %5648 = vrot.lane.b32.xlu0 %v10911_v47, %s7272_s26 }
 0x8e2   :  { %7193 = vmatprep.mubr.msk.bf16.mxu1 %vm5939_vm14, %v5885_v25  ;;  %v5107_v4 = vpop.permute.xlu1 %5106 }
 0x8e3   :  { %v5101_v55 = vpop.permute.xlu0 %5100  ;;  %7194 = vmatmul.mubr.msk.bf16.gmra.mrb[28].mxu1 %vm5939_vm14, %v5886_v27  ;;  %5254 = vst.msk [vmem:[#allocation3 + $0x119] sm:$0x7f] %vm5221_vm9, %v5107_v4  ;;  %v14498_v27 = vld [vmem:[#allocation27_spill] sm:$0xff] }
 0x8e4   :  { %5251 = vst.msk [vmem:[#allocation3 + $0x101] sm:$0xff] %vm5002_vm8, %v5101_v55  ;;  %4841 = vrot.lane.b32.xlu1 %v10928_v52, %s7269_s2 }
 0x8e5   :  { %5652 = vrot.lane.b32.xlu0 %v10917_v41, %s7272_s26 }
 0x8e6   :  { %v5349_v6 = vpop.permute.xlu1 %5348 }
 0x8e7   :  { %v5105_v47 = vpop.permute.xlu0 %5104  ;;  %5497 = vst.msk [vmem:[#allocation3 + $0x108] sm:$0xff] %vm5281_vm10, %v5349_v6 }
 0x8e8   :  { %5253 = vst.msk [vmem:[#allocation3 + $0x111] sm:$0xff] %vm5002_vm8, %v5105_v47  ;;  %4845 = vrot.lane.b32.xlu1 %v10934_v20, %s7269_s2 }
 0x8e9   :  { %4839 = vrot.lane.b32.xlu0 %v10917_v41, %s7269_s2  ;;  %5548 = vst.msk [vmem:[#allocation3 + $0x10f] sm:$0x1] %vm5531_vm12, %v14492_v44 }
 0x8ea   :  { %v5353_v9 = vpop.permute.xlu1 %5352 }
 0x8eb   :  { %v5347_v48 = vpop.permute.xlu0 %5346  ;;  %5499 = vst.msk [vmem:[#allocation3 + $0x118] sm:$0xff] %vm5281_vm10, %v5353_v9 }
 0x8ec   :  { %5496 = vst.msk [vmem:[#allocation3 + $0x100] sm:$0xff] %vm5281_vm10, %v5347_v48  ;;  %5134 = vrot.lane.b32.xlu1 %v10934_v20, %s7270_s3 }
 0x8ed   :  { %4843 = vrot.lane.b32.xlu0 %v10931_v38, %s7269_s2  ;;  %5549 = vst.msk [vmem:[#allocation3 + $0x11f] sm:$0x1] %vm5531_vm12, %v14492_v44 }
 0x8ee   :  { %v5627_v52 = vpop.permute.xlu1 %5626 }
 0x8ef   :  { %v5351_v41 = vpop.permute.xlu0 %5350  ;;  %5776 = vst.msk [vmem:[#allocation3 + $0x107] sm:$0xff] %vm5526_vm13, %v5627_v52 }
 0x8f0   :  { %5498 = vst.msk [vmem:[#allocation3 + $0x110] sm:$0xff] %vm5281_vm10, %v5351_v41  ;;  %5138 = vrot.lane.b32.xlu1 %v10948_v61, %s7270_s3 }
 0x8f1   :  { %5132 = vrot.lane.b32.xlu0 %v10931_v38, %s7270_s3 }
 0x8f2   :  { %v5631_v60 = vpop.permute.xlu1 %5630 }
 0x8f3   :  { %v5625_v36 = vpop.permute.xlu0 %5624  ;;  %5778 = vst.msk [vmem:[#allocation3 + $0x117] sm:$0xff] %vm5526_vm13, %v5631_v60 }
 0x8f4   :  { %5775 = vst.msk [vmem:[#allocation3 + $0xff] sm:$0xfe] %vm5744_vm11, %v5625_v36  ;;  %5380 = vrot.lane.b32.xlu1 %v10934_v20, %s7271_s21 }
 0x8f5   :  { %5136 = vrot.lane.b32.xlu0 %v10937_v11, %s7270_s3 }
 0x8f6   :  { %v4818_v39 = vpop.permute.xlu1 %4817  ;;  %v5840_v26 = vld [vmem:[#allocation3 + $0x108] sm:$0xff] }
 0x8f7   :  { %v5629_v43 = vpop.permute.xlu0 %5628  ;;  %4974 = vst.msk [vmem:[#allocation3 + $0x127] sm:$0xff] %vm4937_vm4, %v4818_v39  ;;  %v14499_v39 = vld [vmem:[#allocation25_spill] sm:$0xff] }
 0x8f8   :  { %5777 = vst.msk [vmem:[#allocation3 + $0x10f] sm:$0xfe] %vm5744_vm11, %v5629_v43  ;;  %5384 = vrot.lane.b32.xlu1 %v10948_v61, %s7271_s21 }
 0x8f9   :  { %5378 = vrot.lane.b32.xlu0 %v10931_v38, %s7271_s21  ;;  %v12663_v45 = vpop.f32.mrb[0].mxu1 }
 0x8fa   :  { %v12667_v2 = vpop.f32.mrb[1].mxu1  ;;  %v4822_v62 = vpop.permute.xlu1 %4821  ;;  %v6465_v23 = vmul.f32 %v12663_v45, %v12663_v45  ;;  %v5842_v18 = vld [vmem:[#allocation3 + $0x118] sm:$0xff]  ;;  %v6332_v57 = vsel %vm2930_vm7, %v12663_v45, 0.0 }
 0x8fb   :  { %v6463_v28 = vmul.f32 %v12667_v2, %v12667_v2  ;;  %v4816_v35 = vpop.permute.xlu0 %4815  ;;  %v12671_v29 = vpop.f32.mrb[2].mxu1  ;;  %v5839_v8 = vld [vmem:[#allocation3 + $0x100] sm:$0xff]  ;;  %v6329_v53 = vsel %vm2930_vm7, %v12667_v2, 0.0  ;;  %4976 = vst.msk [vmem:[#allocation3 + $0x137] sm:$0xff] %vm4937_vm4, %v4822_v62 }
 0x8fc   :  { %4973 = vst.msk [vmem:[#allocation3 + $0x11f] sm:$0xfe] %vm4935_vm5, %v4816_v35  ;;  %v12674_v42 = vpop.f32.mrb[3].mxu1  ;;  %v5887_v12 = vpack.c.bf16 %v5840_v26, %v5839_v8  ;;  %5658 = vrot.lane.b32.xlu1 %v10934_v20, %s7272_s26  ;;  %v6466_v51 = vmul.f32 %v12671_v29, %v12671_v29  ;;  %v6530_v24 = vsel %vm2930_vm7, %v6465_v23, 0.0  ;;  %v6334_v10 = vsel %vm2930_vm7, %v12671_v29, 0.0 }
 0x8fd   :  { %5026 = vst.msk [vmem:[#allocation3 + $0x120] sm:$0x1] %vm5007_vm6, %v14492_v44  ;;  %v6330_v16 = vsel %vm2930_vm7, %v12674_v42, 0.0  ;;  %v6464_v32 = vmul.f32 %v12674_v42, %v12674_v42  ;;  %5382 = vrot.lane.b32.xlu0 %v10937_v11, %s7271_s21  ;;  %v6527_v40 = vsel %vm2930_vm7, %v6463_v28, 0.0 }
 0x8fe   :  { %v6331_v17 = vadd.f32 %v6330_v16, %v6329_v53  ;;  %7197 = vmatprep.mubr.msk.bf16.mxu1 %vm5939_vm14, %v5887_v12  ;;  %v5111_v58 = vpop.permute.xlu1 %5110  ;;  %v6532_v14 = vsel %vm2930_vm7, %v6466_v51, 0.0 }
 0x8ff   :  { %v6528_v0 = vsel %vm2930_vm7, %v6464_v32, 0.0  ;;  %v4820_v13 = vpop.permute.xlu0 %4819  ;;  %v5841_v5 = vld [vmem:[#allocation3 + $0x110] sm:$0xff]  ;;  %5256 = vst.msk [vmem:[#allocation3 + $0x129] sm:$0x7f] %vm5221_vm9, %v5111_v58 }
 0x900   :  { %v6333_v7 = vadd.f32 %v6332_v57, %v6331_v17  ;;  %v6529_v33 = vadd.f32 %v6528_v0, %v6527_v40  ;;  %4975 = vst.msk [vmem:[#allocation3 + $0x12f] sm:$0xfe] %vm4935_vm5, %v4820_v13  ;;  %v5888_v20 = vpack.c.bf16 %v5842_v18, %v5841_v5  ;;  %5662 = vrot.lane.b32.xlu1 %v10948_v61, %s7272_s26 }
 0x901   :  { %5027 = vst.msk [vmem:[#allocation3 + $0x130] sm:$0x1] %vm5007_vm6, %v14492_v44  ;;  %5656 = vrot.lane.b32.xlu0 %v10931_v38, %s7272_s26 }
 0x902   :  { %v6531_v19 = vadd.f32 %v6530_v24, %v6529_v33  ;;  %7198 = vmatmul.mubr.msk.bf16.gmra.mrb[32].mxu1 %vm5939_vm14, %v5888_v20  ;;  %v6335_v49 = vadd.f32 %v6334_v10, %v6333_v7  ;;  %v5115_v3 = vpop.permute.xlu1 %5114 }
 0x903   :  { %v5109_v59 = vpop.permute.xlu0 %5108  ;;  %5258 = vst.msk [vmem:[#allocation3 + $0x139] sm:$0x7f] %vm5221_vm9, %v5115_v3 }
 0x904   :  { %5255 = vst.msk [vmem:[#allocation3 + $0x121] sm:$0xff] %vm5002_vm8, %v5109_v59  ;;  %v6533_v21 = vadd.f32 %v6532_v14, %v6531_v19  ;;  %4849 = vrot.lane.b32.xlu1 %v10948_v61, %s7269_s2  ;;  %v14497_v61 = vld [vmem:[#allocation23_spill] sm:$0xff] }
 0x905   :  { %5660 = vrot.lane.b32.xlu0 %v10937_v11, %s7272_s26 }
 0x906   :  { %v5357_v31 = vpop.permute.xlu1 %5356 }
 0x907   :  { %v5113_v38 = vpop.permute.xlu0 %5112  ;;  %5501 = vst.msk [vmem:[#allocation3 + $0x128] sm:$0xff] %vm5281_vm10, %v5357_v31 }
 0x908   :  { %5257 = vst.msk [vmem:[#allocation3 + $0x131] sm:$0xff] %vm5002_vm8, %v5113_v38  ;;  %4853 = vrot.lane.b32.xlu1 %v14496_v50, %s7269_s2 }
 0x909   :  { %4847 = vrot.lane.b32.xlu0 %v10937_v11, %s7269_s2  ;;  %5550 = vst.msk [vmem:[#allocation3 + $0x12f] sm:$0x1] %vm5531_vm12, %v14492_v44 }
 0x90a   :  { %v5361_v46 = vpop.permute.xlu1 %5360 }
 0x90b   :  { %v5355_v30 = vpop.permute.xlu0 %5354  ;;  %5503 = vst.msk [vmem:[#allocation3 + $0x138] sm:$0xff] %vm5281_vm10, %v5361_v46 }
 0x90c   :  { %5500 = vst.msk [vmem:[#allocation3 + $0x120] sm:$0xff] %vm5281_vm10, %v5355_v30  ;;  %5142 = vrot.lane.b32.xlu1 %v14496_v50, %s7270_s3 }
 0x90d   :  { %4851 = vrot.lane.b32.xlu0 %v14497_v61, %s7269_s2  ;;  %5551 = vst.msk [vmem:[#allocation3 + $0x13f] sm:$0x1] %vm5531_vm12, %v14492_v44 }
 0x90e   :  { %v5635_v37 = vpop.permute.xlu1 %5634 }
 0x90f   :  { %v5359_v11 = vpop.permute.xlu0 %5358  ;;  %5780 = vst.msk [vmem:[#allocation3 + $0x127] sm:$0xff] %vm5526_vm13, %v5635_v37 }
 0x910   :  { %5502 = vst.msk [vmem:[#allocation3 + $0x130] sm:$0xff] %vm5281_vm10, %v5359_v11  ;;  %5146 = vrot.lane.b32.xlu1 %v14498_v27, %s7270_s3 }
 0x911   :  { %5140 = vrot.lane.b32.xlu0 %v14497_v61, %s7270_s3  ;;  %v12736_v63 = vpop.f32.mrb[4].mxu1 }
 0x912   :  { %v12741_v25 = vpop.f32.mrb[5].mxu1  ;;  %v5639_v41 = vpop.permute.xlu1 %5638  ;;  %v6469_v52 = vmul.f32 %v12736_v63, %v12736_v63  ;;  %v6340_v35 = vsel %vm2930_vm7, %v12736_v63, 0.0 }
 0x913   :  { %v6336_v55 = vsel %vm2930_vm7, %v12741_v25, 0.0  ;;  %v6467_v4 = vmul.f32 %v12741_v25, %v12741_v25  ;;  %v5633_v47 = vpop.permute.xlu0 %5632  ;;  %v12747_v6 = vpop.f32.mrb[6].mxu1  ;;  %5782 = vst.msk [vmem:[#allocation3 + $0x137] sm:$0xff] %vm5526_vm13, %v5639_v41 }
 0x914   :  { %v6337_v48 = vadd.f32 %v6336_v55, %v6335_v49  ;;  %5779 = vst.msk [vmem:[#allocation3 + $0x11f] sm:$0xfe] %vm5744_vm11, %v5633_v47  ;;  %v12750_v9 = vpop.f32.mrb[7].mxu1  ;;  %5388 = vrot.lane.b32.xlu1 %v14496_v50, %s7271_s21  ;;  %v6470_v8 = vmul.f32 %v12747_v6, %v12747_v6  ;;  %v6538_v32 = vsel %vm2930_vm7, %v6469_v52, 0.0  ;;  %v6342_v18 = vsel %vm2930_vm7, %v12747_v6, 0.0 }
 0x915   :  { %v6534_v36 = vsel %vm2930_vm7, %v6467_v4, 0.0  ;;  %v6338_v60 = vsel %vm2930_vm7, %v12750_v9, 0.0  ;;  %v6468_v43 = vmul.f32 %v12750_v9, %v12750_v9  ;;  %5144 = vrot.lane.b32.xlu0 %v14499_v39, %s7270_s3 }
 0x916   :  { %v6535_v26 = vadd.f32 %v6534_v36, %v6533_v21  ;;  %v6339_v28 = vadd.f32 %v6338_v60, %v6337_v48  ;;  %v4826_v16 = vpop.permute.xlu1 %4825  ;;  %v5844_v17 = vld [vmem:[#allocation3 + $0x128] sm:$0xff]  ;;  %v6540_v51 = vsel %vm2930_vm7, %v6470_v8, 0.0 }
 0x917   :  { %v6536_v12 = vsel %vm2930_vm7, %v6468_v43, 0.0  ;;  %v5637_v62 = vpop.permute.xlu0 %5636  ;;  %4978 = vst.msk [vmem:[#allocation3 + $0x147] sm:$0xff] %vm4937_vm4, %v4826_v16 }
 0x918   :  { %v6341_v23 = vadd.f32 %v6340_v35, %v6339_v28  ;;  %v6537_v53 = vadd.f32 %v6536_v12, %v6535_v26  ;;  %5781 = vst.msk [vmem:[#allocation3 + $0x12f] sm:$0xfe] %vm5744_vm11, %v5637_v62  ;;  %5392 = vrot.lane.b32.xlu1 %v14498_v27, %s7271_s21 }
 0x919   :  { %5386 = vrot.lane.b32.xlu0 %v14497_v61, %s7271_s21 }
 0x91a   :  { %v6539_v57 = vadd.f32 %v6538_v32, %v6537_v53  ;;  %v6343_v40 = vadd.f32 %v6342_v18, %v6341_v23  ;;  %v4830_v7 = vpop.permute.xlu1 %4829  ;;  %v5846_v20 = vld [vmem:[#allocation3 + $0x138] sm:$0xff] }
 0x91b   :  { %v4824_v0 = vpop.permute.xlu0 %4823  ;;  %v5843_v13 = vld [vmem:[#allocation3 + $0x120] sm:$0xff]  ;;  %4980 = vst.msk [vmem:[#allocation3 + $0x157] sm:$0xff] %vm4937_vm4, %v4830_v7 }
 0x91c   :  { %4977 = vst.msk [vmem:[#allocation3 + $0x13f] sm:$0xfe] %vm4935_vm5, %v4824_v0  ;;  %v5889_v5 = vpack.c.bf16 %v5844_v17, %v5843_v13  ;;  %v6541_v33 = vadd.f32 %v6540_v51, %v6539_v57  ;;  %5666 = vrot.lane.b32.xlu1 %v14496_v50, %s7272_s26 }
 0x91d   :  { %5028 = vst.msk [vmem:[#allocation3 + $0x140] sm:$0x1] %vm5007_vm6, %v14492_v44  ;;  %5390 = vrot.lane.b32.xlu0 %v14499_v39, %s7271_s21 }
 0x91e   :  { %7201 = vmatprep.mubr.msk.bf16.mxu1 %vm5939_vm14, %v5889_v5  ;;  %v5119_v19 = vpop.permute.xlu1 %5118 }
 0x91f   :  { %v4828_v58 = vpop.permute.xlu0 %4827  ;;  %v5845_v24 = vld [vmem:[#allocation3 + $0x130] sm:$0xff]  ;;  %5260 = vst.msk [vmem:[#allocation3 + $0x149] sm:$0x7f] %vm5221_vm9, %v5119_v19 }
 0x920   :  { %4979 = vst.msk [vmem:[#allocation3 + $0x14f] sm:$0xfe] %vm4935_vm5, %v4828_v58  ;;  %v5890_v10 = vpack.c.bf16 %v5846_v20, %v5845_v24  ;;  %5670 = vrot.lane.b32.xlu1 %v14498_v27, %s7272_s26 }
 0x921   :  { %5029 = vst.msk [vmem:[#allocation3 + $0x150] sm:$0x1] %vm5007_vm6, %v14492_v44  ;;  %5664 = vrot.lane.b32.xlu0 %v14497_v61, %s7272_s26 }
 0x922   :  { %7202 = vmatmul.mubr.msk.bf16.gmra.mrb[36].mxu1 %vm5939_vm14, %v5890_v10  ;;  %v5123_v14 = vpop.permute.xlu1 %5122 }
 0x923   :  { %v5117_v49 = vpop.permute.xlu0 %5116  ;;  %5262 = vst.msk [vmem:[#allocation3 + $0x159] sm:$0x7f] %vm5221_vm9, %v5123_v14 }
 0x924   :  { %5259 = vst.msk [vmem:[#allocation3 + $0x141] sm:$0xff] %vm5002_vm8, %v5117_v49  ;;  %4857 = vrot.lane.b32.xlu1 %v14498_v27, %s7269_s2 }
 0x925   :  { %5668 = vrot.lane.b32.xlu0 %v14499_v39, %s7272_s26 }
 0x926   :  { %v5365_v3 = vpop.permute.xlu1 %5364 }
 0x927   :  { %v5121_v59 = vpop.permute.xlu0 %5120  ;;  %5505 = vst.msk [vmem:[#allocation3 + $0x148] sm:$0xff] %vm5281_vm10, %v5365_v3 }
 0x928   :  { %5261 = vst.msk [vmem:[#allocation3 + $0x151] sm:$0xff] %vm5002_vm8, %v5121_v59  ;;  %4861 = vrot.lane.b32.xlu1 %v10974_v1, %s7269_s2 }
 0x929   :  { %4855 = vrot.lane.b32.xlu0 %v14499_v39, %s7269_s2  ;;  %v12806_v21 = vpop.f32.mrb[8].mxu1  ;;  %5552 = vst.msk [vmem:[#allocation3 + $0x14f] sm:$0x1] %vm5531_vm12, %v14492_v44 }
 0x92a   :  { %v12811_v38 = vpop.f32.mrb[9].mxu1  ;;  %v5369_v37 = vpop.permute.xlu1 %5368  ;;  %v6473_v27 = vmul.f32 %v12806_v21, %v12806_v21  ;;  %v6348_v52 = vsel %vm2930_vm7, %v12806_v21, 0.0 }
 0x92b   :  { %v6344_v31 = vsel %vm2930_vm7, %v12811_v38, 0.0  ;;  %v6471_v50 = vmul.f32 %v12811_v38, %v12811_v38  ;;  %v5363_v30 = vpop.permute.xlu0 %5362  ;;  %v12819_v46 = vpop.f32.mrb[10].mxu1  ;;  %5507 = vst.msk [vmem:[#allocation3 + $0x158] sm:$0xff] %vm5281_vm10, %v5369_v37 }
 0x92c   :  { %v6345_v61 = vadd.f32 %v6344_v31, %v6343_v40  ;;  %5504 = vst.msk [vmem:[#allocation3 + $0x140] sm:$0xff] %vm5281_vm10, %v5363_v30  ;;  %v12822_v11 = vpop.f32.mrb[11].mxu1  ;;  %5150 = vrot.lane.b32.xlu1 %v10974_v1, %s7270_s3  ;;  %v6474_v36 = vmul.f32 %v12819_v46, %v12819_v46  ;;  %v6546_v35 = vsel %vm2930_vm7, %v6473_v27, 0.0  ;;  %v6350_v8 = vsel %vm2930_vm7, %v12819_v46, 0.0 }
 0x92d   :  { %v6542_v55 = vsel %vm2930_vm7, %v6471_v50, 0.0  ;;  %v6346_v4 = vsel %vm2930_vm7, %v12822_v11, 0.0  ;;  %v6472_v47 = vmul.f32 %v12822_v11, %v12822_v11  ;;  %4859 = vrot.lane.b32.xlu0 %v14493_v56, %s7269_s2  ;;  %5553 = vst.msk [vmem:[#allocation3 + $0x15f] sm:$0x1] %vm5531_vm12, %v14492_v44 }
 0x92e   :  { %v6543_v48 = vadd.f32 %v6542_v55, %v6541_v33  ;;  %v6347_v41 = vadd.f32 %v6346_v4, %v6345_v61  ;;  %v5643_v28 = vpop.permute.xlu1 %5642  ;;  %v6548_v23 = vsel %vm2930_vm7, %v6474_v36, 0.0 }
 0x92f   :  { %v6544_v60 = vsel %vm2930_vm7, %v6472_v47, 0.0  ;;  %v5367_v43 = vpop.permute.xlu0 %5366  ;;  %5784 = vst.msk [vmem:[#allocation3 + $0x147] sm:$0xff] %vm5526_vm13, %v5643_v28 }
 0x930   :  { %v6349_v39 = vadd.f32 %v6348_v52, %v6347_v41  ;;  %v6545_v26 = vadd.f32 %v6544_v60, %v6543_v48  ;;  %5506 = vst.msk [vmem:[#allocation3 + $0x150] sm:$0xff] %vm5281_vm10, %v5367_v43  ;;  %5154 = vrot.lane.b32.xlu1 %v14494_v54, %s7270_s3 }
 0x931   :  { %5148 = vrot.lane.b32.xlu0 %v14493_v56, %s7270_s3 }
 0x932   :  { %v6547_v12 = vadd.f32 %v6546_v35, %v6545_v26  ;;  %v6351_v62 = vadd.f32 %v6350_v8, %v6349_v39  ;;  %v5647_v16 = vpop.permute.xlu1 %5646 }
 0x933   :  { %v5641_v53 = vpop.permute.xlu0 %5640  ;;  %5786 = vst.msk [vmem:[#allocation3 + $0x157] sm:$0xff] %vm5526_vm13, %v5647_v16 }
 0x934   :  { %5783 = vst.msk [vmem:[#allocation3 + $0x13f] sm:$0xfe] %vm5744_vm11, %v5641_v53  ;;  %v6549_v32 = vadd.f32 %v6548_v23, %v6547_v12  ;;  %5396 = vrot.lane.b32.xlu1 %v10974_v1, %s7271_s21 }
 0x935   :  { %5152 = vrot.lane.b32.xlu0 %v10977_v34, %s7270_s3 }
 0x936   :  { %v4834_v17 = vpop.permute.xlu1 %4833  ;;  %v5848_v57 = vld [vmem:[#allocation3 + $0x148] sm:$0xff] }
 0x937   :  { %v5645_v18 = vpop.permute.xlu0 %5644  ;;  %4982 = vst.msk [vmem:[#allocation3 + $0x167] sm:$0xff] %vm4937_vm4, %v4834_v17 }
 0x938   :  { %5785 = vst.msk [vmem:[#allocation3 + $0x14f] sm:$0xfe] %vm5744_vm11, %v5645_v18  ;;  %5400 = vrot.lane.b32.xlu1 %v14494_v54, %s7271_s21 }
 0x939   :  { %5394 = vrot.lane.b32.xlu0 %v14493_v56, %s7271_s21 }
 0x93a   :  { %v4838_v13 = vpop.permute.xlu1 %4837  ;;  %v5850_v5 = vld [vmem:[#allocation3 + $0x158] sm:$0xff] }
 0x93b   :  { %v4832_v40 = vpop.permute.xlu0 %4831  ;;  %v5847_v51 = vld [vmem:[#allocation3 + $0x140] sm:$0xff]  ;;  %4984 = vst.msk [vmem:[#allocation3 + $0x177] sm:$0xff] %vm4937_vm4, %v4838_v13 }
 0x93c   :  { %4981 = vst.msk [vmem:[#allocation3 + $0x15f] sm:$0xfe] %vm4935_vm5, %v4832_v40  ;;  %v5891_v0 = vpack.c.bf16 %v5848_v57, %v5847_v51  ;;  %5674 = vrot.lane.b32.xlu1 %v10974_v1, %s7272_s26 }
 0x93d   :  { %5030 = vst.msk [vmem:[#allocation3 + $0x160] sm:$0x1] %vm5007_vm6, %v14492_v44  ;;  %5398 = vrot.lane.b32.xlu0 %v10977_v34, %s7271_s21 }
 0x93e   :  { %7205 = vmatprep.mubr.msk.bf16.mxu1 %vm5939_vm14, %v5891_v0  ;;  %v5127_v58 = vpop.permute.xlu1 %5126 }
 0x93f   :  { %v4836_v7 = vpop.permute.xlu0 %4835  ;;  %v5849_v33 = vld [vmem:[#allocation3 + $0x150] sm:$0xff]  ;;  %5264 = vst.msk [vmem:[#allocation3 + $0x169] sm:$0x7f] %vm5221_vm9, %v5127_v58 }
 0x940   :  { %4983 = vst.msk [vmem:[#allocation3 + $0x16f] sm:$0xfe] %vm4935_vm5, %v4836_v7  ;;  %v5892_v20 = vpack.c.bf16 %v5850_v5, %v5849_v33  ;;  %5678 = vrot.lane.b32.xlu1 %v14494_v54, %s7272_s26 }
 0x941   :  { %5031 = vst.msk [vmem:[#allocation3 + $0x170] sm:$0x1] %vm5007_vm6, %v14492_v44  ;;  %5672 = vrot.lane.b32.xlu0 %v14493_v56, %s7272_s26  ;;  %v12879_v24 = vpop.f32.mrb[12].mxu1 }
 0x942   :  { %v12884_v1 = vpop.f32.mrb[13].mxu1  ;;  %7206 = vmatmul.mubr.msk.bf16.gmra.mrb[40].mxu1 %vm5939_vm14, %v5892_v20  ;;  %v5131_v3 = vpop.permute.xlu1 %5130  ;;  %v6477_v31 = vmul.f32 %v12879_v24, %v12879_v24  ;;  %v6356_v55 = vsel %vm2930_vm7, %v12879_v24, 0.0 }
 0x943   :  { %v6352_v10 = vsel %vm2930_vm7, %v12884_v1, 0.0  ;;  %v6475_v19 = vmul.f32 %v12884_v1, %v12884_v1  ;;  %v5125_v49 = vpop.permute.xlu0 %5124  ;;  %v12891_v14 = vpop.f32.mrb[14].mxu1  ;;  %5266 = vst.msk [vmem:[#allocation3 + $0x179] sm:$0x7f] %vm5221_vm9, %v5131_v3 }
 0x944   :  { %v6353_v56 = vadd.f32 %v6352_v10, %v6351_v62  ;;  %5263 = vst.msk [vmem:[#allocation3 + $0x161] sm:$0xff] %vm5002_vm8, %v5125_v49  ;;  %v12894_v59 = vpop.f32.mrb[15].mxu1  ;;  %4865 = vrot.lane.b32.xlu1 %v14494_v54, %s7269_s2  ;;  %v6478_v4 = vmul.f32 %v12891_v14, %v12891_v14  ;;  %v6554_v60 = vsel %vm2930_vm7, %v6477_v31, 0.0  ;;  %v6358_v54 = vsel %vm2930_vm7, %v12891_v14, 0.0 }
 0x945   :  { %v6550_v50 = vsel %vm2930_vm7, %v6475_v19, 0.0  ;;  %v6354_v30 = vsel %vm2930_vm7, %v12894_v59, 0.0  ;;  %v6476_v61 = vmul.f32 %v12894_v59, %v12894_v59  ;;  %5676 = vrot.lane.b32.xlu0 %v10977_v34, %s7272_s26 }
 0x946   :  { %v6551_v37 = vadd.f32 %v6550_v50, %v6549_v32  ;;  %v6355_v27 = vadd.f32 %v6354_v30, %v6353_v56  ;;  %v5373_v36 = vpop.permute.xlu1 %5372  ;;  %v6556_v26 = vsel %vm2930_vm7, %v6478_v4, 0.0 }
 0x947   :  { %v6552_v47 = vsel %vm2930_vm7, %v6476_v61, 0.0  ;;  %v5129_v48 = vpop.permute.xlu0 %5128  ;;  %5509 = vst.msk [vmem:[#allocation3 + $0x168] sm:$0xff] %vm5281_vm10, %v5373_v36 }
 0x948   :  { %v6357_v41 = vadd.f32 %v6356_v55, %v6355_v27  ;;  %v6553_v52 = vadd.f32 %v6552_v47, %v6551_v37  ;;  %5265 = vst.msk [vmem:[#allocation3 + $0x171] sm:$0xff] %vm5002_vm8, %v5129_v48  ;;  %4869 = vrot.lane.b32.xlu1 %v11689_v15, %s7269_s2 }
 0x949   :  { %4863 = vrot.lane.b32.xlu0 %v10977_v34, %s7269_s2  ;;  %5554 = vst.msk [vmem:[#allocation3 + $0x16f] sm:$0x1] %vm5531_vm12, %v14492_v44 }
 0x94a   :  { %v6555_v43 = vadd.f32 %v6554_v60, %v6553_v52  ;;  %v6359_v39 = vadd.f32 %v6358_v54, %v6357_v41  ;;  %v5377_v35 = vpop.permute.xlu1 %5376 }
 0x94b   :  { %v5371_v28 = vpop.permute.xlu0 %5370  ;;  %5511 = vst.msk [vmem:[#allocation3 + $0x178] sm:$0xff] %vm5281_vm10, %v5377_v35 }
 0x94c   :  { %5508 = vst.msk [vmem:[#allocation3 + $0x160] sm:$0xff] %vm5281_vm10, %v5371_v28  ;;  %v6557_v8 = vadd.f32 %v6556_v26, %v6555_v43  ;;  %5158 = vrot.lane.b32.xlu1 %v11689_v15, %s7270_s3 }
 0x94d   :  { %4867 = vrot.lane.b32.xlu0 %v11698_v22, %s7269_s2  ;;  %5555 = vst.msk [vmem:[#allocation3 + $0x17f] sm:$0x1] %vm5531_vm12, %v14492_v44 }
 0x94e   :  { %v5651_v12 = vpop.permute.xlu1 %5650 }
 0x94f   :  { %v5375_v34 = vpop.permute.xlu0 %5374  ;;  %5788 = vst.msk [vmem:[#allocation3 + $0x167] sm:$0xff] %vm5526_vm13, %v5651_v12 }
 0x950   :  { %5510 = vst.msk [vmem:[#allocation3 + $0x170] sm:$0xff] %vm5281_vm10, %v5375_v34  ;;  %5404 = vrot.lane.b32.xlu1 %v11689_v15, %s7271_s21 }
 0x951   :  { %5156 = vrot.lane.b32.xlu0 %v11698_v22, %s7270_s3 }
 0x952   :  { %v5655_v23 = vpop.permute.xlu1 %5654 }
 0x953   :  { %v5649_v62 = vpop.permute.xlu0 %5648  ;;  %5790 = vst.msk [vmem:[#allocation3 + $0x177] sm:$0xff] %vm5526_vm13, %v5655_v23 }
 0x954   :  { %5787 = vst.msk [vmem:[#allocation3 + $0x15f] sm:$0xfe] %vm5744_vm11, %v5649_v62  ;;  %5682 = vrot.lane.b32.xlu1 %v11689_v15, %s7272_s26 }
 0x955   :  { %5402 = vrot.lane.b32.xlu0 %v11698_v22, %s7271_s21 }
 0x956   :  { %v4842_v16 = vpop.permute.xlu1 %4841  ;;  %v5852_v32 = vld [vmem:[#allocation3 + $0x168] sm:$0xff] }
 0x957   :  { %v5653_v53 = vpop.permute.xlu0 %5652  ;;  %4986 = vst.msk [vmem:[#allocation3 + $0x187] sm:$0xff] %vm4937_vm4, %v4842_v16 }
 0x958   :  { %5789 = vst.msk [vmem:[#allocation3 + $0x16f] sm:$0xfe] %vm5744_vm11, %v5653_v53 }
 0x959   :  { %5680 = vrot.lane.b32.xlu0 %v11698_v22, %s7272_s26 }
 0x95a   :  { %v4846_v40 = vpop.permute.xlu1 %4845  ;;  %v5854_v15 = vld [vmem:[#allocation3 + $0x178] sm:$0xff] }
 0x95b   :  { %v4840_v18 = vpop.permute.xlu0 %4839  ;;  %v5851_v17 = vld [vmem:[#allocation3 + $0x160] sm:$0xff]  ;;  %4988 = vst.msk [vmem:[#allocation3 + $0x197] sm:$0xff] %vm4937_vm4, %v4846_v40 }
 0x95c   :  { %4985 = vst.msk [vmem:[#allocation3 + $0x17f] sm:$0xfe] %vm4935_vm5, %v4840_v18  ;;  %v5893_v57 = vpack.c.bf16 %v5852_v32, %v5851_v17 }
 0x95d   :  { %5032 = vst.msk [vmem:[#allocation3 + $0x180] sm:$0x1] %vm5007_vm6, %v14492_v44 }
 0x95e   :  { %7209 = vmatprep.mubr.msk.bf16.mxu1 %vm5939_vm14, %v5893_v57  ;;  %v5135_v13 = vpop.permute.xlu1 %5134 }
 0x95f   :  { %v4844_v51 = vpop.permute.xlu0 %4843  ;;  %v5853_v0 = vld [vmem:[#allocation3 + $0x170] sm:$0xff]  ;;  %5268 = vst.msk [vmem:[#allocation3 + $0x189] sm:$0x7f] %vm5221_vm9, %v5135_v13 }
 0x960   :  { %4987 = vst.msk [vmem:[#allocation3 + $0x18f] sm:$0xfe] %vm4935_vm5, %v4844_v51  ;;  %v5894_v22 = vpack.c.bf16 %v5854_v15, %v5853_v0 }
 0x961   :  { %5033 = vst.msk [vmem:[#allocation3 + $0x190] sm:$0x1] %vm5007_vm6, %v14492_v44  ;;  %v12957_v5 = vpop.f32.mrb[16].mxu1 }
 0x962   :  { %v12960_v7 = vpop.f32.mrb[17].mxu1  ;;  %7210 = vmatmul.mubr.msk.bf16.gmra.mrb[44].mxu1 %vm5939_vm14, %v5894_v22  ;;  %v5139_v56 = vpop.permute.xlu1 %5138  ;;  %v6481_v3 = vmul.f32 %v12957_v5, %v12957_v5  ;;  %v6364_v27 = vsel %vm2930_vm7, %v12957_v5, 0.0 }
 0x963   :  { %v6360_v33 = vsel %vm2930_vm7, %v12960_v7, 0.0  ;;  %v6479_v20 = vmul.f32 %v12960_v7, %v12960_v7  ;;  %v5133_v58 = vpop.permute.xlu0 %5132  ;;  %v12967_v10 = vpop.f32.mrb[18].mxu1  ;;  %5270 = vst.msk [vmem:[#allocation3 + $0x199] sm:$0x7f] %vm5221_vm9, %v5139_v56 }
 0x964   :  { %v6361_v19 = vadd.f32 %v6360_v33, %v6359_v39  ;;  %5267 = vst.msk [vmem:[#allocation3 + $0x181] sm:$0xff] %vm5002_vm8, %v5133_v58  ;;  %v12970_v49 = vpop.f32.mrb[19].mxu1  ;;  %v6482_v55 = vmul.f32 %v12967_v10, %v12967_v10  ;;  %v6562_v36 = vsel %vm2930_vm7, %v6481_v3, 0.0  ;;  %v6366_v60 = vsel %vm2930_vm7, %v12967_v10, 0.0 }
 0x965   :  { %v6558_v31 = vsel %vm2930_vm7, %v6479_v20, 0.0  ;;  %v6362_v50 = vsel %vm2930_vm7, %v12970_v49, 0.0  ;;  %v6480_v30 = vmul.f32 %v12970_v49, %v12970_v49 }
 0x966   :  { %v6559_v61 = vadd.f32 %v6558_v31, %v6557_v8  ;;  %v6363_v37 = vadd.f32 %v6362_v50, %v6361_v19  ;;  %v5381_v52 = vpop.permute.xlu1 %5380  ;;  %v6564_v39 = vsel %vm2930_vm7, %v6482_v55, 0.0 }
 0x967   :  { %v6560_v4 = vsel %vm2930_vm7, %v6480_v30, 0.0  ;;  %v5137_v47 = vpop.permute.xlu0 %5136  ;;  %5513 = vst.msk [vmem:[#allocation3 + $0x188] sm:$0xff] %vm5281_vm10, %v5381_v52 }
 0x968   :  { %v6365_v48 = vadd.f32 %v6364_v27, %v6363_v37  ;;  %v6561_v41 = vadd.f32 %v6560_v4, %v6559_v61  ;;  %5269 = vst.msk [vmem:[#allocation3 + $0x191] sm:$0xff] %vm5002_vm8, %v5137_v47 }
 0x969   :  { %5556 = vst.msk [vmem:[#allocation3 + $0x18f] sm:$0x1] %vm5531_vm12, %v14492_v44 }
 0x96a   :  { %v6563_v54 = vadd.f32 %v6562_v36, %v6561_v41  ;;  %v6367_v43 = vadd.f32 %v6366_v60, %v6365_v48  ;;  %v5385_v28 = vpop.permute.xlu1 %5384 }
 0x96b   :  { %v5379_v26 = vpop.permute.xlu0 %5378  ;;  %5515 = vst.msk [vmem:[#allocation3 + $0x198] sm:$0xff] %vm5281_vm10, %v5385_v28 }
 0x96c   :  { %5512 = vst.msk [vmem:[#allocation3 + $0x180] sm:$0xff] %vm5281_vm10, %v5379_v26  ;;  %v6565_v35 = vadd.f32 %v6564_v39, %v6563_v54 }
 0x96d   :  { %5557 = vst.msk [vmem:[#allocation3 + $0x19f] sm:$0x1] %vm5531_vm12, %v14492_v44 }
 0x96e   :  { %v5659_v34 = vpop.permute.xlu1 %5658 }
 0x96f   :  { %v5383_v8 = vpop.permute.xlu0 %5382  ;;  %5792 = vst.msk [vmem:[#allocation3 + $0x187] sm:$0xff] %vm5526_vm13, %v5659_v34 }
 0x970   :  { %5514 = vst.msk [vmem:[#allocation3 + $0x190] sm:$0xff] %vm5281_vm10, %v5383_v8 }
 0x972   :  { %v5663_v62 = vpop.permute.xlu1 %5662 }
 0x973   :  { %v5657_v12 = vpop.permute.xlu0 %5656  ;;  %5794 = vst.msk [vmem:[#allocation3 + $0x197] sm:$0xff] %vm5526_vm13, %v5663_v62 }
 0x974   :  { %5791 = vst.msk [vmem:[#allocation3 + $0x17f] sm:$0xfe] %vm5744_vm11, %v5657_v12 }
 0x976   :  { %v4850_v53 = vpop.permute.xlu1 %4849  ;;  %v5856_v16 = vld [vmem:[#allocation3 + $0x188] sm:$0xff] }
 0x977   :  { %v5661_v23 = vpop.permute.xlu0 %5660  ;;  %4990 = vst.msk [vmem:[#allocation3 + $0x1a7] sm:$0xff] %vm4937_vm4, %v4850_v53 }
 0x978   :  { %5793 = vst.msk [vmem:[#allocation3 + $0x18f] sm:$0xfe] %vm5744_vm11, %v5661_v23 }
 0x97a   :  { %v4854_v57 = vpop.permute.xlu1 %4853  ;;  %v5858_v40 = vld [vmem:[#allocation3 + $0x198] sm:$0xff] }
 0x97b   :  { %v4848_v32 = vpop.permute.xlu0 %4847  ;;  %v5855_v18 = vld [vmem:[#allocation3 + $0x180] sm:$0xff]  ;;  %4992 = vst.msk [vmem:[#allocation3 + $0x1b7] sm:$0xff] %vm4937_vm4, %v4854_v57 }
 0x97c   :  { %4989 = vst.msk [vmem:[#allocation3 + $0x19f] sm:$0xfe] %vm4935_vm5, %v4848_v32  ;;  %v5895_v17 = vpack.c.bf16 %v5856_v16, %v5855_v18 }
 0x97d   :  { %5034 = vst.msk [vmem:[#allocation3 + $0x1a0] sm:$0x1] %vm5007_vm6, %v14492_v44 }
 0x97e   :  { %7213 = vmatprep.mubr.msk.bf16.mxu1 %vm5939_vm14, %v5895_v17  ;;  %v5143_v22 = vpop.permute.xlu1 %5142 }
 0x97f   :  { %v4852_v15 = vpop.permute.xlu0 %4851  ;;  %v5857_v51 = vld [vmem:[#allocation3 + $0x190] sm:$0xff]  ;;  %5272 = vst.msk [vmem:[#allocation3 + $0x1a9] sm:$0x7f] %vm5221_vm9, %v5143_v22 }
 0x980   :  { %4991 = vst.msk [vmem:[#allocation3 + $0x1af] sm:$0xfe] %vm4935_vm5, %v4852_v15  ;;  %v5896_v0 = vpack.c.bf16 %v5858_v40, %v5857_v51 }
 0x981   :  { %5035 = vst.msk [vmem:[#allocation3 + $0x1b0] sm:$0x1] %vm5007_vm6, %v14492_v44  ;;  %v13011_v13 = vpop.f32.mrb[20].mxu1 }
 0x982   :  { %v13014_v33 = vpop.f32.mrb[21].mxu1  ;;  %7214 = vmatmul.mubr.msk.bf16.gmra.mrb[48].mxu1 %vm5939_vm14, %v5896_v0  ;;  %v5147_v50 = vpop.permute.xlu1 %5146  ;;  %v6485_v30 = vmul.f32 %v13011_v13, %v13011_v13  ;;  %v6372_v47 = vsel %vm2930_vm7, %v13011_v13, 0.0 }
 0x983   :  { %v6368_v20 = vsel %vm2930_vm7, %v13014_v33, 0.0  ;;  %v6483_v58 = vmul.f32 %v13014_v33, %v13014_v33  ;;  %v5141_v19 = vpop.permute.xlu0 %5140  ;;  %v13021_v56 = vpop.f32.mrb[22].mxu1  ;;  %5274 = vst.msk [vmem:[#allocation3 + $0x1b9] sm:$0x7f] %vm5221_vm9, %v5147_v50 }
 0x984   :  { %v6369_v3 = vadd.f32 %v6368_v20, %v6367_v43  ;;  %5271 = vst.msk [vmem:[#allocation3 + $0x1a1] sm:$0xff] %vm5002_vm8, %v5141_v19  ;;  %v13024_v31 = vpop.f32.mrb[23].mxu1  ;;  %v6486_v48 = vmul.f32 %v13021_v56, %v13021_v56  ;;  %v6570_v43 = vsel %vm2930_vm7, %v6485_v30, 0.0  ;;  %v6374_v39 = vsel %vm2930_vm7, %v13021_v56, 0.0 }
 0x985   :  { %v6566_v61 = vsel %vm2930_vm7, %v6483_v58, 0.0  ;;  %v6370_v37 = vsel %vm2930_vm7, %v13024_v31, 0.0  ;;  %v6484_v27 = vmul.f32 %v13024_v31, %v13024_v31 }
 0x986   :  { %v6567_v55 = vadd.f32 %v6566_v61, %v6565_v35  ;;  %v6371_v4 = vadd.f32 %v6370_v37, %v6369_v3  ;;  %v5389_v54 = vpop.permute.xlu1 %5388  ;;  %v6572_v35 = vsel %vm2930_vm7, %v6486_v48, 0.0 }
 0x987   :  { %v6568_v41 = vsel %vm2930_vm7, %v6484_v27, 0.0  ;;  %v5145_v52 = vpop.permute.xlu0 %5144  ;;  %5517 = vst.msk [vmem:[#allocation3 + $0x1a8] sm:$0xff] %vm5281_vm10, %v5389_v54 }
 0x988   :  { %v6373_v36 = vadd.f32 %v6372_v47, %v6371_v4  ;;  %v6569_v60 = vadd.f32 %v6568_v41, %v6567_v55  ;;  %5273 = vst.msk [vmem:[#allocation3 + $0x1b1] sm:$0xff] %vm5002_vm8, %v5145_v52 }
 0x989   :  { %5558 = vst.msk [vmem:[#allocation3 + $0x1af] sm:$0x1] %vm5531_vm12, %v14492_v44 }
 0x98a   :  { %v6571_v26 = vadd.f32 %v6570_v43, %v6569_v60  ;;  %v6375_v28 = vadd.f32 %v6374_v39, %v6373_v36  ;;  %v5393_v34 = vpop.permute.xlu1 %5392 }
 0x98b   :  { %v5387_v8 = vpop.permute.xlu0 %5386  ;;  %5519 = vst.msk [vmem:[#allocation3 + $0x1b8] sm:$0xff] %vm5281_vm10, %v5393_v34 }
 0x98c   :  { %5516 = vst.msk [vmem:[#allocation3 + $0x1a0] sm:$0xff] %vm5281_vm10, %v5387_v8  ;;  %v6573_v12 = vadd.f32 %v6572_v35, %v6571_v26 }
 0x98d   :  { %5559 = vst.msk [vmem:[#allocation3 + $0x1bf] sm:$0x1] %vm5531_vm12, %v14492_v44 }
 0x98e   :  { %v5667_v23 = vpop.permute.xlu1 %5666 }
 0x98f   :  { %v5391_v62 = vpop.permute.xlu0 %5390  ;;  %5796 = vst.msk [vmem:[#allocation3 + $0x1a7] sm:$0xff] %vm5526_vm13, %v5667_v23 }
 0x990   :  { %5518 = vst.msk [vmem:[#allocation3 + $0x1b0] sm:$0xff] %vm5281_vm10, %v5391_v62 }
 0x992   :  { %v5671_v16 = vpop.permute.xlu1 %5670 }
 0x993   :  { %v5665_v53 = vpop.permute.xlu0 %5664  ;;  %5798 = vst.msk [vmem:[#allocation3 + $0x1b7] sm:$0xff] %vm5526_vm13, %v5671_v16 }
 0x994   :  { %5795 = vst.msk [vmem:[#allocation3 + $0x19f] sm:$0xfe] %vm5744_vm11, %v5665_v53 }
 0x996   :  { %v4858_v18 = vpop.permute.xlu1 %4857  ;;  %v5860_v17 = vld [vmem:[#allocation3 + $0x1a8] sm:$0xff] }
 0x997   :  { %v5669_v32 = vpop.permute.xlu0 %5668  ;;  %4994 = vst.msk [vmem:[#allocation3 + $0x1c7] sm:$0xff] %vm4937_vm4, %v4858_v18 }
 0x998   :  { %5797 = vst.msk [vmem:[#allocation3 + $0x1af] sm:$0xfe] %vm5744_vm11, %v5669_v32 }
 0x99a   :  { %v4862_v51 = vpop.permute.xlu1 %4861  ;;  %v5862_v0 = vld [vmem:[#allocation3 + $0x1b8] sm:$0xff] }
 0x99b   :  { %v4856_v57 = vpop.permute.xlu0 %4855  ;;  %v5859_v40 = vld [vmem:[#allocation3 + $0x1a0] sm:$0xff]  ;;  %4996 = vst.msk [vmem:[#allocation3 + $0x1d7] sm:$0xff] %vm4937_vm4, %v4862_v51 }
 0x99c   :  { %4993 = vst.msk [vmem:[#allocation3 + $0x1bf] sm:$0xfe] %vm4935_vm5, %v4856_v57  ;;  %v5897_v15 = vpack.c.bf16 %v5860_v17, %v5859_v40 }
 0x99d   :  { %5036 = vst.msk [vmem:[#allocation3 + $0x1c0] sm:$0x1] %vm5007_vm6, %v14492_v44 }
 0x99e   :  { %7217 = vmatprep.mubr.msk.bf16.mxu1 %vm5939_vm14, %v5897_v15  ;;  %v5151_v19 = vpop.permute.xlu1 %5150 }
 0x99f   :  { %v4860_v22 = vpop.permute.xlu0 %4859  ;;  %v5861_v20 = vld [vmem:[#allocation3 + $0x1b0] sm:$0xff]  ;;  %5276 = vst.msk [vmem:[#allocation3 + $0x1c9] sm:$0x7f] %vm5221_vm9, %v5151_v19 }
 0x9a0   :  { %4995 = vst.msk [vmem:[#allocation3 + $0x1cf] sm:$0xfe] %vm4935_vm5, %v4860_v22  ;;  %v5898_v58 = vpack.c.bf16 %v5862_v0, %v5861_v20 }
 0x9a1   :  { %5037 = vst.msk [vmem:[#allocation3 + $0x1d0] sm:$0x1] %vm5007_vm6, %v14492_v44  ;;  %v13065_v3 = vpop.f32.mrb[24].mxu1 }
 0x9a2   :  { %v13068_v50 = vpop.f32.mrb[25].mxu1  ;;  %7218 = vmatmul.mubr.msk.bf16.gmra.mrb[52].mxu1 %vm5939_vm14, %v5898_v58  ;;  %v5155_v47 = vpop.permute.xlu1 %5154  ;;  %v6489_v48 = vmul.f32 %v13065_v3, %v13065_v3  ;;  %v6380_v43 = vsel %vm2930_vm7, %v13065_v3, 0.0 }
 0x9a3   :  { %v6376_v30 = vsel %vm2930_vm7, %v13068_v50, 0.0  ;;  %v6487_v61 = vmul.f32 %v13068_v50, %v13068_v50  ;;  %v5149_v37 = vpop.permute.xlu0 %5148  ;;  %v13075_v27 = vpop.f32.mrb[26].mxu1  ;;  %5278 = vst.msk [vmem:[#allocation3 + $0x1d9] sm:$0x7f] %vm5221_vm9, %v5155_v47 }
 0x9a4   :  { %v6377_v55 = vadd.f32 %v6376_v30, %v6375_v28  ;;  %5275 = vst.msk [vmem:[#allocation3 + $0x1c1] sm:$0xff] %vm5002_vm8, %v5149_v37  ;;  %v13078_v4 = vpop.f32.mrb[27].mxu1  ;;  %v6490_v39 = vmul.f32 %v13075_v27, %v13075_v27  ;;  %v6578_v62 = vsel %vm2930_vm7, %v6489_v48, 0.0 }
 0x9a5   :  { %v6574_v41 = vsel %vm2930_vm7, %v6487_v61, 0.0  ;;  %v6378_v52 = vsel %vm2930_vm7, %v13078_v4, 0.0  ;;  %v6488_v36 = vmul.f32 %v13078_v4, %v13078_v4 }
 0x9a6   :  { %v6575_v60 = vadd.f32 %v6574_v41, %v6573_v12  ;;  %v6379_v54 = vadd.f32 %v6378_v52, %v6377_v55  ;;  %v5397_v34 = vpop.permute.xlu1 %5396  ;;  %v6382_v12 = vsel %vm2930_vm7, %v13075_v27, 0.0  ;;  %v6580_v16 = vsel %vm2930_vm7, %v6490_v39, 0.0 }
 0x9a7   :  { %v6576_v26 = vsel %vm2930_vm7, %v6488_v36, 0.0  ;;  %v5153_v28 = vpop.permute.xlu0 %5152  ;;  %5521 = vst.msk [vmem:[#allocation3 + $0x1c8] sm:$0xff] %vm5281_vm10, %v5397_v34 }
 0x9a8   :  { %v6381_v35 = vadd.f32 %v6380_v43, %v6379_v54  ;;  %v6577_v8 = vadd.f32 %v6576_v26, %v6575_v60  ;;  %5277 = vst.msk [vmem:[#allocation3 + $0x1d1] sm:$0xff] %vm5002_vm8, %v5153_v28 }
 0x9a9   :  { %5560 = vst.msk [vmem:[#allocation3 + $0x1cf] sm:$0x1] %vm5531_vm12, %v14492_v44 }
 0x9aa   :  { %v6579_v23 = vadd.f32 %v6578_v62, %v6577_v8  ;;  %v6383_v53 = vadd.f32 %v6382_v12, %v6381_v35  ;;  %v5401_v18 = vpop.permute.xlu1 %5400 }
 0x9ab   :  { %v5395_v32 = vpop.permute.xlu0 %5394  ;;  %5523 = vst.msk [vmem:[#allocation3 + $0x1d8] sm:$0xff] %vm5281_vm10, %v5401_v18 }
 0x9ac   :  { %5520 = vst.msk [vmem:[#allocation3 + $0x1c0] sm:$0xff] %vm5281_vm10, %v5395_v32  ;;  %v6581_v17 = vadd.f32 %v6580_v16, %v6579_v23 }
 0x9ad   :  { %5561 = vst.msk [vmem:[#allocation3 + $0x1df] sm:$0x1] %vm5531_vm12, %v14492_v44 }
 0x9ae   :  { %v5675_v40 = vpop.permute.xlu1 %5674 }
 0x9af   :  { %v5399_v57 = vpop.permute.xlu0 %5398  ;;  %5800 = vst.msk [vmem:[#allocation3 + $0x1c7] sm:$0xff] %vm5526_vm13, %v5675_v40 }
 0x9b0   :  { %5522 = vst.msk [vmem:[#allocation3 + $0x1d0] sm:$0xff] %vm5281_vm10, %v5399_v57 }
 0x9b2   :  { %v5679_v51 = vpop.permute.xlu1 %5678 }
 0x9b3   :  { %v5673_v15 = vpop.permute.xlu0 %5672  ;;  %5802 = vst.msk [vmem:[#allocation3 + $0x1d7] sm:$0xff] %vm5526_vm13, %v5679_v51 }
 0x9b4   :  { %5799 = vst.msk [vmem:[#allocation3 + $0x1bf] sm:$0xfe] %vm5744_vm11, %v5673_v15 }
 0x9b6   :  { %v13109_v0 = vpop.f32.mrb[28].mxu1  ;;  %v4866_v37 = vpop.permute.xlu1 %4865  ;;  %v5864_v41 = vld [vmem:[#allocation3 + $0x1c8] sm:$0xff] }
 0x9b7   :  { %v5677_v22 = vpop.permute.xlu0 %5676  ;;  %v13111_v20 = vpop.f32.mrb[29].mxu1  ;;  %v6493_v58 = vmul.f32 %v13109_v0, %v13109_v0  ;;  %v6388_v55 = vsel %vm2930_vm7, %v13109_v0, 0.0  ;;  %4998 = vst.msk [vmem:[#allocation3 + $0x1e7] sm:$0xff] %vm4937_vm4, %v4866_v37 }
 0x9b8   :  { %5801 = vst.msk [vmem:[#allocation3 + $0x1cf] sm:$0xfe] %vm5744_vm11, %v5677_v22  ;;  %v6384_v19 = vsel %vm2930_vm7, %v13111_v20, 0.0  ;;  %v6491_v30 = vmul.f32 %v13111_v20, %v13111_v20  ;;  %v13120_v61 = vpop.f32.mrb[30].mxu1 }
 0x9b9   :  { %v6385_v47 = vadd.f32 %v6384_v19, %v6383_v53  ;;  %v13124_v48 = vpop.f32.mrb[31].mxu1  ;;  %v6494_v36 = vmul.f32 %v13120_v61, %v13120_v61  ;;  %v6586_v35 = vsel %vm2930_vm7, %v6493_v58, 0.0  ;;  %v6390_v8 = vsel %vm2930_vm7, %v13120_v61, 0.0 }
 0x9ba   :  { %v6582_v52 = vsel %vm2930_vm7, %v6491_v30, 0.0  ;;  %v6386_v60 = vsel %vm2930_vm7, %v13124_v48, 0.0  ;;  %v6492_v54 = vmul.f32 %v13124_v48, %v13124_v48  ;;  %v4870_v12 = vpop.permute.xlu1 %4869  ;;  %v5866_v16 = vld [vmem:[#allocation3 + $0x1d8] sm:$0xff] }
 0x9bb   :  { %v6583_v43 = vadd.f32 %v6582_v52, %v6581_v17  ;;  %v6387_v39 = vadd.f32 %v6386_v60, %v6385_v47  ;;  %v4864_v26 = vpop.permute.xlu0 %4863  ;;  %v5863_v28 = vld [vmem:[#allocation3 + $0x1c0] sm:$0xff]  ;;  %5000 = vst.msk [vmem:[#allocation3 + $0x1f7] sm:$0xff] %vm4937_vm4, %v4870_v12  ;;  %v6588_v32 = vsel %vm2930_vm7, %v6494_v36, 0.0 }
 0x9bc   :  { %v6584_v34 = vsel %vm2930_vm7, %v6492_v54, 0.0  ;;  %4997 = vst.msk [vmem:[#allocation3 + $0x1df] sm:$0xfe] %vm4935_vm5, %v4864_v26  ;;  %v5899_v62 = vpack.c.bf16 %v5864_v41, %v5863_v28 }
 0x9bd   :  { %v6389_v23 = vadd.f32 %v6388_v55, %v6387_v39  ;;  %v6585_v53 = vadd.f32 %v6584_v34, %v6583_v43  ;;  %5038 = vst.msk [vmem:[#allocation3 + $0x1e0] sm:$0x1] %vm5007_vm6, %v14492_v44 }
 0x9be   :  { %7221 = vmatprep.mubr.msk.bf16.mxu1 %vm5939_vm14, %v5899_v62  ;;  %5006 = vst.msk [vmem:[#allocation3 + $0x1f8] sm:$0xff] %vm5002_vm8, %v14492_v44  ;;  %v5159_v51 = vpop.permute.xlu1 %5158 }
 0x9bf   :  { %v6587_v18 = vadd.f32 %v6586_v35, %v6585_v53  ;;  %5285 = vst.msk [vmem:[#allocation3 + $0x1f8] sm:$0xff] %vm5281_vm10, %v14492_v44  ;;  %v4868_v17 = vpop.permute.xlu0 %4867  ;;  %v5865_v57 = vld [vmem:[#allocation3 + $0x1d0] sm:$0xff]  ;;  %v6391_v40 = vadd.f32 %v6390_v8, %v6389_v23 }
 0x9c0   :  { %5530 = vst.msk [vmem:[#allocation3 + $0x1f8] sm:$0xff] %vm5526_vm13, %v14492_v44  ;;  %v5900_v15 = vpack.c.bf16 %v5866_v16, %v5865_v57 }
 0x9c1   :  { %4999 = vst.msk [vmem:[#allocation3 + $0x1ef] sm:$0xfe] %vm4935_vm5, %v4868_v17  ;;  %v6589_v22 = vadd.f32 %v6588_v32, %v6587_v18 }
 0x9c2   :  { %5563 = vst.msk [vmem:[#allocation3 + $0x1ff] sm:$0x1] %vm5531_vm12, %v14492_v44  ;;  %7222 = vmatmul.mubr.msk.bf16.gmra.mrb[56].mxu1 %vm5939_vm14, %v5900_v15  ;;  %v5405_v19 = vpop.permute.xlu1 %5404 }
 0x9c3   :  { %5005 = vst.msk [vmem:[#allocation3 + $0x1f0] sm:$0xff] %vm5002_vm8, %v14492_v44  ;;  %v5157_v58 = vpop.permute.xlu0 %5156 }
 0x9c4   :  { %5280 = vst.msk [vmem:[#allocation3 + $0x1e9] sm:$0x7f] %vm5221_vm9, %v5159_v51 }
 0x9c5   :  { %5039 = vst.msk [vmem:[#allocation3 + $0x1f0] sm:$0x1] %vm5007_vm6, %v14492_v44 }
 0x9c6   :  { %5284 = vst.msk [vmem:[#allocation3 + $0x1f0] sm:$0xff] %vm5281_vm10, %v14492_v44  ;;  %v5683_v37 = vpop.permute.xlu1 %5682 }
 0x9c7   :  { %5529 = vst.msk [vmem:[#allocation3 + $0x1f0] sm:$0xff] %vm5526_vm13, %v14492_v44  ;;  %v5403_v30 = vpop.permute.xlu0 %5402 }
 0x9c8   :  { %5279 = vst.msk [vmem:[#allocation3 + $0x1e1] sm:$0xff] %vm5002_vm8, %v5157_v58 }
 0x9c9   :  { %5525 = vst.msk [vmem:[#allocation3 + $0x1e8] sm:$0xff] %vm5281_vm10, %v5405_v19  ;;  %5524 = vst.msk [vmem:[#allocation3 + $0x1e0] sm:$0xff] %vm5281_vm10, %v5403_v30  ;;  %v5870_v41 = vld [vmem:[#allocation3 + $0x1f8] sm:$0xff] }
 0x9ca   :  { %5562 = vst.msk [vmem:[#allocation3 + $0x1ef] sm:$0x1] %vm5531_vm12, %v14492_v44 }
 0x9cb   :  { %5804 = vst.msk [vmem:[#allocation3 + $0x1e7] sm:$0xff] %vm5526_vm13, %v5683_v37  ;;  %v5681_v55 = vpop.permute.xlu0 %5680 }
 0x9cc   :  { %5803 = vst.msk [vmem:[#allocation3 + $0x1df] sm:$0xfe] %vm5744_vm11, %v5681_v55 }
 0x9ce   :  { %v5869_v47 = vld [vmem:[#allocation3 + $0x1f0] sm:$0xff] }
 0x9cf   :  { %v5902_v60 = vpack.c.bf16 %v5870_v41, %v5869_v47 }
 0x9d2   :  { %v5868_v52 = vld [vmem:[#allocation3 + $0x1e8] sm:$0xff] }
 0x9d3   :  { %v5867_v36 = vld [vmem:[#allocation3 + $0x1e0] sm:$0xff] }
 0x9d4   :  { %v5901_v54 = vpack.c.bf16 %v5868_v52, %v5867_v36 }
 0x9d5   :  { %v13170_v43 = vpop.f32.mrb[32].mxu1 }
 0x9d6   :  { %v13172_v39 = vpop.f32.mrb[33].mxu1  ;;  %7225 = vmatprep.mubr.msk.bf16.mxu1 %vm5939_vm14, %v5901_v54  ;;  %v6497_v34 = vmul.f32 %v13170_v43, %v13170_v43  ;;  %v6396_v32 = vsel %vm2930_vm7, %v13170_v43, 0.0 }
 0x9d7   :  { %v6392_v44 = vsel %vm2930_vm7, %v13172_v39, 0.0  ;;  %v6495_v26 = vmul.f32 %v13172_v39, %v13172_v39  ;;  %v13179_v28 = vpop.f32.mrb[34].mxu1  ;;  %7226 = vmatmul.mubr.msk.bf16.gmra.mrb[60].mxu1 %vm5939_vm14, %v5902_v60 }
 0x9d8   :  { %v6393_v35 = vadd.f32 %v6392_v44, %v6391_v40  ;;  %v13182_v8 = vpop.f32.mrb[35].mxu1  ;;  %v6498_v18 = vmul.f32 %v13179_v28, %v13179_v28  ;;  %v6594_v15 = vsel %vm2930_vm7, %v6497_v34, 0.0  ;;  %v6398_v51 = vsel %vm2930_vm7, %v13179_v28, 0.0 }
 0x9d9   :  { %v6590_v62 = vsel %vm2930_vm7, %v6495_v26, 0.0  ;;  %v6394_v12 = vsel %vm2930_vm7, %v13182_v8, 0.0  ;;  %v6496_v23 = vmul.f32 %v13182_v8, %v13182_v8 }
 0x9da   :  { %v6591_v53 = vadd.f32 %v6590_v62, %v6589_v22  ;;  %v6395_v16 = vadd.f32 %v6394_v12, %v6393_v35  ;;  %v6596_v22 = vsel %vm2930_vm7, %v6498_v18, 0.0 }
 0x9db   :  { %v6592_v17 = vsel %vm2930_vm7, %v6496_v23, 0.0 }
 0x9dc   :  { %v6397_v57 = vadd.f32 %v6396_v32, %v6395_v16  ;;  %v6593_v40 = vadd.f32 %v6592_v17, %v6591_v53 }
 0x9de   :  { %v6595_v58 = vadd.f32 %v6594_v15, %v6593_v40  ;;  %v6399_v19 = vadd.f32 %v6398_v51, %v6397_v57 }
 0x9e0   :  { %v6597_v30 = vadd.f32 %v6596_v22, %v6595_v58 }
 0x9f5   :  { %v13200_v37 = vpop.f32.mrb[36].mxu1 }
 0x9f6   :  { %v13202_v55 = vpop.f32.mrb[37].mxu1  ;;  %v6501_v54 = vmul.f32 %v13200_v37, %v13200_v37  ;;  %v6404_v12 = vsel %vm2930_vm7, %v13200_v37, 0.0 }
 0x9f7   :  { %v6400_v47 = vsel %vm2930_vm7, %v13202_v55, 0.0  ;;  %v6499_v41 = vmul.f32 %v13202_v55, %v13202_v55  ;;  %v13208_v52 = vpop.f32.mrb[38].mxu1 }
 0x9f8   :  { %v6401_v36 = vadd.f32 %v6400_v47, %v6399_v19  ;;  %v13210_v60 = vpop.f32.mrb[39].mxu1  ;;  %v6502_v23 = vmul.f32 %v13208_v52, %v13208_v52  ;;  %v6602_v18 = vsel %vm2930_vm7, %v6501_v54, 0.0  ;;  %v6406_v17 = vsel %vm2930_vm7, %v13208_v52, 0.0 }
 0x9f9   :  { %v6598_v44 = vsel %vm2930_vm7, %v6499_v41, 0.0  ;;  %v6402_v26 = vsel %vm2930_vm7, %v13210_v60, 0.0  ;;  %v6500_v35 = vmul.f32 %v13210_v60, %v13210_v60 }
 0x9fa   :  { %v6599_v34 = vadd.f32 %v6598_v44, %v6597_v30  ;;  %v6403_v62 = vadd.f32 %v6402_v26, %v6401_v36  ;;  %v6604_v15 = vsel %vm2930_vm7, %v6502_v23, 0.0 }
 0x9fb   :  { %v6600_v53 = vsel %vm2930_vm7, %v6500_v35, 0.0 }
 0x9fc   :  { %v6405_v16 = vadd.f32 %v6404_v12, %v6403_v62  ;;  %v6601_v32 = vadd.f32 %v6600_v53, %v6599_v34 }
 0x9fe   :  { %v6603_v57 = vadd.f32 %v6602_v18, %v6601_v32  ;;  %v6407_v40 = vadd.f32 %v6406_v17, %v6405_v16 }
 0xa00   :  { %v6605_v51 = vadd.f32 %v6604_v15, %v6603_v57 }
 0xa15   :  { %v13228_v58 = vpop.f32.mrb[40].mxu1 }
 0xa16   :  { %14500 = vst [vmem:[#allocation4_spill] sm:$0xff] %v13228_v58  ;;  %v13230_v19 = vpop.f32.mrb[41].mxu1  ;;  %v6505_v54 = vmul.f32 %v13228_v58, %v13228_v58  ;;  %v6412_v12 = vsel %vm2930_vm7, %v13228_v58, 0.0 }
 0xa17   :  { %14501 = vst [vmem:[#allocation8_spill] sm:$0xff] %v13230_v19  ;;  %v6408_v22 = vsel %vm2930_vm7, %v13230_v19, 0.0  ;;  %v6503_v30 = vmul.f32 %v13230_v19, %v13230_v19  ;;  %v13236_v47 = vpop.f32.mrb[42].mxu1 }
 0xa18   :  { %14502 = vst [vmem:[#allocation14_spill] sm:$0xff] %v13236_v47  ;;  %v6409_v41 = vadd.f32 %v6408_v22, %v6407_v40  ;;  %v13238_v36 = vpop.f32.mrb[43].mxu1  ;;  %v6506_v23 = vmul.f32 %v13236_v47, %v13236_v47  ;;  %v6610_v18 = vsel %vm2930_vm7, %v6505_v54, 0.0  ;;  %v6414_v17 = vsel %vm2930_vm7, %v13236_v47, 0.0 }
 0xa19   :  { %14503 = vst [vmem:[#allocation5_spill] sm:$0xff] %v13238_v36  ;;  %v6606_v44 = vsel %vm2930_vm7, %v6503_v30, 0.0  ;;  %v6410_v26 = vsel %vm2930_vm7, %v13238_v36, 0.0  ;;  %v6504_v35 = vmul.f32 %v13238_v36, %v13238_v36 }
 0xa1a   :  { %v6607_v34 = vadd.f32 %v6606_v44, %v6605_v51  ;;  %v6411_v62 = vadd.f32 %v6410_v26, %v6409_v41  ;;  %v6612_v15 = vsel %vm2930_vm7, %v6506_v23, 0.0 }
 0xa1b   :  { %v6608_v53 = vsel %vm2930_vm7, %v6504_v35, 0.0 }
 0xa1c   :  { %v6413_v16 = vadd.f32 %v6412_v12, %v6411_v62  ;;  %v6609_v32 = vadd.f32 %v6608_v53, %v6607_v34 }
 0xa1e   :  { %v6611_v57 = vadd.f32 %v6610_v18, %v6609_v32  ;;  %v6415_v40 = vadd.f32 %v6414_v17, %v6413_v16 }
 0xa20   :  { %v6613_v51 = vadd.f32 %v6612_v15, %v6611_v57 }
 0xa35   :  { %v13256_v22 = vpop.f32.mrb[44].mxu1 }
 0xa36   :  { %14504 = vst [vmem:[#allocation12_spill] sm:$0xff] %v13256_v22  ;;  %v13258_v30 = vpop.f32.mrb[45].mxu1  ;;  %v6509_v34 = vmul.f32 %v13256_v22, %v13256_v22  ;;  %v6420_v32 = vsel %vm2930_vm7, %v13256_v22, 0.0 }
 0xa37   :  { %14505 = vst [vmem:[#allocation10_spill] sm:$0xff] %v13258_v30  ;;  %v6416_v41 = vsel %vm2930_vm7, %v13258_v30, 0.0  ;;  %v6507_v44 = vmul.f32 %v13258_v30, %v13258_v30  ;;  %v13264_v26 = vpop.f32.mrb[46].mxu1 }
 0xa38   :  { %14506 = vst [vmem:[#allocation16_spill] sm:$0xff] %v13264_v26  ;;  %v6417_v54 = vadd.f32 %v6416_v41, %v6415_v40  ;;  %v13266_v35 = vpop.f32.mrb[47].mxu1  ;;  %v6510_v18 = vmul.f32 %v13264_v26, %v13264_v26  ;;  %v6618_v15 = vsel %vm2930_vm7, %v6509_v34, 0.0  ;;  %v6422_v41 = vsel %vm2930_vm7, %v13264_v26, 0.0 }
 0xa39   :  { %14507 = vst [vmem:[#allocation13_spill] sm:$0xff] %v13266_v35  ;;  %v6614_v62 = vsel %vm2930_vm7, %v6507_v44, 0.0  ;;  %v6418_v12 = vsel %vm2930_vm7, %v13266_v35, 0.0  ;;  %v6508_v23 = vmul.f32 %v13266_v35, %v13266_v35 }
 0xa3a   :  { %v6615_v53 = vadd.f32 %v6614_v62, %v6613_v51  ;;  %v6419_v16 = vadd.f32 %v6418_v12, %v6417_v54  ;;  %v6620_v51 = vsel %vm2930_vm7, %v6510_v18, 0.0 }
 0xa3b   :  { %v6616_v17 = vsel %vm2930_vm7, %v6508_v23, 0.0 }
 0xa3c   :  { %v6421_v57 = vadd.f32 %v6420_v32, %v6419_v16  ;;  %v6617_v40 = vadd.f32 %v6616_v17, %v6615_v53 }
 0xa3e   :  { %v6619_v44 = vadd.f32 %v6618_v15, %v6617_v40  ;;  %v6423_v30 = vadd.f32 %v6422_v41, %v6421_v57 }
 0xa40   :  { %v6621_v54 = vadd.f32 %v6620_v51, %v6619_v44 }
 0xa55   :  { %v13284_v62 = vpop.f32.mrb[48].mxu1 }
 0xa56   :  { %14508 = vst [vmem:[#allocation15_spill] sm:$0xff] %v13284_v62  ;;  %v13286_v12 = vpop.f32.mrb[49].mxu1  ;;  %v6513_v32 = vmul.f32 %v13284_v62, %v13284_v62  ;;  %v6428_v41 = vsel %vm2930_vm7, %v13284_v62, 0.0 }
 0xa57   :  { %14509 = vst [vmem:[#allocation18_spill] sm:$0xff] %v13286_v12  ;;  %v6424_v22 = vsel %vm2930_vm7, %v13286_v12, 0.0  ;;  %v6511_v23 = vmul.f32 %v13286_v12, %v13286_v12  ;;  %v13292_v53 = vpop.f32.mrb[50].mxu1 }
 0xa58   :  { %14510 = vst [vmem:[#allocation11_spill] sm:$0xff] %v13292_v53  ;;  %v6425_v34 = vadd.f32 %v6424_v22, %v6423_v30  ;;  %v13294_v16 = vpop.f32.mrb[51].mxu1  ;;  %v6514_v22 = vmul.f32 %v13292_v53, %v13292_v53  ;;  %v6430_v12 = vsel %vm2930_vm7, %v13292_v53, 0.0 }
 0xa59   :  { %14511 = vst [vmem:[#allocation7_spill] sm:$0xff] %v13294_v16  ;;  %v6622_v18 = vsel %vm2930_vm7, %v6511_v23, 0.0  ;;  %v6426_v17 = vsel %vm2930_vm7, %v13294_v16, 0.0  ;;  %v6512_v57 = vmul.f32 %v13294_v16, %v13294_v16  ;;  %v6626_v23 = vsel %vm2930_vm7, %v6513_v32, 0.0 }
 0xa5a   :  { %v6623_v40 = vadd.f32 %v6622_v18, %v6621_v54  ;;  %v6427_v15 = vadd.f32 %v6426_v17, %v6425_v34  ;;  %v6628_v54 = vsel %vm2930_vm7, %v6514_v22, 0.0 }
 0xa5b   :  { %v6624_v30 = vsel %vm2930_vm7, %v6512_v57, 0.0 }
 0xa5c   :  { %v6429_v44 = vadd.f32 %v6428_v41, %v6427_v15  ;;  %v6625_v51 = vadd.f32 %v6624_v30, %v6623_v40 }
 0xa5e   :  { %v6627_v26 = vadd.f32 %v6626_v23, %v6625_v51  ;;  %v6431_v35 = vadd.f32 %v6430_v12, %v6429_v44 }
 0xa60   :  { %v6629_v34 = vadd.f32 %v6628_v54, %v6627_v26 }
 0xa75   :  { %v13312_v18 = vpop.f32.mrb[52].mxu1 }
 0xa76   :  { %14512 = vst [vmem:[#allocation6_spill] sm:$0xff] %v13312_v18  ;;  %v13314_v17 = vpop.f32.mrb[53].mxu1  ;;  %v6517_v12 = vmul.f32 %v13312_v18, %v13312_v18  ;;  %v6436_v51 = vsel %vm2930_vm7, %v13312_v18, 0.0 }
 0xa77   :  { %14513 = vst [vmem:[#allocation17_spill] sm:$0xff] %v13314_v17  ;;  %v6432_v62 = vsel %vm2930_vm7, %v13314_v17, 0.0  ;;  %v6515_v57 = vmul.f32 %v13314_v17, %v13314_v17  ;;  %v13320_v40 = vpop.f32.mrb[54].mxu1 }
 0xa78   :  { %14514 = vst [vmem:[#allocation20_spill] sm:$0xff] %v13320_v40  ;;  %v6433_v32 = vadd.f32 %v6432_v62, %v6431_v35  ;;  %v13322_v15 = vpop.f32.mrb[55].mxu1  ;;  %v6518_v35 = vmul.f32 %v13320_v40, %v13320_v40  ;;  %v6438_v17 = vsel %vm2930_vm7, %v13320_v40, 0.0 }
 0xa79   :  { %14515 = vst [vmem:[#allocation19_spill] sm:$0xff] %v13322_v15  ;;  %v6630_v26 = vsel %vm2930_vm7, %v6515_v57, 0.0  ;;  %v6434_v41 = vsel %vm2930_vm7, %v13322_v15, 0.0  ;;  %v6516_v22 = vmul.f32 %v13322_v15, %v13322_v15  ;;  %v6634_v57 = vsel %vm2930_vm7, %v6517_v12, 0.0 }
 0xa7a   :  { %v6631_v30 = vadd.f32 %v6630_v26, %v6629_v34  ;;  %v6435_v44 = vadd.f32 %v6434_v41, %v6433_v32  ;;  %v6636_v34 = vsel %vm2930_vm7, %v6518_v35, 0.0 }
 0xa7b   :  { %v6632_v62 = vsel %vm2930_vm7, %v6516_v22, 0.0 }
 0xa7c   :  { %v6437_v23 = vadd.f32 %v6436_v51, %v6435_v44  ;;  %v6633_v54 = vadd.f32 %v6632_v62, %v6631_v30 }
 0xa7e   :  { %v6635_v53 = vadd.f32 %v6634_v57, %v6633_v54  ;;  %v6439_v16 = vadd.f32 %v6438_v17, %v6437_v23 }
 0xa80   :  { %v6637_v32 = vadd.f32 %v6636_v34, %v6635_v53 }
 0xa95   :  { %v13340_v26 = vpop.f32.mrb[56].mxu1 }
 0xa96   :  { %14516 = vst [vmem:[#allocation24_spill] sm:$0xff] %v13340_v26  ;;  %v13342_v41 = vpop.f32.mrb[57].mxu1  ;;  %v6521_v17 = vmul.f32 %v13340_v26, %v13340_v26  ;;  %v6444_v54 = vsel %vm2930_vm7, %v13340_v26, 0.0 }
 0xa97   :  { %14517 = vst [vmem:[#allocation21_spill] sm:$0xff] %v13342_v41  ;;  %v6440_v18 = vsel %vm2930_vm7, %v13342_v41, 0.0  ;;  %v6519_v22 = vmul.f32 %v13342_v41, %v13342_v41  ;;  %v13348_v30 = vpop.f32.mrb[58].mxu1 }
 0xa98   :  { %14518 = vst [vmem:[#allocation9_spill] sm:$0xff] %v13348_v30  ;;  %v6441_v12 = vadd.f32 %v6440_v18, %v6439_v16  ;;  %v13350_v44 = vpop.f32.mrb[59].mxu1  ;;  %v6522_v16 = vmul.f32 %v13348_v30, %v13348_v30  ;;  %v6446_v41 = vsel %vm2930_vm7, %v13348_v30, 0.0 }
 0xa99   :  { %14519 = vst [vmem:[#allocation29_spill] sm:$0xff] %v13350_v44  ;;  %v6638_v53 = vsel %vm2930_vm7, %v6519_v22, 0.0  ;;  %v6442_v51 = vsel %vm2930_vm7, %v13350_v44, 0.0  ;;  %v6520_v35 = vmul.f32 %v13350_v44, %v13350_v44  ;;  %v6642_v22 = vsel %vm2930_vm7, %v6521_v17, 0.0 }
 0xa9a   :  { %v6639_v62 = vadd.f32 %v6638_v53, %v6637_v32  ;;  %v6443_v23 = vadd.f32 %v6442_v51, %v6441_v12  ;;  %v6644_v32 = vsel %vm2930_vm7, %v6522_v16, 0.0 }
 0xa9b   :  { %v6640_v18 = vsel %vm2930_vm7, %v6520_v35, 0.0 }
 0xa9c   :  { %v6445_v57 = vadd.f32 %v6444_v54, %v6443_v23  ;;  %v6641_v34 = vadd.f32 %v6640_v18, %v6639_v62 }
 0xa9e   :  { %v6643_v40 = vadd.f32 %v6642_v22, %v6641_v34  ;;  %v6447_v15 = vadd.f32 %v6446_v41, %v6445_v57 }
 0xaa0   :  { %v6645_v12 = vadd.f32 %v6644_v32, %v6643_v40 }
 0xaaa   :  { %v13368_v53 = vpop.f32.mrb[60].mxu1 }
 0xaab   :  { %14520 = vst [vmem:[#allocation22_spill] sm:$0xff] %v13368_v53  ;;  %v13370_v51 = vpop.f32.mrb[61].mxu1  ;;  %v6525_v41 = vmul.f32 %v13368_v53, %v13368_v53  ;;  %v6452_v34 = vsel %vm2930_vm7, %v13368_v53, 0.0 }
 0xaac   :  { %14521 = vst [vmem:[#allocation26_spill] sm:$0xff] %v13370_v51  ;;  %v6448_v26 = vsel %vm2930_vm7, %v13370_v51, 0.0  ;;  %v6523_v35 = vmul.f32 %v13370_v51, %v13370_v51  ;;  %v13376_v62 = vpop.f32.mrb[62].mxu1 }
 0xaad   :  { %14522 = vst [vmem:[#allocation23_spill] sm:$0xff] %v13376_v62  ;;  %v6449_v17 = vadd.f32 %v6448_v26, %v6447_v15  ;;  %v13378_v23 = vpop.f32.mrb[63].mxu1  ;;  %v6526_v15 = vmul.f32 %v13376_v62, %v13376_v62  ;;  %v6454_v51 = vsel %vm2930_vm7, %v13376_v62, 0.0 }
 0xaae   :  { %14523 = vst [vmem:[#allocation27_spill] sm:$0xff] %v13378_v23  ;;  %v6646_v40 = vsel %vm2930_vm7, %v6523_v35, 0.0  ;;  %v6450_v54 = vsel %vm2930_vm7, %v13378_v23, 0.0  ;;  %v6524_v16 = vmul.f32 %v13378_v23, %v13378_v23  ;;  %v6650_v35 = vsel %vm2930_vm7, %v6525_v41, 0.0 }
 0xaaf   :  { %v6647_v18 = vadd.f32 %v6646_v40, %v6645_v12  ;;  %v6451_v57 = vadd.f32 %v6450_v54, %v6449_v17  ;;  %v6652_v12 = vsel %vm2930_vm7, %v6526_v15, 0.0 }
 0xab0   :  { %v6648_v26 = vsel %vm2930_vm7, %v6524_v16, 0.0 }
 0xab1   :  { %v6453_v22 = vadd.f32 %v6452_v34, %v6451_v57  ;;  %v6649_v32 = vadd.f32 %v6648_v26, %v6647_v18 }
 0xab3   :  { %v6455_v30 = vadd.f32 %v6454_v51, %v6453_v22  ;;  %v6651_v44 = vadd.f32 %v6650_v35, %v6649_v32 }
 0xab5   :  { %v6456_v17 = vrot.slane %v6455_v30, 4  ;;  %v6653_v40 = vadd.f32 %v6652_v12, %v6651_v44 }
 0xab7   :  { %v6457_v54 = vadd.f32 %v6456_v17, %v6455_v30  ;;  %v6654_v53 = vrot.slane %v6653_v40, 4  ;;  %v5805_v30 = vld [vmem:[%s14254_s5] sm:$0x1] }
 0xab9   :  { %v6458_v23 = vrot.slane %v6457_v54, 2  ;;  %v6655_v47 = vadd.f32 %v6654_v53, %v6653_v40  ;;  %v14525_v40 = vld [vmem:[#allocation8_spill] sm:$0xff] }
 0xabb   :  { %v6459_v58 = vadd.f32 %v6458_v23, %v6457_v54  ;;  %v6656_v36 = vrot.slane %v6655_v47, 2  ;;  %v14526_v54 = vld [vmem:[#allocation5_spill] sm:$0xff] }
 0xabd   :  { %v6460_v16 = vrot.slane %v6459_v58, 1  ;;  %v6657_v57 = vadd.f32 %v6656_v36, %v6655_v47  ;;  %v13402_v47 = vld [vmem:[%s14255_s6] sm:$0x1] }
 0xabe   :  { %v14524_v36 = vld [vmem:[#allocation28_spill] sm:$0xff] }
 0xabf   :  { %v6461_v18 = vadd.f32 %v6460_v16, %v6459_v58  ;;  %v6658_v34 = vrot.slane %v6657_v57, 1  ;;  %v14527_v16 = vld [vmem:[#allocation4_spill] sm:$0xff] }
 0xac1   :  { %v6462_v41 = vmul.f32 0.001953125, %v6461_v18  ;;  %v6659_v26 = vadd.f32 %v6658_v34, %v6657_v57  ;;  %v14528_v57 = vld [vmem:[#allocation14_spill] sm:$0xff]  ;;  %v14530_v34 = vld [vmem:[#allocation13_spill] sm:$0xff] }
 0xac2   :  { %v14529_v18 = vld [vmem:[#allocation10_spill] sm:$0xff] }
 0xac3   :  { %v6660_v19 = vmul.f32 0.001953125, %v6659_v26  ;;  %v6661_v62 = vmul.f32 %v6462_v41, %v6462_v41  ;;  %v14531_v26 = vld [vmem:[#allocation12_spill] sm:$0xff] }
 0xac5   :  { %v6662_v51 = vsub.f32 %v6660_v19, %v6661_v62  ;;  %v14544_v19 = vld [vmem:[#allocation6_spill] sm:$0xff] }
 0xac7   :  { %v6663_v22 = vmax.f32 %v6662_v51, 0.0 }
 0xac9   :  { %v6664_v32 = vadd.f32 1e-05, %v6663_v22  ;;  %v14532_v22 = vld [vmem:[#allocation16_spill] sm:$0xff] }
 0xacb   :  { %7254 = vrsqrt.f32 %v6664_v32 }
 0xad5   :  { %v7255_v44 = vpop.eup %7254 }
 0xad6   :  { %v6666_v53 = vmul.f32 %v7255_v44, %v5805_v30  ;;  %v14533_v30 = vld [vmem:[#allocation18_spill] sm:$0xff] }
 0xad8   :  { %v13404_v58 = vmul.f32 %v6666_v53, %v6462_v41  ;;  %v13407_v23 = vrot.slane %v6666_v53, %v14524_v36  ;;  %v14534_v53 = vld [vmem:[#allocation7_spill] sm:$0xff] }
 0xada   :  { %v13413_v62 = vmul.f32 %v13407_v23, %v12667_v2  ;;  %v13417_v15 = vmul.f32 %v13407_v23, %v12674_v42  ;;  %v13421_v35 = vmul.f32 %v12663_v45, %v13407_v23  ;;  %v13425_v12 = vmul.f32 %v12671_v29, %v13407_v23 }
 0xadb   :  { %v13429_v17 = vmul.f32 %v13407_v23, %v12741_v25  ;;  %v13433_v2 = vmul.f32 %v13407_v23, %v12750_v9  ;;  %v13437_v42 = vmul.f32 %v12736_v63, %v13407_v23  ;;  %v13441_v45 = vmul.f32 %v12747_v6, %v13407_v23 }
 0xadc   :  { %v13445_v29 = vmul.f32 %v13407_v23, %v12811_v38  ;;  %v13449_v25 = vmul.f32 %v13407_v23, %v12822_v11  ;;  %v13453_v9 = vmul.f32 %v12806_v21, %v13407_v23  ;;  %v13457_v63 = vmul.f32 %v12819_v46, %v13407_v23 }
 0xadd   :  { %v13461_v6 = vmul.f32 %v13407_v23, %v12884_v1  ;;  %v13465_v38 = vmul.f32 %v13407_v23, %v12894_v59  ;;  %v13469_v11 = vmul.f32 %v12879_v24, %v13407_v23  ;;  %v13473_v21 = vmul.f32 %v12891_v14, %v13407_v23 }
 0xade   :  { %v13477_v46 = vmul.f32 %v13407_v23, %v12960_v7  ;;  %v13481_v1 = vmul.f32 %v13407_v23, %v12970_v49  ;;  %v13485_v59 = vmul.f32 %v12957_v5, %v13407_v23  ;;  %v13489_v24 = vmul.f32 %v12967_v10, %v13407_v23 }
 0xadf   :  { %v13493_v14 = vmul.f32 %v13407_v23, %v13014_v33  ;;  %v13497_v7 = vmul.f32 %v13407_v23, %v13024_v31  ;;  %v13501_v49 = vmul.f32 %v13011_v13, %v13407_v23  ;;  %v13505_v5 = vmul.f32 %v13021_v56, %v13407_v23 }
 0xae0   :  { %v13509_v10 = vmul.f32 %v13407_v23, %v13068_v50  ;;  %v13513_v33 = vmul.f32 %v13407_v23, %v13078_v4  ;;  %v13517_v31 = vmul.f32 %v13065_v3, %v13407_v23  ;;  %v13521_v13 = vmul.f32 %v13075_v27, %v13407_v23 }
 0xae1   :  { %v13525_v56 = vmul.f32 %v13407_v23, %v13111_v20  ;;  %v13529_v50 = vmul.f32 %v13407_v23, %v13124_v48  ;;  %v13533_v4 = vmul.f32 %v13109_v0, %v13407_v23  ;;  %v13537_v3 = vmul.f32 %v13120_v61, %v13407_v23 }
 0xae2   :  { %v13541_v27 = vmul.f32 %v13407_v23, %v13172_v39  ;;  %v13545_v20 = vmul.f32 %v13407_v23, %v13182_v8  ;;  %v13549_v48 = vmul.f32 %v13170_v43, %v13407_v23  ;;  %v13553_v0 = vmul.f32 %v13179_v28, %v13407_v23 }
 0xae3   :  { %v13557_v61 = vmul.f32 %v13407_v23, %v13202_v55  ;;  %v13561_v39 = vmul.f32 %v13407_v23, %v13210_v60  ;;  %v13565_v8 = vmul.f32 %v13200_v37, %v13407_v23  ;;  %v13569_v43 = vmul.f32 %v13208_v52, %v13407_v23 }
 0xae4   :  { %v13573_v28 = vmul.f32 %v13407_v23, %v14525_v40  ;;  %v13577_v55 = vmul.f32 %v13407_v23, %v14526_v54  ;;  %v13581_v60 = vmul.f32 %v14527_v16, %v13407_v23  ;;  %v13585_v37 = vmul.f32 %v14528_v57, %v13407_v23  ;;  %v14536_v54 = vld [vmem:[#allocation15_spill] sm:$0xff] }
 0xae5   :  { %v13589_v52 = vmul.f32 %v13407_v23, %v14529_v18  ;;  %v13593_v41 = vmul.f32 %v13407_v23, %v14530_v34  ;;  %v13597_v51 = vmul.f32 %v14531_v26, %v13407_v23  ;;  %v13601_v32 = vmul.f32 %v14532_v22, %v13407_v23  ;;  %v14538_v57 = vld [vmem:[#allocation11_spill] sm:$0xff]  ;;  %v14540_v34 = vld [vmem:[#allocation17_spill] sm:$0xff] }
 0xae6   :  { %v13605_v44 = vmul.f32 %v13407_v23, %v14533_v30  ;;  %v13609_v40 = vmul.f32 %v13407_v23, %v14534_v53  ;;  %v13613_v16 = vmul.f32 %v14536_v54, %v13407_v23  ;;  %v13617_v18 = vmul.f32 %v14538_v57, %v13407_v23  ;;  %v14542_v22 = vld [vmem:[#allocation19_spill] sm:$0xff] }
 0xae7   :  { %v13621_v26 = vmul.f32 %v13407_v23, %v14540_v34  ;;  %v13625_v30 = vmul.f32 %v13407_v23, %v14542_v22  ;;  %v13629_v53 = vmul.f32 %v14544_v19, %v13407_v23 }
 0xae8   :  { %14535 = vst [vmem:[#allocation25_spill] sm:$0xff] %v13609_v40  ;;  %14537 = vst [vmem:[#allocation28_spill] sm:$0xff] %v13613_v16  ;;  %v14546_v40 = vld [vmem:[#allocation20_spill] sm:$0xff]  ;;  %v14548_v16 = vld [vmem:[#allocation21_spill] sm:$0xff] }
 0xae9   :  { %14539 = vst [vmem:[#allocation8_spill] sm:$0xff] %v13617_v18  ;;  %14541 = vst [vmem:[#allocation5_spill] sm:$0xff] %v13621_v26  ;;  %v13633_v54 = vmul.f32 %v14546_v40, %v13407_v23  ;;  %v13637_v57 = vmul.f32 %v13407_v23, %v14548_v16  ;;  %v14550_v18 = vld [vmem:[#allocation29_spill] sm:$0xff]  ;;  %v14552_v26 = vld [vmem:[#allocation24_spill] sm:$0xff] }
 0xaea   :  { %14543 = vst [vmem:[#allocation4_spill] sm:$0xff] %v13625_v30  ;;  %14545 = vst [vmem:[#allocation14_spill] sm:$0xff] %v13629_v53  ;;  %v13641_v34 = vmul.f32 %v13407_v23, %v14550_v18  ;;  %v13645_v22 = vmul.f32 %v14552_v26, %v13407_v23  ;;  %v14553_v30 = vld [vmem:[#allocation9_spill] sm:$0xff]  ;;  %v14555_v53 = vld [vmem:[#allocation26_spill] sm:$0xff] }
 0xaeb   :  { %14547 = vst [vmem:[#allocation10_spill] sm:$0xff] %v13633_v54  ;;  %14549 = vst [vmem:[#allocation13_spill] sm:$0xff] %v13637_v57  ;;  %v13649_v19 = vmul.f32 %v14553_v30, %v13407_v23  ;;  %v13653_v40 = vmul.f32 %v13407_v23, %v14555_v53  ;;  %v14556_v54 = vld [vmem:[#allocation27_spill] sm:$0xff]  ;;  %v14557_v57 = vld [vmem:[#allocation22_spill] sm:$0xff]  ;;  %v14559_v30 = vsub.f32 %v13402_v47, %v13404_v58 }
 0xaec   :  { %14551 = vst [vmem:[#allocation12_spill] sm:$0xff] %v13641_v34  ;;  %v13657_v16 = vmul.f32 %v13407_v23, %v14556_v54  ;;  %v13661_v18 = vmul.f32 %v14557_v57, %v13407_v23  ;;  %v14558_v34 = vld [vmem:[#allocation23_spill] sm:$0xff] }
 0xaed   :  { %14554 = vst [vmem:[#allocation16_spill] sm:$0xff] %v13649_v19  ;;  %v13665_v26 = vmul.f32 %v14558_v34, %v13407_v23  ;;  %v13671_v19 = vrot.slane %v14559_v30, %v14524_v36 }
 0xaef   :  { %v13675_v53 = vadd.f32 %v13671_v19, %v13413_v62  ;;  %v13679_v54 = vadd.f32 %v13671_v19, %v13417_v15  ;;  %v13683_v57 = vadd.f32 %v13671_v19, %v13421_v35  ;;  %v13687_v23 = vadd.f32 %v13671_v19, %v13425_v12 }
 0xaf0   :  { %v13691_v47 = vadd.f32 %v13671_v19, %v13429_v17  ;;  %v13695_v58 = vadd.f32 %v13671_v19, %v13433_v2  ;;  %v13699_v36 = vadd.f32 %v13671_v19, %v13437_v42  ;;  %v13703_v62 = vadd.f32 %v13671_v19, %v13441_v45  ;;  %v14566_v34 = vld [vmem:[#allocation8_spill] sm:$0xff]  ;;  %v14568_v30 = vld [vmem:[#allocation5_spill] sm:$0xff] }
 0xaf1   :  { %v13707_v15 = vadd.f32 %v13671_v19, %v13445_v29  ;;  %v13711_v35 = vadd.f32 %v13671_v19, %v13449_v25  ;;  %v13715_v12 = vadd.f32 %v13671_v19, %v13453_v9  ;;  %v13719_v17 = vadd.f32 %v13671_v19, %v13457_v63 }
 0xaf2   :  { %v13723_v2 = vadd.f32 %v13671_v19, %v13461_v6  ;;  %v13727_v42 = vadd.f32 %v13671_v19, %v13465_v38  ;;  %v13731_v45 = vadd.f32 %v13671_v19, %v13469_v11  ;;  %v13735_v29 = vadd.f32 %v13671_v19, %v13473_v21 }
 0xaf3   :  { %v13739_v25 = vadd.f32 %v13671_v19, %v13477_v46  ;;  %v13743_v9 = vadd.f32 %v13671_v19, %v13481_v1  ;;  %v13747_v63 = vadd.f32 %v13671_v19, %v13485_v59  ;;  %v13751_v6 = vadd.f32 %v13671_v19, %v13489_v24 }
 0xaf4   :  { %v13755_v38 = vadd.f32 %v13671_v19, %v13493_v14  ;;  %v13759_v11 = vadd.f32 %v13671_v19, %v13497_v7  ;;  %v13763_v21 = vadd.f32 %v13671_v19, %v13501_v49  ;;  %v13767_v46 = vadd.f32 %v13671_v19, %v13505_v5 }
 0xaf5   :  { %v13771_v1 = vadd.f32 %v13671_v19, %v13509_v10  ;;  %v13775_v59 = vadd.f32 %v13671_v19, %v13513_v33  ;;  %v13779_v24 = vadd.f32 %v13671_v19, %v13517_v31  ;;  %v13783_v14 = vadd.f32 %v13671_v19, %v13521_v13 }
 0xaf6   :  { %v13787_v7 = vadd.f32 %v13671_v19, %v13525_v56  ;;  %v13791_v49 = vadd.f32 %v13671_v19, %v13529_v50  ;;  %v13795_v5 = vadd.f32 %v13671_v19, %v13533_v4  ;;  %v13799_v10 = vadd.f32 %v13671_v19, %v13537_v3 }
 0xaf7   :  { %v13803_v33 = vadd.f32 %v13671_v19, %v13541_v27  ;;  %v13807_v31 = vadd.f32 %v13671_v19, %v13545_v20  ;;  %v13811_v13 = vadd.f32 %v13671_v19, %v13549_v48  ;;  %v13815_v56 = vadd.f32 %v13671_v19, %v13553_v0 }
 0xaf8   :  { %v13819_v50 = vadd.f32 %v13671_v19, %v13557_v61  ;;  %v13823_v4 = vadd.f32 %v13671_v19, %v13561_v39  ;;  %v13827_v3 = vadd.f32 %v13671_v19, %v13565_v8  ;;  %v13831_v27 = vadd.f32 %v13671_v19, %v13569_v43 }
 0xaf9   :  { %v13835_v20 = vadd.f32 %v13671_v19, %v13573_v28  ;;  %v13839_v48 = vadd.f32 %v13671_v19, %v13577_v55  ;;  %v13843_v0 = vadd.f32 %v13671_v19, %v13581_v60  ;;  %v13847_v61 = vadd.f32 %v13671_v19, %v13585_v37  ;;  %v14562_v60 = vld [vmem:[#allocation25_spill] sm:$0xff] }
 0xafa   :  { %v13851_v39 = vadd.f32 %v13671_v19, %v13589_v52  ;;  %v13855_v8 = vadd.f32 %v13671_v19, %v13593_v41  ;;  %v13859_v43 = vadd.f32 %v13671_v19, %v13597_v51  ;;  %v13863_v28 = vadd.f32 %v13671_v19, %v13601_v32  ;;  %v14564_v52 = vld [vmem:[#allocation28_spill] sm:$0xff] }
 0xafb   :  { %v13867_v55 = vadd.f32 %v13671_v19, %v13605_v44  ;;  %v13871_v37 = vadd.f32 %v13671_v19, %v14562_v60  ;;  %v13875_v41 = vadd.f32 %v13671_v19, %v14564_v52  ;;  %v13879_v51 = vadd.f32 %v13671_v19, %v14566_v34 }
 0xafc   :  { %14560 = vst [vmem:[#allocation18_spill] sm:$0xff] %v13863_v28  ;;  %v13883_v32 = vadd.f32 %v13671_v19, %v14568_v30  ;;  %v14569_v28 = vld [vmem:[#allocation4_spill] sm:$0xff] }
 0xafd   :  { %14561 = vst [vmem:[#allocation7_spill] sm:$0xff] %v13867_v55  ;;  %14563 = vst [vmem:[#allocation15_spill] sm:$0xff] %v13871_v37  ;;  %v13887_v44 = vadd.f32 %v13671_v19, %v14569_v28  ;;  %v14571_v55 = vld [vmem:[#allocation14_spill] sm:$0xff]  ;;  %v13907_v28 = vadd.f32 %v13671_v19, %v13645_v22  ;;  %v13927_v22 = vadd.f32 %v13671_v19, %v13665_v26  ;;  %v6819_v26 = vmax.f32 %v13715_v12, 0.0 }
 0xafe   :  { %14565 = vst [vmem:[#allocation11_spill] sm:$0xff] %v13875_v41  ;;  %14567 = vst [vmem:[#allocation17_spill] sm:$0xff] %v13879_v51  ;;  %v13891_v60 = vadd.f32 %v13671_v19, %v14571_v55  ;;  %v14572_v37 = vld [vmem:[#allocation10_spill] sm:$0xff]  ;;  %v14573_v41 = vld [vmem:[#allocation13_spill] sm:$0xff]  ;;  %v6830_v12 = vmax.f32 %v13759_v11, 0.0  ;;  %v6841_v11 = vmax.f32 %v13803_v33, 0.0 }
 0xaff   :  { %14570 = vst [vmem:[#allocation19_spill] sm:$0xff] %v13887_v44  ;;  %v13895_v52 = vadd.f32 %v13671_v19, %v14572_v37  ;;  %v13899_v34 = vadd.f32 %v13671_v19, %v14573_v41  ;;  %v14574_v51 = vld [vmem:[#allocation12_spill] sm:$0xff]  ;;  %14575 = vst [vmem:[#allocation6_spill] sm:$0xff] %v13907_v28  ;;  %v13915_v37 = vadd.f32 %v13671_v19, %v13653_v40  ;;  %v6809_v28 = vmax.f32 %v13675_v53, 0.0 }
 0xb00   :  { %v13903_v30 = vadd.f32 %v13671_v19, %v14574_v51  ;;  %v14576_v44 = vld [vmem:[#allocation16_spill] sm:$0xff]  ;;  %v13919_v41 = vadd.f32 %v13671_v19, %v13657_v16  ;;  %v13923_v51 = vadd.f32 %v13671_v19, %v13661_v18  ;;  %v6812_v40 = vmax.f32 %v13687_v23, 0.0  ;;  %6883 = vst.msk [vmem:[%s14256_s7 + $0x50] sm:$0xff] %vm2930_vm7, %v6819_v26  ;;  %6894 = vst.msk [vmem:[%s14256_s7 + $0xa8] sm:$0xff] %vm2930_vm7, %v6830_v12 }
 0xb01   :  { %v13911_v55 = vadd.f32 %v13671_v19, %v14576_v44  ;;  %14578 = vst [vmem:[#allocation21_spill] sm:$0xff] %v13915_v37  ;;  %v6810_v44 = vmax.f32 %v13679_v54, 0.0  ;;  %v6813_v37 = vmax.f32 %v13691_v47, 0.0  ;;  %v6814_v16 = vmax.f32 %v13695_v58, 0.0  ;;  %6873 = vst.msk [vmem:[%s14256_s7] sm:$0xff] %vm2930_vm7, %v6809_v28 }
 0xb02   :  { %14579 = vst [vmem:[#allocation29_spill] sm:$0xff] %v13919_v41  ;;  %14580 = vst [vmem:[#allocation24_spill] sm:$0xff] %v13923_v51  ;;  %v6815_v41 = vmax.f32 %v13699_v36, 0.0  ;;  %v6816_v18 = vmax.f32 %v13703_v62, 0.0  ;;  %v6817_v51 = vmax.f32 %v13707_v15, 0.0  ;;  %v6818_v19 = vmax.f32 %v13711_v35, 0.0 }
 0xb03   :  { %14577 = vst [vmem:[#allocation20_spill] sm:$0xff] %v13911_v55  ;;  %v6811_v55 = vmax.f32 %v13683_v57, 0.0  ;;  %v6820_v53 = vmax.f32 %v13719_v17, 0.0  ;;  %6874 = vst.msk [vmem:[%s14256_s7 + $0x8] sm:$0xff] %vm2930_vm7, %v6810_v44  ;;  %v6821_v54 = vmax.f32 %v13723_v2, 0.0  ;;  %v6822_v57 = vmax.f32 %v13727_v42, 0.0 }
 0xb04   :  { %6876 = vst.msk [vmem:[%s14256_s7 + $0x18] sm:$0xff] %vm2930_vm7, %v6812_v40  ;;  %v6823_v23 = vmax.f32 %v13731_v45, 0.0  ;;  %v6824_v47 = vmax.f32 %v13735_v29, 0.0  ;;  %6877 = vst.msk [vmem:[%s14256_s7 + $0x20] sm:$0xff] %vm2930_vm7, %v6813_v37  ;;  %v6825_v58 = vmax.f32 %v13739_v25, 0.0  ;;  %v6826_v36 = vmax.f32 %v13743_v9, 0.0 }
 0xb05   :  { %6875 = vst.msk [vmem:[%s14256_s7 + $0x10] sm:$0xff] %vm2930_vm7, %v6811_v55  ;;  %6878 = vst.msk [vmem:[%s14256_s7 + $0x28] sm:$0xff] %vm2930_vm7, %v6814_v16  ;;  %v6827_v62 = vmax.f32 %v13747_v63, 0.0  ;;  %v6828_v15 = vmax.f32 %v13751_v6, 0.0  ;;  %v6829_v35 = vmax.f32 %v13755_v38, 0.0  ;;  %v6831_v17 = vmax.f32 %v13763_v21, 0.0 }
 0xb06   :  { %6879 = vst.msk [vmem:[%s14256_s7 + $0x30] sm:$0xff] %vm2930_vm7, %v6815_v41  ;;  %6880 = vst.msk [vmem:[%s14256_s7 + $0x38] sm:$0xff] %vm2930_vm7, %v6816_v18  ;;  %v6832_v2 = vmax.f32 %v13767_v46, 0.0  ;;  %v6833_v42 = vmax.f32 %v13771_v1, 0.0  ;;  %v6834_v45 = vmax.f32 %v13775_v59, 0.0  ;;  %v6835_v29 = vmax.f32 %v13779_v24, 0.0 }
 0xb07   :  { %6881 = vst.msk [vmem:[%s14256_s7 + $0x40] sm:$0xff] %vm2930_vm7, %v6817_v51  ;;  %6882 = vst.msk [vmem:[%s14256_s7 + $0x48] sm:$0xff] %vm2930_vm7, %v6818_v19  ;;  %v6836_v25 = vmax.f32 %v13783_v14, 0.0  ;;  %v6837_v9 = vmax.f32 %v13787_v7, 0.0  ;;  %v6838_v63 = vmax.f32 %v13791_v49, 0.0  ;;  %v6839_v6 = vmax.f32 %v13795_v5, 0.0 }
 0xb08   :  { %6884 = vst.msk [vmem:[%s14256_s7 + $0x58] sm:$0xff] %vm2930_vm7, %v6820_v53  ;;  %6885 = vst.msk [vmem:[%s14256_s7 + $0x60] sm:$0xff] %vm2930_vm7, %v6821_v54  ;;  %v6840_v38 = vmax.f32 %v13799_v10, 0.0  ;;  %v6842_v21 = vmax.f32 %v13807_v31, 0.0  ;;  %v6843_v46 = vmax.f32 %v13811_v13, 0.0  ;;  %v6844_v1 = vmax.f32 %v13815_v56, 0.0 }
 0xb09   :  { %6886 = vst.msk [vmem:[%s14256_s7 + $0x68] sm:$0xff] %vm2930_vm7, %v6822_v57  ;;  %6887 = vst.msk [vmem:[%s14256_s7 + $0x70] sm:$0xff] %vm2930_vm7, %v6823_v23  ;;  %v6845_v59 = vmax.f32 %v13819_v50, 0.0  ;;  %v6846_v24 = vmax.f32 %v13823_v4, 0.0  ;;  %v6847_v14 = vmax.f32 %v13827_v3, 0.0  ;;  %v6848_v7 = vmax.f32 %v13831_v27, 0.0 }
 0xb0a   :  { %6888 = vst.msk [vmem:[%s14256_s7 + $0x78] sm:$0xff] %vm2930_vm7, %v6824_v47  ;;  %6889 = vst.msk [vmem:[%s14256_s7 + $0x80] sm:$0xff] %vm2930_vm7, %v6825_v58  ;;  %v6849_v49 = vmax.f32 %v13835_v20, 0.0  ;;  %v6850_v5 = vmax.f32 %v13839_v48, 0.0  ;;  %v6851_v10 = vmax.f32 %v13843_v0, 0.0  ;;  %v6852_v33 = vmax.f32 %v13847_v61, 0.0 }
 0xb0b   :  { %6890 = vst.msk [vmem:[%s14256_s7 + $0x88] sm:$0xff] %vm2930_vm7, %v6826_v36  ;;  %6891 = vst.msk [vmem:[%s14256_s7 + $0x90] sm:$0xff] %vm2930_vm7, %v6827_v62  ;;  %v6853_v31 = vmax.f32 %v13851_v39, 0.0  ;;  %v6854_v13 = vmax.f32 %v13855_v8, 0.0  ;;  %v6855_v56 = vmax.f32 %v13859_v43, 0.0  ;;  %v14581_v50 = vld [vmem:[#allocation18_spill] sm:$0xff] }
 0xb0c   :  { %6892 = vst.msk [vmem:[%s14256_s7 + $0x98] sm:$0xff] %vm2930_vm7, %v6828_v15  ;;  %6893 = vst.msk [vmem:[%s14256_s7 + $0xa0] sm:$0xff] %vm2930_vm7, %v6829_v35  ;;  %v6856_v4 = vmax.f32 %v14581_v50, 0.0  ;;  %v14582_v3 = vld [vmem:[#allocation7_spill] sm:$0xff]  ;;  %v14585_v39 = vld [vmem:[#allocation17_spill] sm:$0xff]  ;;  %v6861_v43 = vmax.f32 %v13883_v32, 0.0 }
 0xb0d   :  { %6895 = vst.msk [vmem:[%s14256_s7 + $0xb0] sm:$0xff] %vm2930_vm7, %v6831_v17  ;;  %6896 = vst.msk [vmem:[%s14256_s7 + $0xb8] sm:$0xff] %vm2930_vm7, %v6832_v2  ;;  %v6857_v27 = vmax.f32 %v14582_v3, 0.0  ;;  %v14583_v20 = vld [vmem:[#allocation15_spill] sm:$0xff]  ;;  %v6860_v8 = vmax.f32 %v14585_v39, 0.0  ;;  %v6863_v37 = vmax.f32 %v13891_v60, 0.0 }
 0xb0e   :  { %6897 = vst.msk [vmem:[%s14256_s7 + $0xc0] sm:$0xff] %vm2930_vm7, %v6833_v42  ;;  %6898 = vst.msk [vmem:[%s14256_s7 + $0xc8] sm:$0xff] %vm2930_vm7, %v6834_v45  ;;  %v6858_v48 = vmax.f32 %v14583_v20, 0.0  ;;  %v14584_v0 = vld [vmem:[#allocation11_spill] sm:$0xff]  ;;  %v6864_v41 = vmax.f32 %v13895_v52, 0.0  ;;  %v6865_v32 = vmax.f32 %v13899_v34, 0.0 }
 0xb0f   :  { %6899 = vst.msk [vmem:[%s14256_s7 + $0xd0] sm:$0xff] %vm2930_vm7, %v6835_v29  ;;  %6900 = vst.msk [vmem:[%s14256_s7 + $0xd8] sm:$0xff] %vm2930_vm7, %v6836_v25  ;;  %v6859_v61 = vmax.f32 %v14584_v0, 0.0  ;;  %v14586_v28 = vld [vmem:[#allocation19_spill] sm:$0xff]  ;;  %v6866_v60 = vmax.f32 %v13903_v30, 0.0  ;;  %v14587_v52 = vld [vmem:[#allocation6_spill] sm:$0xff] }
 0xb10   :  { %6901 = vst.msk [vmem:[%s14256_s7 + $0xe0] sm:$0xff] %vm2930_vm7, %v6837_v9  ;;  %6902 = vst.msk [vmem:[%s14256_s7 + $0xe8] sm:$0xff] %vm2930_vm7, %v6838_v63  ;;  %v6862_v55 = vmax.f32 %v14586_v28, 0.0  ;;  %v6867_v51 = vmax.f32 %v14587_v52, 0.0  ;;  %v14588_v44 = vld [vmem:[#allocation20_spill] sm:$0xff]  ;;  %v14589_v34 = vld [vmem:[#allocation21_spill] sm:$0xff] }
 0xb11   :  { %6903 = vst.msk [vmem:[%s14256_s7 + $0xf0] sm:$0xff] %vm2930_vm7, %v6839_v6  ;;  %6904 = vst.msk [vmem:[%s14256_s7 + $0xf8] sm:$0xff] %vm2930_vm7, %v6840_v38  ;;  %v6868_v40 = vmax.f32 %v14588_v44, 0.0  ;;  %v6869_v30 = vmax.f32 %v14589_v34, 0.0  ;;  %v14590_v16 = vld [vmem:[#allocation29_spill] sm:$0xff]  ;;  %v14591_v19 = vld [vmem:[#allocation24_spill] sm:$0xff] }
 0xb12   :  { %6905 = vst.msk [vmem:[%s14256_s7 + $0x100] sm:$0xff] %vm2930_vm7, %v6841_v11  ;;  %6906 = vst.msk [vmem:[%s14256_s7 + $0x108] sm:$0xff] %vm2930_vm7, %v6842_v21  ;;  %v6870_v18 = vmax.f32 %v14590_v16, 0.0  ;;  %v6871_v26 = vmax.f32 %v14591_v19, 0.0  ;;  %v6872_v53 = vmax.f32 %v13927_v22, 0.0 }
 0xb13   :  { %6907 = vst.msk [vmem:[%s14256_s7 + $0x110] sm:$0xff] %vm2930_vm7, %v6843_v46  ;;  %6908 = vst.msk [vmem:[%s14256_s7 + $0x118] sm:$0xff] %vm2930_vm7, %v6844_v1 }
 0xb14   :  { %6909 = vst.msk [vmem:[%s14256_s7 + $0x120] sm:$0xff] %vm2930_vm7, %v6845_v59  ;;  %6910 = vst.msk [vmem:[%s14256_s7 + $0x128] sm:$0xff] %vm2930_vm7, %v6846_v24 }
 0xb15   :  { %6911 = vst.msk [vmem:[%s14256_s7 + $0x130] sm:$0xff] %vm2930_vm7, %v6847_v14  ;;  %6912 = vst.msk [vmem:[%s14256_s7 + $0x138] sm:$0xff] %vm2930_vm7, %v6848_v7 }
 0xb16   :  { %6913 = vst.msk [vmem:[%s14256_s7 + $0x140] sm:$0xff] %vm2930_vm7, %v6849_v49  ;;  %6914 = vst.msk [vmem:[%s14256_s7 + $0x148] sm:$0xff] %vm2930_vm7, %v6850_v5 }
 0xb17   :  { %6915 = vst.msk [vmem:[%s14256_s7 + $0x150] sm:$0xff] %vm2930_vm7, %v6851_v10  ;;  %6916 = vst.msk [vmem:[%s14256_s7 + $0x158] sm:$0xff] %vm2930_vm7, %v6852_v33 }
 0xb18   :  { %6917 = vst.msk [vmem:[%s14256_s7 + $0x160] sm:$0xff] %vm2930_vm7, %v6853_v31  ;;  %6918 = vst.msk [vmem:[%s14256_s7 + $0x168] sm:$0xff] %vm2930_vm7, %v6854_v13 }
 0xb19   :  { %6919 = vst.msk [vmem:[%s14256_s7 + $0x170] sm:$0xff] %vm2930_vm7, %v6855_v56  ;;  %6920 = vst.msk [vmem:[%s14256_s7 + $0x178] sm:$0xff] %vm2930_vm7, %v6856_v4 }
 0xb1a   :  { %6921 = vst.msk [vmem:[%s14256_s7 + $0x180] sm:$0xff] %vm2930_vm7, %v6857_v27  ;;  %6922 = vst.msk [vmem:[%s14256_s7 + $0x188] sm:$0xff] %vm2930_vm7, %v6858_v48 }
 0xb1b   :  { %6923 = vst.msk [vmem:[%s14256_s7 + $0x190] sm:$0xff] %vm2930_vm7, %v6859_v61  ;;  %6924 = vst.msk [vmem:[%s14256_s7 + $0x198] sm:$0xff] %vm2930_vm7, %v6860_v8 }
 0xb1c   :  { %6925 = vst.msk [vmem:[%s14256_s7 + $0x1a0] sm:$0xff] %vm2930_vm7, %v6861_v43  ;;  %6926 = vst.msk [vmem:[%s14256_s7 + $0x1a8] sm:$0xff] %vm2930_vm7, %v6862_v55 }
 0xb1d   :  { %6927 = vst.msk [vmem:[%s14256_s7 + $0x1b0] sm:$0xff] %vm2930_vm7, %v6863_v37  ;;  %6928 = vst.msk [vmem:[%s14256_s7 + $0x1b8] sm:$0xff] %vm2930_vm7, %v6864_v41 }
 0xb1e   :  { %6929 = vst.msk [vmem:[%s14256_s7 + $0x1c0] sm:$0xff] %vm2930_vm7, %v6865_v32  ;;  %6930 = vst.msk [vmem:[%s14256_s7 + $0x1c8] sm:$0xff] %vm2930_vm7, %v6866_v60 }
 0xb1f   :  { %6931 = vst.msk [vmem:[%s14256_s7 + $0x1d0] sm:$0xff] %vm2930_vm7, %v6867_v51  ;;  %6932 = vst.msk [vmem:[%s14256_s7 + $0x1d8] sm:$0xff] %vm2930_vm7, %v6868_v40 }
 0xb20   :  { %6933 = vst.msk [vmem:[%s14256_s7 + $0x1e0] sm:$0xff] %vm2930_vm7, %v6869_v30  ;;  %6934 = vst.msk [vmem:[%s14256_s7 + $0x1e8] sm:$0xff] %vm2930_vm7, %v6870_v18 }
 0xb21   :  { %6935 = vst.msk [vmem:[%s14256_s7 + $0x1f0] sm:$0xff] %vm2930_vm7, %v6871_v26  ;;  %6936 = vst.msk [vmem:[%s14256_s7 + $0x1f8] sm:$0xff] %vm2930_vm7, %v6872_v53 }

</bundles_post_ra>
